<compile_context>
chip_gen: v5e
topology: v5e:2x2
jax: 0.10.0
libtpu: 0.0.40
codegen_flags: <defaults>
</compile_context>

<pallas_src>
import functools

import jax
import jax.numpy as jnp
from jax import lax
from jax.experimental import pallas as pl
from jax.experimental.pallas import tpu as pltpu

LEAKY_SLOPE = 0.01   # nn.LeakyReLU default negative_slope
BN_EPS = 1e-5


def _leaky(x):
    return jnp.where(x >= 0, x, LEAKY_SLOPE * x)


# --------------------------- fused Pallas kernel ---------------------------

def _refine_kernel(x_ref, cw_ref, cb_ref, psw1_ref, sw2_ref, bcast_ref, sel_ref,
                   o_ref, *, B, H, W, C):
    """Whole RefinementLayer forward for a block of B batch elements.

    x_ref:    (B, H, W*C)          activations, lane-dense (width*chan on lanes)
    cw_ref:   (7, 3*W*C, W*C)      banded conv matrices (ky=0/1/2 stacked on K), bf16
    cb_ref:   (7, 1, W*C)          conv biases tiled across width, f32
    psw1_ref: (4, W*C, C)          avg-pool matrix pre-folded into SE FC1 (W1^T)
    sw2_ref:  (4, C, C)            SE FC2 (W2^T)
    bcast_ref:(C, W*C)             channel -> lane broadcast matrix
    sel_ref:  (B, B*H)             per-image row selector, entries 1/(H*W)
    o_ref:    (B, H, W*C)
    """
    WC = W * C
    BH = B * H
    f32 = jnp.float32
    bf16 = jnp.bfloat16

    # Hoisted once per grid step (not per conv): top/bottom row masks of every
    # image inside the stacked slab.
    row_idx = lax.broadcasted_iota(jnp.int32, (BH, WC), 0)
    row_in_img = row_idx % H
    top_mask = row_in_img == 0
    bot_mask = row_in_img == H - 1

    def conv(act, li, apply_leaky):
        # Row shifts (with zero fill at each image's top/bottom row) implement
        # the vertical 'SAME' padding; horizontal padding is folded into the
        # banded weights. Single MXU matmul: (BH, 3*WC) @ (3*WC, WC).
        up = jnp.where(top_mask, 0.0, pltpu.roll(act, shift=1, axis=0))       # act[y-1]
        dn = jnp.where(bot_mask, 0.0, pltpu.roll(act, shift=BH - 1, axis=0))  # act[y+1]
        taps = jnp.concatenate(
            [up.astype(bf16), act.astype(bf16), dn.astype(bf16)], axis=1)
        acc = jnp.dot(taps, cw_ref[li], preferred_element_type=f32) + cb_ref[li]
        return _leaky(acc) if apply_leaky else acc

    def se(act, si, identity=None):
        # Per-image global average pool via selector matmul (mean folded into sel),
        # pool matrix folded into FC1 (psw1), sigmoid reciprocal on the EUP.
        pooled_lanes = jnp.dot(sel_ref[...], act, preferred_element_type=f32)       # (B, WC)
        h = _leaky(jnp.dot(pooled_lanes, psw1_ref[si], preferred_element_type=f32)) # (B, C)
        logits = jnp.dot(h, sw2_ref[si], preferred_element_type=f32)                # (B, C)
        s = pl.reciprocal(1.0 + jnp.exp(-logits), approx=True)                      # sigmoid
        scale_rows = jnp.dot(s, bcast_ref[...], preferred_element_type=f32)         # (B, WC)
        out = (act.reshape(B, H, WC) * scale_rows.reshape(B, 1, WC)).reshape(BH, WC)
        if identity is not None:                      # ResidualBlock tail
            out = _leaky(out + identity)
        return out

    x = x_ref[...].reshape(BH, WC).astype(f32)        # stacked (B*H, W*C) slab

    h0 = se(conv(x, 0, True), 0)          # conv0 -> LeakyReLU -> SEBlock
    r = conv(h0, 1, True)                 # ResidualBlock A: conv1->bn1->LeakyReLU
    r = conv(r, 2, False)                 #                   conv2->bn2
    hA = se(r, 1, identity=h0)            #                   SE, +identity, LeakyReLU
    h1 = se(conv(hA, 3, True), 2)         # conv1 -> LeakyReLU -> SEBlock
    r = conv(h1, 4, True)                 # ResidualBlock B
    r = conv(r, 5, False)
    hB = se(r, 3, identity=h1)
    out = conv(hB, 6, False)              # final conv
    o_ref[...] = out.reshape(B, H, WC).astype(o_ref.dtype)


# --------------------------- wrapper (layout plumbing) ---------------------------

def fold_bn(w, b, bn):
    """Fold eval-mode BatchNorm2d into the preceding conv's weights/bias."""
    scale = bn['gamma'] / jnp.sqrt(bn['var'] + BN_EPS)
    return w * scale[:, None, None, None], (b - bn['mean']) * scale + bn['beta']


def _banded_conv_weights(w, W):
    """(Cout, Cin, 3, 3) -> (3*W*Cin, W*Cout): ky=0/1/2 banded matrices stacked
    along the K axis, acting on one image row stored as a (W*Cin,) lane vector.
    Left/right zero padding is implicit (out-of-range taps have no entries)."""
    Cout, Cin, _, _ = w.shape
    xin = jnp.arange(W)[:, None, None]
    xout = jnp.arange(W)[None, :, None]
    kx = jnp.arange(3)[None, None, :]
    S = (xin == xout + kx - 1).astype(w.dtype)                    # (W, W, 3) selector
    M = jnp.einsum('pxd,oiyd->ypixo', S, w,
                   precision=jax.lax.Precision.HIGHEST)           # (3, W, Cin, W, Cout)
    return M.reshape(3 * W * Cin, W * Cout)


def refinement_forward_nhwc(x, p, *, block_batch=8):
    N, H, W, C = x.shape
    WC = W * C

    # Batch-stacking: B images per grid step => conv matmul M = B*H.
    #   B=8  -> M=128 (one v5e MXU tile)
    #   B=16 -> M=256 (fills v6e/v7x MXU) — only if grid length stays >= #TCs.
    B = min(block_batch, N)
    NB = -(-N // B)
    pad = NB * B - N
    if pad:                                           # guard N not divisible by B
        x = jnp.concatenate([x, jnp.zeros((pad, H, W, C), x.dtype)], axis=0)

    convs = [
        (p['conv0_w'], p['conv0_b']),
        fold_bn(p['rbA']['c1_w'], p['rbA']['c1_b'], p['rbA']['bn1']),
        fold_bn(p['rbA']['c2_w'], p['rbA']['c2_b'], p['rbA']['bn2']),
        (p['conv1_w'], p['conv1_b']),
        fold_bn(p['rbB']['c1_w'], p['rbB']['c1_b'], p['rbB']['bn1']),
        fold_bn(p['rbB']['c2_w'], p['rbB']['c2_b'], p['rbB']['bn2']),
        (p['conv2_w'], p['conv2_b']),
    ]
    # bf16 banded weights: halves the dominant HBM transfer and gives
    # single-pass MXU matmuls (accumulation stays f32 in the kernel).
    cw = jnp.stack([_banded_conv_weights(w, W) for w, _ in convs]
                   ).astype(jnp.bfloat16)                               # (7, 3WC, WC)
    cb = jnp.stack([jnp.tile(b, W).reshape(1, WC) for _, b in convs])   # (7, 1, WC)

    lane_c = jnp.arange(WC) % C
    bcast = (jnp.arange(C)[:, None] == lane_c[None, :]).astype(jnp.float32)  # (C, WC)
    # pool matrix pre-folded into SE FC1: psw1[lane, :] = W1^T[lane % C, :] (exact gather)
    se_w1s = [p['se0_w1'], p['rbA']['se_w1'], p['se1_w1'], p['rbB']['se_w1']]
    psw1 = jnp.stack([w1.T[lane_c] for w1 in se_w1s])                        # (4, WC, C)
    sw2 = jnp.stack([p['se0_w2'].T, p['rbA']['se_w2'].T,
                     p['se1_w2'].T, p['rbB']['se_w2'].T])                    # (4, C, C)
    # per-image mean-pool selector over the stacked B*H rows (1/(H*W) folded in)
    rows_img = jnp.arange(B * H) // H
    sel = (jnp.arange(B)[:, None] == rows_img[None, :]).astype(jnp.float32) / float(H * W)

    xr = x.reshape(NB * B, H, WC)                    # lane-dense (row, width*chan)
    kernel = functools.partial(_refine_kernel, B=B, H=H, W=W, C=C)
    out = pl.pallas_call(
        kernel,
        out_shape=jax.ShapeDtypeStruct((NB * B, H, WC), x.dtype),
        grid=(NB,),
        in_specs=[
            pl.BlockSpec((B, H, WC), lambda n: (n, 0, 0)),
            pl.BlockSpec((7, 3 * WC, WC), lambda n: (0, 0, 0)),   # constant blocks:
            pl.BlockSpec((7, 1, WC), lambda n: (0, 0, 0)),        # stay VMEM-resident
            pl.BlockSpec((4, WC, C), lambda n: (0, 0, 0)),
            pl.BlockSpec((4, C, C), lambda n: (0, 0, 0)),
            pl.BlockSpec((C, WC), lambda n: (0, 0)),
            pl.BlockSpec((B, B * H), lambda n: (0, 0)),
        ],
        out_specs=pl.BlockSpec((B, H, WC), lambda n: (n, 0, 0)),
        compiler_params=pltpu.CompilerParams(dimension_semantics=("parallel",)),
    )(xr, cw, cb, psw1, sw2, bcast, sel)
    out = out.reshape(NB * B, H, W, C)
    return out[:N] if pad else out


def refinement_layer(x_nchw, p):
    x = jnp.transpose(x_nchw, (0, 2, 3, 1))          # NCHW -> NHWC
    y = refinement_forward_nhwc(x, p)
    return jnp.transpose(y, (0, 3, 1, 2))            # NHWC -> NCHW


# --------------------------- parameters ---------------------------

def init_params(key, C):
    keys = iter(jax.random.split(key, 64))

    def conv_w():
        return 0.2 * jax.random.normal(next(keys), (C, C, 3, 3), jnp.float32)

    def conv_b():
        return 0.1 * jax.random.normal(next(keys), (C,), jnp.float32)

    def lin_w():
        return 0.4 * jax.random.normal(next(keys), (C, C), jnp.float32)

    def bn():
        return dict(
            gamma=1.0 + 0.1 * jax.random.normal(next(keys), (C,), jnp.float32),
            beta=0.1 * jax.random.normal(next(keys), (C,), jnp.float32),
            mean=0.1 * jax.random.normal(next(keys), (C,), jnp.float32),
            var=1.0 + 0.2 * jax.random.uniform(next(keys), (C,), jnp.float32),
        )

    def resblock():
        return dict(c1_w=conv_w(), c1_b=conv_b(), bn1=bn(),
                    c2_w=conv_w(), c2_b=conv_b(), bn2=bn(),
                    se_w1=lin_w(), se_w2=lin_w())

    return dict(
        conv0_w=conv_w(), conv0_b=conv_b(), se0_w1=lin_w(), se0_w2=lin_w(),
        rbA=resblock(),
        conv1_w=conv_w(), conv1_b=conv_b(), se1_w1=lin_w(), se1_w2=lin_w(),
        rbB=resblock(),
        conv2_w=conv_w(), conv2_b=conv_b(),
    )


# --------------------------- plain-JAX reference (unfolded BN, eval mode) ---------------------------

def _ref_conv(x, w, b):
    return jax.lax.conv_general_dilated(
        x, jnp.transpose(w, (2, 3, 1, 0)), window_strides=(1, 1), padding='SAME',
        dimension_numbers=('NHWC', 'HWIO', 'NHWC'),
        precision=jax.lax.Precision.HIGHEST) + b


def _ref_bn(x, bn):
    return bn['gamma'] * (x - bn['mean']) / jnp.sqrt(bn['var'] + BN_EPS) + bn['beta']


def _ref_se(x, w1, w2):
    y = jnp.mean(x, axis=(1, 2))                                        # (N, C)
    y = _leaky(jnp.matmul(y, w1.T, precision=jax.lax.Precision.HIGHEST))
    y = jax.nn.sigmoid(jnp.matmul(y, w2.T, precision=jax.lax.Precision.HIGHEST))
    return x * y[:, None, None, :]


def _ref_resblock(x, rb):
    h = _leaky(_ref_bn(_ref_conv(x, rb['c1_w'], rb['c1_b']), rb['bn1']))
    h = _ref_bn(_ref_conv(h, rb['c2_w'], rb['c2_b']), rb['bn2'])
    h = _ref_se(h, rb['se_w1'], rb['se_w2'])
    return _leaky(h + x)


def ref_forward(x, p):
    h = _leaky(_ref_conv(x, p['conv0_w'], p['conv0_b']))
    h = _ref_se(h, p['se0_w1'], p['se0_w2'])
    h = _ref_resblock(h, p['rbA'])
    h = _leaky(_ref_conv(h, p['conv1_w'], p['conv1_b']))
    h = _ref_se(h, p['se1_w1'], p['se1_w2'])
    h = _ref_resblock(h, p['rbB'])
    return _ref_conv(h, p['conv2_w'], p['conv2_b'])


# --------------------------- main ---------------------------

if __name__ == "__main__":
    key = jax.random.PRNGKey(0)
    kx, kp = jax.random.split(key)

    # NCHW like PyTorch. W*C = 128 (lane-dense); N=16 with B=8 per grid step
    # -> conv matmul M = 128 and grid length 2 (keeps both v7x TCs busy).
    N, C, H, W = 16, 8, 16, 16
    x = jax.random.normal(kx, (N, C, H, W), jnp.float32)
    params = init_params(kp, C)

    out = jax.jit(refinement_layer)(x, params)
    out = jax.block_until_ready(out)

    # Correctness check against a plain-JAX reference (BN unfolded, eval mode).
    # Tolerance accounts for bf16 MXU operands + approx sigmoid reciprocal vs
    # the f32 Precision.HIGHEST reference.
    x_nhwc = jnp.transpose(x, (0, 2, 3, 1))
    ref = jnp.transpose(ref_forward(x_nhwc, params), (0, 3, 1, 2))
    err = float(jnp.max(jnp.abs(out - ref)))

    assert out.shape == (N, C, H, W)
    assert bool(jnp.isfinite(out).all())
    assert err < 1e-1, f"max abs err {err}"
    print("KERNEL_OK")
</pallas_src>

<mosaic_0001>
module attributes {stable_mosaic.version = 11 : i64} {
  func.func @_refine_kernel(%arg0: i32, %arg1: memref<8x16x128xf32, #tpu.memory_space<vmem>>, %arg2: memref<7x384x128xbf16, #tpu.memory_space<vmem>>, %arg3: memref<7x1x128xf32, #tpu.memory_space<vmem>>, %arg4: memref<4x128x8xf32, #tpu.memory_space<vmem>>, %arg5: memref<4x8x8xf32, #tpu.memory_space<vmem>>, %arg6: memref<8x128xf32, #tpu.memory_space<vmem>>, %arg7: memref<8x128xf32, #tpu.memory_space<vmem>>, %arg8: memref<8x16x128xf32, #tpu.memory_space<vmem>>) attributes {dimension_semantics = [#tpu.dimension_semantics<parallel>], iteration_bounds = array<i64: 2>, scalar_prefetch = 0 : i64, scratch_operands = 0 : i64, tpu.core_type = #tpu.core_type<tc>, window_params = [{transform_indices = @transform_0, window_bounds = array<i64: 8, 16, 128>}, {pipeline_mode = #tpu.pipeline_mode<synchronous>, transform_indices = @transform_1, window_bounds = array<i64: 7, 384, 128>}, {pipeline_mode = #tpu.pipeline_mode<synchronous>, transform_indices = @transform_2, window_bounds = array<i64: 7, 1, 128>}, {pipeline_mode = #tpu.pipeline_mode<synchronous>, transform_indices = @transform_3, window_bounds = array<i64: 4, 128, 8>}, {pipeline_mode = #tpu.pipeline_mode<synchronous>, transform_indices = @transform_4, window_bounds = array<i64: 4, 8, 8>}, {pipeline_mode = #tpu.pipeline_mode<synchronous>, transform_indices = @transform_5, window_bounds = array<i64: 8, 128>}, {pipeline_mode = #tpu.pipeline_mode<synchronous>, transform_indices = @transform_6, window_bounds = array<i64: 8, 128>}, {transform_indices = @transform_7, window_bounds = array<i64: 8, 16, 128>}]} {
    %0 = tpu.iota {dimensions = array<i32: 0>} : vector<128x128xi32>
    %c16_i32 = arith.constant 16 : i32
    %c0_i32 = arith.constant 0 : i32
    %1 = arith.cmpi eq, %c16_i32, %c0_i32 : i32
    %c1_i32 = arith.constant 1 : i32
    %2 = arith.select %1, %c1_i32, %c16_i32 : i32
    %3 = vector.broadcast %2 : i32 to vector<128x128xi32>
    %4 = arith.remsi %0, %3 : vector<128x128xi32>
    %c0_i32_0 = arith.constant 0 : i32
    %5 = vector.broadcast %c0_i32_0 : i32 to vector<128x128xi32>
    %6 = arith.cmpi ne, %4, %5 : vector<128x128xi32>
    %c0_i32_1 = arith.constant 0 : i32
    %7 = vector.broadcast %c0_i32_1 : i32 to vector<128x128xi32>
    %8 = arith.cmpi slt, %4, %7 : vector<128x128xi32>
    %c0_i32_2 = arith.constant 0 : i32
    %9 = arith.cmpi slt, %2, %c0_i32_2 : i32
    %10 = vector.broadcast %9 : i1 to vector<128x128xi1>
    %11 = vector.broadcast %10 : vector<128x128xi1> to vector<128x128xi1>
    %12 = arith.xori %8, %11 : vector<128x128xi1>
    %13 = arith.andi %12, %6 : vector<128x128xi1>
    %14 = vector.broadcast %2 : i32 to vector<128x128xi32>
    %15 = arith.addi %4, %14 : vector<128x128xi32>
    %16 = arith.select %13, %15, %4 : vector<128x128xi1>, vector<128x128xi32>
    %c0_i32_3 = arith.constant 0 : i32
    %17 = vector.broadcast %c0_i32_3 : i32 to vector<128x128xi32>
    %18 = arith.cmpi eq, %16, %17 : vector<128x128xi32>
    %c15_i32 = arith.constant 15 : i32
    %19 = vector.broadcast %c15_i32 : i32 to vector<128x128xi32>
    %20 = arith.cmpi eq, %16, %19 : vector<128x128xi32>
    %c0 = arith.constant 0 : index
    %c0_4 = arith.constant 0 : index
    %c0_5 = arith.constant 0 : index
    %21 = vector.load %arg1[%c0, %c0_4, %c0_5] : memref<8x16x128xf32, #tpu.memory_space<vmem>>, vector<8x16x128xf32>
    %22 = vector.shape_cast %21 : vector<8x16x128xf32> to vector<128x128xf32>
    %c1_i32_6 = arith.constant 1 : i32
    %23 = tpu.dynamic_rotate %22 by %c1_i32_6 dim 0 : vector<128x128xf32>, i32 -> vector<128x128xf32>
    %cst = arith.constant 0.000000e+00 : f32
    %24 = vector.broadcast %cst : f32 to vector<128x128xf32>
    %25 = arith.select %18, %24, %23 : vector<128x128xi1>, vector<128x128xf32>
    %c127_i32 = arith.constant 127 : i32
    %26 = tpu.dynamic_rotate %22 by %c127_i32 dim 0 : vector<128x128xf32>, i32 -> vector<128x128xf32>
    %cst_7 = arith.constant 0.000000e+00 : f32
    %27 = vector.broadcast %cst_7 : f32 to vector<128x128xf32>
    %28 = arith.select %20, %27, %26 : vector<128x128xi1>, vector<128x128xf32>
    %29 = arith.truncf %25 : vector<128x128xf32> to vector<128x128xbf16>
    %30 = arith.truncf %22 : vector<128x128xf32> to vector<128x128xbf16>
    %31 = arith.truncf %28 : vector<128x128xf32> to vector<128x128xbf16>
    %32 = tpu.concatenate %29, %30, %31 in 1 : vector<128x128xbf16>, vector<128x128xbf16>, vector<128x128xbf16> -> vector<128x384xbf16>
    %c0_8 = arith.constant 0 : index
    %c0_9 = arith.constant 0 : index
    %c0_10 = arith.constant 0 : index
    %33 = vector.load %arg2[%c0_8, %c0_9, %c0_10] : memref<7x384x128xbf16, #tpu.memory_space<vmem>>, vector<1x384x128xbf16>
    %34 = vector.shape_cast %33 : vector<1x384x128xbf16> to vector<384x128xbf16>
    %cst_11 = arith.constant dense<0.000000e+00> : vector<128x128xf32>
    %35 = tpu.matmul %32, %34, %cst_11 {dimension_numbers = #tpu.dot_dimension_numbers<[1], [0], [0], [1], [0, 0, 1, 1], [], []>} : vector<128x384xbf16>, vector<384x128xbf16>, vector<128x128xf32> -> vector<128x128xf32>
    %c0_12 = arith.constant 0 : index
    %c0_13 = arith.constant 0 : index
    %c0_14 = arith.constant 0 : index
    %36 = vector.load %arg3[%c0_12, %c0_13, %c0_14] : memref<7x1x128xf32, #tpu.memory_space<vmem>>, vector<1x1x128xf32>
    %37 = vector.shape_cast %36 : vector<1x1x128xf32> to vector<1x128xf32>
    %38 = vector.broadcast %37 : vector<1x128xf32> to vector<128x128xf32>
    %39 = arith.addf %35, %38 : vector<128x128xf32>
    %cst_15 = arith.constant 0.000000e+00 : f32
    %40 = vector.broadcast %cst_15 : f32 to vector<128x128xf32>
    %41 = arith.cmpf oge, %39, %40 : vector<128x128xf32>
    %cst_16 = arith.constant 0.00999999977 : f32
    %42 = vector.broadcast %cst_16 : f32 to vector<128x128xf32>
    %43 = arith.mulf %42, %39 : vector<128x128xf32>
    %44 = arith.select %41, %39, %43 : vector<128x128xi1>, vector<128x128xf32>
    %c0_17 = arith.constant 0 : index
    %c0_18 = arith.constant 0 : index
    %45 = vector.load %arg7[%c0_17, %c0_18] : memref<8x128xf32, #tpu.memory_space<vmem>>, vector<8x128xf32>
    %cst_19 = arith.constant dense<0.000000e+00> : vector<8x128xf32>
    %46 = tpu.matmul %45, %44, %cst_19 {dimension_numbers = #tpu.dot_dimension_numbers<[1], [0], [0], [1], [0, 0, 1, 1], [], []>} : vector<8x128xf32>, vector<128x128xf32>, vector<8x128xf32> -> vector<8x128xf32>
    %c0_20 = arith.constant 0 : index
    %c0_21 = arith.constant 0 : index
    %c0_22 = arith.constant 0 : index
    %47 = vector.load %arg4[%c0_20, %c0_21, %c0_22] : memref<4x128x8xf32, #tpu.memory_space<vmem>>, vector<1x128x8xf32>
    %48 = vector.shape_cast %47 : vector<1x128x8xf32> to vector<128x8xf32>
    %cst_23 = arith.constant dense<0.000000e+00> : vector<8x8xf32>
    %49 = tpu.matmul %46, %48, %cst_23 {dimension_numbers = #tpu.dot_dimension_numbers<[1], [0], [0], [1], [0, 0, 1, 1], [], []>} : vector<8x128xf32>, vector<128x8xf32>, vector<8x8xf32> -> vector<8x8xf32>
    %cst_24 = arith.constant 0.000000e+00 : f32
    %50 = vector.broadcast %cst_24 : f32 to vector<8x8xf32>
    %51 = arith.cmpf oge, %49, %50 : vector<8x8xf32>
    %cst_25 = arith.constant 0.00999999977 : f32
    %52 = vector.broadcast %cst_25 : f32 to vector<8x8xf32>
    %53 = arith.mulf %52, %49 : vector<8x8xf32>
    %54 = arith.select %51, %49, %53 : vector<8x8xi1>, vector<8x8xf32>
    %c0_26 = arith.constant 0 : index
    %c0_27 = arith.constant 0 : index
    %c0_28 = arith.constant 0 : index
    %55 = vector.load %arg5[%c0_26, %c0_27, %c0_28] : memref<4x8x8xf32, #tpu.memory_space<vmem>>, vector<1x8x8xf32>
    %56 = vector.shape_cast %55 : vector<1x8x8xf32> to vector<8x8xf32>
    %cst_29 = arith.constant dense<0.000000e+00> : vector<8x8xf32>
    %57 = tpu.matmul %54, %56, %cst_29 {dimension_numbers = #tpu.dot_dimension_numbers<[1], [0], [0], [1], [0, 0, 1, 1], [], []>} : vector<8x8xf32>, vector<8x8xf32>, vector<8x8xf32> -> vector<8x8xf32>
    %cst_30 = arith.constant 0.000000e+00 : f32
    %58 = vector.broadcast %cst_30 : f32 to vector<8x8xf32>
    %59 = arith.subf %58, %57 : vector<8x8xf32>
    %60 = math.exp %59 : vector<8x8xf32>
    %cst_31 = arith.constant 1.000000e+00 : f32
    %61 = vector.broadcast %cst_31 : f32 to vector<8x8xf32>
    %62 = arith.addf %61, %60 : vector<8x8xf32>
    %63 = tpu.reciprocal %62 {approx = true} : vector<8x8xf32> -> vector<8x8xf32>
    %c0_32 = arith.constant 0 : index
    %c0_33 = arith.constant 0 : index
    %64 = vector.load %arg6[%c0_32, %c0_33] : memref<8x128xf32, #tpu.memory_space<vmem>>, vector<8x128xf32>
    %cst_34 = arith.constant dense<0.000000e+00> : vector<8x128xf32>
    %65 = tpu.matmul %63, %64, %cst_34 {dimension_numbers = #tpu.dot_dimension_numbers<[1], [0], [0], [1], [0, 0, 1, 1], [], []>} : vector<8x8xf32>, vector<8x128xf32>, vector<8x128xf32> -> vector<8x128xf32>
    %66 = vector.shape_cast %44 : vector<128x128xf32> to vector<8x16x128xf32>
    %67 = vector.shape_cast %65 : vector<8x128xf32> to vector<8x1x128xf32>
    %68 = vector.broadcast %67 : vector<8x1x128xf32> to vector<8x16x128xf32>
    %69 = arith.mulf %66, %68 : vector<8x16x128xf32>
    %70 = vector.shape_cast %69 : vector<8x16x128xf32> to vector<128x128xf32>
    %c1_i32_35 = arith.constant 1 : i32
    %71 = tpu.dynamic_rotate %70 by %c1_i32_35 dim 0 : vector<128x128xf32>, i32 -> vector<128x128xf32>
    %cst_36 = arith.constant 0.000000e+00 : f32
    %72 = vector.broadcast %cst_36 : f32 to vector<128x128xf32>
    %73 = arith.select %18, %72, %71 : vector<128x128xi1>, vector<128x128xf32>
    %c127_i32_37 = arith.constant 127 : i32
    %74 = tpu.dynamic_rotate %70 by %c127_i32_37 dim 0 : vector<128x128xf32>, i32 -> vector<128x128xf32>
    %cst_38 = arith.constant 0.000000e+00 : f32
    %75 = vector.broadcast %cst_38 : f32 to vector<128x128xf32>
    %76 = arith.select %20, %75, %74 : vector<128x128xi1>, vector<128x128xf32>
    %77 = arith.truncf %73 : vector<128x128xf32> to vector<128x128xbf16>
    %78 = arith.truncf %70 : vector<128x128xf32> to vector<128x128xbf16>
    %79 = arith.truncf %76 : vector<128x128xf32> to vector<128x128xbf16>
    %80 = tpu.concatenate %77, %78, %79 in 1 : vector<128x128xbf16>, vector<128x128xbf16>, vector<128x128xbf16> -> vector<128x384xbf16>
    %c1 = arith.constant 1 : index
    %c0_39 = arith.constant 0 : index
    %c0_40 = arith.constant 0 : index
    %81 = vector.load %arg2[%c1, %c0_39, %c0_40] : memref<7x384x128xbf16, #tpu.memory_space<vmem>>, vector<1x384x128xbf16>
    %82 = vector.shape_cast %81 : vector<1x384x128xbf16> to vector<384x128xbf16>
    %cst_41 = arith.constant dense<0.000000e+00> : vector<128x128xf32>
    %83 = tpu.matmul %80, %82, %cst_41 {dimension_numbers = #tpu.dot_dimension_numbers<[1], [0], [0], [1], [0, 0, 1, 1], [], []>} : vector<128x384xbf16>, vector<384x128xbf16>, vector<128x128xf32> -> vector<128x128xf32>
    %c1_42 = arith.constant 1 : index
    %c0_43 = arith.constant 0 : index
    %c0_44 = arith.constant 0 : index
    %84 = vector.load %arg3[%c1_42, %c0_43, %c0_44] : memref<7x1x128xf32, #tpu.memory_space<vmem>>, vector<1x1x128xf32>
    %85 = vector.shape_cast %84 : vector<1x1x128xf32> to vector<1x128xf32>
    %86 = vector.broadcast %85 : vector<1x128xf32> to vector<128x128xf32>
    %87 = arith.addf %83, %86 : vector<128x128xf32>
    %cst_45 = arith.constant 0.000000e+00 : f32
    %88 = vector.broadcast %cst_45 : f32 to vector<128x128xf32>
    %89 = arith.cmpf oge, %87, %88 : vector<128x128xf32>
    %cst_46 = arith.constant 0.00999999977 : f32
    %90 = vector.broadcast %cst_46 : f32 to vector<128x128xf32>
    %91 = arith.mulf %90, %87 : vector<128x128xf32>
    %92 = arith.select %89, %87, %91 : vector<128x128xi1>, vector<128x128xf32>
    %c1_i32_47 = arith.constant 1 : i32
    %93 = tpu.dynamic_rotate %92 by %c1_i32_47 dim 0 : vector<128x128xf32>, i32 -> vector<128x128xf32>
    %cst_48 = arith.constant 0.000000e+00 : f32
    %94 = vector.broadcast %cst_48 : f32 to vector<128x128xf32>
    %95 = arith.select %18, %94, %93 : vector<128x128xi1>, vector<128x128xf32>
    %c127_i32_49 = arith.constant 127 : i32
    %96 = tpu.dynamic_rotate %92 by %c127_i32_49 dim 0 : vector<128x128xf32>, i32 -> vector<128x128xf32>
    %cst_50 = arith.constant 0.000000e+00 : f32
    %97 = vector.broadcast %cst_50 : f32 to vector<128x128xf32>
    %98 = arith.select %20, %97, %96 : vector<128x128xi1>, vector<128x128xf32>
    %99 = arith.truncf %95 : vector<128x128xf32> to vector<128x128xbf16>
    %100 = arith.truncf %92 : vector<128x128xf32> to vector<128x128xbf16>
    %101 = arith.truncf %98 : vector<128x128xf32> to vector<128x128xbf16>
    %102 = tpu.concatenate %99, %100, %101 in 1 : vector<128x128xbf16>, vector<128x128xbf16>, vector<128x128xbf16> -> vector<128x384xbf16>
    %c2 = arith.constant 2 : index
    %c0_51 = arith.constant 0 : index
    %c0_52 = arith.constant 0 : index
    %103 = vector.load %arg2[%c2, %c0_51, %c0_52] : memref<7x384x128xbf16, #tpu.memory_space<vmem>>, vector<1x384x128xbf16>
    %104 = vector.shape_cast %103 : vector<1x384x128xbf16> to vector<384x128xbf16>
    %cst_53 = arith.constant dense<0.000000e+00> : vector<128x128xf32>
    %105 = tpu.matmul %102, %104, %cst_53 {dimension_numbers = #tpu.dot_dimension_numbers<[1], [0], [0], [1], [0, 0, 1, 1], [], []>} : vector<128x384xbf16>, vector<384x128xbf16>, vector<128x128xf32> -> vector<128x128xf32>
    %c2_54 = arith.constant 2 : index
    %c0_55 = arith.constant 0 : index
    %c0_56 = arith.constant 0 : index
    %106 = vector.load %arg3[%c2_54, %c0_55, %c0_56] : memref<7x1x128xf32, #tpu.memory_space<vmem>>, vector<1x1x128xf32>
    %107 = vector.shape_cast %106 : vector<1x1x128xf32> to vector<1x128xf32>
    %108 = vector.broadcast %107 : vector<1x128xf32> to vector<128x128xf32>
    %109 = arith.addf %105, %108 : vector<128x128xf32>
    %c0_57 = arith.constant 0 : index
    %c0_58 = arith.constant 0 : index
    %110 = vector.load %arg7[%c0_57, %c0_58] : memref<8x128xf32, #tpu.memory_space<vmem>>, vector<8x128xf32>
    %cst_59 = arith.constant dense<0.000000e+00> : vector<8x128xf32>
    %111 = tpu.matmul %110, %109, %cst_59 {dimension_numbers = #tpu.dot_dimension_numbers<[1], [0], [0], [1], [0, 0, 1, 1], [], []>} : vector<8x128xf32>, vector<128x128xf32>, vector<8x128xf32> -> vector<8x128xf32>
    %c1_60 = arith.constant 1 : index
    %c0_61 = arith.constant 0 : index
    %c0_62 = arith.constant 0 : index
    %112 = vector.load %arg4[%c1_60, %c0_61, %c0_62] : memref<4x128x8xf32, #tpu.memory_space<vmem>>, vector<1x128x8xf32>
    %113 = vector.shape_cast %112 : vector<1x128x8xf32> to vector<128x8xf32>
    %cst_63 = arith.constant dense<0.000000e+00> : vector<8x8xf32>
    %114 = tpu.matmul %111, %113, %cst_63 {dimension_numbers = #tpu.dot_dimension_numbers<[1], [0], [0], [1], [0, 0, 1, 1], [], []>} : vector<8x128xf32>, vector<128x8xf32>, vector<8x8xf32> -> vector<8x8xf32>
    %cst_64 = arith.constant 0.000000e+00 : f32
    %115 = vector.broadcast %cst_64 : f32 to vector<8x8xf32>
    %116 = arith.cmpf oge, %114, %115 : vector<8x8xf32>
    %cst_65 = arith.constant 0.00999999977 : f32
    %117 = vector.broadcast %cst_65 : f32 to vector<8x8xf32>
    %118 = arith.mulf %117, %114 : vector<8x8xf32>
    %119 = arith.select %116, %114, %118 : vector<8x8xi1>, vector<8x8xf32>
    %c1_66 = arith.constant 1 : index
    %c0_67 = arith.constant 0 : index
    %c0_68 = arith.constant 0 : index
    %120 = vector.load %arg5[%c1_66, %c0_67, %c0_68] : memref<4x8x8xf32, #tpu.memory_space<vmem>>, vector<1x8x8xf32>
    %121 = vector.shape_cast %120 : vector<1x8x8xf32> to vector<8x8xf32>
    %cst_69 = arith.constant dense<0.000000e+00> : vector<8x8xf32>
    %122 = tpu.matmul %119, %121, %cst_69 {dimension_numbers = #tpu.dot_dimension_numbers<[1], [0], [0], [1], [0, 0, 1, 1], [], []>} : vector<8x8xf32>, vector<8x8xf32>, vector<8x8xf32> -> vector<8x8xf32>
    %cst_70 = arith.constant 0.000000e+00 : f32
    %123 = vector.broadcast %cst_70 : f32 to vector<8x8xf32>
    %124 = arith.subf %123, %122 : vector<8x8xf32>
    %125 = math.exp %124 : vector<8x8xf32>
    %cst_71 = arith.constant 1.000000e+00 : f32
    %126 = vector.broadcast %cst_71 : f32 to vector<8x8xf32>
    %127 = arith.addf %126, %125 : vector<8x8xf32>
    %128 = tpu.reciprocal %127 {approx = true} : vector<8x8xf32> -> vector<8x8xf32>
    %c0_72 = arith.constant 0 : index
    %c0_73 = arith.constant 0 : index
    %129 = vector.load %arg6[%c0_72, %c0_73] : memref<8x128xf32, #tpu.memory_space<vmem>>, vector<8x128xf32>
    %cst_74 = arith.constant dense<0.000000e+00> : vector<8x128xf32>
    %130 = tpu.matmul %128, %129, %cst_74 {dimension_numbers = #tpu.dot_dimension_numbers<[1], [0], [0], [1], [0, 0, 1, 1], [], []>} : vector<8x8xf32>, vector<8x128xf32>, vector<8x128xf32> -> vector<8x128xf32>
    %131 = vector.shape_cast %109 : vector<128x128xf32> to vector<8x16x128xf32>
    %132 = vector.shape_cast %130 : vector<8x128xf32> to vector<8x1x128xf32>
    %133 = vector.broadcast %132 : vector<8x1x128xf32> to vector<8x16x128xf32>
    %134 = arith.mulf %131, %133 : vector<8x16x128xf32>
    %135 = vector.shape_cast %134 : vector<8x16x128xf32> to vector<128x128xf32>
    %136 = arith.addf %135, %70 : vector<128x128xf32>
    %cst_75 = arith.constant 0.000000e+00 : f32
    %137 = vector.broadcast %cst_75 : f32 to vector<128x128xf32>
    %138 = arith.cmpf oge, %136, %137 : vector<128x128xf32>
    %cst_76 = arith.constant 0.00999999977 : f32
    %139 = vector.broadcast %cst_76 : f32 to vector<128x128xf32>
    %140 = arith.mulf %139, %136 : vector<128x128xf32>
    %141 = arith.select %138, %136, %140 : vector<128x128xi1>, vector<128x128xf32>
    %c1_i32_77 = arith.constant 1 : i32
    %142 = tpu.dynamic_rotate %141 by %c1_i32_77 dim 0 : vector<128x128xf32>, i32 -> vector<128x128xf32>
    %cst_78 = arith.constant 0.000000e+00 : f32
    %143 = vector.broadcast %cst_78 : f32 to vector<128x128xf32>
    %144 = arith.select %18, %143, %142 : vector<128x128xi1>, vector<128x128xf32>
    %c127_i32_79 = arith.constant 127 : i32
    %145 = tpu.dynamic_rotate %141 by %c127_i32_79 dim 0 : vector<128x128xf32>, i32 -> vector<128x128xf32>
    %cst_80 = arith.constant 0.000000e+00 : f32
    %146 = vector.broadcast %cst_80 : f32 to vector<128x128xf32>
    %147 = arith.select %20, %146, %145 : vector<128x128xi1>, vector<128x128xf32>
    %148 = arith.truncf %144 : vector<128x128xf32> to vector<128x128xbf16>
    %149 = arith.truncf %141 : vector<128x128xf32> to vector<128x128xbf16>
    %150 = arith.truncf %147 : vector<128x128xf32> to vector<128x128xbf16>
    %151 = tpu.concatenate %148, %149, %150 in 1 : vector<128x128xbf16>, vector<128x128xbf16>, vector<128x128xbf16> -> vector<128x384xbf16>
    %c3 = arith.constant 3 : index
    %c0_81 = arith.constant 0 : index
    %c0_82 = arith.constant 0 : index
    %152 = vector.load %arg2[%c3, %c0_81, %c0_82] : memref<7x384x128xbf16, #tpu.memory_space<vmem>>, vector<1x384x128xbf16>
    %153 = vector.shape_cast %152 : vector<1x384x128xbf16> to vector<384x128xbf16>
    %cst_83 = arith.constant dense<0.000000e+00> : vector<128x128xf32>
    %154 = tpu.matmul %151, %153, %cst_83 {dimension_numbers = #tpu.dot_dimension_numbers<[1], [0], [0], [1], [0, 0, 1, 1], [], []>} : vector<128x384xbf16>, vector<384x128xbf16>, vector<128x128xf32> -> vector<128x128xf32>
    %c3_84 = arith.constant 3 : index
    %c0_85 = arith.constant 0 : index
    %c0_86 = arith.constant 0 : index
    %155 = vector.load %arg3[%c3_84, %c0_85, %c0_86] : memref<7x1x128xf32, #tpu.memory_space<vmem>>, vector<1x1x128xf32>
    %156 = vector.shape_cast %155 : vector<1x1x128xf32> to vector<1x128xf32>
    %157 = vector.broadcast %156 : vector<1x128xf32> to vector<128x128xf32>
    %158 = arith.addf %154, %157 : vector<128x128xf32>
    %cst_87 = arith.constant 0.000000e+00 : f32
    %159 = vector.broadcast %cst_87 : f32 to vector<128x128xf32>
    %160 = arith.cmpf oge, %158, %159 : vector<128x128xf32>
    %cst_88 = arith.constant 0.00999999977 : f32
    %161 = vector.broadcast %cst_88 : f32 to vector<128x128xf32>
    %162 = arith.mulf %161, %158 : vector<128x128xf32>
    %163 = arith.select %160, %158, %162 : vector<128x128xi1>, vector<128x128xf32>
    %c0_89 = arith.constant 0 : index
    %c0_90 = arith.constant 0 : index
    %164 = vector.load %arg7[%c0_89, %c0_90] : memref<8x128xf32, #tpu.memory_space<vmem>>, vector<8x128xf32>
    %cst_91 = arith.constant dense<0.000000e+00> : vector<8x128xf32>
    %165 = tpu.matmul %164, %163, %cst_91 {dimension_numbers = #tpu.dot_dimension_numbers<[1], [0], [0], [1], [0, 0, 1, 1], [], []>} : vector<8x128xf32>, vector<128x128xf32>, vector<8x128xf32> -> vector<8x128xf32>
    %c2_92 = arith.constant 2 : index
    %c0_93 = arith.constant 0 : index
    %c0_94 = arith.constant 0 : index
    %166 = vector.load %arg4[%c2_92, %c0_93, %c0_94] : memref<4x128x8xf32, #tpu.memory_space<vmem>>, vector<1x128x8xf32>
    %167 = vector.shape_cast %166 : vector<1x128x8xf32> to vector<128x8xf32>
    %cst_95 = arith.constant dense<0.000000e+00> : vector<8x8xf32>
    %168 = tpu.matmul %165, %167, %cst_95 {dimension_numbers = #tpu.dot_dimension_numbers<[1], [0], [0], [1], [0, 0, 1, 1], [], []>} : vector<8x128xf32>, vector<128x8xf32>, vector<8x8xf32> -> vector<8x8xf32>
    %cst_96 = arith.constant 0.000000e+00 : f32
    %169 = vector.broadcast %cst_96 : f32 to vector<8x8xf32>
    %170 = arith.cmpf oge, %168, %169 : vector<8x8xf32>
    %cst_97 = arith.constant 0.00999999977 : f32
    %171 = vector.broadcast %cst_97 : f32 to vector<8x8xf32>
    %172 = arith.mulf %171, %168 : vector<8x8xf32>
    %173 = arith.select %170, %168, %172 : vector<8x8xi1>, vector<8x8xf32>
    %c2_98 = arith.constant 2 : index
    %c0_99 = arith.constant 0 : index
    %c0_100 = arith.constant 0 : index
    %174 = vector.load %arg5[%c2_98, %c0_99, %c0_100] : memref<4x8x8xf32, #tpu.memory_space<vmem>>, vector<1x8x8xf32>
    %175 = vector.shape_cast %174 : vector<1x8x8xf32> to vector<8x8xf32>
    %cst_101 = arith.constant dense<0.000000e+00> : vector<8x8xf32>
    %176 = tpu.matmul %173, %175, %cst_101 {dimension_numbers = #tpu.dot_dimension_numbers<[1], [0], [0], [1], [0, 0, 1, 1], [], []>} : vector<8x8xf32>, vector<8x8xf32>, vector<8x8xf32> -> vector<8x8xf32>
    %cst_102 = arith.constant 0.000000e+00 : f32
    %177 = vector.broadcast %cst_102 : f32 to vector<8x8xf32>
    %178 = arith.subf %177, %176 : vector<8x8xf32>
    %179 = math.exp %178 : vector<8x8xf32>
    %cst_103 = arith.constant 1.000000e+00 : f32
    %180 = vector.broadcast %cst_103 : f32 to vector<8x8xf32>
    %181 = arith.addf %180, %179 : vector<8x8xf32>
    %182 = tpu.reciprocal %181 {approx = true} : vector<8x8xf32> -> vector<8x8xf32>
    %c0_104 = arith.constant 0 : index
    %c0_105 = arith.constant 0 : index
    %183 = vector.load %arg6[%c0_104, %c0_105] : memref<8x128xf32, #tpu.memory_space<vmem>>, vector<8x128xf32>
    %cst_106 = arith.constant dense<0.000000e+00> : vector<8x128xf32>
    %184 = tpu.matmul %182, %183, %cst_106 {dimension_numbers = #tpu.dot_dimension_numbers<[1], [0], [0], [1], [0, 0, 1, 1], [], []>} : vector<8x8xf32>, vector<8x128xf32>, vector<8x128xf32> -> vector<8x128xf32>
    %185 = vector.shape_cast %163 : vector<128x128xf32> to vector<8x16x128xf32>
    %186 = vector.shape_cast %184 : vector<8x128xf32> to vector<8x1x128xf32>
    %187 = vector.broadcast %186 : vector<8x1x128xf32> to vector<8x16x128xf32>
    %188 = arith.mulf %185, %187 : vector<8x16x128xf32>
    %189 = vector.shape_cast %188 : vector<8x16x128xf32> to vector<128x128xf32>
    %c1_i32_107 = arith.constant 1 : i32
    %190 = tpu.dynamic_rotate %189 by %c1_i32_107 dim 0 : vector<128x128xf32>, i32 -> vector<128x128xf32>
    %cst_108 = arith.constant 0.000000e+00 : f32
    %191 = vector.broadcast %cst_108 : f32 to vector<128x128xf32>
    %192 = arith.select %18, %191, %190 : vector<128x128xi1>, vector<128x128xf32>
    %c127_i32_109 = arith.constant 127 : i32
    %193 = tpu.dynamic_rotate %189 by %c127_i32_109 dim 0 : vector<128x128xf32>, i32 -> vector<128x128xf32>
    %cst_110 = arith.constant 0.000000e+00 : f32
    %194 = vector.broadcast %cst_110 : f32 to vector<128x128xf32>
    %195 = arith.select %20, %194, %193 : vector<128x128xi1>, vector<128x128xf32>
    %196 = arith.truncf %192 : vector<128x128xf32> to vector<128x128xbf16>
    %197 = arith.truncf %189 : vector<128x128xf32> to vector<128x128xbf16>
    %198 = arith.truncf %195 : vector<128x128xf32> to vector<128x128xbf16>
    %199 = tpu.concatenate %196, %197, %198 in 1 : vector<128x128xbf16>, vector<128x128xbf16>, vector<128x128xbf16> -> vector<128x384xbf16>
    %c4 = arith.constant 4 : index
    %c0_111 = arith.constant 0 : index
    %c0_112 = arith.constant 0 : index
    %200 = vector.load %arg2[%c4, %c0_111, %c0_112] : memref<7x384x128xbf16, #tpu.memory_space<vmem>>, vector<1x384x128xbf16>
    %201 = vector.shape_cast %200 : vector<1x384x128xbf16> to vector<384x128xbf16>
    %cst_113 = arith.constant dense<0.000000e+00> : vector<128x128xf32>
    %202 = tpu.matmul %199, %201, %cst_113 {dimension_numbers = #tpu.dot_dimension_numbers<[1], [0], [0], [1], [0, 0, 1, 1], [], []>} : vector<128x384xbf16>, vector<384x128xbf16>, vector<128x128xf32> -> vector<128x128xf32>
    %c4_114 = arith.constant 4 : index
    %c0_115 = arith.constant 0 : index
    %c0_116 = arith.constant 0 : index
    %203 = vector.load %arg3[%c4_114, %c0_115, %c0_116] : memref<7x1x128xf32, #tpu.memory_space<vmem>>, vector<1x1x128xf32>
    %204 = vector.shape_cast %203 : vector<1x1x128xf32> to vector<1x128xf32>
    %205 = vector.broadcast %204 : vector<1x128xf32> to vector<128x128xf32>
    %206 = arith.addf %202, %205 : vector<128x128xf32>
    %cst_117 = arith.constant 0.000000e+00 : f32
    %207 = vector.broadcast %cst_117 : f32 to vector<128x128xf32>
    %208 = arith.cmpf oge, %206, %207 : vector<128x128xf32>
    %cst_118 = arith.constant 0.00999999977 : f32
    %209 = vector.broadcast %cst_118 : f32 to vector<128x128xf32>
    %210 = arith.mulf %209, %206 : vector<128x128xf32>
    %211 = arith.select %208, %206, %210 : vector<128x128xi1>, vector<128x128xf32>
    %c1_i32_119 = arith.constant 1 : i32
    %212 = tpu.dynamic_rotate %211 by %c1_i32_119 dim 0 : vector<128x128xf32>, i32 -> vector<128x128xf32>
    %cst_120 = arith.constant 0.000000e+00 : f32
    %213 = vector.broadcast %cst_120 : f32 to vector<128x128xf32>
    %214 = arith.select %18, %213, %212 : vector<128x128xi1>, vector<128x128xf32>
    %c127_i32_121 = arith.constant 127 : i32
    %215 = tpu.dynamic_rotate %211 by %c127_i32_121 dim 0 : vector<128x128xf32>, i32 -> vector<128x128xf32>
    %cst_122 = arith.constant 0.000000e+00 : f32
    %216 = vector.broadcast %cst_122 : f32 to vector<128x128xf32>
    %217 = arith.select %20, %216, %215 : vector<128x128xi1>, vector<128x128xf32>
    %218 = arith.truncf %214 : vector<128x128xf32> to vector<128x128xbf16>
    %219 = arith.truncf %211 : vector<128x128xf32> to vector<128x128xbf16>
    %220 = arith.truncf %217 : vector<128x128xf32> to vector<128x128xbf16>
    %221 = tpu.concatenate %218, %219, %220 in 1 : vector<128x128xbf16>, vector<128x128xbf16>, vector<128x128xbf16> -> vector<128x384xbf16>
    %c5 = arith.constant 5 : index
    %c0_123 = arith.constant 0 : index
    %c0_124 = arith.constant 0 : index
    %222 = vector.load %arg2[%c5, %c0_123, %c0_124] : memref<7x384x128xbf16, #tpu.memory_space<vmem>>, vector<1x384x128xbf16>
    %223 = vector.shape_cast %222 : vector<1x384x128xbf16> to vector<384x128xbf16>
    %cst_125 = arith.constant dense<0.000000e+00> : vector<128x128xf32>
    %224 = tpu.matmul %221, %223, %cst_125 {dimension_numbers = #tpu.dot_dimension_numbers<[1], [0], [0], [1], [0, 0, 1, 1], [], []>} : vector<128x384xbf16>, vector<384x128xbf16>, vector<128x128xf32> -> vector<128x128xf32>
    %c5_126 = arith.constant 5 : index
    %c0_127 = arith.constant 0 : index
    %c0_128 = arith.constant 0 : index
    %225 = vector.load %arg3[%c5_126, %c0_127, %c0_128] : memref<7x1x128xf32, #tpu.memory_space<vmem>>, vector<1x1x128xf32>
    %226 = vector.shape_cast %225 : vector<1x1x128xf32> to vector<1x128xf32>
    %227 = vector.broadcast %226 : vector<1x128xf32> to vector<128x128xf32>
    %228 = arith.addf %224, %227 : vector<128x128xf32>
    %c0_129 = arith.constant 0 : index
    %c0_130 = arith.constant 0 : index
    %229 = vector.load %arg7[%c0_129, %c0_130] : memref<8x128xf32, #tpu.memory_space<vmem>>, vector<8x128xf32>
    %cst_131 = arith.constant dense<0.000000e+00> : vector<8x128xf32>
    %230 = tpu.matmul %229, %228, %cst_131 {dimension_numbers = #tpu.dot_dimension_numbers<[1], [0], [0], [1], [0, 0, 1, 1], [], []>} : vector<8x128xf32>, vector<128x128xf32>, vector<8x128xf32> -> vector<8x128xf32>
    %c3_132 = arith.constant 3 : index
    %c0_133 = arith.constant 0 : index
    %c0_134 = arith.constant 0 : index
    %231 = vector.load %arg4[%c3_132, %c0_133, %c0_134] : memref<4x128x8xf32, #tpu.memory_space<vmem>>, vector<1x128x8xf32>
    %232 = vector.shape_cast %231 : vector<1x128x8xf32> to vector<128x8xf32>
    %cst_135 = arith.constant dense<0.000000e+00> : vector<8x8xf32>
    %233 = tpu.matmul %230, %232, %cst_135 {dimension_numbers = #tpu.dot_dimension_numbers<[1], [0], [0], [1], [0, 0, 1, 1], [], []>} : vector<8x128xf32>, vector<128x8xf32>, vector<8x8xf32> -> vector<8x8xf32>
    %cst_136 = arith.constant 0.000000e+00 : f32
    %234 = vector.broadcast %cst_136 : f32 to vector<8x8xf32>
    %235 = arith.cmpf oge, %233, %234 : vector<8x8xf32>
    %cst_137 = arith.constant 0.00999999977 : f32
    %236 = vector.broadcast %cst_137 : f32 to vector<8x8xf32>
    %237 = arith.mulf %236, %233 : vector<8x8xf32>
    %238 = arith.select %235, %233, %237 : vector<8x8xi1>, vector<8x8xf32>
    %c3_138 = arith.constant 3 : index
    %c0_139 = arith.constant 0 : index
    %c0_140 = arith.constant 0 : index
    %239 = vector.load %arg5[%c3_138, %c0_139, %c0_140] : memref<4x8x8xf32, #tpu.memory_space<vmem>>, vector<1x8x8xf32>
    %240 = vector.shape_cast %239 : vector<1x8x8xf32> to vector<8x8xf32>
    %cst_141 = arith.constant dense<0.000000e+00> : vector<8x8xf32>
    %241 = tpu.matmul %238, %240, %cst_141 {dimension_numbers = #tpu.dot_dimension_numbers<[1], [0], [0], [1], [0, 0, 1, 1], [], []>} : vector<8x8xf32>, vector<8x8xf32>, vector<8x8xf32> -> vector<8x8xf32>
    %cst_142 = arith.constant 0.000000e+00 : f32
    %242 = vector.broadcast %cst_142 : f32 to vector<8x8xf32>
    %243 = arith.subf %242, %241 : vector<8x8xf32>
    %244 = math.exp %243 : vector<8x8xf32>
    %cst_143 = arith.constant 1.000000e+00 : f32
    %245 = vector.broadcast %cst_143 : f32 to vector<8x8xf32>
    %246 = arith.addf %245, %244 : vector<8x8xf32>
    %247 = tpu.reciprocal %246 {approx = true} : vector<8x8xf32> -> vector<8x8xf32>
    %c0_144 = arith.constant 0 : index
    %c0_145 = arith.constant 0 : index
    %248 = vector.load %arg6[%c0_144, %c0_145] : memref<8x128xf32, #tpu.memory_space<vmem>>, vector<8x128xf32>
    %cst_146 = arith.constant dense<0.000000e+00> : vector<8x128xf32>
    %249 = tpu.matmul %247, %248, %cst_146 {dimension_numbers = #tpu.dot_dimension_numbers<[1], [0], [0], [1], [0, 0, 1, 1], [], []>} : vector<8x8xf32>, vector<8x128xf32>, vector<8x128xf32> -> vector<8x128xf32>
    %250 = vector.shape_cast %228 : vector<128x128xf32> to vector<8x16x128xf32>
    %251 = vector.shape_cast %249 : vector<8x128xf32> to vector<8x1x128xf32>
    %252 = vector.broadcast %251 : vector<8x1x128xf32> to vector<8x16x128xf32>
    %253 = arith.mulf %250, %252 : vector<8x16x128xf32>
    %254 = vector.shape_cast %253 : vector<8x16x128xf32> to vector<128x128xf32>
    %255 = arith.addf %254, %189 : vector<128x128xf32>
    %cst_147 = arith.constant 0.000000e+00 : f32
    %256 = vector.broadcast %cst_147 : f32 to vector<128x128xf32>
    %257 = arith.cmpf oge, %255, %256 : vector<128x128xf32>
    %cst_148 = arith.constant 0.00999999977 : f32
    %258 = vector.broadcast %cst_148 : f32 to vector<128x128xf32>
    %259 = arith.mulf %258, %255 : vector<128x128xf32>
    %260 = arith.select %257, %255, %259 : vector<128x128xi1>, vector<128x128xf32>
    %c1_i32_149 = arith.constant 1 : i32
    %261 = tpu.dynamic_rotate %260 by %c1_i32_149 dim 0 : vector<128x128xf32>, i32 -> vector<128x128xf32>
    %cst_150 = arith.constant 0.000000e+00 : f32
    %262 = vector.broadcast %cst_150 : f32 to vector<128x128xf32>
    %263 = arith.select %18, %262, %261 : vector<128x128xi1>, vector<128x128xf32>
    %c127_i32_151 = arith.constant 127 : i32
    %264 = tpu.dynamic_rotate %260 by %c127_i32_151 dim 0 : vector<128x128xf32>, i32 -> vector<128x128xf32>
    %cst_152 = arith.constant 0.000000e+00 : f32
    %265 = vector.broadcast %cst_152 : f32 to vector<128x128xf32>
    %266 = arith.select %20, %265, %264 : vector<128x128xi1>, vector<128x128xf32>
    %267 = arith.truncf %263 : vector<128x128xf32> to vector<128x128xbf16>
    %268 = arith.truncf %260 : vector<128x128xf32> to vector<128x128xbf16>
    %269 = arith.truncf %266 : vector<128x128xf32> to vector<128x128xbf16>
    %270 = tpu.concatenate %267, %268, %269 in 1 : vector<128x128xbf16>, vector<128x128xbf16>, vector<128x128xbf16> -> vector<128x384xbf16>
    %c6 = arith.constant 6 : index
    %c0_153 = arith.constant 0 : index
    %c0_154 = arith.constant 0 : index
    %271 = vector.load %arg2[%c6, %c0_153, %c0_154] : memref<7x384x128xbf16, #tpu.memory_space<vmem>>, vector<1x384x128xbf16>
    %272 = vector.shape_cast %271 : vector<1x384x128xbf16> to vector<384x128xbf16>
    %cst_155 = arith.constant dense<0.000000e+00> : vector<128x128xf32>
    %273 = tpu.matmul %270, %272, %cst_155 {dimension_numbers = #tpu.dot_dimension_numbers<[1], [0], [0], [1], [0, 0, 1, 1], [], []>} : vector<128x384xbf16>, vector<384x128xbf16>, vector<128x128xf32> -> vector<128x128xf32>
    %c6_156 = arith.constant 6 : index
    %c0_157 = arith.constant 0 : index
    %c0_158 = arith.constant 0 : index
    %274 = vector.load %arg3[%c6_156, %c0_157, %c0_158] : memref<7x1x128xf32, #tpu.memory_space<vmem>>, vector<1x1x128xf32>
    %275 = vector.shape_cast %274 : vector<1x1x128xf32> to vector<1x128xf32>
    %276 = vector.broadcast %275 : vector<1x128xf32> to vector<128x128xf32>
    %277 = arith.addf %273, %276 : vector<128x128xf32>
    %278 = vector.shape_cast %277 : vector<128x128xf32> to vector<8x16x128xf32>
    %c0_159 = arith.constant 0 : index
    %c0_160 = arith.constant 0 : index
    %c0_161 = arith.constant 0 : index
    %279 = vector.load %arg8[%c0_159, %c0_160, %c0_161] : memref<8x16x128xf32, #tpu.memory_space<vmem>>, vector<8x16x128xf32>
    tpu.vector_store %arg8[%c0_159, %c0_160, %c0_161], %278 {strides = array<i32>} : memref<8x16x128xf32, #tpu.memory_space<vmem>>, vector<8x16x128xf32>,
    return
  }
  func.func @transform_0(%arg0: i32) -> (i32, i32, i32) {
    %c0_i32 = arith.constant 0 : i32
    %c0_i32_0 = arith.constant 0 : i32
    %c0_i32_1 = arith.constant 0 : i32
    return %arg0, %c0_i32, %c0_i32_0 : i32, i32, i32
  }
  func.func @transform_1(%arg0: i32) -> (i32, i32, i32) {
    %c0_i32 = arith.constant 0 : i32
    %c0_i32_0 = arith.constant 0 : i32
    %c0_i32_1 = arith.constant 0 : i32
    %c0_i32_2 = arith.constant 0 : i32
    return %c0_i32, %c0_i32_0, %c0_i32_1 : i32, i32, i32
  }
  func.func @transform_2(%arg0: i32) -> (i32, i32, i32) {
    %c0_i32 = arith.constant 0 : i32
    %c0_i32_0 = arith.constant 0 : i32
    %c0_i32_1 = arith.constant 0 : i32
    %c0_i32_2 = arith.constant 0 : i32
    return %c0_i32, %c0_i32_0, %c0_i32_1 : i32, i32, i32
  }
  func.func @transform_3(%arg0: i32) -> (i32, i32, i32) {
    %c0_i32 = arith.constant 0 : i32
    %c0_i32_0 = arith.constant 0 : i32
    %c0_i32_1 = arith.constant 0 : i32
    %c0_i32_2 = arith.constant 0 : i32
    return %c0_i32, %c0_i32_0, %c0_i32_1 : i32, i32, i32
  }
  func.func @transform_4(%arg0: i32) -> (i32, i32, i32) {
    %c0_i32 = arith.constant 0 : i32
    %c0_i32_0 = arith.constant 0 : i32
    %c0_i32_1 = arith.constant 0 : i32
    %c0_i32_2 = arith.constant 0 : i32
    return %c0_i32, %c0_i32_0, %c0_i32_1 : i32, i32, i32
  }
  func.func @transform_5(%arg0: i32) -> (i32, i32) {
    %c0_i32 = arith.constant 0 : i32
    %c0_i32_0 = arith.constant 0 : i32
    %c0_i32_1 = arith.constant 0 : i32
    return %c0_i32, %c0_i32_0 : i32, i32
  }
  func.func @transform_6(%arg0: i32) -> (i32, i32) {
    %c0_i32 = arith.constant 0 : i32
    %c0_i32_0 = arith.constant 0 : i32
    %c0_i32_1 = arith.constant 0 : i32
    return %c0_i32, %c0_i32_0 : i32, i32
  }
  func.func @transform_7(%arg0: i32) -> (i32, i32, i32) {
    %c0_i32 = arith.constant 0 : i32
    %c0_i32_0 = arith.constant 0 : i32
    %c0_i32_1 = arith.constant 0 : i32
    return %arg0, %c0_i32, %c0_i32_0 : i32, i32, i32
  }
}

</mosaic_0001>

<bundles_post_ra>
// kernel: tile.42
= control target key start
LH: loop header
LB: loop body
LE: loop exit
PB: predicated region body
PF: predicated region fallthrough
CT: control target
= control target key end

     0   :  { %s28_s0 = inlined_call_operand.vmem [shape: f32[8], index: 0, kind: input, shape index: {}]   ;;  %s29_s1 = inlined_call_operand.vmem [shape: f32[16,8], index: 1, kind: output, shape index: {}]  }
   0x1   :  { %v4_v0 = vld [vmem:[%s28_s0] ss:$0 sm:$0xff] }
   0x2   :  { %5 = vst [vmem:[%s29_s1] sm:$0xff] %v4_v0 }
   0x3   :  { %8 = vst [vmem:[%s29_s1 + $0x8] sm:$0xff] %v4_v0 }

// kernel: tile.64
= control target key start
LH: loop header
LB: loop body
LE: loop exit
PB: predicated region body
PF: predicated region fallthrough
CT: control target
= control target key end

     0   :  { %s131_s10 = smov 120   ;;  %s132_s11 = smov 104   ;;  %vm3_vm0 = vcmask 64512   ;;  %vm9_vm1 = vcmask 1048512   ;;  %vm15_vm2 = vcmask 982912   ;;  %vm21_vm3 = vcmask 917312   ;;  %s207_s0 = inlined_call_operand.vmem [shape: f32[16,8], index: 0, kind: input, shape index: {}]   ;;  %s208_s1 = inlined_call_operand.vmem [shape: f32[1,1,128], index: 1, kind: output, shape index: {}]  }
   0x1   :  { %v101_v0 = vld [vmem:[%s207_s0 + $0xf] sm:$0x1]   ;;  %v103_v1 = vld [vmem:[%s207_s0 + $0xd] sm:$0x1]   ;;  %v105_v2 = vld [vmem:[%s207_s0 + $0xb] sm:$0x1]  }
   0x2   :  { %7 = vrot.lane.b32.xlu0 %v101_v0, %s131_s10  ;;  %19 = vrot.lane.b32.xlu1 %v103_v1, %s132_s11  ;;  %s133_s14 = smov 88   ;;  %v102_v3 = vld [vmem:[%s207_s0 + $0xe] sm:$0x1]   ;;  %v104_v4 = vld [vmem:[%s207_s0 + $0xc] sm:$0x1]   ;;  %s134_s19 = smov 112  }
   0x3   :  { %31 = vrot.lane.b32.xlu2 %v105_v2, %s133_s14  ;;  %s135_s20 = smov 96   ;;  %v106_v5 = vld [vmem:[%s207_s0 + $0xa] sm:$0x1]   ;;  %s136_s23 = smov 80   ;;  %v107_v6 = vld [vmem:[%s207_s0 + $0x9] sm:$0x1]  }
   0x4   :  { %v108_v7 = vld [vmem:[%s207_s0 + $0x8] sm:$0x1]   ;;  %s137_s28 = smov 72   ;;  %s138_s29 = smov 64   ;;  %v109_v8 = vld [vmem:[%s207_s0 + $0x7] sm:$0x1]  }
   0x5   :  { %s139_s3 = smov 56   ;;  %v110_v9 = vld [vmem:[%s207_s0 + $0x6] sm:$0x1]   ;;  %v111_v10 = vld [vmem:[%s207_s0 + $0x5] sm:$0x1]   ;;  %s140_s8 = smov 48  }
   0x6   :  { %s141_s9 = smov 40   ;;  %v112_v11 = vld [vmem:[%s207_s0 + $0x4] sm:$0x1]   ;;  %s142_s12 = smov 32   ;;  %v113_v12 = vld [vmem:[%s207_s0 + $0x3] sm:$0x1]  }
   0x7   :  { %v114_v13 = vld [vmem:[%s207_s0 + $0x2] sm:$0x1]   ;;  %s143_s17 = smov 24   ;;  %s144_s18 = smov 16   ;;  %v115_v14 = vld [vmem:[%s207_s0 + $0x1] sm:$0x1]  }
   0x8   :  { %s145_s21 = smov 8   ;;  %v2_v15 = vld [vmem:[%s207_s0] sm:$0x1]   ;;  %vm27_vm4 = vcmask 851712   ;;  %vm33_vm5 = vcmask 786112   ;;  %vm39_vm6 = vcmask 720512  }
   0x9   :  { %4 = vst.msk [vmem:[#allocation0] sm:$0x1] %vm3_vm0, %v2_v15   ;;  %vm45_vm7 = vcmask 654912   ;;  %vm51_vm8 = vcmask 589312   ;;  %vm57_vm9 = vcmask 523712   ;;  %vm63_vm10 = vcmask 458112  }
   0xa   :  { %13 = vrot.lane.b32.xlu0 %v102_v3, %s134_s19  ;;  %25 = vrot.lane.b32.xlu1 %v104_v4, %s135_s20  ;;  %vm69_vm11 = vcmask 392512   ;;  %vm75_vm12 = vcmask 326912   ;;  %vm81_vm13 = vcmask 261312   ;;  %vm87_vm14 = vcmask 195712  }
   0xb   :  { %37 = vrot.lane.b32.xlu2 %v106_v5, %s136_s23  ;;  %vm93_vm15 = vcmask 130112  }
  0x12   :  { %43 = vrot.lane.b32.xlu0 %v107_v6, %s137_s28  ;;  %49 = vrot.lane.b32.xlu1 %v108_v7, %s138_s29 }
  0x13   :  { %55 = vrot.lane.b32.xlu2 %v109_v8, %s139_s3 }
  0x1a   :  { %61 = vrot.lane.b32.xlu0 %v110_v9, %s140_s8  ;;  %67 = vrot.lane.b32.xlu1 %v111_v10, %s141_s9 }
  0x1b   :  { %73 = vrot.lane.b32.xlu2 %v112_v11, %s142_s12 }
  0x22   :  { %79 = vrot.lane.b32.xlu0 %v113_v12, %s143_s17  ;;  %85 = vrot.lane.b32.xlu1 %v114_v13, %s144_s18 }
  0x23   :  { %91 = vrot.lane.b32.xlu2 %v115_v14, %s145_s21 }
  0x5d   :  { %v32_v16 = vpop.permute.xlu2 %31  }
  0x65   :  { %v38_v17 = vpop.permute.xlu2 %37  }
  0x6d   :  { %v56_v18 = vpop.permute.xlu2 %55  }
  0x74   :  { %v8_v19 = vpop.permute.xlu0 %7   ;;  %v20_v20 = vpop.permute.xlu1 %19  }
  0x75   :  { %10 = vst.msk [vmem:[#allocation0] sm:$0x1] %vm9_vm1, %v8_v19   ;;  %v74_v21 = vpop.permute.xlu2 %73  }
  0x7c   :  { %v14_v22 = vpop.permute.xlu0 %13   ;;  %v26_v23 = vpop.permute.xlu1 %25  }
  0x7d   :  { %16 = vst.msk [vmem:[#allocation0] sm:$0x1] %vm15_vm2, %v14_v22   ;;  %v92_v24 = vpop.permute.xlu2 %91  }
  0x7e   :  { %22 = vst.msk [vmem:[#allocation0] sm:$0x1] %vm21_vm3, %v20_v20  }
  0x7f   :  { %28 = vst.msk [vmem:[#allocation0] sm:$0x1] %vm27_vm4, %v26_v23  }
  0x80   :  { %34 = vst.msk [vmem:[#allocation0] sm:$0x1] %vm33_vm5, %v32_v16  }
  0x81   :  { %40 = vst.msk [vmem:[#allocation0] sm:$0x1] %vm39_vm6, %v38_v17  }
  0x84   :  { %v44_v25 = vpop.permute.xlu0 %43   ;;  %v50_v26 = vpop.permute.xlu1 %49  }
  0x85   :  { %46 = vst.msk [vmem:[#allocation0] sm:$0x1] %vm45_vm7, %v44_v25  }
  0x86   :  { %52 = vst.msk [vmem:[#allocation0] sm:$0x1] %vm51_vm8, %v50_v26  }
  0x87   :  { %58 = vst.msk [vmem:[#allocation0] sm:$0x1] %vm57_vm9, %v56_v18  }
  0x8c   :  { %v62_v27 = vpop.permute.xlu0 %61   ;;  %v68_v28 = vpop.permute.xlu1 %67  }
  0x8d   :  { %64 = vst.msk [vmem:[#allocation0] sm:$0x1] %vm63_vm10, %v62_v27  }
  0x8e   :  { %70 = vst.msk [vmem:[#allocation0] sm:$0x1] %vm69_vm11, %v68_v28  }
  0x8f   :  { %76 = vst.msk [vmem:[#allocation0] sm:$0x1] %vm75_vm12, %v74_v21  }
  0x94   :  { %v80_v29 = vpop.permute.xlu0 %79   ;;  %v86_v30 = vpop.permute.xlu1 %85  }
  0x95   :  { %82 = vst.msk [vmem:[#allocation0] sm:$0x1] %vm81_vm13, %v80_v29  }
  0x96   :  { %88 = vst.msk [vmem:[#allocation0] sm:$0x1] %vm87_vm14, %v86_v30  }
  0x97   :  { %94 = vst.msk [vmem:[#allocation0] sm:$0x1] %vm93_vm15, %v92_v24  }
  0x9e   :  { %v97_v31 = vld [vmem:[#allocation0] sm:$0x1] }
  0x9f   :  { %100 = vst [vmem:[%s208_s1] sm:$0x1] %v97_v31 }

// kernel: refinement_layer.1
= control target key start
LH: loop header
LB: loop body
LE: loop exit
PB: predicated region body
PF: predicated region fallthrough
CT: control target
= control target key end

     0   :  { %s7282_s24 = smov 0   ;;  %s10400_s0 = inlined_call_operand.vmem [shape: f32[16,16,128], index: 0, kind: input, shape index: {}]   ;;  %s10401_s1 = inlined_call_operand.vmem [shape: bf16[7,384,128], index: 1, kind: input, shape index: {}]   ;;  %s10402_s2 = inlined_call_operand.vmem [shape: f32[7,1,128], index: 2, kind: input, shape index: {}]   ;;  %s10403_s3 = inlined_call_operand.vmem [shape: f32[4,128,8], index: 3, kind: input, shape index: {}]   ;;  %s10404_s4 = inlined_call_operand.vmem [shape: f32[4,8,8], index: 4, kind: input, shape index: {}]   ;;  %s10405_s5 = inlined_call_operand.vmem [shape: f32[8,128], index: 5, kind: input, shape index: {}]   ;;  %s10406_s6 = inlined_call_operand.vmem [shape: f32[8,128], index: 6, kind: input, shape index: {}]   ;;  %s10407_s7 = inlined_call_operand.vmem [shape: f32[16,16,128], index: 7, kind: output, shape index: {}]  }
   0x1 LB: > { %s5982_s25 = sadd.s32 4294967295, %s7240_s24   ;;  %p5986_p0 = scmp.ge.s32.totalorder %s7240_s24, 1  ;;  %s7240_s24 = sphi %s7282_s24, %s17_s24  }
   0x2   : > { %p239_p1 = scmp.lt.s32.totalorder %s7240_s24, 3 }
   0x4   : > { %p240_p2 = pnand %p5986_p0, %p239_p1 }
   0x6   : > { %243 = sbr.rel (%p240_p2) target bundleno = 4248 (0x1098), region = 48 }
   0xb   : > { %v7029_v0 = vld [vmem:[%s10401_s1 + $0x38] sm:$0xff]  ;;  %s5987_s30 = sshll.u32 %s5982_s25, 3  ;;  %v7028_v2 = vld [vmem:[%s10401_s1 + $0x30] sm:$0xff]  ;;  %v287_v4 = vlaneseq  ;;  %v7027_v5 = vld [vmem:[%s10401_s1 + $0x28] sm:$0xff]  ;;  %v10513_v20 = vmov 0  ;;  %v10516_v50 = vmov 0 }
   0xc   : > { %v7037_v1 = vld [vmem:[%s10401_s1 + $0x78] sm:$0xff]  ;;  %p274_p3 = scmp.lt.s32.totalorder %s5987_s30, 15  ;;  %1030 = vmatpush.bf16.msra.mxu0 %v7029_v0  ;;  %v7036_v3 = vld [vmem:[%s10401_s1 + $0x70] sm:$0xff]  ;;  %v7035_v7 = vld [vmem:[%s10401_s1 + $0x68] sm:$0xff] }
   0xd   : > { %1079 = vmatpush.bf16.msra.mxu1 %v7037_v1  ;;  %v7311_v6 = vld [vmem:[%s10401_s1 + $0xb8] sm:$0xff]  ;;  %v7323_v8 = vshrl.u32 %v287_v4, 7  ;;  %v7026_v11 = vld [vmem:[%s10401_s1 + $0x20] sm:$0xff]  ;;  %v7044_v22 = vld [vmem:[%s10401_s1 + $0xb0] sm:$0xff]  ;;  %v10519_v4 = vmov 0 }
   0xe   : > { %s10849_s30 = smov (!%p274_p3, %s5987_s30), 15  ;;  %7190 = vmatpush.bf16.msra.mxu2 %v7311_v6  ;;  %v7034_v12 = vld [vmem:[%s10401_s1 + $0x60] sm:$0xff]  ;;  %v7025_v17 = vld [vmem:[%s10401_s1 + $0x18] sm:$0xff]  ;;  %v7024_v23 = vld [vmem:[%s10401_s1 + $0x10] sm:$0xff] }
   0xf   : > { %s7020_s14 = sshll.u32 %s10849_s30, 4  ;;  %v308_v13 = vand.u32 15, %v7323_v8  ;;  %vm10408_vm0 = vcmp.lt.s32.totalorder %v7323_v8, 1  ;;  %v7033_v18 = vld [vmem:[%s10401_s1 + $0x58] sm:$0xff]  ;;  %v7032_v24 = vld [vmem:[%s10401_s1 + $0x50] sm:$0xff]  ;;  %v7376_v27 = vld [vmem:[%s10401_s1 + $0xa8] sm:$0xff] }
  0x10   : > { %1031 = vmatpush.bf16.msra.mxu0 %v7028_v2  ;;  %s7321_s21 = scalar_lea.vmem %s10400_s0, %s7020_s14  ;;  %v7023_v32 = vld [vmem:[%s10401_s1 + $0x8] sm:$0xff]  ;;  %v290_v34 = vadd.s32 16, %v7323_v8  ;;  %v7396_v36 = vld [vmem:[%s10401_s1 + $0xa0] sm:$0xff]  ;;  %v7041_v46 = vld [vmem:[%s10401_s1 + $0x98] sm:$0xff]  ;;  %v295_v55 = vadd.s32 56, %v7323_v8  ;;  %vm10409_vm3 = vcmp.lt.s32.totalorder %v7323_v8, 7  ;;  %s10364_s10 = scalar_lea.vmem %s10407_s7, %s7020_s14 }
  0x11   : > { %1080 = vmatpush.bf16.msra.mxu1 %v7036_v3  ;;  %v7327_v9 = vld [vmem:[%s7321_s21] sm:$0xff]  ;;  %v7330_v10 = vld [vmem:[%s7321_s21 + $0x78] sm:$0xff]  ;;  %v7340_v14 = vld [vmem:[%s7321_s21 + $0x8] sm:$0xff]  ;;  %vm7352_vm1 = vcmp.eq.s32.totalorder %v308_v13, 0 }
  0x12   : > { %v544_v15 = vrot.slane %v7327_v9, 7  ;;  %v559_v16 = vrot.slane %v7330_v10, 7  ;;  %v545_v19 = vrot.slane %v7340_v14, 7  ;;  %v10514_v20 = vsel %vm7352_vm1, 4294967295, %v10513_v20  ;;  %7191 = vmatpush.bf16.msra.mxu2 %v7044_v22  ;;  %v7031_v33 = vld [vmem:[%s10401_s1 + $0x48] sm:$0xff]  ;;  %v7390_v35 = vld [vmem:[%s7321_s21 + $0x10] sm:$0xff] }
  0x13   : > { %10515 = vst [vmem:[#allocation2_spill] sm:$0xff] %v10514_v20  ;;  %v658_v30 = vpack.c.bf16 %v7327_v9, %v7327_v9  ;;  %v659_v31 = vpack.c.bf16 %v7340_v14, %v7340_v14  ;;  %v7022_v41 = vld [vmem:[%s10401_s1] sm:$0xff]  ;;  %v322_v43 = vand.u32 15, %v290_v34  ;;  %v7405_v44 = vld [vmem:[%s7321_s21 + $0x18] sm:$0xff]  ;;  %v546_v45 = vrot.slane %v7390_v35, 7  ;;  %v7040_v54 = vld [vmem:[%s10401_s1 + $0x90] sm:$0xff] }
  0x14   : > { %1032 = vmatpush.bf16.msra.mxu0 %v7027_v5  ;;  %v576_v21 = vsel %vm10408_vm0, %v559_v16, %v544_v15  ;;  %v575_v25 = vsel %vm10408_vm0, %v544_v15, %v545_v19  ;;  %v7030_v42 = vld [vmem:[%s10401_s1 + $0x40] sm:$0xff]  ;;  %v547_v49 = vrot.slane %v7405_v44, 7  ;;  %v7430_v56 = vld [vmem:[%s7321_s21 + $0x30] sm:$0xff]  ;;  %v7433_v57 = vld [vmem:[%s7321_s21 + $0x38] sm:$0xff]  ;;  %v357_v60 = vand.u32 15, %v295_v55 }
  0x15   : > { %1081 = vmatpush.bf16.msra.mxu1 %v7035_v7  ;;  %v577_v26 = vsel %vm7352_vm1, 0.0, %v576_v21  ;;  %v643_v29 = vpack.c.bf16 %v575_v25, %v575_v25  ;;  %v754_v39 = vunpack.c.l.b16 %v658_v30  ;;  %v755_v40 = vunpack.c.l.b16 %v659_v31  ;;  %v7436_v58 = vld [vmem:[%s7321_s21 + $0x40] sm:$0xff]  ;;  %v7039_v59 = vld [vmem:[%s10401_s1 + $0x88] sm:$0xff] }
  0x16   : > { %v642_v28 = vpack.c.bf16 %v577_v26, %v577_v26  ;;  %7192 = vmatpush.bf16.msra.mxu2 %v7376_v27  ;;  %vm7413_vm2 = vcmp.eq.s32.totalorder %v322_v43, 0  ;;  %v574_v51 = vsel %vm10408_vm0, %v545_v19, %v546_v45  ;;  %v573_v52 = vsel %vm10408_vm0, %v546_v45, %v547_v49  ;;  %v7462_v13 = vld [vmem:[%s7321_s21 + $0x20] sm:$0xff]  ;;  %v7469_v26 = vld [vmem:[%s7321_s21 + $0x28] sm:$0xff] }
  0x17   : > { %v707_v38 = vunpack.c.l.b16 %v643_v29  ;;  %v770_v48 = vpack.c.b16 %v755_v40, %v754_v39  ;;  %v10517_v50 = vsel %vm7413_vm2, 4294967295, %v10516_v50  ;;  %v579_v53 = vsel %vm7413_vm2, 0.0, %v574_v51  ;;  %v7038_v15 = vld [vmem:[%s10401_s1 + $0x80] sm:$0xff]  ;;  %v7489_v39 = vld [vmem:[%s7321_s21 + $0x50] sm:$0xff] }
  0x18   : > { %1033 = vmatpush.bf16.msra.mxu0 %v7026_v11  ;;  %v706_v37 = vunpack.c.l.b16 %v642_v28  ;;  %10518 = vst [vmem:[#allocation3_spill] sm:$0xff] %v10517_v50  ;;  %v599_v61 = vrot.slane %v7430_v56, 1  ;;  %v600_v62 = vrot.slane %v7433_v57, 1  ;;  %v601_v63 = vrot.slane %v7436_v58, 1 }
  0x19   : > { %1082 = vmatpush.bf16.msra.mxu1 %v7034_v12  ;;  %v644_v0 = vpack.c.bf16 %v579_v53, %v579_v53  ;;  %v645_v1 = vpack.c.bf16 %v573_v52, %v573_v52  ;;  %v660_v2 = vpack.c.bf16 %v7390_v35, %v7390_v35  ;;  %v661_v3 = vpack.c.bf16 %v7405_v44, %v7405_v44 }
  0x1a   : > { %7193 = vmatpush.bf16.msra.mxu2 %v7396_v36  ;;  %v722_v47 = vpack.c.b16 %v707_v38, %v706_v37  ;;  %vm7448_vm4 = vcmp.eq.s32.totalorder %v357_v60, 15  ;;  %v617_v5 = vsel %vm10409_vm3, %v600_v62, %v601_v63  ;;  %v292_v7 = vadd.s32 32, %v7323_v8  ;;  %v7486_v38 = vld [vmem:[%s7321_s21 + $0x48] sm:$0xff] }
  0x1b   : > { %v10520_v4 = vsel %vm7448_vm4, 4294967295, %v10519_v4  ;;  %v633_v11 = vsel %vm7448_vm4, 0.0, %v617_v5  ;;  %v708_v21 = vunpack.c.l.b16 %v644_v0  ;;  %v548_v28 = vrot.slane %v7462_v13, 7 }
  0x1c   : > { %1034 = vmatpush.bf16.msra.mxu0 %v7025_v17  ;;  %10521 = vst [vmem:[#allocation4_spill] sm:$0xff] %v10520_v4  ;;  %v681_v17 = vpack.c.bf16 %v633_v11, %v633_v11  ;;  %v336_v25 = vand.u32 15, %v292_v7  ;;  %v297_v37 = vadd.s32 72, %v7323_v8  ;;  %v602_v40 = vrot.slane %v7486_v38, 1 }
  0x1d   : > { %1083 = vmatpush.bf16.msra.mxu1 %v7033_v18  ;;  %v709_v18 = vunpack.c.l.b16 %v645_v1  ;;  %v10525_v51 = vmov 0  ;;  %v294_v53 = vadd.s32 48, %v7323_v8  ;;  %v550_v5 = vrot.slane %v7430_v56, 7 }
  0x1e   : > { %7194 = vmatpush.bf16.msra.mxu2 %v7041_v46  ;;  %vm7474_vm5 = vcmp.eq.s32.totalorder %v336_v25, 0 }
  0x1f   : > { %v723_v30 = vpack.c.b16 %v709_v18, %v708_v21  ;;  %v7522_v21 = vld [vmem:[%s7321_s21 + $0x58] sm:$0xff] }
  0x20   : > { %1035 = vmatpush.bf16.msra.mxu0 %v7024_v23  ;;  %v757_v23 = vunpack.c.l.b16 %v661_v3  ;;  %v350_v3 = vand.u32 15, %v294_v53 }
  0x21   : > { %1084 = vmatpush.bf16.msra.mxu1 %v7032_v24  ;;  %v809_v24 = vunpack.c.l.b16 %v681_v17  ;;  %v10528_v17 = vmov 0 }
  0x22   : > { %7195 = vmatpush.bf16.msra.mxu2 %v7040_v54  ;;  %vm7510_vm7 = vcmp.eq.s32.totalorder %v350_v3, 0  ;;  %v7561_v3 = vld [vmem:[%s7321_s21 + $0x70] sm:$0xff] }
  0x23   : > { %v10529_v17 = vsel %vm7510_vm7, 4294967295, %v10528_v17 }
  0x24   : > { %1036 = vmatpush.bf16.msra.mxu0 %v7023_v32  ;;  %v10522_v32 = vmov 0  ;;  %10530 = vst [vmem:[#allocation7_spill] sm:$0xff] %v10529_v17 }
  0x25   : > { %1085 = vmatpush.bf16.msra.mxu1 %v7031_v33  ;;  %v10523_v32 = vsel %vm7474_vm5, 4294967295, %v10522_v32  ;;  %v572_v33 = vsel %vm10408_vm0, %v547_v49, %v548_v28  ;;  %v663_v49 = vpack.c.bf16 %v7469_v26, %v7469_v26 }
  0x26   : > { %7196 = vmatpush.bf16.msra.mxu2 %v7039_v59  ;;  %10524 = vst [vmem:[#allocation5_spill] sm:$0xff] %v10523_v32 }
  0x27   : > { %v759_v1 = vunpack.c.l.b16 %v663_v49  ;;  %v552_v49 = vrot.slane %v7436_v58, 7 }
  0x28   : > { %1037 = vmatpush.bf16.msra.mxu0 %v7022_v41  ;;  %v603_v41 = vrot.slane %v7489_v39, 1 }
  0x29   : > { %1086 = vmatpush.bf16.msra.mxu1 %v7030_v42  ;;  %v371_v42 = vand.u32 15, %v297_v37  ;;  %v296_v37 = vadd.s32 64, %v7323_v8 }
  0x2a   : > { %7197 = vmatpush.bf16.msra.mxu2 %v7038_v15 }
  0x2b   : > { %1038 = vmatmul.bf16.vlgmr.msra.gmra.mxu0 %v722_v47  ;;  %v616_v47 = vsel %vm10409_vm3, %v601_v63, %v602_v40  ;;  %vm7501_vm6 = vcmp.eq.s32.totalorder %v371_v42, 15 }
  0x2c   : > { %1128 = vmatpush.bf16.msrb.mxu0 %v7311_v6  ;;  %1087 = vmatmul.bf16.vlgmr.msra.gmra.mxu1 %v770_v48  ;;  %v618_v6 = vsel %vm10409_vm3, %v599_v61, %v600_v62  ;;  %v662_v48 = vpack.c.bf16 %v7462_v13, %v7462_v13  ;;  %v10526_v51 = vsel %vm7501_vm6, 4294967295, %v10525_v51  ;;  %v682_v52 = vpack.c.bf16 %v616_v47, %v616_v47 }
  0x2d   : > { %v680_v12 = vpack.c.bf16 %v618_v6, %v618_v6  ;;  %10527 = vst [vmem:[#allocation6_spill] sm:$0xff] %v10526_v51 }
  0x2e   : > { %v810_v60 = vunpack.c.l.b16 %v682_v52  ;;  %v758_v0 = vunpack.c.l.b16 %v662_v48 }
  0x2f   : > { %v808_v19 = vunpack.c.l.b16 %v680_v12  ;;  %v551_v12 = vrot.slane %v7433_v57, 7 }
  0x30   : > { %1129 = vmatpush.bf16.msrb.mxu0 %v7044_v22  ;;  %v756_v22 = vunpack.c.l.b16 %v660_v2  ;;  %v772_v11 = vpack.c.b16 %v759_v1, %v758_v0  ;;  %v301_v1 = vadd.s32 104, %v7323_v8 }
  0x31   : > { %v821_v29 = vpack.c.b16 %v809_v24, %v808_v19  ;;  %v569_v18 = vsel %vm10408_vm0, %v550_v5, %v551_v12  ;;  %v299_v19 = vadd.s32 88, %v7323_v8 }
  0x32   : > { %v771_v31 = vpack.c.b16 %v757_v23, %v756_v22  ;;  %v7525_v22 = vld [vmem:[%s7321_s21 + $0x60] sm:$0xff]  ;;  %v604_v23 = vrot.slane %v7522_v21, 1 }
  0x33   : > { %1151 = vmatmul.bf16.vlgmr.msra.gmra.mxu2 %v821_v29  ;;  %v605_v24 = vrot.slane %v7525_v22, 1  ;;  %v385_v25 = vand.u32 15, %v299_v19  ;;  %v649_v29 = vpack.c.bf16 %v569_v18, %v569_v18  ;;  %v667_v19 = vpack.c.bf16 %v7486_v38, %v7486_v38 }
  0x34   : > { %1130 = vmatpush.bf16.msrb.mxu0 %v7376_v27  ;;  %v549_v27 = vrot.slane %v7469_v26, 7 }
  0x35   : > { %vm7537_vm8 = vcmp.eq.s32.totalorder %v385_v25, 15 }
  0x36   : > { %v571_v34 = vsel %vm10408_vm0, %v548_v28, %v549_v27 }
  0x37   : > { %v647_v45 = vpack.c.bf16 %v571_v34, %v571_v34  ;;  %v10531_v34 = vmov 0 }
  0x38   : > { %1131 = vmatpush.bf16.msrb.mxu0 %v7396_v36  ;;  %v581_v36 = vsel %vm7474_vm5, 0.0, %v572_v33  ;;  %v665_v33 = vpack.c.bf16 %v7433_v57, %v7433_v57  ;;  %v10532_v34 = vsel %vm7537_vm8, 4294967295, %v10531_v34  ;;  %v364_v57 = vand.u32 15, %v296_v37 }
  0x39   : > { %v646_v43 = vpack.c.bf16 %v581_v36, %v581_v36  ;;  %v711_v62 = vunpack.c.l.b16 %v647_v45  ;;  %10533 = vst [vmem:[#allocation8_spill] sm:$0xff] %v10532_v34  ;;  %v713_v45 = vunpack.c.l.b16 %v649_v29  ;;  %v298_v29 = vadd.s32 80, %v7323_v8 }
  0x3a   : > { %v761_v47 = vunpack.c.l.b16 %v665_v33  ;;  %vm7546_vm9 = vcmp.eq.s32.totalorder %v364_v57, 0  ;;  %v593_v57 = vrot.slane %v7327_v9, 1  ;;  %v596_v9 = vrot.slane %v7405_v44, 1 }
  0x3b   : > { %1043 = vmatmul.bf16.gmra.mxu0 %v723_v30  ;;  %v710_v63 = vunpack.c.l.b16 %v646_v43  ;;  %v613_v30 = vsel %vm10409_vm3, %v604_v23, %v605_v24  ;;  %v378_v37 = vand.u32 15, %v298_v29  ;;  %v556_v29 = vrot.slane %v7525_v22, 7 }
  0x3c   : > { %1132 = vmatpush.bf16.msrb.mxu0 %v7041_v46  ;;  %1092 = vmatmul.bf16.gmra.mxu1 %v771_v31  ;;  %v615_v46 = vsel %vm10409_vm3, %v602_v40, %v603_v41  ;;  %v614_v31 = vsel %vm10409_vm3, %v603_v41, %v604_v23  ;;  %v637_v40 = vsel %vm7537_vm8, 0.0, %v613_v30  ;;  %v10537_v23 = vmov 0 }
  0x3d   : > { %v724_v7 = vpack.c.b16 %v711_v62, %v710_v63  ;;  %v684_v36 = vpack.c.bf16 %v614_v31, %v614_v31  ;;  %v685_v42 = vpack.c.bf16 %v637_v40, %v637_v40  ;;  %v568_v62 = vsel %vm10408_vm0, %v551_v12, %v552_v49 }
  0x3e   : > { %v585_v0 = vsel %vm7546_vm9, 0.0, %v568_v62  ;;  %vm7582_vm11 = vcmp.eq.s32.totalorder %v378_v37, 0 }
  0x3f   : > { %v812_v43 = vunpack.c.l.b16 %v684_v36  ;;  %v813_v48 = vunpack.c.l.b16 %v685_v42  ;;  %v763_v36 = vunpack.c.l.b16 %v667_v19 }
  0x40   : > { %1133 = vmatpush.bf16.msrb.mxu0 %v7040_v54  ;;  %v635_v54 = vsel %vm7501_vm6, 0.0, %v615_v46 }
  0x41   : > { %v683_v55 = vpack.c.bf16 %v635_v54, %v635_v54  ;;  %v823_v52 = vpack.c.b16 %v813_v48, %v812_v43  ;;  %v303_v48 = vadd.s32 120, %v7323_v8 }
  0x43   : > { %v811_v2 = vunpack.c.l.b16 %v683_v55  ;;  %v553_v55 = vrot.slane %v7486_v38, 7  ;;  %v554_v38 = vrot.slane %v7489_v39, 7 }
  0x44   : > { %1134 = vmatpush.bf16.msrb.mxu0 %v7039_v59  ;;  %v570_v59 = vsel %vm10408_vm0, %v549_v27, %v550_v5  ;;  %v664_v27 = vpack.c.bf16 %v7430_v56, %v7430_v56 }
  0x45   : > { %v822_v6 = vpack.c.b16 %v811_v2, %v810_v60  ;;  %v10534_v60 = vmov 0  ;;  %v567_v63 = vsel %vm10408_vm0, %v552_v49, %v553_v55  ;;  %v7558_v2 = vld [vmem:[%s7321_s21 + $0x68] sm:$0xff]  ;;  %v608_v49 = vrot.slane %v7330_v10, 1 }
  0x46   : > { %v760_v46 = vunpack.c.l.b16 %v664_v27  ;;  %v10535_v60 = vsel %vm7546_vm9, 4294967295, %v10534_v60  ;;  %v606_v5 = vrot.slane %v7558_v2, 1  ;;  %v651_v12 = vpack.c.bf16 %v567_v63, %v567_v63 }
  0x47   : > { %1156 = vmatmul.bf16.gmra.mxu2 %v822_v6  ;;  %10536 = vst [vmem:[#allocation9_spill] sm:$0xff] %v10535_v60  ;;  %v607_v6 = vrot.slane %v7561_v3, 1 }
  0x48   : > { %1135 = vmatpush.bf16.msrb.mxu0 %v7038_v15  ;;  %v583_v15 = vsel %vm7510_vm7, 0.0, %v570_v59  ;;  %v773_v54 = vpack.c.b16 %v761_v47, %v760_v46  ;;  %v612_v18 = vsel %vm10409_vm3, %v605_v24, %v606_v5  ;;  %v715_v27 = vunpack.c.l.b16 %v651_v12 }
  0x49   : > { %v648_v28 = vpack.c.bf16 %v583_v15, %v583_v15  ;;  %v611_v59 = vsel %vm10409_vm3, %v606_v5, %v607_v6  ;;  %v666_v15 = vpack.c.bf16 %v7436_v58, %v7436_v58  ;;  %v686_v25 = vpack.c.bf16 %v612_v18, %v612_v18 }
  0x4a   : > { %v566_v46 = vsel %vm10408_vm0, %v553_v55, %v554_v38  ;;  %v625_v55 = vsel %vm10409_vm3, %v608_v49, %v593_v57  ;;  %v669_v5 = vpack.c.bf16 %v7522_v21, %v7522_v21 }
  0x4b   : > { %1048 = vmatmul.bf16.gmra.mxu0 %v724_v7  ;;  %v712_v41 = vunpack.c.l.b16 %v648_v28  ;;  %v399_v7 = vand.u32 15, %v301_v1  ;;  %v814_v31 = vunpack.c.l.b16 %v686_v25  ;;  %v762_v33 = vunpack.c.l.b16 %v666_v15 }
  0x4c   : > { %1097 = vmatmul.bf16.gmra.mxu1 %v772_v11  ;;  %v650_v11 = vpack.c.bf16 %v585_v0, %v585_v0  ;;  %v668_v1 = vpack.c.bf16 %v7489_v39, %v7489_v39  ;;  %v765_v25 = vunpack.c.l.b16 %v669_v5  ;;  %v673_v5 = vpack.c.bf16 %v7330_v10, %v7330_v10 }
  0x4d   : > { %v725_v53 = vpack.c.b16 %v713_v45, %v712_v41  ;;  %vm7573_vm10 = vcmp.eq.s32.totalorder %v399_v7, 15  ;;  %v774_v43 = vpack.c.b16 %v763_v36, %v762_v33  ;;  %v555_v45 = vrot.slane %v7522_v21, 7 }
  0x4e   : > { %v10538_v23 = vsel %vm7573_vm10, 4294967295, %v10537_v23  ;;  %v639_v28 = vsel %vm7573_vm10, 0.0, %v611_v59  ;;  %v714_v24 = vunpack.c.l.b16 %v650_v11  ;;  %v10540_v41 = vmov 0 }
  0x4f   : > { %10539 = vst [vmem:[#allocation10_spill] sm:$0xff] %v10538_v23  ;;  %v687_v30 = vpack.c.bf16 %v639_v28, %v639_v28  ;;  %v10541_v41 = vsel %vm7582_vm11, 4294967295, %v10540_v41  ;;  %v565_v47 = vsel %vm10408_vm0, %v554_v38, %v555_v45  ;;  %v10543_v7 = vmov 0 }
  0x50   : > { %v726_v42 = vpack.c.b16 %v715_v27, %v714_v24  ;;  %10542 = vst [vmem:[#allocation11_spill] sm:$0xff] %v10541_v41  ;;  %v653_v62 = vpack.c.bf16 %v565_v47, %v565_v47  ;;  %v300_v11 = vadd.s32 96, %v7323_v8  ;;  %v764_v19 = vunpack.c.l.b16 %v668_v1 }
  0x51   : > { %v815_v58 = vunpack.c.l.b16 %v687_v30  ;;  %v557_v27 = vrot.slane %v7558_v2, 7  ;;  %v10546_v24 = vmov 0  ;;  %v564_v33 = vsel %vm10408_vm0, %v555_v45, %v556_v29 }
  0x52   : > { %v717_v18 = vunpack.c.l.b16 %v653_v62  ;;  %v392_v39 = vand.u32 15, %v300_v11  ;;  %v672_v1 = vpack.c.bf16 %v7561_v3, %v7561_v3 }
  0x53   : > { %v824_v40 = vpack.c.b16 %v815_v58, %v814_v31  ;;  %v775_v31 = vpack.c.b16 %v765_v25, %v764_v19  ;;  %v563_v36 = vsel %vm10408_vm0, %v556_v29, %v557_v27  ;;  %v595_v19 = vrot.slane %v7390_v35, 1 }
  0x54   : > { %vm7614_vm13 = vcmp.eq.s32.totalorder %v392_v39, 0  ;;  %v655_v38 = vpack.c.bf16 %v563_v36, %v563_v36  ;;  %v10552_v39 = vmov 0  ;;  %v597_v36 = vrot.slane %v7462_v13, 1 }
  0x55   : > { %v10547_v24 = vsel %vm7614_vm13, 4294967295, %v10546_v24  ;;  %v589_v58 = vsel %vm7614_vm13, 0.0, %v564_v33  ;;  %v622_v44 = vsel %vm10409_vm3, %v595_v19, %v596_v9 }
  0x56   : > { %10548 = vst [vmem:[#allocation13_spill] sm:$0xff] %v10547_v24  ;;  %v654_v37 = vpack.c.bf16 %v589_v58, %v589_v58  ;;  %v719_v45 = vunpack.c.l.b16 %v655_v38 }
  0x57   : > { %1161 = vmatmul.bf16.gmra.mxu2 %v823_v52  ;;  %v587_v52 = vsel %vm7582_vm11, 0.0, %v566_v46 }
  0x58   : > { %v652_v0 = vpack.c.bf16 %v587_v52, %v587_v52  ;;  %v718_v46 = vunpack.c.l.b16 %v654_v37  ;;  %v558_v52 = vrot.slane %v7561_v3, 7 }
  0x5a   : > { %v716_v15 = vunpack.c.l.b16 %v652_v0 }
  0x5b   : > { %1053 = vmatmul.bf16.gmra.mxu0 %v725_v53  ;;  %v413_v53 = vand.u32 15, %v303_v48 }
  0x5c   : > { %1102 = vmatmul.bf16.gmra.mxu1 %v773_v54  ;;  %v610_v54 = vsel %vm10409_vm3, %v607_v6, %v608_v49  ;;  %v727_v30 = vpack.c.b16 %v717_v18, %v716_v15  ;;  %v769_v18 = vunpack.c.l.b16 %v673_v5 }
  0x5d   : > { %v688_v63 = vpack.c.bf16 %v610_v54, %v610_v54  ;;  %vm7605_vm12 = vcmp.eq.s32.totalorder %v413_v53, 15  ;;  %v728_v53 = vpack.c.b16 %v719_v45, %v718_v46  ;;  %v676_v46 = vpack.c.bf16 %v622_v44, %v622_v44 }
  0x5e   : > { %v10544_v7 = vsel %vm7605_vm12, 4294967295, %v10543_v7  ;;  %v641_v6 = vsel %vm7605_vm12, 0.0, %v625_v55  ;;  %v10549_v55 = vmov 0  ;;  %vm10561_vm12 = vcmp.lt.s32.totalorder %v7323_v8, 7 }
  0x5f   : > { %10545 = vst [vmem:[#allocation12_spill] sm:$0xff] %v10544_v7  ;;  %v689_v12 = vpack.c.bf16 %v641_v6, %v641_v6  ;;  %v816_v59 = vunpack.c.l.b16 %v688_v63  ;;  %v289_v6 = vadd.s32 8, %v7323_v8 }
  0x61   : > { %v817_v28 = vunpack.c.l.b16 %v689_v12  ;;  %v315_v15 = vand.u32 15, %v289_v6 }
  0x63   : > { %v825_v21 = vpack.c.b16 %v817_v28, %v816_v59  ;;  %v768_v59 = vunpack.c.l.b16 %v672_v1  ;;  %vm7649_vm15 = vcmp.eq.s32.totalorder %v315_v15, 15  ;;  %v10558_v1 = vmov 0 }
  0x64   : > { %v10553_v39 = vsel %vm7649_vm15, 4294967295, %v10552_v39 }
  0x65   : > { %v777_v28 = vpack.c.b16 %v769_v18, %v768_v59  ;;  %10554 = vst [vmem:[#allocation15_spill] sm:$0xff] %v10553_v39 }
  0x67   : > { %1166 = vmatmul.bf16.gmra.mxu2 %v824_v40  ;;  %v670_v40 = vpack.c.bf16 %v7525_v22, %v7525_v22  ;;  %v562_v22 = vsel %vm10408_vm0, %v557_v27, %v558_v52  ;;  %v7665_v27 = vld [vmem:[%s10402_s2] ss:$0 sm:$0xff] }
  0x69   : > { %v766_v47 = vunpack.c.l.b16 %v670_v40  ;;  %v10555_v40 = vmov 0 }
  0x6b   : > { %1058 = vmatmul.bf16.gmra.mxu0 %v726_v42  ;;  %v671_v42 = vpack.c.bf16 %v7558_v2, %v7558_v2  ;;  %v561_v2 = vsel %vm10408_vm0, %v558_v52, %v559_v16  ;;  %v594_v16 = vrot.slane %v7340_v14, 1  ;;  %v804_v52 = vunpack.c.l.b16 %v676_v46 }
  0x6c   : > { %1107 = vmatmul.bf16.gmra.mxu1 %v774_v43  ;;  %v302_v43 = vadd.s32 112, %v7323_v8  ;;  %v657_v0 = vpack.c.bf16 %v561_v2, %v561_v2 }
  0x6d   : > { %v767_v48 = vunpack.c.l.b16 %v671_v42  ;;  %v623_v10 = vsel %vm10409_vm3, %v594_v16, %v595_v19  ;;  %v624_v3 = vsel %vm10409_vm3, %v593_v57, %v594_v16  ;;  %v621_v42 = vsel %vm10409_vm3, %v596_v9, %v597_v36 }
  0x6e   : > { %v406_v49 = vand.u32 15, %v302_v43  ;;  %v721_v12 = vunpack.c.l.b16 %v657_v0  ;;  %v627_v14 = vsel %vm7649_vm15, 0.0, %v623_v10  ;;  %v674_v35 = vpack.c.bf16 %v624_v3, %v624_v3 }
  0x6f   : > { %v776_v54 = vpack.c.b16 %v767_v48, %v766_v47  ;;  %v675_v29 = vpack.c.bf16 %v627_v14, %v627_v14 }
  0x70   : > { %vm7630_vm14 = vcmp.eq.s32.totalorder %v406_v49, 0  ;;  %v293_v49 = vadd.s32 40, %v7323_v8 }
  0x71   : > { %v10550_v55 = vsel %vm7630_vm14, 4294967295, %v10549_v55  ;;  %v591_v62 = vsel %vm7630_vm14, 0.0, %v562_v22  ;;  %v598_v22 = vrot.slane %v7469_v26, 1  ;;  %vm10562_vm14 = vmmov %vm10561_vm12 }
  0x72   : > { %10551 = vst [vmem:[#allocation14_spill] sm:$0xff] %v10550_v55  ;;  %v656_v63 = vpack.c.bf16 %v591_v62, %v591_v62 }
  0x73   : > { %v619_v5 = vsel %vm10561_vm12, %v598_v22, %v599_v61  ;;  %v620_v26 = vsel %vm10562_vm14, %v597_v36, %v598_v22 }
  0x74   : > { %v720_v11 = vunpack.c.l.b16 %v656_v63 }
  0x76   : > { %v729_v25 = vpack.c.b16 %v721_v12, %v720_v11  ;;  %v678_v12 = vpack.c.bf16 %v620_v26, %v620_v26 }
  0x77   : > { %1171 = vmatmul.bf16.gmra.mxu2 %v825_v21  ;;  %v291_v21 = vadd.s32 24, %v7323_v8 }
  0x78   : > { %v806_v16 = vunpack.c.l.b16 %v678_v12 }
  0x79   : > { %v329_v33 = vand.u32 15, %v291_v21 }
  0x7b   : > { %1063 = vmatmul.bf16.gmra.mxu0 %v727_v30  ;;  %v802_v30 = vunpack.c.l.b16 %v674_v35  ;;  %vm7670_vm0 = vcmp.eq.s32.totalorder %v329_v33, 15 }
  0x7c   : > { %1112 = vmatmul.bf16.gmra.mxu1 %v775_v31  ;;  %v803_v31 = vunpack.c.l.b16 %v675_v29  ;;  %v10556_v40 = vsel %vm7670_vm0, 4294967295, %v10555_v40  ;;  %v629_v13 = vsel %vm7670_vm0, 0.0, %v621_v42 }
  0x7d   : > { %10557 = vst [vmem:[#allocation16_spill] sm:$0xff] %v10556_v40  ;;  %v677_v45 = vpack.c.bf16 %v629_v13, %v629_v13 }
  0x7e   : > { %v818_v57 = vpack.c.b16 %v803_v31, %v802_v30 }
  0x8b   : > { %1068 = vmatmul.bf16.gmra.mxu0 %v728_v53  ;;  %v805_v53 = vunpack.c.l.b16 %v677_v45 }
  0x8c   : > { %1117 = vmatmul.bf16.gmra.mxu1 %v776_v54  ;;  %v343_v54 = vand.u32 15, %v293_v49 }
  0x8d   : > { %v819_v2 = vpack.c.b16 %v805_v53, %v804_v52 }
  0x8e   : > { %vm7689_vm3 = vcmp.eq.s32.totalorder %v343_v54, 15 }
  0x8f   : > { %v10559_v1 = vsel %vm7689_vm3, 4294967295, %v10558_v1  ;;  %v631_v11 = vsel %vm7689_vm3, 0.0, %v619_v5 }
  0x90   : > { %10560 = vst [vmem:[#allocation17_spill] sm:$0xff] %v10559_v1  ;;  %v679_v59 = vpack.c.bf16 %v631_v11, %v631_v11 }
  0x92   : > { %v807_v56 = vunpack.c.l.b16 %v679_v59 }
  0x94   : > { %v820_v19 = vpack.c.b16 %v807_v56, %v806_v16 }
  0x9b   : > { %1073 = vmatmul.bf16.gmra.mxu0 %v729_v25 }
  0x9c   : > { %1122 = vmatmul.bf16.gmra.mxu1 %v777_v28 }
  0xa8   : > { %v1039_v58 = vpop.f32.mrf.mxu0 }
  0xa9   : > { %v1088_v37 = vpop.f32.mrf.mxu1  ;;  %v1040_v38 = vadd.f32 %v7665_v27, %v1039_v58 }
  0xab   : > { %v7676_v43 = vadd.f32 %v1088_v37, %v1040_v38  ;;  %1136 = vmatmul.bf16.vlgmr.msrb.gmra.mxu0 %v818_v57 }
  0xb0   : > { %v7682_v47 = vpop.f32.mrf.mxu0 }
  0xb1   : > { %v7684_v48 = vpop.f32.mrf.mxu1 }
  0xb6   : > { %v1152_v25 = vpop.f32.mrf.mxu2 }
  0xb8   : > { %v1044_v62 = vpop.f32.mrf.mxu0 }
  0xb9   : > { %v1093_v63 = vpop.f32.mrf.mxu1  ;;  %v1045_v0 = vadd.f32 %v7665_v27, %v1044_v62 }
  0xbb   : > { %v7697_v6 = vadd.f32 %v1093_v63, %v1045_v0  ;;  %1141 = vmatmul.bf16.gmra.mxu0 %v819_v2 }
  0xbe   : > { %v7714_v29 = vpop.f32.mrf.mxu2 }
  0xc0   : > { %v7703_v18 = vpop.f32.mrf.mxu0 }
  0xc1   : > { %v7705_v15 = vpop.f32.mrf.mxu1 }
  0xc8   : > { %v1049_v61 = vpop.f32.mrf.mxu0 }
  0xc9   : > { %v1098_v28 = vpop.f32.mrf.mxu1  ;;  %v1050_v10 = vadd.f32 %v7665_v27, %v1049_v61 }
  0xca   : > { %v7717_v9 = vpop.f32.mrf.mxu2 }
  0xcb   : > { %v7708_v3 = vadd.f32 %v1098_v28, %v1050_v10  ;;  %1146 = vmatmul.bf16.gmra.mxu0 %v820_v19 }
  0xd0   : > { %v7710_v14 = vpop.f32.mrf.mxu0 }
  0xd1   : > { %v7712_v35 = vpop.f32.mrf.mxu1 }
  0xd2   : > { %v1159_v37 = vpop.f32.mrf.mxu2 }
  0xd8   : > { %v1054_v21 = vpop.f32.mrf.mxu0 }
  0xd9   : > { %v1103_v30 = vpop.f32.mrf.mxu1  ;;  %v1055_v31 = vadd.f32 %v7665_v27, %v1054_v21 }
  0xda   : > { %v1162_v44 = vpop.f32.mrf.mxu2 }
  0xdb   : > { %v1104_v33 = vadd.f32 %v1103_v30, %v1055_v31 }
  0xdd   : > { %v7719_v36 = vadd.f32 %v1152_v25, %v1104_v33 }
  0xe0   : > { %v1056_v57 = vpop.f32.mrf.mxu0 }
  0xe1   : > { %v1105_v58 = vpop.f32.mrf.mxu1 }
  0xe2   : > { %v1164_v52 = vpop.f32.mrf.mxu2 }
  0xe8   : > { %v1059_v38 = vpop.f32.mrf.mxu0 }
  0xe9   : > { %v1108_v42 = vpop.f32.mrf.mxu1 }
  0xea   : > { %v1167_v22 = vpop.f32.mrf.mxu2 }
  0xf0   : > { %v1061_v13 = vpop.f32.mrf.mxu0 }
  0xf1   : > { %v1110_v46 = vpop.f32.mrf.mxu1 }
  0xf2   : > { %v1169_v63 = vpop.f32.mrf.mxu2 }
  0xf8   : > { %v1064_v45 = vpop.f32.mrf.mxu0 }
  0xf9   : > { %v1113_v49 = vpop.f32.mrf.mxu1  ;;  %v1065_v30 = vadd.f32 %v7665_v27, %v1064_v45 }
  0xfa   : > { %v1172_v26 = vpop.f32.mrf.mxu2 }
 0x100   : > { %v1066_v53 = vpop.f32.mrf.mxu0 }
 0x101   : > { %v1115_v54 = vpop.f32.mrf.mxu1  ;;  %v1067_v28 = vadd.f32 %v7665_v27, %v1066_v53 }
 0x102   : > { %v1174_v31 = vpop.f32.mrf.mxu2 }
 0x103   : > { %v1116_v23 = vadd.f32 %v1115_v54, %v1067_v28 }
 0x108   : > { %v1069_v2 = vpop.f32.mrf.mxu0 }
 0x109   : > { %v1118_v62 = vpop.f32.mrf.mxu1  ;;  %v1070_v56 = vadd.f32 %v7665_v27, %v1069_v2  ;;  %v1060_v2 = vadd.f32 %v7665_v27, %v1059_v38 }
 0x10b   : > { %v1119_v33 = vadd.f32 %v1118_v62, %v1070_v56  ;;  %v1165_v62 = vadd.f32 %v1164_v52, %v1116_v23 }
 0x110   : > { %v1071_v0 = vpop.f32.mrf.mxu0 }
 0x111   : > { %v1120_v5 = vpop.f32.mrf.mxu1  ;;  %v1072_v16 = vadd.f32 %v7665_v27, %v1071_v0 }
 0x113   : > { %v1121_v10 = vadd.f32 %v1120_v5, %v1072_v16  ;;  %v1057_v16 = vadd.f32 %v7665_v27, %v1056_v57 }
 0x115   : > { %v1170_v0 = vadd.f32 %v1169_v63, %v1121_v10  ;;  %v1106_v57 = vadd.f32 %v1105_v58, %v1057_v16 }
 0x117   : > { %vm1190_vm10 = vcmp.ge.f32.partialorder %v1170_v0, 0.0 }
 0x118   : > { %v1074_v11 = vpop.f32.mrf.mxu0 }
 0x119   : > { %v1123_v12 = vpop.f32.mrf.mxu1  ;;  %v1075_v59 = vadd.f32 %v7665_v27, %v1074_v11  ;;  %v1062_v11 = vadd.f32 %v7665_v27, %v1061_v13  ;;  %v1206_v13 = vmul.f32 0.01, %v1170_v0 }
 0x11b   : > { %v1124_v19 = vadd.f32 %v1123_v12, %v1075_v59  ;;  %v1114_v12 = vadd.f32 %v1113_v49, %v1065_v30  ;;  %v1168_v59 = vadd.f32 %v1167_v22, %v1119_v33  ;;  %v1111_v45 = vadd.f32 %v1110_v46, %v1062_v11 }
 0x11c   : > { %v7738_v63 = vsel %vm1190_vm10, %v1170_v0, %v1206_v13  ;;  %v1204_v46 = vmul.f32 0.01, %v1165_v62  ;;  %v1047_v33 = vadd.f32 %v7665_v27, %v7703_v18  ;;  %v1052_v11 = vadd.f32 %v7665_v27, %v7710_v14 }
 0x11d   : > { %v1173_v7 = vadd.f32 %v1172_v26, %v1124_v19  ;;  %v1163_v38 = vadd.f32 %v1162_v44, %v1114_v12  ;;  %v1205_v54 = vmul.f32 0.01, %v1168_v59  ;;  %vm1189_vm13 = vcmp.ge.f32.partialorder %v1168_v59, 0.0 }
 0x11e   : > { %v1160_v22 = vadd.f32 %v1159_v37, %v1111_v45  ;;  %v1042_v0 = vadd.f32 %v7665_v27, %v7682_v47  ;;  %v1101_v12 = vadd.f32 %v7712_v35, %v1052_v11 }
 0x11f   : > { %v1207_v5 = vmul.f32 0.01, %v1173_v7  ;;  %vm1191_vm14 = vcmp.ge.f32.partialorder %v1173_v7, 0.0 }
 0x120   : > { %v1076_v25 = vpop.f32.mrf.mxu0  ;;  %v1202_v58 = vmul.f32 0.01, %v1160_v22  ;;  %vm1186_vm10 = vcmp.ge.f32.partialorder %v1160_v22, 0.0  ;;  %v1091_v16 = vadd.f32 %v7684_v48, %v1042_v0  ;;  %v1285_v0 = vld [vmem:[%s10404_s4] sm:$0xff] }
 0x121   : > { %v1125_v61 = vpop.f32.mrf.mxu1  ;;  %v1077_v21 = vadd.f32 %v7665_v27, %v1076_v25  ;;  %v7735_v49 = vsel %vm1191_vm14, %v1173_v7, %v1207_v5  ;;  %vm1187_vm14 = vcmp.ge.f32.partialorder %v1163_v38, 0.0  ;;  %v1155_v7 = vadd.f32 %v7714_v29, %v1106_v57  ;;  %v1260_v57 = vld [vmem:[%s10403_s3 + $0x70] sm:$0xff] }
 0x122   : > { %v1199_v29 = vmul.f32 0.01, %v7719_v36 }
 0x123   : > { %v1126_v55 = vadd.f32 %v1125_v61, %v1077_v21  ;;  %v1200_v19 = vmul.f32 0.01, %v1155_v7  ;;  %vm1184_vm8 = vcmp.ge.f32.partialorder %v1155_v7, 0.0 }
 0x125   : > { %v1175_v24 = vadd.f32 %v1174_v31, %v1126_v55  ;;  %v1109_v55 = vadd.f32 %v1108_v42, %v1060_v2  ;;  %v1203_v42 = vmul.f32 0.01, %v1163_v38  ;;  %v7760_v10 = vsel %vm1184_vm8, %v1155_v7, %v1200_v19  ;;  %v1254_v7 = vld [vmem:[%s10403_s3 + $0x40] sm:$0xff]  ;;  %v1251_v19 = vld [vmem:[%s10403_s3 + $0x28] sm:$0xff] }
 0x126   : > { %v1096_v2 = vadd.f32 %v7705_v15, %v1047_v33  ;;  %v1246_v33 = vld [vmem:[%s10403_s3] sm:$0xff] }
 0x127   : > { %vm1192_vm12 = vcmp.ge.f32.partialorder %v1175_v24, 0.0  ;;  %v1208_v53 = vmul.f32 0.01, %v1175_v24  ;;  %v1158_v23 = vadd.f32 %v7717_v9, %v1109_v55  ;;  %v7749_v37 = vsel %vm1187_vm14, %v1163_v38, %v1203_v42  ;;  %v1256_v42 = vld [vmem:[%s10403_s3 + $0x50] sm:$0xff] }
 0x128   : > { %v7730_v25 = vpop.f32.mrf.mxu0  ;;  %v7752_v9 = vsel %vm1186_vm10, %v1160_v22, %v1202_v58  ;;  %v1259_v22 = vld [vmem:[%s10403_s3 + $0x68] sm:$0xff]  ;;  %v1253_v58 = vld [vmem:[%s10403_s3 + $0x38] sm:$0xff] }
 0x129   : > { %v7732_v26 = vsel %vm1192_vm12, %v1175_v24, %v1208_v53  ;;  %vm1188_vm12 = vcmp.ge.f32.partialorder %v1165_v62, 0.0  ;;  %v7742_v24 = vsel %vm1189_vm13, %v1168_v59, %v1205_v54  ;;  %v1201_v56 = vmul.f32 0.01, %v1158_v23  ;;  %v1261_v54 = vld [vmem:[%s10403_s3 + $0x78] sm:$0xff] }
 0x12a   : > { %1226 = vmatpush.msra.mxu3 %v7732_v26  ;;  %v7746_v52 = vsel %vm1188_vm12, %v1165_v62, %v1204_v46  ;;  %vm1185_vm13 = vcmp.ge.f32.partialorder %v1158_v23, 0.0  ;;  %vm1183_vm12 = vcmp.ge.f32.partialorder %v7719_v36, 0.0  ;;  %v1138_v47 = vadd.f32 %v7730_v25, %v7676_v43  ;;  %v1225_v43 = vld [vmem:[%s10406_s6] sm:$0xff] }
 0x12b   : > { %v7755_v61 = vsel %vm1185_vm13, %v1158_v23, %v1201_v56  ;;  %v7764_v21 = vsel %vm1183_vm12, %v7719_v36, %v1199_v29  ;;  %v1258_v46 = vld [vmem:[%s10403_s3 + $0x60] sm:$0xff]  ;;  %v1257_v23 = vld [vmem:[%s10403_s3 + $0x58] sm:$0xff]  ;;  %v1252_v56 = vld [vmem:[%s10403_s3 + $0x30] sm:$0xff] }
 0x12c   : > { %1227 = vmatpush.msra.mxu3 %v7735_v49  ;;  %v1193_v55 = vmul.f32 0.01, %v1138_v47  ;;  %v1250_v29 = vld [vmem:[%s10403_s3 + $0x20] sm:$0xff] }
 0x12e   : > { %1228 = vmatpush.msra.mxu3 %v7738_v63 }
 0x130   : > { %v1139_v44 = vpop.f32.mrf.mxu0  ;;  %1229 = vmatpush.msra.mxu3 %v7742_v24 }
 0x131   : > { %v1140_v14 = vadd.f32 %v1139_v44, %v1091_v16  ;;  %v1255_v44 = vld [vmem:[%s10403_s3 + $0x48] sm:$0xff]  ;;  %v7069_v16 = vld [vmem:[%s10401_s1 + $0x178] sm:$0xff] }
 0x132   : > { %1230 = vmatpush.msra.mxu3 %v7746_v52  ;;  %1963 = vmatpush.bf16.msrb.mxu1 %v7069_v16 }
 0x133   : > { %vm1178_vm12 = vcmp.ge.f32.partialorder %v1140_v14, 0.0 }
 0x134   : > { %1231 = vmatpush.msra.mxu3 %v7749_v37 }
 0x136   : > { %1232 = vmatpush.msra.mxu3 %v7752_v9 }
 0x138   : > { %v1142_v28 = vpop.f32.mrf.mxu0  ;;  %1233 = vmatpush.msra.mxu3 %v7755_v61 }
 0x139   : > { %v1143_v45 = vadd.f32 %v1142_v28, %v7697_v6  ;;  %v1194_v6 = vmul.f32 0.01, %v1140_v14  ;;  %v1249_v28 = vld [vmem:[%s10403_s3 + $0x18] sm:$0xff] }
 0x13a   : > { %1234 = vmatpush.msra.mxu3 %v7760_v10 }
 0x13b   : > { %vm1179_vm13 = vcmp.ge.f32.partialorder %v1143_v45, 0.0  ;;  %v7792_v38 = vsel %vm1178_vm12, %v1140_v14, %v1194_v6  ;;  %v7059_v14 = vld [vmem:[%s10401_s1 + $0x128] sm:$0xff]  ;;  %v7050_v6 = vld [vmem:[%s10401_s1 + $0xe0] sm:$0xff]  ;;  %vm10564_vm12 = vcmp.lt.s32.totalorder %v7323_v8, 7 }
 0x13c   : > { %1235 = vmatpush.msra.mxu3 %v7764_v21 }
 0x140   : > { %v1144_v30 = vpop.f32.mrf.mxu0 }
 0x141   : > { %v1145_v53 = vadd.f32 %v1144_v30, %v1096_v2  ;;  %v1248_v30 = vld [vmem:[%s10403_s3 + $0x10] sm:$0xff] }
 0x143   : > { %v1196_v27 = vmul.f32 0.01, %v1145_v53  ;;  %vm1180_vm10 = vcmp.ge.f32.partialorder %v1145_v53, 0.0 }
 0x145   : > { %v7786_v48 = vsel %vm1180_vm10, %v1145_v53, %v1196_v27  ;;  %vm10428_vm10 = vcmask 64512   ;;  %v7061_v53 = vld [vmem:[%s10401_s1 + $0x138] sm:$0xff]  ;;  %v7051_v27 = vld [vmem:[%s10401_s1 + $0xe8] sm:$0xff] }
 0x146   : > { %1914 = vmatpush.bf16.msra.mxu0 %v7061_v53 }
 0x148   : > { %v1147_v31 = vpop.f32.mrf.mxu0 }
 0x149   : > { %v1148_v36 = vadd.f32 %v1147_v31, %v7708_v3  ;;  %v1195_v3 = vmul.f32 0.01, %v1143_v45  ;;  %v1247_v31 = vld [vmem:[%s10403_s3 + $0x8] sm:$0xff] }
 0x14b   : > { %v1197_v62 = vmul.f32 0.01, %v1148_v36  ;;  %vm1181_vm14 = vcmp.ge.f32.partialorder %v1148_v36, 0.0  ;;  %v7789_v35 = vsel %vm1179_vm13, %v1143_v45, %v1195_v3  ;;  %v7060_v45 = vld [vmem:[%s10401_s1 + $0x130] sm:$0xff]  ;;  %v7058_v3 = vld [vmem:[%s10401_s1 + $0x120] sm:$0xff]  ;;  %vm10563_vm13 = vcmp.lt.s32.totalorder %v7323_v8, 1 }
 0x14c   : > { %1915 = vmatpush.bf16.msra.mxu0 %v7060_v45 }
 0x14d   : > { %v7783_v15 = vsel %vm1181_vm14, %v1148_v36, %v1197_v62  ;;  %v7068_v62 = vld [vmem:[%s10401_s1 + $0x170] sm:$0xff] }
 0x14e   : > { %1964 = vmatpush.bf16.msrb.mxu1 %v7068_v62 }
 0x150   : > { %v1149_v59 = vpop.f32.mrf.mxu0  ;;  %1916 = vmatpush.bf16.msra.mxu0 %v7059_v14 }
 0x151   : > { %v1150_v5 = vadd.f32 %v1149_v59, %v1101_v12  ;;  %v1315_v59 = vld [vmem:[%s10405_s5] sm:$0xff] }
 0x153   : > { %vm1182_vm8 = vcmp.ge.f32.partialorder %v1150_v5, 0.0  ;;  %v1198_v18 = vmul.f32 0.01, %v1150_v5 }
 0x154   : > { %1917 = vmatpush.bf16.msra.mxu0 %v7058_v3 }
 0x155   : > { %v7778_v13 = vsel %vm1182_vm8, %v1150_v5, %v1198_v18  ;;  %vm1177_vm8 = vcmp.ge.f32.partialorder %v1138_v47, 0.0  ;;  %v7053_v5 = vld [vmem:[%s10401_s1 + $0xf8] sm:$0xff]  ;;  %v7052_v18 = vld [vmem:[%s10401_s1 + $0xf0] sm:$0xff] }
 0x156   : > { %1236 = vmatpush.msra.mxu3 %v7778_v13  ;;  %v7798_v25 = vsel %vm1177_vm8, %v1138_v47, %v1193_v55  ;;  %v7067_v47 = vld [vmem:[%s10401_s1 + $0x168] sm:$0xff]  ;;  %vm10565_vm8 = vmmov %vm10563_vm13 }
 0x157   : > { %1965 = vmatpush.bf16.msrb.mxu1 %v7067_v47 }
 0x158   : > { %1237 = vmatpush.msra.mxu3 %v7783_v15 }
 0x15a   : > { %1238 = vmatpush.msra.mxu3 %v7786_v48 }
 0x15c   : > { %1239 = vmatpush.msra.mxu3 %v7789_v35 }
 0x15e   : > { %1240 = vmatpush.msra.mxu3 %v7792_v38 }
 0x160   : > { %1241 = vmatpush.msra.mxu3 %v7798_v25 }
 0x161   : > { %1242 = vmatmul.f32.vlgmr.msra.gmra.mxu3 %v1225_v43  ;;  %v7066_v43 = vld [vmem:[%s10401_s1 + $0x160] sm:$0xff] }
 0x162   : > { %1262 = vmatpush.msrb.mxu3 %v1261_v54  ;;  %1966 = vmatpush.bf16.msrb.mxu1 %v7066_v43 }
 0x164   : > { %1263 = vmatpush.msrb.mxu3 %v1260_v57 }
 0x166   : > { %1264 = vmatpush.msrb.mxu3 %v1259_v22  ;;  %v7057_v22 = vld [vmem:[%s10401_s1 + $0x118] sm:$0xff] }
 0x167   : > { %1918 = vmatpush.bf16.msra.mxu0 %v7057_v22 }
 0x168   : > { %1265 = vmatpush.msrb.mxu3 %v1258_v46 }
 0x16a   : > { %1266 = vmatpush.msrb.mxu3 %v1257_v23 }
 0x16c   : > { %1267 = vmatpush.msrb.mxu3 %v1256_v42 }
 0x16e   : > { %1268 = vmatpush.msrb.mxu3 %v1255_v44  ;;  %v7056_v44 = vld [vmem:[%s10401_s1 + $0x110] sm:$0xff] }
 0x16f   : > { %1919 = vmatpush.bf16.msra.mxu0 %v7056_v44 }
 0x170   : > { %1269 = vmatpush.msrb.mxu3 %v1254_v7  ;;  %v7049_v7 = vld [vmem:[%s10401_s1 + $0xd8] sm:$0xff] }
 0x172   : > { %1270 = vmatpush.msrb.mxu3 %v1253_v58  ;;  %v7065_v58 = vld [vmem:[%s10401_s1 + $0x158] sm:$0xff] }
 0x173   : > { %1967 = vmatpush.bf16.msrb.mxu1 %v7065_v58 }
 0x174   : > { %1271 = vmatpush.msrb.mxu3 %v1252_v56  ;;  %v7055_v56 = vld [vmem:[%s10401_s1 + $0x108] sm:$0xff] }
 0x175   : > { %1920 = vmatpush.bf16.msra.mxu0 %v7055_v56 }
 0x176   : > { %1272 = vmatpush.msrb.mxu3 %v1251_v19  ;;  %v7048_v19 = vld [vmem:[%s10401_s1 + $0xd0] sm:$0xff] }
 0x178   : > { %1273 = vmatpush.msrb.mxu3 %v1250_v29  ;;  %v7064_v29 = vld [vmem:[%s10401_s1 + $0x150] sm:$0xff] }
 0x179   : > { %1968 = vmatpush.bf16.msrb.mxu1 %v7064_v29 }
 0x17a   : > { %1274 = vmatpush.msrb.mxu3 %v1249_v28  ;;  %v7054_v28 = vld [vmem:[%s10401_s1 + $0x100] sm:$0xff] }
 0x17b   : > { %1921 = vmatpush.bf16.msra.mxu0 %v7054_v28 }
 0x17c   : > { %1275 = vmatpush.msrb.mxu3 %v1248_v30  ;;  %v7047_v30 = vld [vmem:[%s10401_s1 + $0xc8] sm:$0xff] }
 0x17e   : > { %1276 = vmatpush.msrb.mxu3 %v1247_v31  ;;  %v7063_v31 = vld [vmem:[%s10401_s1 + $0x148] sm:$0xff] }
 0x17f   : > { %1969 = vmatpush.bf16.msrb.mxu1 %v7063_v31 }
 0x180   : > { %1277 = vmatpush.msrb.mxu3 %v1246_v33  ;;  %v7046_v33 = vld [vmem:[%s10401_s1 + $0xc0] sm:$0xff] }
 0x182   : > { %1305 = vmatpush.msra.mxu3 %v1285_v0 }
 0x1e4   : > { %v1243_v11 = vpop.f32.mrf.mxu3 }
 0x1e5   : > { %1278 = vmatmul.f32.vlgmr.msrb.gmra.mxu3 %v1243_v11  ;;  %v7062_v11 = vld [vmem:[%s10401_s1 + $0x140] sm:$0xff] }
 0x1e6   : > { %1334 = vmatpush.msrb.mxu3 %v1315_v59  ;;  %1970 = vmatpush.bf16.msrb.mxu1 %v7062_v11 }
 0x268   : > { %v1279_v2 = vpop.f32.mrf.mxu3 }
 0x269   : > { %vm1282_vm14 = vcmp.ge.f32.partialorder %v1279_v2, 0.0  ;;  %v1283_v12 = vmul.f32 0.01, %v1279_v2 }
 0x26b   : > { %v1284_v36 = vsel %vm1282_vm14, %v1279_v2, %v1283_v12  ;;  %vm10566_vm14 = vmmov %vm10564_vm12 }
 0x26c   : > { %6089 = vmatmul.msk.f32.vlgmr.msra.gmra.mxu3 %vm10428_vm10, %v1284_v36 }
 0x26d   : > { %1865 = vmatpush.bf16.msra.mxu3 %v7053_v5 }
 0x271   : > { %1866 = vmatpush.bf16.msra.mxu3 %v7052_v18 }
 0x275   : > { %1867 = vmatpush.bf16.msra.mxu3 %v7051_v27 }
 0x279   : > { %1868 = vmatpush.bf16.msra.mxu3 %v7050_v6 }
 0x27d   : > { %1869 = vmatpush.bf16.msra.mxu3 %v7049_v7 }
 0x281   : > { %1870 = vmatpush.bf16.msra.mxu3 %v7048_v19 }
 0x285   : > { %1871 = vmatpush.bf16.msra.mxu3 %v7047_v30 }
 0x289   : > { %1872 = vmatpush.bf16.msra.mxu3 %v7046_v33 }
 0x2ef   : > { %v1307_v55 = vpop.f32.mrf.mxu3 }
 0x2f0   : > { %v1310_v54 = vsub.f32 0.0, %v1307_v55 }
 0x2f2   : > { %v1311_v57 = vmul.f32 1.442695, %v1310_v54 }
 0x2f4   : > { %7213 = vpow2.f32 %v1311_v57 }
 0x2fa   : > { %v7214_v46 = vpop.eup %7213 }
 0x2fb   : > { %v1313_v23 = vadd.f32 1.0, %v7214_v46 }
 0x2fd   : > { %7215 = vrcp.f32 %v1313_v23 }
 0x303   : > { %v7216_v42 = vpop.eup %7215 }
 0x304   : > { %6090 = vmatmul.msk.f32.vlgmr.msrb.gmra.mxu3 %vm10428_vm10, %v7216_v42  ;;  %vm10586_vm10 = vnez %v10532_v34 }
 0x387   : > { %v7929_v0 = vpop.f32.mrf.mxu3 }
 0x388   : > { %v1346_v2 = vrot.slane %v7929_v0, 7  ;;  %v1347_v12 = vperm.slane %v7929_v0, 0  ;;  %v1340_v36 = vrot.slane %v7929_v0, 1  ;;  %v1341_v45 = vrot.slane %v7929_v0, 2 }
 0x38a   : > { %v7934_v59 = vperm.slane %v1346_v2, 0  ;;  %v7937_v53 = vmul.f32 %v1347_v12, %v7798_v25  ;;  %v7940_v5 = vmul.f32 %v1347_v12, %v7792_v38  ;;  %v1348_v16 = vperm.slane %v1340_v36, 0 }
 0x38b   : > { %v1349_v23 = vperm.slane %v1341_v45, 0 }
 0x38c   : > { %v1491_v18 = vpack.c.bf16 %v7937_v53, %v7937_v53  ;;  %v1492_v62 = vpack.c.bf16 %v7940_v5, %v7940_v5  ;;  %v7949_v14 = vmul.f32 %v7934_v59, %v7732_v26  ;;  %v1379_v27 = vrot.slane %v7937_v53, 7 }
 0x38d   : > { %v1380_v25 = vrot.slane %v7940_v5, 7  ;;  %v7954_v38 = vmul.f32 %v1348_v16, %v7789_v35  ;;  %v1427_v47 = vrot.slane %v7937_v53, 1  ;;  %v1428_v3 = vrot.slane %v7940_v5, 1 }
 0x38e   : > { %v1587_v6 = vunpack.c.l.b16 %v1491_v18  ;;  %v1588_v55 = vunpack.c.l.b16 %v1492_v62  ;;  %v1394_v43 = vrot.slane %v7949_v14, 7  ;;  %v7975_v58 = vmul.f32 %v1348_v16, %v7786_v48 }
 0x38f   : > { %v1409_v54 = vsel %vm10563_vm13, %v1379_v27, %v1380_v25  ;;  %v1429_v26 = vrot.slane %v7954_v38, 1  ;;  %v1457_v57 = vsel %vm10564_vm12, %v1427_v47, %v1428_v3  ;;  %v1381_v31 = vrot.slane %v7954_v38, 7  ;;  %vm10568_vm13 = vmmov %vm10565_vm8 }
 0x390   : > { %v1603_v35 = vpack.c.b16 %v1588_v55, %v1587_v6  ;;  %v1410_v22 = vsel %vm10565_vm8, %v1394_v43, %v1379_v27  ;;  %v1476_v46 = vpack.c.bf16 %v1409_v54, %v1409_v54  ;;  %v1507_v7 = vpack.c.bf16 %v1457_v57, %v1457_v57 }
 0x391   : > { %v1411_v42 = vsel %vm7352_vm1, 0.0, %v1410_v22  ;;  %v1456_v44 = vsel %vm10566_vm14, %v1428_v3, %v1429_v26  ;;  %v7981_v33 = vmul.f32 %v1349_v23, %v7783_v15  ;;  %v1430_v12 = vrot.slane %v7975_v58, 1  ;;  %vm10569_vm14 = vmmov %vm10564_vm12 }
 0x392   : > { %1922 = vmatmul.bf16.vlgmr.msra.gmra.mxu0 %v1603_v35  ;;  %v1475_v56 = vpack.c.bf16 %v1411_v42, %v1411_v42  ;;  %v1460_v19 = vsel %vm7649_vm15, 0.0, %v1456_v44  ;;  %v1540_v30 = vunpack.c.l.b16 %v1476_v46  ;;  %v1635_v11 = vunpack.c.l.b16 %v1507_v7  ;;  %vm10592_vm1 = vmmov %vm10564_vm12 }
 0x393   : > { %v1508_v29 = vpack.c.bf16 %v1460_v19, %v1460_v19  ;;  %10567 = vst [vmem:[#allocation18_spill] sm:$0xff] %v7981_v33  ;;  %v1431_v48 = vrot.slane %v7981_v33, 1  ;;  %v1382_v45 = vrot.slane %v7975_v58, 7  ;;  %v1493_v18 = vpack.c.bf16 %v7954_v38, %v7954_v38 }
 0x394   : > { %v1539_v28 = vunpack.c.l.b16 %v1475_v56  ;;  %v1494_v62 = vpack.c.bf16 %v7975_v58, %v7975_v58  ;;  %v1408_v15 = vsel %vm10568_vm13, %v1380_v25, %v1381_v31  ;;  %v1342_v3 = vrot.slane %v7929_v0, 3  ;;  %vm10572_vm13 = vmmov %vm10565_vm8 }
 0x395   : > { %v1636_v2 = vunpack.c.l.b16 %v1508_v29  ;;  %v1454_v27 = vsel %vm10564_vm12, %v1430_v12, %v1431_v48  ;;  %v1407_v6 = vsel %vm10565_vm8, %v1381_v31, %v1382_v45  ;;  %v1413_v55 = vsel %vm7413_vm2, 0.0, %v1408_v15 }
 0x396   : > { %v1555_v36 = vpack.c.b16 %v1540_v30, %v1539_v28  ;;  %v1589_v54 = vunpack.c.l.b16 %v1493_v18  ;;  %v1590_v57 = vunpack.c.l.b16 %v1494_v62  ;;  %v1455_v35 = vsel %vm10569_vm14, %v1429_v26, %v1430_v12  ;;  %vm10573_vm14 = vmmov %vm10564_vm12 }
 0x397   : > { %v1651_v16 = vpack.c.b16 %v1636_v2, %v1635_v11  ;;  %v1462_v25 = vsel %vm7670_vm0, 0.0, %v1454_v27  ;;  %v1350_v22 = vperm.slane %v1342_v3, 0  ;;  %v1477_v46 = vpack.c.bf16 %v1413_v55, %v1413_v55 }
 0x398   : > { %1873 = vmatmul.bf16.vlgmr.msra.gmra.mxu3 %v1555_v36  ;;  %v1478_v42 = vpack.c.bf16 %v1407_v6, %v1407_v6  ;;  %v1509_v44 = vpack.c.bf16 %v1455_v35, %v1455_v35  ;;  %v1510_v7 = vpack.c.bf16 %v1462_v25, %v1462_v25  ;;  %v1604_v56 = vpack.c.b16 %v1590_v57, %v1589_v54 }
 0x399   : > { %1971 = vmatmul.bf16.vlgmr.msrb.gmra.mxu1 %v1651_v16  ;;  %v8004_v19 = vmul.f32 %v1349_v23, %v7778_v13  ;;  %v8007_v29 = vmul.f32 %v1350_v22, %v7764_v21  ;;  %v1541_v28 = vunpack.c.l.b16 %v1477_v46  ;;  %v1383_v11 = vrot.slane %v7981_v33, 7 }
 0x39a   : > { %v1542_v30 = vunpack.c.l.b16 %v1478_v42  ;;  %v1637_v31 = vunpack.c.l.b16 %v1509_v44  ;;  %v1638_v26 = vunpack.c.l.b16 %v1510_v7  ;;  %v1495_v21 = vpack.c.bf16 %v7981_v33, %v7981_v33 }
 0x39b   : > { %10570 = vst [vmem:[#allocation19_spill] sm:$0xff] %v8004_v19  ;;  %v1432_v2 = vrot.slane %v8004_v19, 1  ;;  %v1433_v12 = vrot.slane %v8007_v29, 1  ;;  %v1384_v18 = vrot.slane %v8004_v19, 7  ;;  %v1496_v13 = vpack.c.bf16 %v8004_v19, %v8004_v19 }
 0x39c   : > { %10571 = vst [vmem:[#allocation20_spill] sm:$0xff] %v8007_v29  ;;  %v1556_v36 = vpack.c.b16 %v1542_v30, %v1541_v28  ;;  %v1652_v16 = vpack.c.b16 %v1638_v26, %v1637_v31  ;;  %v1406_v23 = vsel %vm10572_vm13, %v1382_v45, %v1383_v11  ;;  %v1343_v15 = vrot.slane %v7929_v0, 4  ;;  %vm10576_vm13 = vmmov %vm10565_vm8 }
 0x39d   : > { %v1452_v62 = vsel %vm10564_vm12, %v1432_v2, %v1433_v12  ;;  %v1405_v27 = vsel %vm10565_vm8, %v1383_v11, %v1384_v18  ;;  %v1415_v3 = vsel %vm7474_vm5, 0.0, %v1406_v23  ;;  %v1591_v6 = vunpack.c.l.b16 %v1495_v21 }
 0x39e   : > { %v1592_v55 = vunpack.c.l.b16 %v1496_v13  ;;  %v1453_v54 = vsel %vm10573_vm14, %v1431_v48, %v1432_v2  ;;  %v1464_v45 = vsel %vm7689_vm3, 0.0, %v1452_v62  ;;  %v1351_v57 = vperm.slane %v1343_v15, 0  ;;  %vm10577_vm14 = vmmov %vm10564_vm12 }
 0x39f   : > { %v1479_v35 = vpack.c.bf16 %v1415_v3, %v1415_v3  ;;  %v1480_v25 = vpack.c.bf16 %v1405_v27, %v1405_v27  ;;  %v1511_v46 = vpack.c.bf16 %v1453_v54, %v1453_v54  ;;  %v1512_v42 = vpack.c.bf16 %v1464_v45, %v1464_v45 }
 0x3a0   : > { %v1605_v44 = vpack.c.b16 %v1592_v55, %v1591_v6  ;;  %v8031_v7 = vmul.f32 %v1350_v22, %v7760_v10  ;;  %v1385_v26 = vrot.slane %v8007_v29, 7  ;;  %v1344_v23 = vrot.slane %v7929_v0, 5 }
 0x3a1   : > { %v1543_v28 = vunpack.c.l.b16 %v1479_v35  ;;  %v1544_v30 = vunpack.c.l.b16 %v1480_v25  ;;  %v1639_v31 = vunpack.c.l.b16 %v1511_v46  ;;  %v1640_v48 = vunpack.c.l.b16 %v1512_v42 }
 0x3a2   : > { %1927 = vmatmul.bf16.gmra.mxu0 %v1604_v56  ;;  %10574 = vst [vmem:[#allocation21_spill] sm:$0xff] %v8031_v7  ;;  %v8034_v56 = vmul.f32 %v1351_v57, %v7755_v61  ;;  %v1434_v11 = vrot.slane %v8031_v7, 1  ;;  %v1386_v21 = vrot.slane %v8031_v7, 7  ;;  %v1497_v61 = vpack.c.bf16 %v8007_v29, %v8007_v29 }
 0x3a3   : > { %v1498_v10 = vpack.c.bf16 %v8031_v7, %v8031_v7  ;;  %v1404_v22 = vsel %vm10576_vm13, %v1384_v18, %v1385_v26  ;;  %v1352_v55 = vperm.slane %v1344_v23, 0  ;;  %v8058_v42 = vmul.f32 %v1351_v57, %v7752_v9  ;;  %vm10580_vm13 = vmmov %vm10565_vm8 }
 0x3a4   : > { %10575 = vst [vmem:[#allocation22_spill] sm:$0xff] %v8034_v56  ;;  %v1435_v2 = vrot.slane %v8034_v56, 1  ;;  %v1403_v62 = vsel %vm10565_vm8, %v1385_v26, %v1386_v21  ;;  %v1417_v15 = vsel %vm7510_vm7, 0.0, %v1404_v22  ;;  %v1593_v27 = vunpack.c.l.b16 %v1497_v61 }
 0x3a5   : > { %v1594_v3 = vunpack.c.l.b16 %v1498_v10  ;;  %v1451_v6 = vsel %vm10577_vm14, %v1433_v12, %v1434_v11  ;;  %v1481_v54 = vpack.c.bf16 %v1417_v15, %v1417_v15  ;;  %v1482_v45 = vpack.c.bf16 %v1403_v62, %v1403_v62  ;;  %10578 = vst [vmem:[#allocation23_spill] sm:$0xff] %v8058_v42  ;;  %vm10581_vm14 = vmmov %vm10564_vm12 }
 0x3a6   : > { %v1450_v13 = vsel %vm10564_vm12, %v1434_v11, %v1435_v2  ;;  %v1513_v35 = vpack.c.bf16 %v1451_v6, %v1451_v6  ;;  %v1436_v26 = vrot.slane %v8058_v42, 1  ;;  %v1388_v61 = vrot.slane %v8058_v42, 7 }
 0x3a7   : > { %v1466_v18 = vsel %vm7448_vm4, 0.0, %v1450_v13  ;;  %v1606_v46 = vpack.c.b16 %v1594_v3, %v1593_v27  ;;  %v1500_v9 = vpack.c.bf16 %v8058_v42, %v8058_v42  ;;  %v1345_v22 = vrot.slane %v7929_v0, 6 }
 0x3a8   : > { %1878 = vmatmul.bf16.gmra.mxu3 %v1556_v36  ;;  %v1557_v36 = vpack.c.b16 %v1544_v30, %v1543_v28  ;;  %v1514_v25 = vpack.c.bf16 %v1466_v18, %v1466_v18  ;;  %v1545_v28 = vunpack.c.l.b16 %v1481_v54  ;;  %v1546_v30 = vunpack.c.l.b16 %v1482_v45 }
 0x3a9   : > { %1976 = vmatmul.bf16.gmra.mxu1 %v1652_v16  ;;  %v1653_v16 = vpack.c.b16 %v1640_v48, %v1639_v31  ;;  %v1641_v31 = vunpack.c.l.b16 %v1513_v35  ;;  %v1387_v48 = vrot.slane %v8034_v56, 7  ;;  %v1596_v15 = vunpack.c.l.b16 %v1500_v9 }
 0x3aa   : > { %v1642_v12 = vunpack.c.l.b16 %v1514_v25  ;;  %v1449_v27 = vsel %vm10581_vm14, %v1435_v2, %v1436_v26  ;;  %v1353_v3 = vperm.slane %v1345_v22, 0  ;;  %v8085_v35 = vmul.f32 %v1352_v55, %v7746_v52  ;;  %vm10585_vm14 = vmmov %vm10564_vm12 }
 0x3ab   : > { %v1402_v57 = vsel %vm10580_vm13, %v1386_v21, %v1387_v48  ;;  %v1401_v13 = vsel %vm10565_vm8, %v1387_v48, %v1388_v61  ;;  %v1515_v54 = vpack.c.bf16 %v1449_v27, %v1449_v27  ;;  %vm10584_vm13 = vmmov %vm10565_vm8 }
 0x3ac   : > { %v1419_v23 = vsel %vm7546_vm9, 0.0, %v1402_v57  ;;  %v1484_v18 = vpack.c.bf16 %v1401_v13, %v1401_v13  ;;  %10582 = vst [vmem:[#allocation25_spill] sm:$0xff] %v8085_v35  ;;  %v8088_v25 = vmul.f32 %v1353_v3, %v7742_v24  ;;  %v1502_v52 = vpack.c.bf16 %v8085_v35, %v8085_v35 }
 0x3ad   : > { %v1483_v6 = vpack.c.bf16 %v1419_v23, %v1419_v23 }
 0x3ae   : > { %10583 = vst [vmem:[#allocation26_spill] sm:$0xff] %v8088_v25  ;;  %v1439_v48 = vrot.slane %v8088_v25, 1  ;;  %v1598_v22 = vunpack.c.l.b16 %v1502_v52 }
 0x3b2   : > { %1932 = vmatmul.bf16.gmra.mxu0 %v1605_v44  ;;  %v8061_v44 = vmul.f32 %v1352_v55, %v7749_v37  ;;  %v1499_v37 = vpack.c.bf16 %v8034_v56, %v8034_v56 }
 0x3b4   : > { %10579 = vst [vmem:[#allocation24_spill] sm:$0xff] %v8061_v44  ;;  %v1437_v11 = vrot.slane %v8061_v44, 1  ;;  %v1595_v62 = vunpack.c.l.b16 %v1499_v37  ;;  %v1501_v24 = vpack.c.bf16 %v8061_v44, %v8061_v44 }
 0x3b6   : > { %v1448_v10 = vsel %vm10564_vm12, %v1436_v26, %v1437_v11  ;;  %v1607_v0 = vpack.c.b16 %v1596_v15, %v1595_v62 }
 0x3b7   : > { %v1468_v21 = vsel %vm7501_vm6, 0.0, %v1448_v10  ;;  %v1597_v10 = vunpack.c.l.b16 %v1501_v24 }
 0x3b8   : > { %1883 = vmatmul.bf16.gmra.mxu3 %v1557_v36  ;;  %v1558_v36 = vpack.c.b16 %v1546_v30, %v1545_v28  ;;  %v1516_v45 = vpack.c.bf16 %v1468_v21, %v1468_v21  ;;  %v1548_v28 = vunpack.c.l.b16 %v1484_v18  ;;  %v1643_v30 = vunpack.c.l.b16 %v1515_v54 }
 0x3b9   : > { %1981 = vmatmul.bf16.gmra.mxu1 %v1653_v16  ;;  %v1654_v16 = vpack.c.b16 %v1642_v12, %v1641_v31  ;;  %v1389_v31 = vrot.slane %v8061_v44, 7  ;;  %v1438_v12 = vrot.slane %v8085_v35, 1  ;;  %v1608_v21 = vpack.c.b16 %v1598_v22, %v1597_v10 }
 0x3ba   : > { %v1644_v2 = vunpack.c.l.b16 %v1516_v45  ;;  %v8115_v18 = vmul.f32 %v7934_v59, %v7735_v49  ;;  %v1503_v49 = vpack.c.bf16 %v8088_v25, %v8088_v25 }
 0x3bb   : > { %v1400_v55 = vsel %vm10584_vm13, %v1388_v61, %v1389_v31  ;;  %v1446_v37 = vsel %vm10564_vm12, %v1438_v12, %v1439_v48  ;;  %v1447_v13 = vsel %vm10585_vm14, %v1437_v11, %v1438_v12  ;;  %vm10589_vm13 = vmmov %vm10565_vm8 }
 0x3bc   : > { %v1421_v57 = vsel %vm7582_vm11, 0.0, %v1400_v55  ;;  %v1470_v23 = vsel %vm10586_vm10, 0.0, %v1446_v37  ;;  %v1517_v15 = vpack.c.bf16 %v1447_v13, %v1447_v13  ;;  %10588 = vst [vmem:[#allocation28_spill] sm:$0xff] %v8115_v18  ;;  %v1599_v52 = vunpack.c.l.b16 %v1503_v49 }
 0x3bd   : > { %v1485_v62 = vpack.c.bf16 %v1421_v57, %v1421_v57  ;;  %v1518_v27 = vpack.c.bf16 %v1470_v23, %v1470_v23  ;;  %v7085_v23 = vld [vmem:[%s10401_s1 + $0x1f8] sm:$0xff] }
 0x3be   : > { %2595 = vmatpush.bf16.msrb.mxu3 %v7085_v23  ;;  %v7083_v23 = vld [vmem:[%s10401_s1 + $0x1e8] sm:$0xff] }
 0x3bf   : > { %v1549_v54 = vunpack.c.l.b16 %v1485_v62  ;;  %v1646_v11 = vunpack.c.l.b16 %v1518_v27 }
 0x3c2   : > { %1937 = vmatmul.bf16.gmra.mxu0 %v1606_v46  ;;  %v1547_v46 = vunpack.c.l.b16 %v1483_v6  ;;  %v8111_v6 = vmul.f32 %v1353_v3, %v7738_v63 }
 0x3c4   : > { %v1559_v26 = vpack.c.b16 %v1548_v28, %v1547_v46  ;;  %10587 = vst [vmem:[#allocation27_spill] sm:$0xff] %v8111_v6  ;;  %v1391_v46 = vrot.slane %v8088_v25, 7  ;;  %v1440_v28 = vrot.slane %v8111_v6, 1  ;;  %v1392_v63 = vrot.slane %v8111_v6, 7 }
 0x3c5   : > { %v1504_v59 = vpack.c.bf16 %v8111_v6, %v8111_v6 }
 0x3c6   : > { %v1445_v37 = vsel %vm10592_vm1, %v1439_v48, %v1440_v28  ;;  %v1393_v48 = vrot.slane %v8115_v18, 7  ;;  %vm10595_vm1 = vmmov %vm10565_vm8 }
 0x3c7   : > { %v1600_v55 = vunpack.c.l.b16 %v1504_v59  ;;  %v1519_v22 = vpack.c.bf16 %v1445_v37, %v1445_v37  ;;  %v10598_v59 = vld [vmem:[#allocation14_spill] sm:$0xff] }
 0x3c8   : > { %1888 = vmatmul.bf16.gmra.mxu3 %v1558_v36  ;;  %v1655_v36 = vpack.c.b16 %v1644_v2, %v1643_v30  ;;  %v1441_v30 = vrot.slane %v8115_v18, 1 }
 0x3c9   : > { %1986 = vmatmul.bf16.gmra.mxu1 %v1654_v16  ;;  %v1390_v16 = vrot.slane %v8085_v35, 7  ;;  %v1609_v62 = vpack.c.b16 %v1600_v55, %v1599_v52  ;;  %v1647_v27 = vunpack.c.l.b16 %v1519_v22 }
 0x3ca   : > { %v1444_v12 = vsel %vm10564_vm12, %v1440_v28, %v1441_v30  ;;  %v1506_v28 = vpack.c.bf16 %v7949_v14, %v7949_v14 }
 0x3cb   : > { %v1399_v9 = vsel %vm10565_vm8, %v1389_v31, %v1390_v16  ;;  %v1398_v3 = vsel %vm10589_vm13, %v1390_v16, %v1391_v46  ;;  %vm10596_vm13 = vmmov %vm10564_vm12 }
 0x3cc   : > { %v1486_v61 = vpack.c.bf16 %v1399_v9, %v1399_v9  ;;  %v10593_v9 = vld [vmem:[#allocation10_spill] sm:$0xff]  ;;  %vm10597_vm12 = vmmov %vm10595_vm1 }
 0x3cd   : > { %vm10594_vm11 = vnez %v10593_v9  ;;  %v1395_v49 = vsel %vm10597_vm12, %v1393_v48, %v1394_v43 }
 0x3ce   : > { %v1550_v45 = vunpack.c.l.b16 %v1486_v61  ;;  %v1472_v57 = vsel %vm10594_vm11, 0.0, %v1444_v12  ;;  %v1490_v37 = vpack.c.bf16 %v1395_v49, %v1395_v49  ;;  %v8201_v49 = vld [vmem:[%s10402_s2 + $0x1] ss:$0 sm:$0xff] }
 0x3cf   : > { %v1520_v13 = vpack.c.bf16 %v1472_v57, %v1472_v57 }
 0x3d0   : > { %v1560_v2 = vpack.c.b16 %v1550_v45, %v1549_v54  ;;  %v1442_v54 = vrot.slane %v7949_v14, 1  ;;  %v1554_v22 = vunpack.c.l.b16 %v1490_v37  ;;  %v7087_v37 = vld [vmem:[%s10401_s1 + $0x208] sm:$0xff] }
 0x3d2   : > { %1942 = vmatmul.bf16.gmra.mxu0 %v1607_v0  ;;  %v1645_v0 = vunpack.c.l.b16 %v1517_v15 }
 0x3d4   : > { %v1656_v31 = vpack.c.b16 %v1646_v11, %v1645_v0  ;;  %v7084_v11 = vld [vmem:[%s10401_s1 + $0x1f0] sm:$0xff] }
 0x3d5   : > { %2596 = vmatpush.bf16.msrb.mxu3 %v7084_v11  ;;  %v7090_v11 = vld [vmem:[%s10401_s1 + $0x220] sm:$0xff] }
 0x3d8   : > { %1893 = vmatmul.bf16.gmra.mxu3 %v1559_v26  ;;  %v1397_v26 = vsel %vm10565_vm8, %v1391_v46, %v1392_v63  ;;  %v1505_v46 = vpack.c.bf16 %v8115_v18, %v8115_v18  ;;  %vm10599_vm8 = vnez %v10598_v59 }
 0x3d9   : > { %1991 = vmatmul.bf16.gmra.mxu1 %v1655_v36  ;;  %v10590_v36 = vld [vmem:[#allocation13_spill] sm:$0xff]  ;;  %v1488_v16 = vpack.c.bf16 %v1397_v26, %v1397_v26  ;;  %v1602_v26 = vunpack.c.l.b16 %v1506_v28  ;;  %2597 = vmatpush.bf16.msrb.mxu3 %v7083_v23 }
 0x3da   : > { %vm10591_vm14 = vnez %v10590_v36  ;;  %v1601_v12 = vunpack.c.l.b16 %v1505_v46 }
 0x3db   : > { %v1423_v24 = vsel %vm10591_vm14, 0.0, %v1398_v3  ;;  %v1552_v15 = vunpack.c.l.b16 %v1488_v16  ;;  %vm10600_vm14 = vmmov %vm10596_vm13 }
 0x3dc   : > { %v1487_v10 = vpack.c.bf16 %v1423_v24, %v1423_v24  ;;  %v10601_v24 = vld [vmem:[#allocation12_spill] sm:$0xff] }
 0x3de   : > { %v1551_v61 = vunpack.c.l.b16 %v1487_v10  ;;  %v1610_v10 = vpack.c.b16 %v1602_v26, %v1601_v12  ;;  %v7088_v12 = vld [vmem:[%s10401_s1 + $0x210] sm:$0xff] }
 0x3e0   : > { %v1561_v45 = vpack.c.b16 %v1552_v15, %v1551_v61  ;;  %v7082_v15 = vld [vmem:[%s10401_s1 + $0x1e0] sm:$0xff] }
 0x3e1   : > { %2598 = vmatpush.bf16.msrb.mxu3 %v7082_v15 }
 0x3e2   : > { %1947 = vmatmul.bf16.gmra.mxu0 %v1608_v21  ;;  %v1648_v21 = vunpack.c.l.b16 %v1520_v13 }
 0x3e4   : > { %v1657_v0 = vpack.c.b16 %v1648_v21, %v1647_v27  ;;  %v7081_v27 = vld [vmem:[%s10401_s1 + $0x1d8] sm:$0xff]  ;;  %v7092_v21 = vld [vmem:[%s10401_s1 + $0x230] sm:$0xff] }
 0x3e5   : > { %2599 = vmatpush.bf16.msrb.mxu3 %v7081_v27 }
 0x3e8   : > { %1898 = vmatmul.bf16.gmra.mxu3 %v1560_v2  ;;  %v1396_v2 = vsel %vm10595_vm1, %v1392_v63, %v1393_v48  ;;  %v1443_v63 = vsel %vm10600_vm14, %v1441_v30, %v1442_v54  ;;  %vm10602_vm1 = vnez %v10601_v24  ;;  %v7093_v30 = vld [vmem:[%s10401_s1 + $0x238] sm:$0xff] }
 0x3e9   : > { %1996 = vmatmul.bf16.gmra.mxu1 %v1656_v31  ;;  %v1458_v31 = vsel %vm10596_vm13, %v1442_v54, %v1427_v47  ;;  %v1425_v3 = vsel %vm10599_vm8, 0.0, %v1396_v2  ;;  %v1521_v47 = vpack.c.bf16 %v1443_v63, %v1443_v63  ;;  %2644 = vmatpush.bf16.msrb.mxu0 %v7093_v30  ;;  %v7080_v54 = vld [vmem:[%s10401_s1 + $0x1d0] sm:$0xff]  ;;  %v7078_v2 = vld [vmem:[%s10401_s1 + $0x1c0] sm:$0xff] }
 0x3ea   : > { %v1474_v52 = vsel %vm10602_vm1, 0.0, %v1458_v31  ;;  %v1489_v55 = vpack.c.bf16 %v1425_v3, %v1425_v3  ;;  %2600 = vmatpush.bf16.msrb.mxu3 %v7080_v54  ;;  %v7089_v31 = vld [vmem:[%s10401_s1 + $0x218] sm:$0xff] }
 0x3eb   : > { %v1522_v57 = vpack.c.bf16 %v1474_v52, %v1474_v52  ;;  %v1649_v43 = vunpack.c.l.b16 %v1521_v47 }
 0x3ec   : > { %v1553_v16 = vunpack.c.l.b16 %v1489_v55 }
 0x3ed   : > { %v1650_v13 = vunpack.c.l.b16 %v1522_v57  ;;  %2645 = vmatpush.bf16.msrb.mxu0 %v7092_v21 }
 0x3ef   : > { %v1658_v61 = vpack.c.b16 %v1650_v13, %v1649_v43 }
 0x3f2   : > { %1952 = vmatmul.bf16.gmra.mxu0 %v1609_v62  ;;  %v1562_v62 = vpack.c.b16 %v1554_v22, %v1553_v16  ;;  %v7086_v22 = vld [vmem:[%s10401_s1 + $0x200] sm:$0xff] }
 0x3f8   : > { %1903 = vmatmul.bf16.gmra.mxu3 %v1561_v45  ;;  %v7091_v45 = vld [vmem:[%s10401_s1 + $0x228] sm:$0xff] }
 0x3f9   : > { %2001 = vmatmul.bf16.gmra.mxu1 %v1657_v0  ;;  %2646 = vmatpush.bf16.msrb.mxu0 %v7091_v45  ;;  %v7079_v0 = vld [vmem:[%s10401_s1 + $0x1c8] sm:$0xff] }
 0x3fa   : > { %2601 = vmatpush.bf16.msrb.mxu3 %v7079_v0 }
 0x3fd   : > { %2647 = vmatpush.bf16.msrb.mxu0 %v7090_v11 }
 0x3fe   : > { %2602 = vmatpush.bf16.msrb.mxu3 %v7078_v2 }
 0x401   : > { %2648 = vmatpush.bf16.msrb.mxu0 %v7089_v31 }
 0x402   : > { %1957 = vmatmul.bf16.gmra.mxu0 %v1610_v10 }
 0x405   : > { %2649 = vmatpush.bf16.msrb.mxu0 %v7088_v12 }
 0x408   : > { %1908 = vmatmul.bf16.gmra.mxu3 %v1562_v62 }
 0x409   : > { %2006 = vmatmul.bf16.gmra.mxu1 %v1658_v61  ;;  %2650 = vmatpush.bf16.msrb.mxu0 %v7087_v37 }
 0x40d   : > { %2651 = vmatpush.bf16.msrb.mxu0 %v7086_v22 }
 0x40f   : > { %v1923_v48 = vpop.f32.mrf.mxu0 }
 0x416   : > { %v1972_v46 = vpop.f32.mrf.mxu1 }
 0x417   : > { %v1925_v28 = vpop.f32.mrf.mxu0 }
 0x41b   : > { %v1874_v3 = vpop.f32.mrf.mxu3 }
 0x41c   : > { %v1875_v26 = vadd.f32 %v8201_v49, %v1874_v3 }
 0x41e   : > { %v1924_v63 = vadd.f32 %v1923_v48, %v1875_v26  ;;  %v1974_v52 = vpop.f32.mrf.mxu1 }
 0x41f   : > { %v1928_v55 = vpop.f32.mrf.mxu0 }
 0x420   : > { %v1973_v47 = vadd.f32 %v1972_v46, %v1924_v63 }
 0x422   : > { %v2028_v10 = vmul.f32 0.01, %v1973_v47  ;;  %vm2012_vm14 = vcmp.ge.f32.partialorder %v1973_v47, 0.0 }
 0x423   : > { %v1876_v57 = vpop.f32.mrf.mxu3 }
 0x424   : > { %v1877_v16 = vadd.f32 %v8201_v49, %v1876_v57  ;;  %v8214_v30 = vsel %vm2012_vm14, %v1973_v47, %v2028_v10  ;;  %vm10603_vm14 = vcmp.lt.s32.totalorder %v7323_v8, 7 }
 0x425   : > { %v2172_v27 = vpack.c.bf16 %v8214_v30, %v8214_v30  ;;  %v10435_v12 = vrot.slane %v8214_v30, 1 }
 0x426   : > { %v1926_v43 = vadd.f32 %v1925_v28, %v1877_v16  ;;  %v1977_v13 = vpop.f32.mrf.mxu1 }
 0x427   : > { %v1930_v23 = vpop.f32.mrf.mxu0  ;;  %v2268_v46 = vunpack.c.l.b16 %v2172_v27 }
 0x428   : > { %v1975_v62 = vadd.f32 %v1974_v52, %v1926_v43 }
 0x42a   : > { %vm2013_vm13 = vcmp.ge.f32.partialorder %v1975_v62, 0.0  ;;  %v2029_v61 = vmul.f32 0.01, %v1975_v62 }
 0x42b   : > { %v1879_v15 = vpop.f32.mrf.mxu3 }
 0x42c   : > { %v2045_v21 = vsel %vm2013_vm13, %v1975_v62, %v2029_v61  ;;  %v1880_v48 = vadd.f32 %v8201_v49, %v1879_v15  ;;  %vm10604_vm13 = vmmov %vm10603_vm14 }
 0x42d   : > { %v2173_v54 = vpack.c.bf16 %v2045_v21, %v2045_v21  ;;  %v2109_v2 = vrot.slane %v2045_v21, 1 }
 0x42e   : > { %v1929_v45 = vadd.f32 %v1928_v55, %v1880_v48  ;;  %v1979_v0 = vpop.f32.mrf.mxu1 }
 0x42f   : > { %v1933_v11 = vpop.f32.mrf.mxu0  ;;  %v2269_v28 = vunpack.c.l.b16 %v2173_v54  ;;  %v2138_v55 = vsel %vm10603_vm14, %v10435_v12, %v2109_v2  ;;  %vm10605_vm14 = vcmp.lt.s32.totalorder %v7323_v8, 1 }
 0x430   : > { %v1978_v31 = vadd.f32 %v1977_v13, %v1929_v45  ;;  %v2188_v43 = vpack.c.bf16 %v2138_v55, %v2138_v55 }
 0x431   : > { %v2284_v3 = vpack.c.b16 %v2269_v28, %v2268_v46 }
 0x432   : > { %vm2014_vm12 = vcmp.ge.f32.partialorder %v1978_v31, 0.0  ;;  %v2030_v26 = vmul.f32 0.01, %v1978_v31  ;;  %v2316_v48 = vunpack.c.l.b16 %v2188_v43 }
 0x433   : > { %v1881_v63 = vpop.f32.mrf.mxu3  ;;  %2603 = vmatmul.bf16.vlgmr.msrb.gmra.mxu3 %v2284_v3 }
 0x434   : > { %v8220_v52 = vsel %vm2014_vm12, %v1978_v31, %v2030_v26  ;;  %v1882_v37 = vadd.f32 %v8201_v49, %v1881_v63 }
 0x435   : > { %v2110_v47 = vrot.slane %v8220_v52, 1  ;;  %v2174_v45 = vpack.c.bf16 %v8220_v52, %v8220_v52 }
 0x436   : > { %v1931_v57 = vadd.f32 %v1930_v23, %v1882_v37  ;;  %v1982_v10 = vpop.f32.mrf.mxu1  ;;  %v2061_v23 = vrot.slane %v2045_v21, 7 }
 0x437   : > { %v1935_v16 = vpop.f32.mrf.mxu0  ;;  %v2137_v22 = vsel %vm10604_vm13, %v2109_v2, %v2110_v47  ;;  %v10436_v2 = vrot.slane %v8214_v30, 7  ;;  %v2270_v21 = vunpack.c.l.b16 %v2174_v45 }
 0x438   : > { %v1980_v13 = vadd.f32 %v1979_v0, %v1931_v57  ;;  %v2141_v62 = vsel %vm7649_vm15, 0.0, %v2137_v22 }
 0x439   : > { %v2189_v61 = vpack.c.bf16 %v2141_v62, %v2141_v62  ;;  %v8244_v63 = vsel %vm10605_vm14, %v10436_v2, %v2061_v23 }
 0x43a   : > { %v2031_v15 = vmul.f32 0.01, %v1980_v13  ;;  %vm2015_vm12 = vcmp.ge.f32.partialorder %v1980_v13, 0.0 }
 0x43b   : > { %v1884_v27 = vpop.f32.mrf.mxu3  ;;  %v2317_v54 = vunpack.c.l.b16 %v2189_v61 }
 0x43c   : > { %v1885_v46 = vadd.f32 %v8201_v49, %v1884_v27  ;;  %v8235_v28 = vsel %vm2015_vm12, %v1980_v13, %v2031_v15  ;;  %vm10606_vm12 = vcmp.lt.s32.totalorder %v7323_v8, 7 }
 0x43d   : > { %v2332_v0 = vpack.c.b16 %v2317_v54, %v2316_v48  ;;  %v2175_v31 = vpack.c.bf16 %v8235_v28, %v8235_v28  ;;  %v2111_v22 = vrot.slane %v8235_v28, 1  ;;  %vm10607_vm15 = vmmov %vm10606_vm12 }
 0x43e   : > { %v1934_v3 = vadd.f32 %v1933_v11, %v1885_v46  ;;  %v1984_v26 = vpop.f32.mrf.mxu1  ;;  %v2062_v11 = vrot.slane %v8220_v52, 7 }
 0x43f   : > { %v1938_v37 = vpop.f32.mrf.mxu0  ;;  %2652 = vmatmul.bf16.vlgmr.msrb.gmra.mxu0 %v2332_v0  ;;  %v2271_v55 = vunpack.c.l.b16 %v2175_v31  ;;  %v2136_v27 = vsel %vm10606_vm12, %v2110_v47, %v2111_v22 }
 0x440   : > { %v1983_v57 = vadd.f32 %v1982_v10, %v1934_v3  ;;  %v2089_v10 = vsel %vm10605_vm14, %v2061_v23, %v2062_v11  ;;  %v2190_v31 = vpack.c.bf16 %v2136_v27, %v2136_v27 }
 0x441   : > { %v2285_v43 = vpack.c.b16 %v2271_v55, %v2270_v21  ;;  %v2063_v21 = vrot.slane %v8235_v28, 7  ;;  %v2094_v47 = vsel %vm7413_vm2, 0.0, %v2089_v10 }
 0x442   : > { %vm2016_vm13 = vcmp.ge.f32.partialorder %v1983_v57, 0.0  ;;  %v2032_v13 = vmul.f32 0.01, %v1983_v57 }
 0x443   : > { %v1886_v62 = vpop.f32.mrf.mxu3  ;;  %2608 = vmatmul.bf16.gmra.mxu3 %v2285_v43 }
 0x444   : > { %v8248_v61 = vsel %vm2016_vm13, %v1983_v57, %v2032_v13  ;;  %v1887_v15 = vadd.f32 %v8201_v49, %v1886_v62  ;;  %v2158_v62 = vpack.c.bf16 %v2094_v47, %v2094_v47 }
 0x445   : > { %v2112_v48 = vrot.slane %v8248_v61, 1  ;;  %v2176_v13 = vpack.c.bf16 %v8248_v61, %v8248_v61 }
 0x446   : > { %v1936_v54 = vadd.f32 %v1935_v16, %v1887_v15  ;;  %v1987_v45 = vpop.f32.mrf.mxu1  ;;  %v2318_v16 = vunpack.c.l.b16 %v2190_v31 }
 0x447   : > { %v1940_v46 = vpop.f32.mrf.mxu0  ;;  %v2135_v0 = vsel %vm10607_vm15, %v2111_v22, %v2112_v48  ;;  %vm10608_vm15 = vmmov %vm10605_vm14  ;;  %vm10609_vm14 = vcmp.lt.s32.totalorder %v7323_v8, 7 }
 0x448   : > { %v1985_v52 = vadd.f32 %v1984_v26, %v1936_v54  ;;  %v2143_v3 = vsel %vm7670_vm0, 0.0, %v2135_v0  ;;  %v2088_v27 = vsel %vm10608_vm15, %v2062_v11, %v2063_v21 }
 0x449   : > { %v2191_v55 = vpack.c.bf16 %v2143_v3, %v2143_v3  ;;  %v2159_v0 = vpack.c.bf16 %v2088_v27, %v2088_v27  ;;  %v2272_v3 = vunpack.c.l.b16 %v2176_v13 }
 0x44a   : > { %vm2017_vm13 = vcmp.ge.f32.partialorder %v1985_v52, 0.0  ;;  %v2033_v57 = vmul.f32 0.01, %v1985_v52 }
 0x44b   : > { %v1889_v23 = vpop.f32.mrf.mxu3  ;;  %v2319_v43 = vunpack.c.l.b16 %v2191_v55  ;;  %v8275_v47 = vunpack.c.l.b16 %v2159_v0 }
 0x44c   : > { %v1890_v22 = vadd.f32 %v8201_v49, %v1889_v23  ;;  %v8266_v26 = vsel %vm2017_vm13, %v1985_v52, %v2033_v57  ;;  %v8273_v52 = vunpack.c.l.b16 %v2158_v62  ;;  %vm10610_vm13 = vmmov %vm10608_vm15 }
 0x44d   : > { %v2333_v15 = vpack.c.b16 %v2319_v43, %v2318_v16  ;;  %v2177_v28 = vpack.c.bf16 %v8266_v26, %v8266_v26  ;;  %v2113_v23 = vrot.slane %v8266_v26, 1  ;;  %v2064_v43 = vrot.slane %v8248_v61, 7  ;;  %vm10611_vm15 = vmmov %vm10609_vm14 }
 0x44e   : > { %v1939_v10 = vadd.f32 %v1938_v37, %v1890_v22  ;;  %v1989_v54 = vpop.f32.mrf.mxu1 }
 0x44f   : > { %v1943_v31 = vpop.f32.mrf.mxu0  ;;  %2657 = vmatmul.bf16.gmra.mxu0 %v2333_v15  ;;  %v2273_v55 = vunpack.c.l.b16 %v2177_v28  ;;  %v2134_v13 = vsel %vm10609_vm14, %v2112_v48, %v2113_v23  ;;  %v2087_v15 = vsel %vm10610_vm13, %v2063_v21, %v2064_v43  ;;  %vm10612_vm14 = vmmov %vm10610_vm13 }
 0x450   : > { %v1988_v12 = vadd.f32 %v1987_v45, %v1939_v10  ;;  %v2192_v0 = vpack.c.bf16 %v2134_v13, %v2134_v13  ;;  %v2096_v48 = vsel %vm7474_vm5, 0.0, %v2087_v15 }
 0x451   : > { %v2286_v57 = vpack.c.b16 %v2273_v55, %v2272_v3  ;;  %v2160_v13 = vpack.c.bf16 %v2096_v48, %v2096_v48 }
 0x452   : > { %vm2018_vm12 = vcmp.ge.f32.partialorder %v1988_v12, 0.0  ;;  %v2034_v16 = vmul.f32 0.01, %v1988_v12 }
 0x453   : > { %v1891_v37 = vpop.f32.mrf.mxu3  ;;  %2613 = vmatmul.bf16.gmra.mxu3 %v2286_v57 }
 0x454   : > { %v8280_v22 = vsel %vm2018_vm12, %v1988_v12, %v2034_v16  ;;  %v1892_v45 = vadd.f32 %v8201_v49, %v1891_v37  ;;  %v2320_v37 = vunpack.c.l.b16 %v2192_v0 }
 0x455   : > { %v2114_v62 = vrot.slane %v8280_v22, 1 }
 0x456   : > { %v1941_v28 = vadd.f32 %v1940_v46, %v1892_v45  ;;  %v1992_v27 = vpop.f32.mrf.mxu1  ;;  %v2178_v46 = vpack.c.bf16 %v8280_v22, %v8280_v22 }
 0x457   : > { %v2133_v10 = vsel %vm10611_vm15, %v2113_v23, %v2114_v62  ;;  %v1945_v61 = vpop.f32.mrf.mxu0  ;;  %v2065_v23 = vrot.slane %v8266_v26, 7 }
 0x458   : > { %v1990_v3 = vadd.f32 %v1989_v54, %v1941_v28  ;;  %v2145_v12 = vsel %vm7689_vm3, 0.0, %v2133_v10  ;;  %v2274_v11 = vunpack.c.l.b16 %v2178_v46 }
 0x459   : > { %v2193_v55 = vpack.c.bf16 %v2145_v12, %v2145_v12  ;;  %v2086_v15 = vsel %vm10612_vm14, %v2064_v43, %v2065_v23 }
 0x45a   : > { %vm2019_vm12 = vcmp.ge.f32.partialorder %v1990_v3, 0.0  ;;  %v2035_v57 = vmul.f32 0.01, %v1990_v3 }
 0x45b   : > { %v1894_v16 = vpop.f32.mrf.mxu3  ;;  %v2321_v21 = vunpack.c.l.b16 %v2193_v55  ;;  %v2161_v55 = vpack.c.bf16 %v2086_v15, %v2086_v15 }
 0x45c   : > { %v1895_v54 = vadd.f32 %v8201_v49, %v1894_v16  ;;  %v8298_v45 = vsel %vm2019_vm12, %v1990_v3, %v2035_v57  ;;  %v8305_v16 = vunpack.c.l.b16 %v2160_v13  ;;  %vm10613_vm12 = vmmov %vm10612_vm14 }
 0x45d   : > { %v2334_v28 = vpack.c.b16 %v2321_v21, %v2320_v37  ;;  %v2179_v10 = vpack.c.bf16 %v8298_v45, %v8298_v45  ;;  %v2115_v26 = vrot.slane %v8298_v45, 1  ;;  %v8307_v3 = vunpack.c.l.b16 %v2161_v55  ;;  %vm10614_vm14 = vmmov %vm10611_vm15 }
 0x45e   : > { %v1944_v12 = vadd.f32 %v1943_v31, %v1895_v54  ;;  %v1994_v0 = vpop.f32.mrf.mxu1  ;;  %v2066_v21 = vrot.slane %v8280_v22, 7 }
 0x45f   : > { %2662 = vmatmul.bf16.gmra.mxu0 %v2334_v28  ;;  %v2275_v2 = vunpack.c.l.b16 %v2179_v10  ;;  %v1948_v43 = vpop.f32.mrf.mxu0  ;;  %v2132_v54 = vsel %vm10611_vm15, %v2114_v62, %v2115_v26  ;;  %vm10615_vm15 = vmmov %vm10613_vm12 }
 0x460   : > { %v1993_v25 = vadd.f32 %v1992_v27, %v1944_v12  ;;  %v2194_v15 = vpack.c.bf16 %v2132_v54, %v2132_v54 }
 0x461   : > { %v2287_v48 = vpack.c.b16 %v2275_v2, %v2274_v11  ;;  %v2085_v2 = vsel %vm10613_vm12, %v2065_v23, %v2066_v21  ;;  %v7077_v23 = vld [vmem:[%s10401_s1 + $0x1b8] sm:$0xff] }
 0x462   : > { %vm2020_vm13 = vcmp.ge.f32.partialorder %v1993_v25, 0.0  ;;  %v2036_v57 = vmul.f32 0.01, %v1993_v25  ;;  %v2098_v55 = vsel %vm7510_vm7, 0.0, %v2085_v2  ;;  %2546 = vmatpush.bf16.msrb.mxu2 %v7077_v23 }
 0x463   : > { %v1896_v31 = vpop.f32.mrf.mxu3  ;;  %2618 = vmatmul.bf16.gmra.mxu3 %v2287_v48  ;;  %v2322_v48 = vunpack.c.l.b16 %v2194_v15  ;;  %v2162_v54 = vpack.c.bf16 %v2098_v55, %v2098_v55 }
 0x464   : > { %v8312_v46 = vsel %vm2020_vm13, %v1993_v25, %v2036_v57  ;;  %v1897_v27 = vadd.f32 %v8201_v49, %v1896_v31 }
 0x465   : > { %v2116_v13 = vrot.slane %v8312_v46, 1 }
 0x466   : > { %v1946_v11 = vadd.f32 %v1945_v61, %v1897_v27  ;;  %v1997_v28 = vpop.f32.mrf.mxu1 }
 0x467   : > { %v2131_v10 = vsel %vm10614_vm14, %v2115_v26, %v2116_v13  ;;  %v2180_v26 = vpack.c.bf16 %v8312_v46, %v8312_v46  ;;  %v1950_v2 = vpop.f32.mrf.mxu0 }
 0x468   : > { %v1995_v12 = vadd.f32 %v1994_v0, %v1946_v11  ;;  %v2147_v25 = vsel %vm7448_vm4, 0.0, %v2131_v10  ;;  %v2067_v0 = vrot.slane %v8298_v45, 7 }
 0x469   : > { %v2195_v22 = vpack.c.bf16 %v2147_v25, %v2147_v25  ;;  %v2276_v35 = vunpack.c.l.b16 %v2180_v26 }
 0x46a   : > { %vm2021_vm13 = vcmp.ge.f32.partialorder %v1995_v12, 0.0  ;;  %v2037_v62 = vmul.f32 0.01, %v1995_v12  ;;  %v2084_v15 = vsel %vm10615_vm15, %v2066_v21, %v2067_v0 }
 0x46b   : > { %v1899_v61 = vpop.f32.mrf.mxu3  ;;  %v2323_v57 = vunpack.c.l.b16 %v2195_v22  ;;  %v2163_v22 = vpack.c.bf16 %v2084_v15, %v2084_v15 }
 0x46c   : > { %v1900_v31 = vadd.f32 %v8201_v49, %v1899_v61  ;;  %v8333_v27 = vsel %vm2021_vm13, %v1995_v12, %v2037_v62  ;;  %v8340_v62 = vunpack.c.l.b16 %v2162_v54  ;;  %vm10616_vm13 = vmmov %vm10615_vm15 }
 0x46d   : > { %v2335_v11 = vpack.c.b16 %v2323_v57, %v2322_v48  ;;  %v2181_v10 = vpack.c.bf16 %v8333_v27, %v8333_v27  ;;  %v2117_v12 = vrot.slane %v8333_v27, 1  ;;  %v8342_v55 = vunpack.c.l.b16 %v2163_v22  ;;  %vm10617_vm15 = vmmov %vm10614_vm14 }
 0x46e   : > { %v1949_v25 = vadd.f32 %v1948_v43, %v1900_v31  ;;  %v1999_v37 = vpop.f32.mrf.mxu1  ;;  %v2068_v43 = vrot.slane %v8312_v46, 7 }
 0x46f   : > { %2667 = vmatmul.bf16.gmra.mxu0 %v2335_v11  ;;  %v2277_v45 = vunpack.c.l.b16 %v2181_v10  ;;  %v2130_v26 = vsel %vm10614_vm14, %v2116_v13, %v2117_v12  ;;  %v1953_v10 = vpop.f32.mrf.mxu0  ;;  %v7075_v13 = vld [vmem:[%s10401_s1 + $0x1a8] sm:$0xff]  ;;  %vm10618_vm14 = vmmov %vm10616_vm13 }
 0x470   : > { %v1998_v18 = vadd.f32 %v1997_v28, %v1949_v25  ;;  %v2083_v54 = vsel %vm10616_vm13, %v2067_v0, %v2068_v43  ;;  %v2196_v46 = vpack.c.bf16 %v2130_v26, %v2130_v26 }
 0x471   : > { %v2288_v23 = vpack.c.b16 %v2277_v45, %v2276_v35  ;;  %v7076_v35 = vld [vmem:[%s10401_s1 + $0x1b0] sm:$0xff]  ;;  %v2100_v0 = vsel %vm7546_vm9, 0.0, %v2083_v54 }
 0x472   : > { %vm2022_vm12 = vcmp.ge.f32.partialorder %v1998_v18, 0.0  ;;  %v2038_v61 = vmul.f32 0.01, %v1998_v18  ;;  %2547 = vmatpush.bf16.msrb.mxu2 %v7076_v35  ;;  %v2164_v54 = vpack.c.bf16 %v2100_v0, %v2100_v0 }
 0x473   : > { %v1901_v21 = vpop.f32.mrf.mxu3  ;;  %2623 = vmatmul.bf16.gmra.mxu3 %v2288_v23 }
 0x474   : > { %v8347_v57 = vsel %vm2022_vm12, %v1998_v18, %v2038_v61  ;;  %v1902_v28 = vadd.f32 %v8201_v49, %v1901_v21  ;;  %v2324_v61 = vunpack.c.l.b16 %v2196_v46 }
 0x475   : > { %v2118_v31 = vrot.slane %v8347_v57, 1  ;;  %v2182_v21 = vpack.c.bf16 %v8347_v57, %v8347_v57 }
 0x476   : > { %v1951_v11 = vadd.f32 %v1950_v2, %v1902_v28  ;;  %v2002_v22 = vpop.f32.mrf.mxu1  ;;  %2548 = vmatpush.bf16.msrb.mxu2 %v7075_v13  ;;  %v2069_v28 = vrot.slane %v8333_v27, 7  ;;  %v7073_v27 = vld [vmem:[%s10401_s1 + $0x198] sm:$0xff] }
 0x477   : > { %v2129_v18 = vsel %vm10617_vm15, %v2117_v12, %v2118_v31 }
 0x478   : > { %v2000_v15 = vadd.f32 %v1999_v37, %v1951_v11  ;;  %v2149_v25 = vsel %vm7501_vm6, 0.0, %v2129_v18  ;;  %v7074_v37 = vld [vmem:[%s10401_s1 + $0x1a0] sm:$0xff]  ;;  %v2082_v46 = vsel %vm10618_vm14, %v2068_v43, %v2069_v28 }
 0x479   : > { %v2197_v45 = vpack.c.bf16 %v2149_v25, %v2149_v25  ;;  %v2165_v13 = vpack.c.bf16 %v2082_v46, %v2082_v46 }
 0x47a   : > { %vm2023_vm12 = vcmp.ge.f32.partialorder %v2000_v15, 0.0  ;;  %v2039_v2 = vmul.f32 0.01, %v2000_v15  ;;  %2549 = vmatpush.bf16.msrb.mxu2 %v7074_v37 }
 0x47b   : > { %v1904_v23 = vpop.f32.mrf.mxu3  ;;  %v2325_v12 = vunpack.c.l.b16 %v2197_v45  ;;  %v2278_v45 = vunpack.c.l.b16 %v2182_v21 }
 0x47c   : > { %v1905_v26 = vadd.f32 %v8201_v49, %v1904_v23  ;;  %v8374_v35 = vsel %vm2023_vm12, %v2000_v15, %v2039_v2  ;;  %v8384_v2 = vunpack.c.l.b16 %v2164_v54  ;;  %v8386_v23 = vunpack.c.l.b16 %v2165_v13  ;;  %vm10619_vm12 = vmmov %vm10618_vm14 }
 0x47d   : > { %v2336_v11 = vpack.c.b16 %v2325_v12, %v2324_v61  ;;  %v2183_v18 = vpack.c.bf16 %v8374_v35, %v8374_v35  ;;  %v2119_v0 = vrot.slane %v8374_v35, 1  ;;  %v1955_v61 = vpop.f32.mrf.mxu0  ;;  %vm10620_vm14 = vmmov %vm10617_vm15 }
 0x47e   : > { %v1954_v25 = vadd.f32 %v1953_v10, %v1905_v26  ;;  %v2004_v21 = vpop.f32.mrf.mxu1  ;;  %2550 = vmatpush.bf16.msrb.mxu2 %v7073_v27  ;;  %v2070_v26 = vrot.slane %v8347_v57, 7  ;;  %v7071_v57 = vld [vmem:[%s10401_s1 + $0x188] sm:$0xff] }
 0x47f   : > { %2672 = vmatmul.bf16.gmra.mxu0 %v2336_v11  ;;  %v2279_v48 = vunpack.c.l.b16 %v2183_v18 }
 0x480   : > { %v2003_v15 = vadd.f32 %v2002_v22, %v1954_v25  ;;  %v7072_v22 = vld [vmem:[%s10401_s1 + $0x190] sm:$0xff]  ;;  %v2081_v46 = vsel %vm10619_vm12, %v2069_v28, %v2070_v26 }
 0x481   : > { %v2289_v12 = vpack.c.b16 %v2279_v48, %v2278_v45  ;;  %v2128_v48 = vsel %vm10617_vm15, %v2118_v31, %v2119_v0 }
 0x482   : > { %vm2024_vm13 = vcmp.ge.f32.partialorder %v2003_v15, 0.0  ;;  %v2040_v43 = vmul.f32 0.01, %v2003_v15  ;;  %v2198_v45 = vpack.c.bf16 %v2128_v48, %v2128_v48  ;;  %2551 = vmatpush.bf16.msrb.mxu2 %v7072_v22 }
 0x483   : > { %v1906_v37 = vpop.f32.mrf.mxu3  ;;  %2628 = vmatmul.bf16.gmra.mxu3 %v2289_v12 }
 0x484   : > { %v8394_v54 = vsel %vm2024_vm13, %v2003_v15, %v2040_v43  ;;  %v1907_v11 = vadd.f32 %v8201_v49, %v1906_v37  ;;  %vm10621_vm13 = vnez %v10541_v41  ;;  %v2326_v37 = vunpack.c.l.b16 %v2198_v45 }
 0x485   : > { %v2120_v18 = vrot.slane %v8394_v54, 1  ;;  %v2102_v12 = vsel %vm10621_vm13, 0.0, %v2081_v46  ;;  %v2184_v22 = vpack.c.bf16 %v8394_v54, %v8394_v54 }
 0x486   : > { %v1956_v25 = vadd.f32 %v1955_v61, %v1907_v11  ;;  %v1958_v61 = vpop.f32.mrf.mxu0  ;;  %2552 = vmatpush.bf16.msrb.mxu2 %v7071_v57  ;;  %v2071_v11 = vrot.slane %v8374_v35, 7  ;;  %v2166_v46 = vpack.c.bf16 %v2102_v12, %v2102_v12 }
 0x487   : > { %v2127_v13 = vsel %vm10620_vm14, %v2119_v0, %v2120_v18  ;;  %v2280_v41 = vunpack.c.l.b16 %v2184_v22  ;;  %v2072_v22 = vrot.slane %v8394_v54, 7 }
 0x488   : > { %v2005_v27 = vadd.f32 %v2004_v21, %v1956_v25  ;;  %v2151_v15 = vsel %vm10586_vm10, 0.0, %v2127_v13  ;;  %v7070_v21 = vld [vmem:[%s10401_s1 + $0x180] sm:$0xff]  ;;  %v2007_v13 = vpop.f32.mrf.mxu1 }
 0x489   : > { %v2199_v31 = vpack.c.bf16 %v2151_v15, %v2151_v15 }
 0x48a   : > { %vm2025_vm15 = vcmp.ge.f32.partialorder %v2005_v27, 0.0  ;;  %v2041_v28 = vmul.f32 0.01, %v2005_v27  ;;  %2553 = vmatpush.bf16.msrb.mxu2 %v7070_v21 }
 0x48b   : > { %v1909_v43 = vpop.f32.mrf.mxu3  ;;  %v2327_v0 = vunpack.c.l.b16 %v2199_v31  ;;  %v2080_v31 = vsel %vm10619_vm12, %v2070_v26, %v2071_v11 }
 0x48c   : > { %v1910_v48 = vadd.f32 %v8201_v49, %v1909_v43  ;;  %v8418_v25 = vsel %vm2025_vm15, %v2005_v27, %v2041_v28  ;;  %v2167_v10 = vpack.c.bf16 %v2080_v31, %v2080_v31  ;;  %v8425_v27 = vunpack.c.l.b16 %v2166_v46 }
 0x48d   : > { %v2337_v15 = vpack.c.b16 %v2327_v0, %v2326_v37  ;;  %v2185_v45 = vpack.c.bf16 %v8418_v25, %v8418_v25  ;;  %v2121_v34 = vrot.slane %v8418_v25, 1  ;;  %vm10622_vm15 = vcmp.lt.s32.totalorder %v7323_v8, 7 }
 0x48e   : > { %v1959_v57 = vadd.f32 %v1958_v61, %v1910_v48  ;;  %v8427_v12 = vunpack.c.l.b16 %v2167_v10  ;;  %v1960_v46 = vpop.f32.mrf.mxu0  ;;  %vm10623_vm10 = vmmov %vm10622_vm15 }
 0x48f   : > { %2677 = vmatmul.bf16.gmra.mxu0 %v2337_v15  ;;  %v2281_v35 = vunpack.c.l.b16 %v2185_v45  ;;  %v2126_v61 = vsel %vm10622_vm15, %v2120_v18, %v2121_v34 }
 0x490   : > { %v2008_v43 = vadd.f32 %v2007_v13, %v1959_v57  ;;  %v2200_v15 = vpack.c.bf16 %v2126_v61, %v2126_v61  ;;  %v2009_v45 = vpop.f32.mrf.mxu1 }
 0x491   : > { %v2290_v28 = vpack.c.b16 %v2281_v35, %v2280_v41  ;;  %v2079_v41 = vsel %vm10619_vm12, %v2071_v11, %v2072_v22 }
 0x492   : > { %vm2026_vm14 = vcmp.ge.f32.partialorder %v2008_v43, 0.0  ;;  %v2042_v37 = vmul.f32 0.01, %v2008_v43 }
 0x493   : > { %v1911_v26 = vpop.f32.mrf.mxu3  ;;  %2633 = vmatmul.bf16.gmra.mxu3 %v2290_v28 }
 0x494   : > { %v2058_v48 = vsel %vm2026_vm14, %v2008_v43, %v2042_v37  ;;  %v1912_v21 = vadd.f32 %v8201_v49, %v1911_v26  ;;  %v2328_v43 = vunpack.c.l.b16 %v2200_v15  ;;  %v2073_v37 = vrot.slane %v8418_v25, 7 }
 0x495   : > { %v2122_v13 = vrot.slane %v2058_v48, 1  ;;  %v2186_v28 = vpack.c.bf16 %v2058_v48, %v2058_v48  ;;  %vm10624_vm14 = vnez %v10590_v36  ;;  %v10626_v25 = vrot.slane %v8214_v30, 7 }
 0x496   : > { %v1961_v10 = vadd.f32 %v1960_v46, %v1912_v21  ;;  %v2104_v11 = vsel %vm10624_vm14, 0.0, %v2079_v41 }
 0x497   : > { %v2125_v31 = vsel %vm10623_vm10, %v2121_v34, %v2122_v13  ;;  %vm10625_vm10 = vmmov %vm10619_vm12  ;;  %v2282_v15 = vunpack.c.l.b16 %v2186_v28 }
 0x498   : > { %v2010_v57 = vadd.f32 %v2009_v45, %v1961_v10  ;;  %v2153_v18 = vsel %vm10594_vm11, 0.0, %v2125_v31  ;;  %v2157_v10 = vpack.c.bf16 %v8244_v63, %v8244_v63  ;;  %v2078_v45 = vsel %vm10625_vm10, %v2072_v22, %v2073_v37  ;;  %vm10627_vm12 = vmmov %vm10625_vm10 }
 0x499   : > { %v2201_v35 = vpack.c.bf16 %v2153_v18, %v2153_v18  ;;  %v2168_v31 = vpack.c.bf16 %v2104_v11, %v2104_v11  ;;  %vm10630_vm11 = vnez %v10514_v20 }
 0x49a   : > { %vm2027_vm15 = vcmp.ge.f32.partialorder %v2010_v57, 0.0  ;;  %v2043_v54 = vmul.f32 0.01, %v2010_v57 }
 0x49b   : > { %v2329_v49 = vunpack.c.l.b16 %v2201_v35  ;;  %v2232_v11 = vunpack.c.l.b16 %v2168_v31 }
 0x49c   : > { %v2059_v26 = vsel %vm2027_vm15, %v2010_v57, %v2043_v54  ;;  %v10628_v57 = vrot.slane %v8214_v30, 1  ;;  %vm10629_vm15 = vcmp.lt.s32.totalorder %v7323_v8, 7  ;;  %v2169_v54 = vpack.c.bf16 %v2078_v45, %v2078_v45 }
 0x49d   : > { %v2338_v61 = vpack.c.b16 %v2329_v49, %v2328_v43  ;;  %v2075_v21 = vrot.slane %v2059_v26, 7  ;;  %v2123_v46 = vrot.slane %v2059_v26, 1  ;;  %v2187_v34 = vpack.c.bf16 %v2059_v26, %v2059_v26  ;;  %vm10631_vm10 = vmmov %vm10629_vm15 }
 0x49e   : > { %v2233_v26 = vunpack.c.l.b16 %v2169_v54  ;;  %v2221_v30 = vunpack.c.l.b16 %v2157_v10  ;;  %v10633_v54 = vpack.c.b16 %v8275_v47, %v8273_v52 }
 0x49f   : > { %2682 = vmatmul.bf16.gmra.mxu0 %v2338_v61  ;;  %v2283_v18 = vunpack.c.l.b16 %v2187_v34  ;;  %v2091_v41 = vsel %vm10627_vm12, %v2075_v21, %v10626_v25  ;;  %v2139_v35 = vsel %vm10629_vm15, %v2123_v46, %v10628_v57  ;;  %v2124_v49 = vsel %vm10631_vm10, %v2122_v13, %v2123_v46  ;;  %vm10632_vm15 = vmmov %vm10627_vm12 }
 0x4a0   : > { %v2092_v63 = vsel %vm10630_vm11, 0.0, %v2091_v41  ;;  %v2155_v28 = vsel %vm10602_vm1, 0.0, %v2139_v35  ;;  %v2074_v34 = vrot.slane %v2058_v48, 7  ;;  %v2242_v25 = vpack.c.b16 %v2233_v26, %v2232_v11 }
 0x4a1   : > { %v2291_v43 = vpack.c.b16 %v2283_v18, %v2282_v15  ;;  %v2156_v22 = vpack.c.bf16 %v2092_v63, %v2092_v63  ;;  %v2202_v0 = vpack.c.bf16 %v2124_v49, %v2124_v49  ;;  %v2203_v9 = vpack.c.bf16 %v2155_v28, %v2155_v28 }
 0x4a2   : > { %v2077_v45 = vsel %vm10627_vm12, %v2073_v37, %v2074_v34  ;;  %v2076_v41 = vsel %vm10632_vm15, %v2074_v34, %v2075_v21  ;;  %v10636_v37 = vpack.c.b16 %v8386_v23, %v8384_v2  ;;  %v10637_v21 = vpack.c.b16 %v8427_v12, %v8425_v27 }
 0x4a3   : > { %2638 = vmatmul.bf16.gmra.mxu3 %v2291_v43  ;;  %v2220_v61 = vunpack.c.l.b16 %v2156_v22  ;;  %v2330_v15 = vunpack.c.l.b16 %v2202_v0  ;;  %v2331_v18 = vunpack.c.l.b16 %v2203_v9  ;;  %v2106_v13 = vsel %vm10599_vm8, 0.0, %v2077_v45 }
 0x4a4   : > { %v2170_v46 = vpack.c.bf16 %v2106_v13, %v2106_v13  ;;  %v2171_v10 = vpack.c.bf16 %v2076_v41, %v2076_v41  ;;  %v10634_v9 = vpack.c.b16 %v8307_v3, %v8305_v16  ;;  %v10635_v0 = vpack.c.b16 %v8342_v55, %v8340_v62  ;;  %v8534_v41 = vld [vmem:[%s10402_s2 + $0x2] ss:$0 sm:$0xff] }
 0x4a5   : > { %v2236_v57 = vpack.c.b16 %v2221_v30, %v2220_v61  ;;  %v2339_v31 = vpack.c.b16 %v2331_v18, %v2330_v15  ;;  %vm10638_vm12 = vcmask 64512  }
 0x4a6   : > { %v2234_v48 = vunpack.c.l.b16 %v2170_v46  ;;  %v2235_v35 = vunpack.c.l.b16 %v2171_v10  ;;  %vm10639_vm15 = vmmov %vm10638_vm12 }
 0x4a7   : > { %2554 = vmatmul.bf16.vlgmr.msrb.gmra.mxu2 %v2236_v57 }
 0x4a8   : > { %v2243_v63 = vpack.c.b16 %v2235_v35, %v2234_v48 }
 0x4af   : > { %2687 = vmatmul.bf16.gmra.mxu0 %v2339_v31 }
 0x4b6   : > { %v8483_v43 = vpop.f32.mrf.mxu3 }
 0x4b7   : > { %2559 = vmatmul.bf16.gmra.mxu2 %v10633_v54 }
 0x4bc   : > { %v8485_v52 = vpop.f32.mrf.mxu0 }
 0x4be   : > { %v8487_v47 = vpop.f32.mrf.mxu3 }
 0x4c4   : > { %v8489_v16 = vpop.f32.mrf.mxu0 }
 0x4c6   : > { %v8491_v3 = vpop.f32.mrf.mxu3 }
 0x4c7   : > { %2564 = vmatmul.bf16.gmra.mxu2 %v10634_v9 }
 0x4cc   : > { %v8493_v62 = vpop.f32.mrf.mxu0 }
 0x4ce   : > { %v8497_v2 = vpop.f32.mrf.mxu3 }
 0x4d4   : > { %v8499_v23 = vpop.f32.mrf.mxu0 }
 0x4d6   : > { %v8503_v12 = vpop.f32.mrf.mxu3 }
 0x4d7   : > { %2569 = vmatmul.bf16.gmra.mxu2 %v10635_v0 }
 0x4dc   : > { %v8505_v22 = vpop.f32.mrf.mxu0 }
 0x4de   : > { %v8509_v28 = vpop.f32.mrf.mxu3 }
 0x4e4   : > { %v8511_v11 = vpop.f32.mrf.mxu0 }
 0x4e6   : > { %v8515_v61 = vpop.f32.mrf.mxu3 }
 0x4e7   : > { %2574 = vmatmul.bf16.gmra.mxu2 %v10636_v37 }
 0x4ec   : > { %v8519_v34 = vpop.f32.mrf.mxu0 }
 0x4ee   : > { %v8523_v57 = vpop.f32.mrf.mxu3 }
 0x4f4   : > { %v8525_v45 = vpop.f32.mrf.mxu0 }
 0x4f6   : > { %v2624_v18 = vpop.f32.mrf.mxu3 }
 0x4f7   : > { %2579 = vmatmul.bf16.gmra.mxu2 %v10637_v21 }
 0x4fc   : > { %v8529_v13 = vpop.f32.mrf.mxu0 }
 0x4fe   : > { %v2626_v31 = vpop.f32.mrf.mxu3 }
 0x504   : > { %v8536_v10 = vpop.f32.mrf.mxu0 }
 0x506   : > { %v2629_v54 = vpop.f32.mrf.mxu3 }
 0x507   : > { %2584 = vmatmul.bf16.gmra.mxu2 %v2242_v25 }
 0x50c   : > { %v2678_v0 = vpop.f32.mrf.mxu0 }
 0x50e   : > { %v2631_v21 = vpop.f32.mrf.mxu3 }
 0x514   : > { %v2680_v36 = vpop.f32.mrf.mxu0 }
 0x516   : > { %v2634_v51 = vpop.f32.mrf.mxu3 }
 0x517   : > { %2589 = vmatmul.bf16.gmra.mxu2 %v2243_v63 }
 0x51c   : > { %v2683_v24 = vpop.f32.mrf.mxu0 }
 0x51e   : > { %v2636_v6 = vpop.f32.mrf.mxu3 }
 0x524   : > { %v2685_v4 = vpop.f32.mrf.mxu0 }
 0x526   : > { %v2639_v17 = vpop.f32.mrf.mxu3 }
 0x52a   : > { %v8495_v55 = vpop.f32.mrf.mxu2 }
 0x52c   : > { %v2688_v1 = vpop.f32.mrf.mxu0 }
 0x52e   : > { %v2641_v56 = vpop.f32.mrf.mxu3 }
 0x532   : > { %v8501_v27 = vpop.f32.mrf.mxu2 }
 0x534   : > { %v2690_v19 = vpop.f32.mrf.mxu0 }
 0x53a   : > { %v8507_v49 = vpop.f32.mrf.mxu2 }
 0x542   : > { %v8513_v26 = vpop.f32.mrf.mxu2 }
 0x54a   : > { %v8517_v30 = vpop.f32.mrf.mxu2 }
 0x552   : > { %v8521_v25 = vpop.f32.mrf.mxu2 }
 0x55a   : > { %v8527_v15 = vpop.f32.mrf.mxu2 }
 0x562   : > { %v2572_v46 = vpop.f32.mrf.mxu2 }
 0x56a   : > { %v2575_v48 = vpop.f32.mrf.mxu2 }
 0x56b   : > { %v2576_v35 = vadd.f32 %v8534_v41, %v2575_v48 }
 0x56d   : > { %v8539_v63 = vadd.f32 %v2624_v18, %v2576_v35 }
 0x572   : > { %v2577_v9 = vpop.f32.mrf.mxu2 }
 0x57a   : > { %v2580_v37 = vpop.f32.mrf.mxu2 }
 0x582   : > { %v2582_v59 = vpop.f32.mrf.mxu2 }
 0x583   : > { %v2583_v50 = vadd.f32 %v8534_v41, %v2582_v59  ;;  %v6390_v59 = vld [vmem:[%s10403_s3 + $0xc8] sm:$0xff] }
 0x58a   : > { %v2585_v60 = vpop.f32.mrf.mxu2 }
 0x58b   : > { %v2586_v7 = vadd.f32 %v8534_v41, %v2585_v60  ;;  %v2578_v60 = vadd.f32 %v8534_v41, %v2577_v9 }
 0x58d   : > { %v2635_v20 = vadd.f32 %v2634_v51, %v2586_v7  ;;  %v6393_v51 = vld [vmem:[%s10403_s3 + $0xe0] sm:$0xff] }
 0x592   : > { %v2587_v44 = vpop.f32.mrf.mxu2 }
 0x593   : > { %v2588_v35 = vadd.f32 %v8534_v41, %v2587_v44  ;;  %v6395_v44 = vld [vmem:[%s10403_s3 + $0xf0] sm:$0xff] }
 0x595   : > { %v2637_v33 = vadd.f32 %v2636_v6, %v2588_v35 }
 0x59a   : > { %v2590_v42 = vpop.f32.mrf.mxu2 }
 0x59b   : > { %v2591_v48 = vadd.f32 %v8534_v41, %v2590_v42  ;;  %v6396_v42 = vld [vmem:[%s10403_s3 + $0xf8] sm:$0xff] }
 0x59c   : > { %2730 = vmatpush.msra.mxu2 %v6396_v42 }
 0x59d   : > { %v2640_v29 = vadd.f32 %v2639_v17, %v2591_v48  ;;  %v6394_v17 = vld [vmem:[%s10403_s3 + $0xe8] sm:$0xff] }
 0x59e   : > { %2731 = vmatpush.msra.mxu2 %v6395_v44  ;;  %v6397_v48 = vld [vmem:[%s10404_s4 + $0x8] sm:$0xff] }
 0x5a0   : > { %2732 = vmatpush.msra.mxu2 %v6394_v17  ;;  %v7101_v17 = vld [vmem:[%s10401_s1 + $0x278] sm:$0xff] }
 0x5a2   : > { %v2592_v18 = vpop.f32.mrf.mxu2  ;;  %2733 = vmatpush.msra.mxu2 %v6393_v51  ;;  %v7100_v51 = vld [vmem:[%s10401_s1 + $0x270] sm:$0xff] }
 0x5a3   : > { %v2593_v32 = vadd.f32 %v8534_v41, %v2592_v18  ;;  %v2581_v18 = vadd.f32 %v8534_v41, %v2580_v37 }
 0x5a5   : > { %v2642_v40 = vadd.f32 %v2641_v56, %v2593_v32  ;;  %v8556_v32 = vadd.f32 %v2688_v1, %v2640_v29  ;;  %v2630_v7 = vadd.f32 %v2629_v54, %v2581_v18  ;;  %v8569_v1 = vadd.f32 %v2683_v24, %v2635_v20  ;;  %v6392_v29 = vld [vmem:[%s10403_s3 + $0xd8] sm:$0xff] }
 0x5a6   : > { %v2627_v56 = vadd.f32 %v2626_v31, %v2578_v60  ;;  %v2571_v20 = vadd.f32 %v8534_v41, %v8527_v15  ;;  %2734 = vmatpush.msra.mxu2 %v6392_v29  ;;  %v6389_v15 = vld [vmem:[%s10403_s3 + $0xc0] sm:$0xff]  ;;  %v2566_v31 = vadd.f32 %v8534_v41, %v8517_v30  ;;  %v6387_v30 = vld [vmem:[%s10403_s3 + $0xb0] sm:$0xff]  ;;  %v7109_v18 = vld [vmem:[%s10401_s1 + $0x2b8] sm:$0xff] }
 0x5a7   : > { %v8546_v39 = vadd.f32 %v2690_v19, %v2642_v40  ;;  %v2632_v40 = vadd.f32 %v2631_v21, %v2583_v50  ;;  %v8563_v19 = vadd.f32 %v2685_v4, %v2637_v33  ;;  %v2573_v50 = vadd.f32 %v8534_v41, %v2572_v46  ;;  %v6391_v33 = vld [vmem:[%s10403_s3 + $0xd0] sm:$0xff]  ;;  %v7117_v60 = vld [vmem:[%s10401_s1 + $0x2f8] sm:$0xff]  ;;  %v7107_v29 = vld [vmem:[%s10401_s1 + $0x2a8] sm:$0xff] }
 0x5a8   : > { %v8584_v6 = vadd.f32 %v2678_v0, %v2630_v7  ;;  %v8594_v46 = vadd.f32 %v8536_v10, %v2627_v56  ;;  %2735 = vmatpush.msra.mxu2 %v6391_v33  ;;  %v2620_v54 = vadd.f32 %v8515_v61, %v2571_v20  ;;  %v2563_v10 = vadd.f32 %v8534_v41, %v8513_v26  ;;  %v7116_v7 = vld [vmem:[%s10401_s1 + $0x2f0] sm:$0xff]  ;;  %v7115_v56 = vld [vmem:[%s10401_s1 + $0x2e8] sm:$0xff]  ;;  %v7106_v33 = vld [vmem:[%s10401_s1 + $0x2a0] sm:$0xff] }
 0x5a9   : > { %2693 = vmatpush.msra.mxu1 %v8546_v39  ;;  %v8576_v4 = vadd.f32 %v2680_v36, %v2632_v40  ;;  %v2568_v36 = vadd.f32 %v8534_v41, %v8521_v25  ;;  %v2622_v24 = vadd.f32 %v8523_v57, %v2573_v50  ;;  %v8605_v25 = vadd.f32 %v8529_v13, %v8539_v63  ;;  %v6388_v57 = vld [vmem:[%s10403_s3 + $0xb8] sm:$0xff]  ;;  %v7108_v40 = vld [vmem:[%s10401_s1 + $0x2b0] sm:$0xff]  ;;  %v7099_v50 = vld [vmem:[%s10401_s1 + $0x268] sm:$0xff] }
 0x5aa   : > { %2736 = vmatpush.msra.mxu2 %v6390_v59  ;;  %v2561_v13 = vadd.f32 %v8534_v41, %v8507_v49  ;;  %v2615_v63 = vadd.f32 %v8503_v12, %v2566_v31  ;;  %v8625_v26 = vadd.f32 %v8519_v34, %v2620_v54  ;;  %v2612_v0 = vadd.f32 %v8497_v2, %v2563_v10  ;;  %v6385_v12 = vld [vmem:[%s10403_s3 + $0xa0] sm:$0xff]  ;;  %v6384_v2 = vld [vmem:[%s10403_s3 + $0x98] sm:$0xff] }
 0x5ab   : > { %2694 = vmatpush.msra.mxu1 %v8556_v32  ;;  %v2617_v9 = vadd.f32 %v8509_v28, %v2568_v36  ;;  %v8615_v61 = vadd.f32 %v8525_v45, %v2622_v24  ;;  %v6386_v28 = vld [vmem:[%s10403_s3 + $0xa8] sm:$0xff]  ;;  %v2558_v45 = vadd.f32 %v8534_v41, %v8501_v27  ;;  %v2556_v34 = vadd.f32 %v8534_v41, %v8495_v55  ;;  %v6381_v41 = vld [vmem:[%s10403_s3 + $0x80] sm:$0xff]  ;;  %v7105_v54 = vld [vmem:[%s10401_s1 + $0x298] sm:$0xff] }
 0x5ac   : > { %2737 = vmatpush.msra.mxu2 %v6389_v15  ;;  %v2610_v37 = vadd.f32 %v8491_v3, %v2561_v13  ;;  %v8645_v27 = vadd.f32 %v8505_v22, %v2615_v63  ;;  %v8653_v21 = vadd.f32 %v8499_v23, %v2612_v0  ;;  %v6383_v3 = vld [vmem:[%s10403_s3 + $0x90] sm:$0xff]  ;;  %3494 = vmatpush.bf16.msra.mxu3 %v7117_v60  ;;  %v7114_v10 = vld [vmem:[%s10401_s1 + $0x2e0] sm:$0xff]  ;;  %v7113_v13 = vld [vmem:[%s10401_s1 + $0x2d8] sm:$0xff] }
 0x5ad   : > { %2695 = vmatpush.msra.mxu1 %v8563_v19  ;;  %v8635_v49 = vadd.f32 %v8511_v11, %v2617_v9  ;;  %v2607_v11 = vadd.f32 %v8487_v47, %v2558_v45  ;;  %v2605_v55 = vadd.f32 %v8483_v43, %v2556_v34  ;;  %v6382_v47 = vld [vmem:[%s10403_s3 + $0x88] sm:$0xff]  ;;  %v7104_v9 = vld [vmem:[%s10401_s1 + $0x290] sm:$0xff]  ;;  %v7102_v0 = vld [vmem:[%s10401_s1 + $0x280] sm:$0xff] }
 0x5ae   : > { %2738 = vmatpush.msra.mxu2 %v6388_v57  ;;  %v8661_v22 = vadd.f32 %v8493_v62, %v2610_v37  ;;  %v7229_v62 = vld [vmem:[%s10406_s6] sm:$0xff]  ;;  %v7103_v63 = vld [vmem:[%s10401_s1 + $0x288] sm:$0xff]  ;;  %v7112_v45 = vld [vmem:[%s10401_s1 + $0x2d0] sm:$0xff] }
 0x5af   : > { %2696 = vmatpush.msra.mxu1 %v8569_v1  ;;  %v8668_v23 = vadd.f32 %v8489_v16, %v2607_v11  ;;  %v8672_v43 = vadd.f32 %v8485_v52, %v2605_v55  ;;  %v8684_v16 = vld [vmem:[%s10405_s5] sm:$0xff]  ;;  %v7111_v34 = vld [vmem:[%s10401_s1 + $0x2c8] sm:$0xff] }
 0x5b0   : > { %2739 = vmatpush.msra.mxu2 %v6387_v30  ;;  %3495 = vmatpush.bf16.msra.mxu3 %v7116_v7  ;;  %v7098_v57 = vld [vmem:[%s10401_s1 + $0x260] sm:$0xff]  ;;  %v7097_v30 = vld [vmem:[%s10401_s1 + $0x258] sm:$0xff] }
 0x5b1   : > { %2697 = vmatpush.msra.mxu1 %v8576_v4  ;;  %v7094_v37 = vld [vmem:[%s10401_s1 + $0x240] sm:$0xff] }
 0x5b2   : > { %2740 = vmatpush.msra.mxu2 %v6386_v28  ;;  %v7096_v28 = vld [vmem:[%s10401_s1 + $0x250] sm:$0xff] }
 0x5b3   : > { %2698 = vmatpush.msra.mxu1 %v8584_v6 }
 0x5b4   : > { %2741 = vmatpush.msra.mxu2 %v6385_v12  ;;  %3496 = vmatpush.bf16.msra.mxu3 %v7115_v56  ;;  %v7095_v12 = vld [vmem:[%s10401_s1 + $0x248] sm:$0xff] }
 0x5b5   : > { %2699 = vmatpush.msra.mxu1 %v8594_v46 }
 0x5b6   : > { %2742 = vmatpush.msra.mxu2 %v6384_v2  ;;  %v7110_v2 = vld [vmem:[%s10401_s1 + $0x2c0] sm:$0xff] }
 0x5b7   : > { %2700 = vmatpush.msra.mxu1 %v8605_v25 }
 0x5b8   : > { %2743 = vmatpush.msra.mxu2 %v6383_v3  ;;  %3497 = vmatpush.bf16.msra.mxu3 %v7114_v10 }
 0x5b9   : > { %2701 = vmatpush.msra.mxu1 %v8615_v61 }
 0x5ba   : > { %2744 = vmatpush.msra.mxu2 %v6382_v47 }
 0x5bb   : > { %2702 = vmatpush.msra.mxu1 %v8625_v26 }
 0x5bc   : > { %2745 = vmatpush.msra.mxu2 %v6381_v41  ;;  %3498 = vmatpush.bf16.msra.mxu3 %v7113_v13 }
 0x5bd   : > { %2703 = vmatpush.msra.mxu1 %v8635_v49 }
 0x5be   : > { %2801 = vmatpush.msrb.mxu2 %v8684_v16 }
 0x5bf   : > { %2704 = vmatpush.msra.mxu1 %v8645_v27 }
 0x5c0   : > { %3499 = vmatpush.bf16.msra.mxu3 %v7112_v45 }
 0x5c1   : > { %2705 = vmatpush.msra.mxu1 %v8653_v21 }
 0x5c3   : > { %2706 = vmatpush.msra.mxu1 %v8661_v22 }
 0x5c4   : > { %3500 = vmatpush.bf16.msra.mxu3 %v7111_v34 }
 0x5c5   : > { %2707 = vmatpush.msra.mxu1 %v8668_v23 }
 0x5c7   : > { %2708 = vmatpush.msra.mxu1 %v8672_v43 }
 0x5c8   : > { %2709 = vmatmul.f32.vlgmr.msra.gmra.mxu1 %v7229_v62  ;;  %3501 = vmatpush.bf16.msra.mxu3 %v7110_v2 }
 0x5c9   : > { %2773 = vmatpush.msrb.mxu1 %v6397_v48 }
 0x5cb   : > { %3396 = vmatpush.bf16.msra.mxu1 %v7101_v17 }
 0x5cf   : > { %3397 = vmatpush.bf16.msra.mxu1 %v7100_v51 }
 0x5d3   : > { %3398 = vmatpush.bf16.msra.mxu1 %v7099_v50 }
 0x5d7   : > { %3399 = vmatpush.bf16.msra.mxu1 %v7098_v57 }
 0x5db   : > { %3400 = vmatpush.bf16.msra.mxu1 %v7097_v30 }
 0x5df   : > { %3401 = vmatpush.bf16.msra.mxu1 %v7096_v28 }
 0x5e3   : > { %3402 = vmatpush.bf16.msra.mxu1 %v7095_v12 }
 0x5e7   : > { %3403 = vmatpush.bf16.msra.mxu1 %v7094_v37 }
 0x645   : > { %v2710_v52 = vpop.f32.mrf.mxu1 }
 0x646   : > { %2746 = vmatmul.f32.vlgmr.msra.gmra.mxu2 %v2710_v52 }
 0x647   : > { %3445 = vmatpush.bf16.msra.mxu2 %v7109_v18 }
 0x64b   : > { %3446 = vmatpush.bf16.msra.mxu2 %v7108_v40 }
 0x64f   : > { %3447 = vmatpush.bf16.msra.mxu2 %v7107_v29 }
 0x653   : > { %3448 = vmatpush.bf16.msra.mxu2 %v7106_v33 }
 0x657   : > { %3449 = vmatpush.bf16.msra.mxu2 %v7105_v54 }
 0x65b   : > { %3450 = vmatpush.bf16.msra.mxu2 %v7104_v9  ;;  %v10643_v9 = vld [vmem:[#allocation2_spill] sm:$0xff] }
 0x65f   : > { %3451 = vmatpush.bf16.msra.mxu2 %v7103_v63 }
 0x663   : > { %3452 = vmatpush.bf16.msra.mxu2 %v7102_v0  ;;  %v10645_v0 = vld [vmem:[#allocation15_spill] sm:$0xff] }
 0x6c9   : > { %v2747_v35 = vpop.f32.mrf.mxu2 }
 0x6ca   : > { %vm2750_vm10 = vcmp.ge.f32.partialorder %v2747_v35, 0.0  ;;  %v2751_v42 = vmul.f32 0.01, %v2747_v35 }
 0x6cc   : > { %v2752_v44 = vsel %vm2750_vm10, %v2747_v35, %v2751_v42 }
 0x6cd   : > { %6398 = vmatmul.msk.f32.vlgmr.msrb.gmra.mxu1 %vm10638_vm12, %v2752_v44 }
 0x6ce   : > { %3699 = vmatpush.msrb.mxu1 %v8684_v16 }
 0x74a   : > { %v2775_v20 = vpop.f32.mrf.mxu1 }
 0x74b   : > { %v2778_v59 = vsub.f32 0.0, %v2775_v20 }
 0x74d   : > { %v2779_v36 = vmul.f32 1.442695, %v2778_v59 }
 0x74f   : > { %7217 = vpow2.f32 %v2779_v36 }
 0x755   : > { %v7218_v24 = vpop.eup %7217 }
 0x756   : > { %v2781_v15 = vadd.f32 1.0, %v7218_v24 }
 0x758   : > { %7219 = vrcp.f32 %v2781_v15 }
 0x75e   : > { %v7220_v31 = vpop.eup %7219 }
 0x75f   : > { %6399 = vmatmul.msk.f32.vlgmr.msrb.gmra.mxu2 %vm10639_vm15, %v7220_v31 }
 0x7e2   : > { %v8765_v11 = vpop.f32.mrf.mxu2 }
 0x7e3   : > { %v2807_v3 = vrot.slane %v8765_v11, 1  ;;  %v2813_v55 = vrot.slane %v8765_v11, 7  ;;  %v2814_v47 = vperm.slane %v8765_v11, 0 }
 0x7e5   : > { %v2815_v62 = vperm.slane %v2807_v3, 0  ;;  %v8770_v41 = vperm.slane %v2813_v55, 0  ;;  %v2830_v52 = vmul.f32 %v2814_v47, %v8672_v43  ;;  %v2831_v48 = vmul.f32 %v2814_v47, %v8668_v23 }
 0x7e7   : > { %v2832_v35 = vmul.f32 %v2815_v62, %v8661_v22  ;;  %v2845_v16 = vmul.f32 %v8770_v41, %v8546_v39  ;;  %v2846_v42 = vadd.f32 %v2830_v52, %v7937_v53  ;;  %v2847_v44 = vadd.f32 %v2831_v48, %v7940_v5 }
 0x7e8   : > { %v2833_v18 = vmul.f32 %v2815_v62, %v8653_v21 }
 0x7e9   : > { %vm2862_vm10 = vcmp.ge.f32.partialorder %v2846_v42, 0.0  ;;  %vm2863_vm12 = vcmp.ge.f32.partialorder %v2847_v44, 0.0  ;;  %v2878_v17 = vmul.f32 0.01, %v2846_v42  ;;  %v2879_v60 = vmul.f32 0.01, %v2847_v44 }
 0x7ea   : > { %v2861_v40 = vadd.f32 %v2845_v16, %v7949_v14  ;;  %v2848_v43 = vadd.f32 %v2832_v35, %v7954_v38  ;;  %v2849_v51 = vadd.f32 %v2833_v18, %v7975_v58  ;;  %v2808_v38 = vrot.slane %v8765_v11, 2  ;;  %v10647_v16 = vld [vmem:[#allocation18_spill] sm:$0xff] }
 0x7eb   : > { %v8782_v23 = vsel %vm2862_vm10, %v2846_v42, %v2878_v17  ;;  %v2895_v22 = vsel %vm2863_vm12, %v2847_v44, %v2879_v60  ;;  %vm10640_vm10 = vcmp.lt.s32.totalorder %v7323_v8, 1  ;;  %vm10641_vm12 = vcmp.lt.s32.totalorder %v7323_v8, 7 }
 0x7ec   : > { %v2910_v39 = vrot.slane %v8782_v23, 7  ;;  %v2911_v53 = vrot.slane %v2895_v22, 7  ;;  %v2958_v5 = vrot.slane %v8782_v23, 1  ;;  %v2959_v7 = vrot.slane %v2895_v22, 1  ;;  %vm10642_vm13 = vmmov %vm10640_vm10 }
 0x7ed   : > { %v3022_v21 = vpack.c.bf16 %v8782_v23, %v8782_v23  ;;  %v3023_v29 = vpack.c.bf16 %v2895_v22, %v2895_v22  ;;  %vm2877_vm15 = vcmp.ge.f32.partialorder %v2861_v40, 0.0  ;;  %v2893_v50 = vmul.f32 0.01, %v2861_v40 }
 0x7ee   : > { %vm2864_vm14 = vcmp.ge.f32.partialorder %v2848_v43, 0.0  ;;  %v2880_v14 = vmul.f32 0.01, %v2848_v43  ;;  %v2940_v58 = vsel %vm10640_vm10, %v2910_v39, %v2911_v53  ;;  %v2988_v24 = vsel %vm10641_vm12, %v2958_v5, %v2959_v7 }
 0x7ef   : > { %v3118_v56 = vunpack.c.l.b16 %v3022_v21  ;;  %v3119_v33 = vunpack.c.l.b16 %v3023_v29  ;;  %v8790_v20 = vsel %vm2877_vm15, %v2861_v40, %v2893_v50  ;;  %v2881_v54 = vmul.f32 0.01, %v2849_v51  ;;  %v10650_v21 = vld [vmem:[#allocation19_spill] sm:$0xff] }
 0x7f0   : > { %v2925_v59 = vrot.slane %v8790_v20, 7  ;;  %v2896_v36 = vsel %vm2864_vm14, %v2848_v43, %v2880_v14  ;;  %v3007_v10 = vpack.c.bf16 %v2940_v58, %v2940_v58  ;;  %vm2865_vm15 = vcmp.ge.f32.partialorder %v2849_v51, 0.0  ;;  %vm10644_vm14 = vmmov %vm10641_vm12 }
 0x7f1   : > { %v3134_v15 = vpack.c.b16 %v3119_v33, %v3118_v56  ;;  %v2960_v31 = vrot.slane %v2896_v36, 1  ;;  %v3038_v63 = vpack.c.bf16 %v2988_v24, %v2988_v24  ;;  %v2816_v28 = vperm.slane %v2808_v38, 0 }
 0x7f2   : > { %v2941_v57 = vsel %vm10642_vm13, %v2925_v59, %v2910_v39  ;;  %vm10646_vm10 = vnez %v10645_v0  ;;  %v8809_v37 = vsel %vm2865_vm15, %v2849_v51, %v2881_v54  ;;  %v2912_v2 = vrot.slane %v2896_v36, 7  ;;  %vm10648_vm15 = vmmov %vm10642_vm13 }
 0x7f3   : > { %3453 = vmatmul.bf16.vlgmr.msra.gmra.mxu2 %v3134_v15  ;;  %v2942_v30 = vsel %vm10630_vm11, 0.0, %v2941_v57  ;;  %v2987_v13 = vsel %vm10644_vm14, %v2959_v7, %v2960_v31  ;;  %v3071_v55 = vunpack.c.l.b16 %v3007_v10  ;;  %v2834_v47 = vmul.f32 %v2816_v28, %v8645_v27 }
 0x7f4   : > { %v3006_v45 = vpack.c.bf16 %v2942_v30, %v2942_v30  ;;  %v2991_v12 = vsel %vm10646_vm10, 0.0, %v2987_v13  ;;  %v3166_v62 = vunpack.c.l.b16 %v3038_v63  ;;  %v2913_v35 = vrot.slane %v8809_v37, 7 }
 0x7f5   : > { %v3039_v34 = vpack.c.bf16 %v2991_v12, %v2991_v12  ;;  %v2850_v42 = vadd.f32 %v2834_v47, %v10647_v16  ;;  %v2835_v44 = vmul.f32 %v2816_v28, %v8635_v49  ;;  %v3024_v17 = vpack.c.bf16 %v2896_v36, %v2896_v36  ;;  %v10653_v28 = vld [vmem:[#allocation20_spill] sm:$0xff] }
 0x7f6   : > { %v3070_v3 = vunpack.c.l.b16 %v3006_v45  ;;  %v3025_v60 = vpack.c.bf16 %v8809_v37, %v8809_v37  ;;  %v2939_v40 = vsel %vm10642_vm13, %v2911_v53, %v2912_v2  ;;  %v2961_v27 = vrot.slane %v8809_v37, 1  ;;  %vm10651_vm13 = vmmov %vm10644_vm14 }
 0x7f7   : > { %v3167_v52 = vunpack.c.l.b16 %v3039_v34  ;;  %vm2866_vm12 = vcmp.ge.f32.partialorder %v2850_v42, 0.0  ;;  %v2882_v43 = vmul.f32 0.01, %v2850_v42  ;;  %v2809_v22 = vrot.slane %v8765_v11, 3 }
 0x7f8   : > { %v3086_v48 = vpack.c.b16 %v3071_v55, %v3070_v3  ;;  %v2938_v51 = vsel %vm10648_vm15, %v2912_v2, %v2913_v35  ;;  %v2944_v39 = vsel %vm7413_vm2, 0.0, %v2939_v40  ;;  %v2851_v29 = vadd.f32 %v2835_v44, %v10650_v21 }
 0x7f9   : > { %v3182_v18 = vpack.c.b16 %v3167_v52, %v3166_v62  ;;  %v2898_v7 = vsel %vm2866_vm12, %v2850_v42, %v2882_v43  ;;  %v3120_v50 = vunpack.c.l.b16 %v3024_v17  ;;  %v3121_v14 = vunpack.c.l.b16 %v3025_v60  ;;  %v10655_v43 = vld [vmem:[#allocation21_spill] sm:$0xff] }
 0x7fa   : > { %3404 = vmatmul.bf16.vlgmr.msra.gmra.mxu1 %v3086_v48  ;;  %v2962_v53 = vrot.slane %v2898_v7, 1  ;;  %v2817_v38 = vperm.slane %v2809_v22, 0  ;;  %v2986_v56 = vsel %vm10644_vm14, %v2960_v31, %v2961_v27  ;;  %v3008_v33 = vpack.c.bf16 %v2944_v39, %v2944_v39 }
 0x7fb   : > { %3502 = vmatmul.bf16.vlgmr.msra.gmra.mxu3 %v3182_v18  ;;  %v3009_v58 = vpack.c.bf16 %v2938_v51, %v2938_v51  ;;  %v2883_v54 = vmul.f32 0.01, %v2851_v29  ;;  %v2810_v10 = vrot.slane %v8765_v11, 4  ;;  %v3135_v30 = vpack.c.b16 %v3121_v14, %v3120_v50 }
 0x7fc   : > { %v2985_v36 = vsel %vm10651_vm13, %v2961_v27, %v2962_v53  ;;  %v2836_v57 = vmul.f32 %v2817_v38, %v8625_v26  ;;  %v3040_v13 = vpack.c.bf16 %v2986_v56, %v2986_v56  ;;  %vm2867_vm12 = vcmp.ge.f32.partialorder %v2851_v29, 0.0 }
 0x7fd   : > { %v2993_v15 = vsel %vm7670_vm0, 0.0, %v2985_v36  ;;  %v3072_v31 = vunpack.c.l.b16 %v3008_v33  ;;  %v3073_v12 = vunpack.c.l.b16 %v3009_v58  ;;  %v2899_v34 = vsel %vm2867_vm12, %v2851_v29, %v2883_v54 }
 0x7fe   : > { %v3041_v63 = vpack.c.bf16 %v2993_v15, %v2993_v15  ;;  %v2852_v45 = vadd.f32 %v2836_v57, %v10653_v28  ;;  %v2818_v2 = vperm.slane %v2810_v10, 0  ;;  %v3168_v3 = vunpack.c.l.b16 %v3040_v13 }
 0x7ff   : > { %v2914_v47 = vrot.slane %v2898_v7, 7  ;;  %v2963_v26 = vrot.slane %v2899_v34, 1  ;;  %v2837_v48 = vmul.f32 %v2817_v38, %v8615_v61  ;;  %v3087_v16 = vpack.c.b16 %v3073_v12, %v3072_v31  ;;  %v10656_v61 = vld [vmem:[#allocation22_spill] sm:$0xff] }
 0x800   : > { %vm2868_vm15 = vcmp.ge.f32.partialorder %v2852_v45, 0.0  ;;  %v2884_v37 = vmul.f32 0.01, %v2852_v45  ;;  %v3169_v55 = vunpack.c.l.b16 %v3041_v63  ;;  %v2838_v42 = vmul.f32 %v2818_v2, %v8605_v25 }
 0x801   : > { %v2915_v18 = vrot.slane %v2899_v34, 7  ;;  %v3026_v17 = vpack.c.bf16 %v2898_v7, %v2898_v7  ;;  %v3027_v60 = vpack.c.bf16 %v2899_v34, %v2899_v34  ;;  %vm10654_vm14 = vcmp.lt.s32.totalorder %v7323_v8, 1 }
 0x802   : > { %v8835_v62 = vsel %vm2868_vm15, %v2852_v45, %v2884_v37  ;;  %v3183_v44 = vpack.c.b16 %v3169_v55, %v3168_v3  ;;  %v2937_v40 = vsel %vm10654_vm14, %v2913_v35, %v2914_v47  ;;  %v2853_v22 = vadd.f32 %v2837_v48, %v10655_v43  ;;  %vm10657_vm12 = vmmov %vm10654_vm14 }
 0x803   : > { %3458 = vmatmul.bf16.gmra.mxu2 %v3135_v30  ;;  %v2964_v52 = vrot.slane %v8835_v62, 1  ;;  %v2854_v51 = vadd.f32 %v2838_v42, %v10656_v61  ;;  %v3122_v39 = vunpack.c.l.b16 %v3026_v17  ;;  %v3123_v25 = vunpack.c.l.b16 %v3027_v60  ;;  %vm10659_vm15 = vmmov %vm10651_vm13  ;;  %v10661_v17 = vld [vmem:[#allocation23_spill] sm:$0xff] }
 0x804   : > { %v2936_v7 = vsel %vm10657_vm12, %v2914_v47, %v2915_v18  ;;  %v2946_v29 = vsel %vm7474_vm5, 0.0, %v2937_v40  ;;  %v2984_v35 = vsel %vm10659_vm15, %v2962_v53, %v2963_v26  ;;  %v2811_v38 = vrot.slane %v8765_v11, 5  ;;  %vm10662_vm15 = vmmov %vm10657_vm12 }
 0x805   : > { %v2983_v27 = vsel %vm10651_vm13, %v2963_v26, %v2964_v52  ;;  %v2885_v56 = vmul.f32 0.01, %v2853_v22  ;;  %v3010_v33 = vpack.c.bf16 %v2946_v29, %v2946_v29  ;;  %v3011_v58 = vpack.c.bf16 %v2936_v7, %v2936_v7 }
 0x806   : > { %v2995_v14 = vsel %vm7689_vm3, 0.0, %v2983_v27  ;;  %vm2869_vm14 = vcmp.ge.f32.partialorder %v2853_v22, 0.0  ;;  %v2886_v36 = vmul.f32 0.01, %v2854_v51  ;;  %v3136_v15 = vpack.c.b16 %v3123_v25, %v3122_v39 }
 0x807   : > { %v3042_v54 = vpack.c.bf16 %v2984_v35, %v2984_v35  ;;  %v3043_v57 = vpack.c.bf16 %v2995_v14, %v2995_v14  ;;  %vm2870_vm13 = vcmp.ge.f32.partialorder %v2854_v51, 0.0  ;;  %v2819_v10 = vperm.slane %v2811_v38, 0  ;;  %v10668_v14 = vld [vmem:[#allocation27_spill] sm:$0xff] }
 0x808   : > { %v2901_v30 = vsel %vm2869_vm14, %v2853_v22, %v2885_v56  ;;  %v2916_v13 = vrot.slane %v8835_v62, 7  ;;  %v3074_v53 = vunpack.c.l.b16 %v3010_v33  ;;  %v3075_v63 = vunpack.c.l.b16 %v3011_v58 }
 0x809   : > { %v8858_v28 = vsel %vm2870_vm13, %v2854_v51, %v2886_v36  ;;  %v3170_v45 = vunpack.c.l.b16 %v3042_v54  ;;  %v3171_v31 = vunpack.c.l.b16 %v3043_v57  ;;  %v2839_v12 = vmul.f32 %v2818_v2, %v8594_v46 }
 0x80a   : > { %3409 = vmatmul.bf16.gmra.mxu1 %v3087_v16  ;;  %v2812_v34 = vrot.slane %v8765_v11, 6  ;;  %v2917_v37 = vrot.slane %v2901_v30, 7  ;;  %v3028_v3 = vpack.c.bf16 %v8835_v62, %v8835_v62  ;;  %v2840_v55 = vmul.f32 %v2819_v10, %v8584_v6  ;;  %v10664_v6 = vld [vmem:[#allocation24_spill] sm:$0xff] }
 0x80b   : > { %3507 = vmatmul.bf16.gmra.mxu3 %v3183_v44  ;;  %v2965_v47 = vrot.slane %v2901_v30, 1  ;;  %v3029_v26 = vpack.c.bf16 %v2901_v30, %v2901_v30  ;;  %v2935_v48 = vsel %vm10657_vm12, %v2915_v18, %v2916_v13  ;;  %v2966_v16 = vrot.slane %v8858_v28, 1 }
 0x80c   : > { %v3088_v42 = vpack.c.b16 %v3075_v63, %v3074_v53  ;;  %v3184_v44 = vpack.c.b16 %v3171_v31, %v3170_v45  ;;  %v2855_v60 = vadd.f32 %v2839_v12, %v10661_v17  ;;  %v2820_v46 = vperm.slane %v2812_v34, 0 }
 0x80d   : > { %v2934_v11 = vsel %vm10662_vm15, %v2916_v13, %v2917_v37  ;;  %v2948_v40 = vsel %vm7510_vm7, 0.0, %v2935_v48  ;;  %v2856_v27 = vadd.f32 %v2840_v55, %v10664_v6  ;;  %v3124_v43 = vunpack.c.l.b16 %v3028_v3  ;;  %v10669_v13 = vld [vmem:[#allocation28_spill] sm:$0xff] }
 0x80e   : > { %v3125_v22 = vunpack.c.l.b16 %v3029_v26  ;;  %vm10665_vm14 = vcmp.lt.s32.totalorder %v7323_v8, 7  ;;  %v2843_v61 = vmul.f32 %v2820_v46, %v8563_v19  ;;  %v3012_v51 = vpack.c.bf16 %v2948_v40, %v2948_v40 }
 0x80f   : > { %v2981_v18 = vsel %vm10665_vm14, %v2965_v47, %v2966_v16  ;;  %v3013_v39 = vpack.c.bf16 %v2934_v11, %v2934_v11  ;;  %vm10666_vm13 = vmmov %vm10665_vm14  ;;  %v2887_v7 = vmul.f32 0.01, %v2855_v60  ;;  %vm2871_vm12 = vcmp.ge.f32.partialorder %v2855_v60, 0.0 }
 0x810   : > { %v2982_v25 = vsel %vm10666_vm13, %v2964_v52, %v2965_v47  ;;  %v2997_v35 = vsel %vm7448_vm4, 0.0, %v2981_v18  ;;  %v2859_v38 = vadd.f32 %v2843_v61, %v10668_v14  ;;  %v3137_v56 = vpack.c.b16 %v3125_v22, %v3124_v43  ;;  %v10676_v61 = vld [vmem:[#allocation25_spill] sm:$0xff] }
 0x811   : > { %v2888_v33 = vmul.f32 0.01, %v2856_v27  ;;  %v3044_v58 = vpack.c.bf16 %v2982_v25, %v2982_v25  ;;  %v2918_v36 = vrot.slane %v8858_v28, 7  ;;  %vm2872_vm15 = vcmp.ge.f32.partialorder %v2856_v27, 0.0 }
 0x812   : > { %v2844_v19 = vmul.f32 %v8770_v41, %v8556_v32  ;;  %v3076_v62 = vunpack.c.l.b16 %v3012_v51  ;;  %v3045_v54 = vpack.c.bf16 %v2997_v35, %v2997_v35  ;;  %v8889_v52 = vsel %vm2871_vm12, %v2855_v60, %v2887_v7 }
 0x813   : > { %3463 = vmatmul.bf16.gmra.mxu2 %v3136_v15  ;;  %v3077_v15 = vunpack.c.l.b16 %v3013_v39  ;;  %v2891_v57 = vmul.f32 0.01, %v2859_v38  ;;  %v8891_v30 = vsel %vm2872_vm15, %v2856_v27, %v2888_v33  ;;  %vm2875_vm14 = vcmp.ge.f32.partialorder %v2859_v38, 0.0 }
 0x814   : > { %v2860_v53 = vadd.f32 %v2844_v19, %v10669_v13  ;;  %v2973_v63 = vrot.slane %v8790_v20, 1  ;;  %v2919_v45 = vrot.slane %v8889_v52, 7  ;;  %v3030_v31 = vpack.c.bf16 %v8858_v28, %v8858_v28 }
 0x815   : > { %v3031_v32 = vpack.c.bf16 %v8889_v52, %v8889_v52  ;;  %vm10670_vm13 = vcmp.lt.s32.totalorder %v7323_v8, 1  ;;  %v3089_v12 = vpack.c.b16 %v3077_v15, %v3076_v62  ;;  %v3172_v34 = vunpack.c.l.b16 %v3044_v58 }
 0x816   : > { %v2933_v41 = vsel %vm10670_vm13, %v2917_v37, %v2918_v36  ;;  %v3173_v3 = vunpack.c.l.b16 %v3045_v54  ;;  %v2841_v55 = vmul.f32 %v2819_v10, %v8576_v4  ;;  %v2967_v47 = vrot.slane %v8889_v52, 1 }
 0x817   : > { %v2968_v26 = vrot.slane %v8891_v30, 1  ;;  %v8905_v48 = vsel %vm2875_vm14, %v2859_v38, %v2891_v57  ;;  %vm2876_vm12 = vcmp.ge.f32.partialorder %v2860_v53, 0.0  ;;  %v2892_v17 = vmul.f32 0.01, %v2860_v53  ;;  %vm10673_vm14 = vmmov %vm10670_vm13  ;;  %v10678_v38 = vld [vmem:[#allocation26_spill] sm:$0xff] }
 0x818   : > { %v3037_v60 = vpack.c.bf16 %v8790_v20, %v8790_v20  ;;  %vm10672_vm15 = vcmp.lt.s32.totalorder %v7323_v8, 7  ;;  %v3126_v4 = vunpack.c.l.b16 %v3030_v31  ;;  %v3127_v10 = vunpack.c.l.b16 %v3031_v32 }
 0x819   : > { %v2989_v37 = vsel %vm10672_vm15, %v2973_v63, %v2958_v5  ;;  %v2932_v11 = vsel %vm10673_vm14, %v2918_v36, %v2919_v45  ;;  %v2842_v40 = vmul.f32 %v2820_v46, %v8569_v1  ;;  %v3185_v6 = vpack.c.b16 %v3173_v3, %v3172_v34  ;;  %vm10675_vm13 = vmmov %vm10672_vm15 }
 0x81a   : > { %3414 = vmatmul.bf16.gmra.mxu1 %v3088_v42  ;;  %v2923_v27 = vrot.slane %v8905_v48, 7  ;;  %v8921_v43 = vsel %vm2876_vm12, %v2860_v53, %v2892_v17  ;;  %v3005_v23 = vsel %vm10602_vm1, 0.0, %v2989_v37  ;;  %v2979_v5 = vsel %vm10675_vm13, %v2967_v47, %v2968_v26  ;;  %vm10677_vm12 = vmmov %vm10675_vm13 }
 0x81b   : > { %3512 = vmatmul.bf16.gmra.mxu3 %v3184_v44  ;;  %v2950_v44 = vsel %vm7546_vm9, 0.0, %v2933_v41  ;;  %v2857_v51 = vadd.f32 %v2841_v55, %v10676_v61  ;;  %v2972_v39 = vrot.slane %v8921_v43, 1  ;;  %v3036_v1 = vpack.c.bf16 %v8921_v43, %v8921_v43  ;;  %vm10679_vm15 = vmmov %vm10677_vm12 }
 0x81c   : > { %v3014_v18 = vpack.c.bf16 %v2950_v44, %v2950_v44  ;;  %v8933_v46 = vunpack.c.l.b16 %v3037_v60  ;;  %v2924_v25 = vrot.slane %v8921_v43, 7  ;;  %v3053_v7 = vpack.c.bf16 %v3005_v23, %v3005_v23  ;;  %vm10680_vm13 = vmmov %vm10673_vm14 }
 0x81d   : > { %v3015_v35 = vpack.c.bf16 %v2932_v11, %v2932_v11  ;;  %v2980_v14 = vsel %vm10677_vm12, %v2966_v16, %v2967_v47  ;;  %v2974_v33 = vsel %vm10679_vm15, %v2972_v39, %v2973_v63  ;;  %v3138_v58 = vpack.c.b16 %v3127_v10, %v3126_v4 }
 0x81e   : > { %v8945_v36 = vunpack.c.l.b16 %v3036_v1  ;;  %v2926_v19 = vsel %vm10673_vm14, %v2924_v25, %v2925_v59  ;;  %v2927_v28 = vsel %vm10680_vm13, %v2923_v27, %v2924_v25  ;;  %v2999_v62 = vsel %vm7501_vm6, 0.0, %v2979_v5  ;;  %vm10683_vm14 = vmmov %vm10680_vm13 }
 0x81f   : > { %v2956_v54 = vsel %vm10599_vm8, 0.0, %v2927_v28  ;;  %v3021_v57 = vpack.c.bf16 %v2926_v19, %v2926_v19  ;;  %v3052_v13 = vpack.c.bf16 %v2974_v33, %v2974_v33  ;;  %v3046_v53 = vpack.c.bf16 %v2980_v14, %v2980_v14  ;;  %v10689_v33 = vld [vmem:[#allocation8_spill] sm:$0xff] }
 0x820   : > { %v3141_v20 = vpack.c.b16 %v8933_v46, %v8945_v36  ;;  %v3020_v63 = vpack.c.bf16 %v2956_v54, %v2956_v54  ;;  %v8961_v31 = vunpack.c.l.b16 %v3053_v7  ;;  %v2889_v59 = vmul.f32 0.01, %v2857_v51 }
 0x821   : > { %v8963_v41 = vunpack.c.l.b16 %v3021_v57  ;;  %v3047_v34 = vpack.c.bf16 %v2999_v62, %v2999_v62  ;;  %vm2873_vm12 = vcmp.ge.f32.partialorder %v2857_v51, 0.0  ;;  %v3078_v44 = vunpack.c.l.b16 %v3014_v18 }
 0x822   : > { %v8967_v3 = vunpack.c.l.b16 %v3020_v63  ;;  %v3079_v17 = vunpack.c.l.b16 %v3015_v35  ;;  %v2905_v60 = vsel %vm2873_vm12, %v2857_v51, %v2889_v59  ;;  %v3174_v4 = vunpack.c.l.b16 %v3046_v53  ;;  %vm10685_vm12 = vmmov %vm10683_vm14 }
 0x823   : > { %3468 = vmatmul.bf16.gmra.mxu2 %v3137_v56  ;;  %v2858_v56 = vadd.f32 %v2842_v40, %v10678_v38  ;;  %v3175_v10 = vunpack.c.l.b16 %v3047_v34  ;;  %v2920_v11 = vrot.slane %v8891_v30, 7  ;;  %v2969_v40 = vrot.slane %v2905_v60, 1  ;;  %v10686_v38 = vld [vmem:[#allocation11_spill] sm:$0xff] }
 0x824   : > { %v3093_v47 = vpack.c.b16 %v8963_v41, %v8967_v3  ;;  %v3090_v23 = vpack.c.b16 %v3079_v17, %v3078_v44  ;;  %v2921_v61 = vrot.slane %v2905_v60, 7  ;;  %v3032_v1 = vpack.c.bf16 %v8891_v30, %v8891_v30 }
 0x825   : > { %v2890_v32 = vmul.f32 0.01, %v2858_v56  ;;  %vm2874_vm15 = vcmp.ge.f32.partialorder %v2858_v56, 0.0  ;;  %v3186_v5 = vpack.c.b16 %v3175_v10, %v3174_v4  ;;  %v3033_v25 = vpack.c.bf16 %v2905_v60, %v2905_v60 }
 0x826   : > { %v2931_v18 = vsel %vm10683_vm14, %v2919_v45, %v2920_v11  ;;  %vm10684_vm13 = vcmp.lt.s32.totalorder %v7323_v8, 7  ;;  %v3128_v7 = vunpack.c.l.b16 %v3032_v1  ;;  %v2930_v14 = vsel %vm10685_vm12, %v2920_v11, %v2921_v61  ;;  %v10694_v11 = vld [vmem:[#allocation13_spill] sm:$0xff] }
 0x827   : > { %v2906_v37 = vsel %vm2874_vm15, %v2858_v56, %v2890_v32  ;;  %v3129_v35 = vunpack.c.l.b16 %v3033_v25  ;;  %vm10687_vm15 = vnez %v10686_v38  ;;  %vm10688_vm8 = vmmov %vm10684_vm13  ;;  %vm10690_vm1 = vnez %v10689_v33 }
 0x828   : > { %v2952_v56 = vsel %vm10687_vm15, 0.0, %v2931_v18  ;;  %v2978_v52 = vsel %vm10688_vm8, %v2968_v26, %v2969_v40  ;;  %v3017_v19 = vpack.c.bf16 %v2930_v14, %v2930_v14  ;;  %v2922_v59 = vrot.slane %v2906_v37, 7  ;;  %vm10691_vm8 = vmmov %vm10685_vm12 }
 0x829   : > { %v3139_v28 = vpack.c.b16 %v3129_v35, %v3128_v7  ;;  %v3048_v62 = vpack.c.bf16 %v2978_v52, %v2978_v52  ;;  %v2971_v32 = vrot.slane %v8905_v48, 1  ;;  %v3034_v44 = vpack.c.bf16 %v2906_v37, %v2906_v37  ;;  %vm10692_vm14 = vmmov %vm10684_vm13 }
 0x82a   : > { %3419 = vmatmul.bf16.gmra.mxu1 %v3089_v12  ;;  %v8965_v12 = vunpack.c.l.b16 %v3052_v13  ;;  %v3081_v13 = vunpack.c.l.b16 %v3017_v19  ;;  %v3035_v26 = vpack.c.bf16 %v8905_v48, %v8905_v48  ;;  %v2929_v17 = vsel %vm10691_vm8, %v2921_v61, %v2922_v59  ;;  %vm10696_vm15 = vmmov %vm10692_vm14 }
 0x82b   : > { %3517 = vmatmul.bf16.gmra.mxu3 %v3185_v6  ;;  %v2970_v6 = vrot.slane %v2906_v37, 1  ;;  %v3176_v53 = vunpack.c.l.b16 %v3048_v62  ;;  %v2975_v60 = vsel %vm10692_vm14, %v2971_v32, %v2972_v39  ;;  %v3130_v4 = vunpack.c.l.b16 %v3034_v44 }
 0x82c   : > { %v3189_v55 = vpack.c.b16 %v8961_v31, %v8965_v12  ;;  %v3131_v10 = vunpack.c.l.b16 %v3035_v26  ;;  %vm10695_vm12 = vnez %v10694_v11 }
 0x82d   : > { %v2977_v51 = vsel %vm10684_vm13, %v2969_v40, %v2970_v6  ;;  %vm10693_vm13 = vmmov %vm10691_vm8  ;;  %v2954_v40 = vsel %vm10695_vm12, 0.0, %v2929_v17 }
 0x82e   : > { %v3001_v45 = vsel %vm10690_vm1, 0.0, %v2977_v51  ;;  %v2928_v37 = vsel %vm10693_vm13, %v2922_v59, %v2923_v27  ;;  %v3018_v43 = vpack.c.bf16 %v2954_v40, %v2954_v40  ;;  %v3140_v25 = vpack.c.b16 %v3131_v10, %v3130_v4 }
 0x82f   : > { %v3049_v54 = vpack.c.bf16 %v3001_v45, %v3001_v45  ;;  %v3019_v1 = vpack.c.bf16 %v2928_v37, %v2928_v37 }
 0x830   : > { %v3082_v51 = vunpack.c.l.b16 %v3018_v43 }
 0x831   : > { %v3177_v63 = vunpack.c.l.b16 %v3049_v54  ;;  %v3083_v48 = vunpack.c.l.b16 %v3019_v1 }
 0x833   : > { %3473 = vmatmul.bf16.gmra.mxu2 %v3138_v58  ;;  %v3016_v58 = vpack.c.bf16 %v2952_v56, %v2952_v56  ;;  %v3187_v34 = vpack.c.b16 %v3177_v63, %v3176_v53  ;;  %v3092_v27 = vpack.c.b16 %v3083_v48, %v3082_v51 }
 0x835   : > { %v3080_v57 = vunpack.c.l.b16 %v3016_v58 }
 0x837   : > { %v3091_v30 = vpack.c.b16 %v3081_v13, %v3080_v57 }
 0x83a   : > { %3424 = vmatmul.bf16.gmra.mxu1 %v3090_v23  ;;  %v2976_v23 = vsel %vm10696_vm15, %v2970_v6, %v2971_v32  ;;  %v9023_v6 = vld [vmem:[%s10402_s2 + $0x3] ss:$0 sm:$0xff] }
 0x83b   : > { %3522 = vmatmul.bf16.gmra.mxu3 %v3186_v5  ;;  %v10697_v5 = vld [vmem:[#allocation10_spill] sm:$0xff]  ;;  %v3050_v39 = vpack.c.bf16 %v2976_v23, %v2976_v23 }
 0x83c   : > { %vm10698_vm8 = vnez %v10697_v5 }
 0x83d   : > { %v3003_v61 = vsel %vm10698_vm8, 0.0, %v2975_v60  ;;  %v3178_v7 = vunpack.c.l.b16 %v3050_v39 }
 0x83e   : > { %v3051_v18 = vpack.c.bf16 %v3003_v61, %v3003_v61 }
 0x840   : > { %v3179_v35 = vunpack.c.l.b16 %v3051_v18 }
 0x842   : > { %v3188_v14 = vpack.c.b16 %v3179_v35, %v3178_v7 }
 0x843   : > { %3478 = vmatmul.bf16.gmra.mxu2 %v3139_v28 }
 0x84a   : > { %3429 = vmatmul.bf16.gmra.mxu1 %v3091_v30 }
 0x84b   : > { %3527 = vmatmul.bf16.gmra.mxu3 %v3187_v34 }
 0x853   : > { %3483 = vmatmul.bf16.gmra.mxu2 %v3140_v25 }
 0x85a   : > { %3434 = vmatmul.bf16.gmra.mxu1 %v3092_v27 }
 0x85b   : > { %3532 = vmatmul.bf16.gmra.mxu3 %v3188_v14 }
 0x863   : > { %3488 = vmatmul.bf16.gmra.mxu2 %v3141_v20 }
 0x86a   : > { %3439 = vmatmul.bf16.gmra.mxu1 %v3093_v47 }
 0x86b   : > { %3537 = vmatmul.bf16.gmra.mxu3 %v3189_v55 }
 0x876   : > { %v3454_v56 = vpop.f32.mrf.mxu2 }
 0x877   : > { %v3405_v52 = vpop.f32.mrf.mxu1 }
 0x878   : > { %v3406_v45 = vadd.f32 %v9023_v6, %v3405_v52 }
 0x87a   : > { %v3455_v58 = vadd.f32 %v3454_v56, %v3406_v45 }
 0x87e   : > { %v3503_v46 = vpop.f32.mrf.mxu3  ;;  %v9026_v36 = vpop.f32.mrf.mxu2 }
 0x87f   : > { %v9028_v20 = vadd.f32 %v3503_v46, %v3455_v58  ;;  %v9030_v41 = vpop.f32.mrf.mxu1 }
 0x886   : > { %v9032_v3 = vpop.f32.mrf.mxu3  ;;  %v3459_v31 = vpop.f32.mrf.mxu2 }
 0x887   : > { %v3410_v12 = vpop.f32.mrf.mxu1 }
 0x888   : > { %v3411_v55 = vadd.f32 %v9023_v6, %v3410_v12 }
 0x88a   : > { %v3460_v47 = vadd.f32 %v3459_v31, %v3411_v55 }
 0x88e   : > { %v3508_v19 = vpop.f32.mrf.mxu3  ;;  %v9035_v28 = vpop.f32.mrf.mxu2 }
 0x88f   : > { %v9037_v62 = vadd.f32 %v3508_v19, %v3460_v47  ;;  %v9039_v54 = vpop.f32.mrf.mxu1 }
 0x896   : > { %v9041_v57 = vpop.f32.mrf.mxu3  ;;  %v3464_v13 = vpop.f32.mrf.mxu2 }
 0x897   : > { %v3415_v53 = vpop.f32.mrf.mxu1 }
 0x898   : > { %v3416_v63 = vadd.f32 %v9023_v6, %v3415_v53 }
 0x89a   : > { %v3465_v59 = vadd.f32 %v3464_v13, %v3416_v63 }
 0x89e   : > { %v3513_v32 = vpop.f32.mrf.mxu3  ;;  %v9044_v30 = vpop.f32.mrf.mxu2 }
 0x89f   : > { %v9046_v34 = vadd.f32 %v3513_v32, %v3465_v59  ;;  %v9048_v44 = vpop.f32.mrf.mxu1 }
 0x8a6   : > { %v9050_v26 = vpop.f32.mrf.mxu3  ;;  %v3469_v17 = vpop.f32.mrf.mxu2 }
 0x8a7   : > { %v3420_v60 = vpop.f32.mrf.mxu1 }
 0x8a8   : > { %v3421_v4 = vadd.f32 %v9023_v6, %v3420_v60 }
 0x8aa   : > { %v3470_v10 = vadd.f32 %v3469_v17, %v3421_v4 }
 0x8ae   : > { %v3518_v37 = vpop.f32.mrf.mxu3  ;;  %v9053_v40 = vpop.f32.mrf.mxu2 }
 0x8af   : > { %v9055_v23 = vadd.f32 %v3518_v37, %v3470_v10  ;;  %v3422_v61 = vpop.f32.mrf.mxu1 }
 0x8b6   : > { %v9057_v43 = vpop.f32.mrf.mxu3  ;;  %v3474_v1 = vpop.f32.mrf.mxu2 }
 0x8b7   : > { %v3425_v25 = vpop.f32.mrf.mxu1 }
 0x8be   : > { %v9059_v39 = vpop.f32.mrf.mxu3  ;;  %v3476_v18 = vpop.f32.mrf.mxu2 }
 0x8bf   : > { %v3427_v51 = vpop.f32.mrf.mxu1 }
 0x8c0   : > { %v3428_v42 = vadd.f32 %v9023_v6, %v3427_v51 }
 0x8c6   : > { %v3525_v48 = vpop.f32.mrf.mxu3  ;;  %v3479_v7 = vpop.f32.mrf.mxu2 }
 0x8c7   : > { %v3430_v35 = vpop.f32.mrf.mxu1 }
 0x8c8   : > { %v3431_v5 = vadd.f32 %v9023_v6, %v3430_v35  ;;  %v3423_v35 = vadd.f32 %v9023_v6, %v3422_v61 }
 0x8ce   : > { %v3528_v27 = vpop.f32.mrf.mxu3  ;;  %v3481_v14 = vpop.f32.mrf.mxu2 }
 0x8cf   : > { %v3432_v56 = vpop.f32.mrf.mxu1 }
 0x8d0   : > { %v3433_v4 = vadd.f32 %v9023_v6, %v3432_v56  ;;  %v3480_v56 = vadd.f32 %v3479_v7, %v3431_v5 }
 0x8d6   : > { %v3530_v52 = vpop.f32.mrf.mxu3  ;;  %v3484_v45 = vpop.f32.mrf.mxu2 }
 0x8d7   : > { %v3435_v58 = vpop.f32.mrf.mxu1 }
 0x8d8   : > { %v3436_v17 = vadd.f32 %v9023_v6, %v3435_v58 }
 0x8da   : > { %v3485_v38 = vadd.f32 %v3484_v45, %v3436_v17 }
 0x8de   : > { %v3533_v46 = vpop.f32.mrf.mxu3  ;;  %v3486_v12 = vpop.f32.mrf.mxu2 }
 0x8df   : > { %v3437_v31 = vpop.f32.mrf.mxu1  ;;  %v3534_v16 = vadd.f32 %v3533_v46, %v3485_v38  ;;  %v3408_v46 = vadd.f32 %v9023_v6, %v9030_v41  ;;  %v3563_v41 = vmul.f32 0.01, %v9046_v34 }
 0x8e0   : > { %v3438_v59 = vadd.f32 %v9023_v6, %v3437_v31  ;;  %v3482_v31 = vadd.f32 %v3481_v14, %v3433_v4  ;;  %v3561_v4 = vmul.f32 0.01, %v9037_v62 }
 0x8e1   : > { %v3571_v38 = vmul.f32 0.01, %v3534_v16  ;;  %vm3555_vm12 = vcmp.ge.f32.partialorder %v3534_v16, 0.0 }
 0x8e2   : > { %v3487_v37 = vadd.f32 %v3486_v12, %v3438_v59  ;;  %v3531_v12 = vadd.f32 %v3530_v52, %v3482_v31  ;;  %v3418_v52 = vadd.f32 %v9023_v6, %v9048_v44  ;;  %v3413_v44 = vadd.f32 %v9023_v6, %v9039_v54  ;;  %v6560_v31 = vld [vmem:[%s10403_s3 + $0x178] sm:$0xff] }
 0x8e3   : > { %v9083_v61 = vsel %vm3555_vm12, %v3534_v16, %v3571_v38  ;;  %v6549_v38 = vld [vmem:[%s10403_s3 + $0x120] sm:$0xff] }
 0x8e4   : > { %v3570_v5 = vmul.f32 0.01, %v3531_v12  ;;  %v3462_v54 = vadd.f32 %v9035_v28, %v3413_v44  ;;  %v7133_v44 = vld [vmem:[%s10401_s1 + $0x378] sm:$0xff] }
 0x8e6   : > { %v3535_v55 = vpop.f32.mrf.mxu3  ;;  %v3489_v19 = vpop.f32.mrf.mxu2 }
 0x8e7   : > { %v3440_v47 = vpop.f32.mrf.mxu1  ;;  %v3536_v33 = vadd.f32 %v3535_v55, %v3487_v37 }
 0x8e8   : > { %v3441_v53 = vadd.f32 %v9023_v6, %v3440_v47 }
 0x8e9   : > { %vm3556_vm13 = vcmp.ge.f32.partialorder %v3536_v33, 0.0 }
 0x8ea   : > { %v3490_v60 = vadd.f32 %v3489_v19, %v3441_v53  ;;  %v3426_v19 = vadd.f32 %v9023_v6, %v3425_v25 }
 0x8ec   : > { %v3475_v25 = vadd.f32 %v3474_v1, %v3426_v19  ;;  %v6556_v19 = vld [vmem:[%s10403_s3 + $0x158] sm:$0xff] }
 0x8ee   : > { %v3538_v13 = vpop.f32.mrf.mxu3  ;;  %v3491_v10 = vpop.f32.mrf.mxu2 }
 0x8ef   : > { %v3442_v63 = vpop.f32.mrf.mxu1  ;;  %v3539_v15 = vadd.f32 %v3538_v13, %v3490_v60  ;;  %v3572_v13 = vmul.f32 0.01, %v3536_v33 }
 0x8f0   : > { %v3443_v32 = vadd.f32 %v9023_v6, %v3442_v63  ;;  %v3457_v6 = vadd.f32 %v9026_v36, %v3408_v46  ;;  %v7140_v46 = vld [vmem:[%s10401_s1 + $0x3b0] sm:$0xff] }
 0x8f1   : > { %v3573_v58 = vmul.f32 0.01, %v3539_v15  ;;  %vm3557_vm14 = vcmp.ge.f32.partialorder %v3539_v15, 0.0  ;;  %v9076_v7 = vsel %vm3556_vm13, %v3536_v33, %v3572_v13  ;;  %v6553_v13 = vld [vmem:[%s10403_s3 + $0x140] sm:$0xff] }
 0x8f2   : > { %v3492_v22 = vadd.f32 %v3491_v10, %v3443_v32  ;;  %v3506_v17 = vadd.f32 %v9032_v3, %v3457_v6  ;;  %v3559_v3 = vmul.f32 0.01, %v9028_v20  ;;  %v7122_v6 = vld [vmem:[%s10401_s1 + $0x320] sm:$0xff] }
 0x8f3   : > { %v9073_v51 = vsel %vm3557_vm14, %v3539_v15, %v3573_v58  ;;  %v3524_v15 = vadd.f32 %v9059_v39, %v3475_v25  ;;  %v6557_v58 = vld [vmem:[%s10403_s3 + $0x160] sm:$0xff]  ;;  %v6548_v25 = vld [vmem:[%s10403_s3 + $0x118] sm:$0xff] }
 0x8f4   : > { %v3560_v10 = vmul.f32 0.01, %v3506_v17 }
 0x8f5   : > { %v3567_v16 = vmul.f32 0.01, %v3524_v15  ;;  %vm3551_vm12 = vcmp.ge.f32.partialorder %v3524_v15, 0.0 }
 0x8f6   : > { %v3540_v11 = vpop.f32.mrf.mxu3 }
 0x8f7   : > { %v3541_v47 = vadd.f32 %v3540_v11, %v3492_v22  ;;  %v3477_v22 = vadd.f32 %v3476_v18, %v3428_v42  ;;  %v3529_v11 = vadd.f32 %v3528_v27, %v3480_v56  ;;  %v3472_v42 = vadd.f32 %v9053_v40, %v3423_v35  ;;  %v6555_v56 = vld [vmem:[%s10403_s3 + $0x150] sm:$0xff]  ;;  %v6552_v35 = vld [vmem:[%s10403_s3 + $0x138] sm:$0xff] }
 0x8f8   : > { %v3467_v40 = vadd.f32 %v9044_v30, %v3418_v52  ;;  %v3565_v30 = vmul.f32 0.01, %v9055_v23  ;;  %v9104_v55 = vsel %vm3551_vm12, %v3524_v15, %v3567_v16  ;;  %vm3547_vm12 = vcmp.ge.f32.partialorder %v9046_v34, 0.0  ;;  %v6545_v52 = vld [vmem:[%s10403_s3 + $0x100] sm:$0xff]  ;;  %v6561_v15 = vld [vmem:[%s10404_s4 + $0x10] sm:$0xff]  ;;  %v7141_v16 = vld [vmem:[%s10401_s1 + $0x3b8] sm:$0xff] }
 0x8f9   : > { %vm3558_vm15 = vcmp.ge.f32.partialorder %v3541_v47, 0.0  ;;  %v3574_v63 = vmul.f32 0.01, %v3541_v47  ;;  %v3526_v14 = vadd.f32 %v3525_v48, %v3477_v22  ;;  %v3569_v18 = vmul.f32 0.01, %v3529_v11  ;;  %v6551_v22 = vld [vmem:[%s10403_s3 + $0x130] sm:$0xff]  ;;  %4328 = vmatpush.bf16.msra.mxu1 %v7141_v16 }
 0x8fa   : > { %vm3553_vm14 = vcmp.ge.f32.partialorder %v3529_v11, 0.0  ;;  %v3521_v1 = vadd.f32 %v9057_v43, %v3472_v42  ;;  %v3516_v27 = vadd.f32 %v9050_v26, %v3467_v40  ;;  %v3511_v26 = vadd.f32 %v9041_v57, %v3462_v54  ;;  %v7125_v40 = vld [vmem:[%s10401_s1 + $0x338] sm:$0xff]  ;;  %v7131_v54 = vld [vmem:[%s10401_s1 + $0x368] sm:$0xff] }
 0x8fb   : > { %v9069_v53 = vsel %vm3558_vm15, %v3541_v47, %v3574_v63  ;;  %vm3554_vm15 = vcmp.ge.f32.partialorder %v3531_v12, 0.0  ;;  %v3568_v33 = vmul.f32 0.01, %v3526_v14  ;;  %vm3552_vm13 = vcmp.ge.f32.partialorder %v3526_v14, 0.0  ;;  %v6559_v63 = vld [vmem:[%s10403_s3 + $0x170] sm:$0xff]  ;;  %4230 = vmatpush.bf16.msrb.mxu2 %v7125_v40 }
 0x8fc   : > { %3591 = vmatpush.msra.mxu0 %v9069_v53  ;;  %v9087_v48 = vsel %vm3554_vm15, %v3531_v12, %v3570_v5  ;;  %v9093_v39 = vsel %vm3553_vm14, %v3529_v11, %v3569_v18  ;;  %v3566_v45 = vmul.f32 0.01, %v3521_v1  ;;  %vm3550_vm15 = vcmp.ge.f32.partialorder %v3521_v1, 0.0  ;;  %v6554_v12 = vld [vmem:[%s10403_s3 + $0x148] sm:$0xff] }
 0x8fd   : > { %v9097_v43 = vsel %vm3552_vm13, %v3526_v14, %v3568_v33  ;;  %vm3549_vm14 = vcmp.ge.f32.partialorder %v9055_v23, 0.0  ;;  %v3564_v32 = vmul.f32 0.01, %v3516_v27  ;;  %vm3548_vm13 = vcmp.ge.f32.partialorder %v3516_v27, 0.0  ;;  %v6550_v11 = vld [vmem:[%s10403_s3 + $0x128] sm:$0xff]  ;;  %v6547_v14 = vld [vmem:[%s10403_s3 + $0x110] sm:$0xff]  ;;  %4329 = vmatpush.bf16.msra.mxu1 %v7140_v46 }
 0x8fe   : > { %3592 = vmatpush.msra.mxu0 %v9073_v51  ;;  %v9109_v59 = vsel %vm3550_vm15, %v3521_v1, %v3566_v45  ;;  %v9115_v28 = vsel %vm3549_vm14, %v9055_v23, %v3565_v30  ;;  %v3562_v60 = vmul.f32 0.01, %v3511_v26  ;;  %vm3546_vm15 = vcmp.ge.f32.partialorder %v3511_v26, 0.0  ;;  %v6546_v5 = vld [vmem:[%s10403_s3 + $0x108] sm:$0xff]  ;;  %v7124_v45 = vld [vmem:[%s10401_s1 + $0x330] sm:$0xff] }
 0x8ff   : > { %v9120_v57 = vsel %vm3548_vm13, %v3516_v27, %v3564_v32  ;;  %v9125_v36 = vsel %vm3547_vm12, %v9046_v34, %v3563_v41  ;;  %vm3545_vm14 = vcmp.ge.f32.partialorder %v9037_v62, 0.0  ;;  %vm3544_vm13 = vcmp.ge.f32.partialorder %v3506_v17, 0.0  ;;  %v7132_v27 = vld [vmem:[%s10401_s1 + $0x370] sm:$0xff]  ;;  %4231 = vmatpush.bf16.msrb.mxu2 %v7124_v45  ;;  %v7123_v30 = vld [vmem:[%s10401_s1 + $0x328] sm:$0xff]  ;;  %v7130_v32 = vld [vmem:[%s10401_s1 + $0x360] sm:$0xff] }
 0x900   : > { %3593 = vmatpush.msra.mxu0 %v9076_v7  ;;  %v9129_v23 = vsel %vm3546_vm15, %v3511_v26, %v3562_v60  ;;  %v9134_v37 = vsel %vm3545_vm14, %v9037_v62, %v3561_v4  ;;  %vm3543_vm12 = vcmp.ge.f32.partialorder %v9028_v20, 0.0  ;;  %v9138_v34 = vsel %vm3544_vm13, %v3506_v17, %v3560_v10  ;;  %v7231_v62 = vld [vmem:[%s10406_s6] sm:$0xff]  ;;  %v7139_v26 = vld [vmem:[%s10401_s1 + $0x3a8] sm:$0xff]  ;;  %v7129_v10 = vld [vmem:[%s10401_s1 + $0x358] sm:$0xff] }
 0x901   : > { %v9142_v47 = vsel %vm3543_vm12, %v9028_v20, %v3559_v3  ;;  %v6558_v20 = vld [vmem:[%s10403_s3 + $0x168] sm:$0xff]  ;;  %vm10699_vm14 = vcmask 64512   ;;  %4330 = vmatpush.bf16.msra.mxu1 %v7139_v26  ;;  %v7138_v17 = vld [vmem:[%s10401_s1 + $0x3a0] sm:$0xff]  ;;  %vm10702_vm12 = vcmp.lt.s32.totalorder %v7323_v8, 1 }
 0x902   : > { %3594 = vmatpush.msra.mxu0 %v9083_v61  ;;  %vm10700_vm13 = vmmov %vm10699_vm14 }
 0x903   : > { %4232 = vmatpush.bf16.msrb.mxu2 %v7123_v30 }
 0x904   : > { %3595 = vmatpush.msra.mxu0 %v9087_v48 }
 0x905   : > { %4331 = vmatpush.bf16.msra.mxu1 %v7138_v17 }
 0x906   : > { %3596 = vmatpush.msra.mxu0 %v9093_v39 }
 0x907   : > { %4233 = vmatpush.bf16.msrb.mxu2 %v7122_v6 }
 0x908   : > { %3597 = vmatpush.msra.mxu0 %v9097_v43 }
 0x90a   : > { %3598 = vmatpush.msra.mxu0 %v9104_v55 }
 0x90c   : > { %3599 = vmatpush.msra.mxu0 %v9109_v59 }
 0x90e   : > { %3600 = vmatpush.msra.mxu0 %v9115_v28 }
 0x910   : > { %3601 = vmatpush.msra.mxu0 %v9120_v57 }
 0x912   : > { %3602 = vmatpush.msra.mxu0 %v9125_v36 }
 0x914   : > { %3603 = vmatpush.msra.mxu0 %v9129_v23 }
 0x916   : > { %3604 = vmatpush.msra.mxu0 %v9134_v37 }
 0x918   : > { %3605 = vmatpush.msra.mxu0 %v9138_v34 }
 0x91a   : > { %3606 = vmatpush.msra.mxu0 %v9142_v47 }
 0x91b   : > { %3607 = vmatmul.f32.vlgmr.msra.gmra.mxu0 %v7231_v62 }
 0x91c   : > { %3628 = vmatpush.msrb.mxu0 %v6560_v31 }
 0x91e   : > { %3629 = vmatpush.msrb.mxu0 %v6559_v63  ;;  %v7128_v63 = vld [vmem:[%s10401_s1 + $0x350] sm:$0xff] }
 0x920   : > { %3630 = vmatpush.msrb.mxu0 %v6558_v20  ;;  %v7121_v20 = vld [vmem:[%s10401_s1 + $0x318] sm:$0xff] }
 0x921   : > { %4234 = vmatpush.bf16.msrb.mxu2 %v7121_v20 }
 0x922   : > { %3631 = vmatpush.msrb.mxu0 %v6557_v58  ;;  %v7137_v58 = vld [vmem:[%s10401_s1 + $0x398] sm:$0xff] }
 0x923   : > { %4332 = vmatpush.bf16.msra.mxu1 %v7137_v58 }
 0x924   : > { %3632 = vmatpush.msrb.mxu0 %v6556_v19  ;;  %v7127_v19 = vld [vmem:[%s10401_s1 + $0x348] sm:$0xff] }
 0x926   : > { %3633 = vmatpush.msrb.mxu0 %v6555_v56  ;;  %v7120_v56 = vld [vmem:[%s10401_s1 + $0x310] sm:$0xff] }
 0x927   : > { %4235 = vmatpush.bf16.msrb.mxu2 %v7120_v56 }
 0x928   : > { %3634 = vmatpush.msrb.mxu0 %v6554_v12  ;;  %v7136_v12 = vld [vmem:[%s10401_s1 + $0x390] sm:$0xff] }
 0x929   : > { %4333 = vmatpush.bf16.msra.mxu1 %v7136_v12 }
 0x92a   : > { %3635 = vmatpush.msrb.mxu0 %v6553_v13  ;;  %v7126_v13 = vld [vmem:[%s10401_s1 + $0x340] sm:$0xff] }
 0x92c   : > { %3636 = vmatpush.msrb.mxu0 %v6552_v35  ;;  %v7119_v35 = vld [vmem:[%s10401_s1 + $0x308] sm:$0xff] }
 0x92d   : > { %4236 = vmatpush.bf16.msrb.mxu2 %v7119_v35 }
 0x92e   : > { %3637 = vmatpush.msrb.mxu0 %v6551_v22  ;;  %v7135_v22 = vld [vmem:[%s10401_s1 + $0x388] sm:$0xff] }
 0x92f   : > { %4334 = vmatpush.bf16.msra.mxu1 %v7135_v22 }
 0x930   : > { %3638 = vmatpush.msrb.mxu0 %v6550_v11  ;;  %v7118_v11 = vld [vmem:[%s10401_s1 + $0x300] sm:$0xff] }
 0x931   : > { %4237 = vmatpush.bf16.msrb.mxu2 %v7118_v11 }
 0x932   : > { %3639 = vmatpush.msrb.mxu0 %v6549_v38  ;;  %v7134_v38 = vld [vmem:[%s10401_s1 + $0x380] sm:$0xff] }
 0x933   : > { %4335 = vmatpush.bf16.msra.mxu1 %v7134_v38 }
 0x934   : > { %3640 = vmatpush.msrb.mxu0 %v6548_v25 }
 0x936   : > { %3641 = vmatpush.msrb.mxu0 %v6547_v14 }
 0x938   : > { %3642 = vmatpush.msrb.mxu0 %v6546_v5 }
 0x93a   : > { %3643 = vmatpush.msrb.mxu0 %v6545_v52 }
 0x93c   : > { %3671 = vmatpush.msra.mxu0 %v6561_v15 }
 0x998   : > { %v3608_v42 = vpop.f32.mrf.mxu0 }
 0x999   : > { %3644 = vmatmul.f32.vlgmr.msrb.gmra.mxu0 %v3608_v42 }
 0x99a   : > { %4279 = vmatpush.bf16.msrb.mxu0 %v7133_v44 }
 0x99e   : > { %4280 = vmatpush.bf16.msrb.mxu0 %v7132_v27 }
 0x9a2   : > { %4281 = vmatpush.bf16.msrb.mxu0 %v7131_v54 }
 0x9a6   : > { %4282 = vmatpush.bf16.msrb.mxu0 %v7130_v32 }
 0x9aa   : > { %4283 = vmatpush.bf16.msrb.mxu0 %v7129_v10 }
 0x9ae   : > { %4284 = vmatpush.bf16.msrb.mxu0 %v7128_v63 }
 0x9b2   : > { %4285 = vmatpush.bf16.msrb.mxu0 %v7127_v19 }
 0x9b6   : > { %4286 = vmatpush.bf16.msrb.mxu0 %v7126_v13 }
 0xa16   : > { %v3645_v18 = vpop.f32.mrf.mxu0 }
 0xa17   : > { %vm3648_vm15 = vcmp.ge.f32.partialorder %v3645_v18, 0.0  ;;  %v3649_v1 = vmul.f32 0.01, %v3645_v18 }
 0xa19   : > { %v3650_v33 = vsel %vm3648_vm15, %v3645_v18, %v3649_v1  ;;  %vm10703_vm15 = vcmp.lt.s32.totalorder %v7323_v8, 7 }
 0xa1a   : > { %6562 = vmatmul.msk.f32.vlgmr.msra.gmra.mxu0 %vm10699_vm14, %v3650_v33  ;;  %vm10704_vm14 = vmmov %vm10703_vm15 }
 0xa97   : > { %v3673_v41 = vpop.f32.mrf.mxu0 }
 0xa98   : > { %v3676_v60 = vsub.f32 0.0, %v3673_v41 }
 0xa9a   : > { %v3677_v4 = vmul.f32 1.442695, %v3676_v60 }
 0xa9c   : > { %7221 = vpow2.f32 %v3677_v4 }
 0xaa2   : > { %v7222_v3 = vpop.eup %7221 }
 0xaa3   : > { %v3679_v31 = vadd.f32 1.0, %v7222_v3 }
 0xaa5   : > { %7223 = vrcp.f32 %v3679_v31 }
 0xaab   : > { %v7224_v62 = vpop.eup %7223 }
 0xaac   : > { %6563 = vmatmul.msk.f32.vlgmr.msrb.gmra.mxu1 %vm10700_vm13, %v7224_v62  ;;  %vm10705_vm13 = vmmov %vm10702_vm12 }
 0xb29   : > { %v9273_v25 = vpop.f32.mrf.mxu1 }
 0xb2a   : > { %v3705_v14 = vrot.slane %v9273_v25, 1  ;;  %v3706_v5 = vrot.slane %v9273_v25, 2  ;;  %v3711_v52 = vrot.slane %v9273_v25, 7  ;;  %v3712_v42 = vperm.slane %v9273_v25, 0 }
 0xb2b   : > { %v3707_v38 = vrot.slane %v9273_v25, 3 }
 0xb2c   : > { %v3713_v15 = vperm.slane %v3705_v14, 0  ;;  %v3714_v18 = vperm.slane %v3706_v5, 0  ;;  %v9279_v1 = vperm.slane %v3711_v52, 0  ;;  %v9282_v33 = vmul.f32 %v3712_v42, %v9142_v47 }
 0xb2d   : > { %v9285_v44 = vmul.f32 %v3712_v42, %v9138_v34 }
 0xb2e   : > { %v9288_v40 = vmul.f32 %v3713_v15, %v9134_v37  ;;  %v9292_v16 = vmul.f32 %v9279_v1, %v9069_v53  ;;  %v3856_v27 = vpack.c.bf16 %v9282_v33, %v9282_v33  ;;  %v3744_v45 = vrot.slane %v9282_v33, 7 }
 0xb2f   : > { %v3792_v46 = vrot.slane %v9282_v33, 1  ;;  %v3857_v47 = vpack.c.bf16 %v9285_v44, %v9285_v44  ;;  %v3745_v34 = vrot.slane %v9285_v44, 7  ;;  %v3793_v54 = vrot.slane %v9285_v44, 1 }
 0xb30   : > { %v3794_v37 = vrot.slane %v9288_v40, 1  ;;  %v3952_v30 = vunpack.c.l.b16 %v3856_v27  ;;  %v3759_v53 = vrot.slane %v9292_v16, 7  ;;  %v9305_v26 = vmul.f32 %v3713_v15, %v9129_v23 }
 0xb31   : > { %v9308_v32 = vmul.f32 %v3714_v18, %v9125_v36  ;;  %v3953_v6 = vunpack.c.l.b16 %v3857_v47  ;;  %v3774_v41 = vsel %vm10702_vm12, %v3744_v45, %v3745_v34  ;;  %v3822_v60 = vsel %vm10704_vm14, %v3792_v46, %v3793_v54  ;;  %vm10706_vm12 = vmmov %vm10704_vm14 }
 0xb32   : > { %v3821_v17 = vsel %vm10703_vm15, %v3793_v54, %v3794_v37  ;;  %v3775_v23 = vsel %vm10705_vm13, %v3759_v53, %v3744_v45  ;;  %v3841_v4 = vpack.c.bf16 %v3774_v41, %v3774_v41  ;;  %v3872_v10 = vpack.c.bf16 %v3822_v60, %v3822_v60  ;;  %vm10707_vm15 = vmmov %vm10705_vm13 }
 0xb33   : > { %10701 = vst [vmem:[#allocation2_spill] sm:$0xff] %v9308_v32  ;;  %v3825_v36 = vsel %vm10646_vm10, 0.0, %v3821_v17  ;;  %v3968_v3 = vpack.c.b16 %v3953_v6, %v3952_v30  ;;  %v3776_v31 = vsel %vm10630_vm11, 0.0, %v3775_v23  ;;  %v3795_v19 = vrot.slane %v9305_v26, 1  ;;  %vm10708_vm14 = vmmov %vm10706_vm12 }
 0xb34   : > { %v3873_v62 = vpack.c.bf16 %v3825_v36, %v3825_v36  ;;  %v3840_v63 = vpack.c.bf16 %v3776_v31, %v3776_v31  ;;  %v4000_v20 = vunpack.c.l.b16 %v3872_v10  ;;  %v3905_v12 = vunpack.c.l.b16 %v3841_v4 }
 0xb35   : > { %4287 = vmatmul.bf16.vlgmr.msrb.gmra.mxu0 %v3968_v3  ;;  %v3746_v13 = vrot.slane %v9288_v40, 7  ;;  %v3796_v35 = vrot.slane %v9308_v32, 1  ;;  %v3747_v14 = vrot.slane %v9305_v26, 7  ;;  %v3858_v42 = vpack.c.bf16 %v9288_v40, %v9288_v40 }
 0xb36   : > { %v4001_v58 = vunpack.c.l.b16 %v3873_v62  ;;  %v3904_v56 = vunpack.c.l.b16 %v3840_v63  ;;  %v3859_v15 = vpack.c.bf16 %v9305_v26, %v9305_v26  ;;  %v3820_v27 = vsel %vm10708_vm14, %v3794_v37, %v3795_v19  ;;  %vm10712_vm14 = vmmov %vm10706_vm12 }
 0xb37   : > { %v3819_v5 = vsel %vm10706_vm12, %v3795_v19, %v3796_v35  ;;  %v3773_v52 = vsel %vm10707_vm15, %v3745_v34, %v3746_v13  ;;  %v3715_v47 = vperm.slane %v3707_v38, 0  ;;  %v3772_v54 = vsel %vm10705_vm13, %v3746_v13, %v3747_v14  ;;  %vm10711_vm15 = vmmov %vm10705_vm13 }
 0xb38   : > { %v4016_v22 = vpack.c.b16 %v4001_v58, %v4000_v20  ;;  %v3920_v11 = vpack.c.b16 %v3905_v12, %v3904_v56  ;;  %v3827_v45 = vsel %vm7670_vm0, 0.0, %v3819_v5  ;;  %v3778_v30 = vsel %vm7413_vm2, 0.0, %v3773_v52 }
 0xb39   : > { %v3954_v34 = vunpack.c.l.b16 %v3858_v42  ;;  %v3955_v6 = vunpack.c.l.b16 %v3859_v15  ;;  %v3874_v41 = vpack.c.bf16 %v3820_v27, %v3820_v27  ;;  %v3875_v17 = vpack.c.bf16 %v3827_v45, %v3827_v45 }
 0xb3a   : > { %4336 = vmatmul.bf16.vlgmr.msra.gmra.mxu1 %v4016_v22  ;;  %4238 = vmatmul.bf16.vlgmr.msrb.gmra.mxu2 %v3920_v11  ;;  %v3842_v60 = vpack.c.bf16 %v3778_v30, %v3778_v30  ;;  %v3843_v23 = vpack.c.bf16 %v3772_v54, %v3772_v54  ;;  %v9348_v4 = vmul.f32 %v3714_v18, %v9120_v57  ;;  %v3748_v58 = vrot.slane %v9308_v32, 7 }
 0xb3b   : > { %v9351_v37 = vmul.f32 %v3715_v47, %v9115_v28  ;;  %v3969_v36 = vpack.c.b16 %v3955_v6, %v3954_v34  ;;  %v4002_v10 = vunpack.c.l.b16 %v3874_v41  ;;  %v4003_v3 = vunpack.c.l.b16 %v3875_v17 }
 0xb3c   : > { %10709 = vst [vmem:[#allocation18_spill] sm:$0xff] %v9348_v4  ;;  %v3906_v31 = vunpack.c.l.b16 %v3842_v60  ;;  %v3907_v62 = vunpack.c.l.b16 %v3843_v23  ;;  %v3797_v63 = vrot.slane %v9348_v4, 1  ;;  %v3708_v57 = vrot.slane %v9273_v25, 4 }
 0xb3d   : > { %10710 = vst [vmem:[#allocation19_spill] sm:$0xff] %v9351_v37  ;;  %v3798_v20 = vrot.slane %v9351_v37, 1  ;;  %v4017_v19 = vpack.c.b16 %v4003_v3, %v4002_v10  ;;  %v3749_v28 = vrot.slane %v9348_v4, 7  ;;  %v3771_v12 = vsel %vm10711_vm15, %v3747_v14, %v3748_v58  ;;  %vm10715_vm15 = vmmov %vm10705_vm13 }
 0xb3e   : > { %v3921_v56 = vpack.c.b16 %v3907_v62, %v3906_v31  ;;  %v3860_v13 = vpack.c.bf16 %v9308_v32, %v9308_v32  ;;  %v3861_v22 = vpack.c.bf16 %v9348_v4, %v9348_v4  ;;  %v3818_v11 = vsel %vm10712_vm14, %v3796_v35, %v3797_v63  ;;  %vm10716_vm14 = vmmov %vm10706_vm12 }
 0xb3f   : > { %v3817_v18 = vsel %vm10706_vm12, %v3797_v63, %v3798_v20  ;;  %v3716_v5 = vperm.slane %v3708_v57, 0  ;;  %v3770_v52 = vsel %vm10705_vm13, %v3748_v58, %v3749_v28  ;;  %v3780_v42 = vsel %vm7474_vm5, 0.0, %v3771_v12 }
 0xb40   : > { %v3829_v38 = vsel %vm7689_vm3, 0.0, %v3817_v18  ;;  %v3956_v14 = vunpack.c.l.b16 %v3860_v13  ;;  %v3957_v15 = vunpack.c.l.b16 %v3861_v22  ;;  %v3876_v27 = vpack.c.bf16 %v3818_v11, %v3818_v11 }
 0xb41   : > { %v3877_v45 = vpack.c.bf16 %v3829_v38, %v3829_v38  ;;  %v3844_v54 = vpack.c.bf16 %v3780_v42, %v3780_v42  ;;  %v3845_v30 = vpack.c.bf16 %v3770_v52, %v3770_v52  ;;  %v9375_v34 = vmul.f32 %v3715_v47, %v9109_v59 }
 0xb42   : > { %v9378_v35 = vmul.f32 %v3716_v5, %v9104_v55  ;;  %v3970_v6 = vpack.c.b16 %v3957_v15, %v3956_v14  ;;  %v4004_v41 = vunpack.c.l.b16 %v3876_v27  ;;  %v3750_v3 = vrot.slane %v9351_v37, 7 }
 0xb43   : > { %10713 = vst [vmem:[#allocation20_spill] sm:$0xff] %v9375_v34  ;;  %v4005_v17 = vunpack.c.l.b16 %v3877_v45  ;;  %v3908_v60 = vunpack.c.l.b16 %v3844_v54  ;;  %v3909_v23 = vunpack.c.l.b16 %v3845_v30  ;;  %v3709_v59 = vrot.slane %v9273_v25, 5 }
 0xb44   : > { %10714 = vst [vmem:[#allocation21_spill] sm:$0xff] %v9378_v35  ;;  %v3800_v10 = vrot.slane %v9378_v35, 1  ;;  %v3751_v55 = vrot.slane %v9375_v34, 7  ;;  %v3769_v63 = vsel %vm10715_vm15, %v3749_v28, %v3750_v3  ;;  %v3862_v58 = vpack.c.bf16 %v9351_v37, %v9351_v37  ;;  %vm10719_vm15 = vmmov %vm10705_vm13 }
 0xb45   : > { %4292 = vmatmul.bf16.gmra.mxu0 %v3969_v36  ;;  %v3799_v36 = vrot.slane %v9375_v34, 1  ;;  %v4018_v31 = vpack.c.b16 %v4005_v17, %v4004_v41  ;;  %v3922_v62 = vpack.c.b16 %v3909_v23, %v3908_v60  ;;  %v3717_v18 = vperm.slane %v3709_v59, 0 }
 0xb46   : > { %v3768_v12 = vsel %vm10705_vm13, %v3750_v3, %v3751_v55  ;;  %v3782_v13 = vsel %vm7510_vm7, 0.0, %v3769_v63  ;;  %v3958_v28 = vunpack.c.l.b16 %v3862_v58  ;;  %v9402_v14 = vmul.f32 %v3716_v5, %v9097_v43 }
 0xb47   : > { %v3815_v47 = vsel %vm10706_vm12, %v3799_v36, %v3800_v10  ;;  %v3846_v52 = vpack.c.bf16 %v3782_v13, %v3782_v13  ;;  %v3847_v42 = vpack.c.bf16 %v3768_v12, %v3768_v12  ;;  %v3752_v17 = vrot.slane %v9378_v35, 7 }
 0xb48   : > { %v3831_v57 = vsel %vm7448_vm4, 0.0, %v3815_v47  ;;  %10717 = vst [vmem:[#allocation22_spill] sm:$0xff] %v9402_v14  ;;  %v3710_v43 = vrot.slane %v9273_v25, 6  ;;  %v3864_v3 = vpack.c.bf16 %v9378_v35, %v9378_v35 }
 0xb49   : > { %v3879_v38 = vpack.c.bf16 %v3831_v57, %v3831_v57  ;;  %v3910_v54 = vunpack.c.l.b16 %v3846_v52  ;;  %v3911_v30 = vunpack.c.l.b16 %v3847_v42 }
 0xb4a   : > { %4341 = vmatmul.bf16.gmra.mxu1 %v4017_v19  ;;  %4243 = vmatmul.bf16.gmra.mxu2 %v3921_v56  ;;  %v3863_v19 = vpack.c.bf16 %v9375_v34, %v9375_v34  ;;  %v3816_v56 = vsel %vm10716_vm14, %v3798_v20, %v3799_v36  ;;  %v9405_v20 = vmul.f32 %v3717_v18, %v9093_v39  ;;  %v3753_v39 = vrot.slane %v9402_v14, 7  ;;  %vm10720_vm14 = vmmov %vm10706_vm12 }
 0xb4b   : > { %v3878_v11 = vpack.c.bf16 %v3816_v56, %v3816_v56  ;;  %v4007_v45 = vunpack.c.l.b16 %v3879_v38  ;;  %v3923_v23 = vpack.c.b16 %v3911_v30, %v3910_v54  ;;  %v3767_v36 = vsel %vm10719_vm15, %v3751_v55, %v3752_v17  ;;  %vm10725_vm15 = vmmov %vm10705_vm13 }
 0xb4c   : > { %v3959_v22 = vunpack.c.l.b16 %v3863_v19  ;;  %10718 = vst [vmem:[#allocation23_spill] sm:$0xff] %v9405_v20  ;;  %v3802_v41 = vrot.slane %v9405_v20, 1  ;;  %v3718_v47 = vperm.slane %v3710_v43, 0  ;;  %v3766_v63 = vsel %vm10705_vm13, %v3752_v17, %v3753_v39 }
 0xb4d   : > { %v4006_v27 = vunpack.c.l.b16 %v3878_v11  ;;  %v3784_v19 = vsel %vm7546_vm9, 0.0, %v3767_v36  ;;  %v3960_v55 = vunpack.c.l.b16 %v3864_v3  ;;  %v3754_v54 = vrot.slane %v9405_v20, 7  ;;  %v10728_v3 = vld [vmem:[#allocation11_spill] sm:$0xff] }
 0xb4e   : > { %v3971_v15 = vpack.c.b16 %v3959_v22, %v3958_v28  ;;  %v3848_v13 = vpack.c.bf16 %v3784_v19, %v3784_v19  ;;  %v3849_v28 = vpack.c.bf16 %v3766_v63, %v3766_v63  ;;  %v9429_v22 = vmul.f32 %v3717_v18, %v9087_v48 }
 0xb4f   : > { %v4019_v60 = vpack.c.b16 %v4007_v45, %v4006_v27  ;;  %v3765_v18 = vsel %vm10725_vm15, %v3753_v39, %v3754_v54  ;;  %v3866_v17 = vpack.c.bf16 %v9405_v20, %v9405_v20 }
 0xb50   : > { %10723 = vst [vmem:[#allocation24_spill] sm:$0xff] %v9429_v22  ;;  %v3912_v42 = vunpack.c.l.b16 %v3848_v13  ;;  %v3803_v27 = vrot.slane %v9429_v22, 1  ;;  %v3755_v48 = vrot.slane %v9429_v22, 7 }
 0xb52   : > { %v3764_v36 = vsel %vm10705_vm13, %v3754_v54, %v3755_v48 }
 0xb55   : > { %4297 = vmatmul.bf16.gmra.mxu0 %v3970_v6  ;;  %v3801_v6 = vrot.slane %v9402_v14, 1 }
 0xb57   : > { %v3813_v5 = vsel %vm10706_vm12, %v3801_v6, %v3802_v41 }
 0xb58   : > { %v3833_v59 = vsel %vm7501_vm6, 0.0, %v3813_v5 }
 0xb59   : > { %v3881_v12 = vpack.c.bf16 %v3833_v59, %v3833_v59 }
 0xb5a   : > { %4346 = vmatmul.bf16.gmra.mxu1 %v4018_v31  ;;  %4248 = vmatmul.bf16.gmra.mxu2 %v3922_v62  ;;  %v3865_v31 = vpack.c.bf16 %v9402_v14, %v9402_v14  ;;  %v3814_v62 = vsel %vm10720_vm14, %v3800_v10, %v3801_v6  ;;  %v9432_v10 = vmul.f32 %v3718_v47, %v9083_v61  ;;  %vm10726_vm14 = vmmov %vm10706_vm12 }
 0xb5b   : > { %v3880_v57 = vpack.c.bf16 %v3814_v62, %v3814_v62  ;;  %v4009_v52 = vunpack.c.l.b16 %v3881_v12  ;;  %v3962_v62 = vunpack.c.l.b16 %v3866_v17  ;;  %vm10732_vm15 = vmmov %vm10726_vm14  ;;  %v10737_v17 = vld [vmem:[#allocation13_spill] sm:$0xff] }
 0xb5c   : > { %v3961_v56 = vunpack.c.l.b16 %v3865_v31  ;;  %10724 = vst [vmem:[#allocation27_spill] sm:$0xff] %v9432_v10  ;;  %v3804_v45 = vrot.slane %v9432_v10, 1 }
 0xb5d   : > { %v4008_v38 = vunpack.c.l.b16 %v3880_v57 }
 0xb5e   : > { %v3972_v11 = vpack.c.b16 %v3961_v56, %v3960_v55  ;;  %v3811_v61 = vsel %vm10706_vm12, %v3803_v27, %v3804_v45  ;;  %vm10729_vm12 = vnez %v10728_v3  ;;  %v3851_v55 = vpack.c.bf16 %v3764_v36, %v3764_v36 }
 0xb5f   : > { %v4020_v30 = vpack.c.b16 %v4009_v52, %v4008_v38  ;;  %v3835_v5 = vsel %vm10690_vm1, 0.0, %v3811_v61  ;;  %v3786_v31 = vsel %vm10729_vm12, 0.0, %v3765_v18  ;;  %v9455_v56 = vmul.f32 %v3718_v47, %v9076_v7 }
 0xb60   : > { %v3883_v63 = vpack.c.bf16 %v3835_v5, %v3835_v5  ;;  %v3850_v19 = vpack.c.bf16 %v3786_v31, %v3786_v31  ;;  %v3868_v47 = vpack.c.bf16 %v9432_v10, %v9432_v10 }
 0xb61   : > { %10730 = vst [vmem:[#allocation28_spill] sm:$0xff] %v9455_v56  ;;  %v3805_v38 = vrot.slane %v9455_v56, 1  ;;  %v3757_v7 = vrot.slane %v9455_v56, 7  ;;  %v3869_v54 = vpack.c.bf16 %v9455_v56, %v9455_v56 }
 0xb62   : > { %v4011_v13 = vunpack.c.l.b16 %v3883_v63 }
 0xb65   : > { %4302 = vmatmul.bf16.gmra.mxu0 %v3971_v15  ;;  %v3913_v15 = vunpack.c.l.b16 %v3849_v28  ;;  %v3914_v28 = vunpack.c.l.b16 %v3850_v19 }
 0xb67   : > { %v3924_v6 = vpack.c.b16 %v3913_v15, %v3912_v42  ;;  %v3756_v42 = vrot.slane %v9432_v10, 7 }
 0xb6a   : > { %4351 = vmatmul.bf16.gmra.mxu1 %v4019_v60  ;;  %4253 = vmatmul.bf16.gmra.mxu2 %v3923_v23  ;;  %v3867_v60 = vpack.c.bf16 %v9429_v22, %v9429_v22  ;;  %v3812_v23 = vsel %vm10726_vm14, %v3802_v41, %v3803_v27  ;;  %v9459_v41 = vmul.f32 %v9279_v1, %v9073_v51  ;;  %vm10733_vm14 = vmmov %vm10705_vm13 }
 0xb6b   : > { %v3882_v59 = vpack.c.bf16 %v3812_v23, %v3812_v23  ;;  %v3763_v1 = vsel %vm10733_vm14, %v3755_v48, %v3756_v42  ;;  %vm10734_vm13 = vmmov %vm10732_vm15  ;;  %v3964_v23 = vunpack.c.l.b16 %v3868_v47  ;;  %v3965_v48 = vunpack.c.l.b16 %v3869_v54  ;;  %v10744_v47 = vld [vmem:[#allocation14_spill] sm:$0xff] }
 0xb6c   : > { %v3963_v39 = vunpack.c.l.b16 %v3867_v60  ;;  %10731 = vst [vmem:[#allocation25_spill] sm:$0xff] %v9459_v41  ;;  %v3806_v52 = vrot.slane %v9459_v41, 1  ;;  %vm10736_vm11 = vmmov %vm10733_vm14 }
 0xb6d   : > { %v4010_v12 = vunpack.c.l.b16 %v3882_v59  ;;  %v3762_v18 = vsel %vm10736_vm11, %v3756_v42, %v3757_v7  ;;  %vm10739_vm11 = vmmov %vm10734_vm13  ;;  %v7156_v42 = vld [vmem:[%s10401_s1 + $0x430] sm:$0xff] }
 0xb6e   : > { %v3973_v57 = vpack.c.b16 %v3963_v39, %v3962_v62  ;;  %v3809_v51 = vsel %vm10732_vm15, %v3805_v38, %v3806_v52  ;;  %vm10738_vm15 = vnez %v10737_v17  ;;  %v3853_v62 = vpack.c.bf16 %v3762_v18, %v3762_v18  ;;  %v7157_v39 = vld [vmem:[%s10401_s1 + $0x438] sm:$0xff] }
 0xb6f   : > { %v4021_v15 = vpack.c.b16 %v4011_v13, %v4010_v12  ;;  %v3837_v61 = vsel %vm10698_vm8, 0.0, %v3809_v51  ;;  %v3788_v60 = vsel %vm10738_vm15, 0.0, %v3763_v1  ;;  %4960 = vmatpush.bf16.msra.mxu2 %v7157_v39  ;;  %v3758_v12 = vrot.slane %v9459_v41, 7  ;;  %v10741_v1 = vld [vmem:[#allocation12_spill] sm:$0xff] }
 0xb70   : > { %v3885_v36 = vpack.c.bf16 %v3837_v61, %v3837_v61  ;;  %v3852_v31 = vpack.c.bf16 %v3788_v60, %v3788_v60  ;;  %vm10742_vm15 = vnez %v10741_v1 }
 0xb72   : > { %v4013_v63 = vunpack.c.l.b16 %v3885_v36  ;;  %v3916_v19 = vunpack.c.l.b16 %v3852_v31 }
 0xb73   : > { %4961 = vmatpush.bf16.msra.mxu2 %v7156_v42 }
 0xb75   : > { %4307 = vmatmul.bf16.gmra.mxu0 %v3972_v11  ;;  %v3915_v11 = vunpack.c.l.b16 %v3851_v55  ;;  %v3917_v55 = vunpack.c.l.b16 %v3853_v62 }
 0xb77   : > { %v3925_v27 = vpack.c.b16 %v3915_v11, %v3914_v28  ;;  %v3926_v28 = vpack.c.b16 %v3917_v55, %v3916_v19  ;;  %v7153_v19 = vld [vmem:[%s10401_s1 + $0x418] sm:$0xff]  ;;  %v7164_v55 = vld [vmem:[%s10401_s1 + $0x470] sm:$0xff] }
 0xb7a   : > { %4356 = vmatmul.bf16.gmra.mxu1 %v4020_v30  ;;  %4258 = vmatmul.bf16.gmra.mxu2 %v3924_v6  ;;  %v3810_v30 = vsel %vm10734_vm13, %v3804_v45, %v3805_v38  ;;  %v3974_v45 = vpack.c.b16 %v3965_v48, %v3964_v23  ;;  %v3761_v38 = vsel %vm10733_vm14, %v3757_v7, %v3758_v12  ;;  %vm10740_vm13 = vmmov %vm10739_vm11  ;;  %v9881_v6 = vld [vmem:[%s10402_s2 + $0x5] ss:$0 sm:$0xff] }
 0xb7b   : > { %v3884_v5 = vpack.c.bf16 %v3810_v30, %v3810_v30 }
 0xb7d   : > { %v4012_v59 = vunpack.c.l.b16 %v3884_v5 }
 0xb7f   : > { %v4022_v13 = vpack.c.b16 %v4013_v63, %v4012_v59  ;;  %v7165_v59 = vld [vmem:[%s10401_s1 + $0x478] sm:$0xff]  ;;  %v7154_v63 = vld [vmem:[%s10401_s1 + $0x420] sm:$0xff] }
 0xb80   : > { %5009 = vmatpush.bf16.msra.mxu0 %v7165_v59 }
 0xb84   : > { %5010 = vmatpush.bf16.msra.mxu0 %v7164_v55 }
 0xb85   : > { %4312 = vmatmul.bf16.gmra.mxu0 %v3973_v57  ;;  %v3807_v57 = vrot.slane %v9292_v16, 1 }
 0xb87   : > { %v3823_v11 = vsel %vm10739_vm11, %v3807_v57, %v3792_v46  ;;  %v3808_v51 = vsel %vm10740_vm13, %v3806_v52, %v3807_v57  ;;  %vm10743_vm11 = vmmov %vm10733_vm14  ;;  %vm10745_vm14 = vnez %v10744_v47 }
 0xb88   : > { %v3839_v46 = vsel %vm10742_vm15, 0.0, %v3823_v11  ;;  %v3760_v7 = vsel %vm10743_vm11, %v3758_v12, %v3759_v53  ;;  %v3790_v54 = vsel %vm10745_vm14, 0.0, %v3761_v38  ;;  %v3886_v18 = vpack.c.bf16 %v3808_v51, %v3808_v51  ;;  %v7155_v53 = vld [vmem:[%s10401_s1 + $0x428] sm:$0xff]  ;;  %v7152_v12 = vld [vmem:[%s10401_s1 + $0x410] sm:$0xff]  ;;  %v7162_v38 = vld [vmem:[%s10401_s1 + $0x460] sm:$0xff] }
 0xb89   : > { %v3887_v60 = vpack.c.bf16 %v3839_v46, %v3839_v46  ;;  %v3854_v23 = vpack.c.bf16 %v3790_v54, %v3790_v54  ;;  %v3855_v48 = vpack.c.bf16 %v3760_v7, %v3760_v7  ;;  %4962 = vmatpush.bf16.msra.mxu2 %v7155_v53  ;;  %v7151_v11 = vld [vmem:[%s10401_s1 + $0x408] sm:$0xff]  ;;  %v7161_v51 = vld [vmem:[%s10401_s1 + $0x458] sm:$0xff] }
 0xb8a   : > { %4361 = vmatmul.bf16.gmra.mxu1 %v4021_v15  ;;  %4263 = vmatmul.bf16.gmra.mxu2 %v3925_v27  ;;  %v3870_v15 = vpack.c.bf16 %v9459_v41, %v9459_v41  ;;  %v3871_v27 = vpack.c.bf16 %v9292_v16, %v9292_v16  ;;  %v4014_v52 = vunpack.c.l.b16 %v3886_v18 }
 0xb8b   : > { %v4015_v36 = vunpack.c.l.b16 %v3887_v60  ;;  %v3918_v31 = vunpack.c.l.b16 %v3854_v23  ;;  %v3919_v62 = vunpack.c.l.b16 %v3855_v48  ;;  %v7159_v23 = vld [vmem:[%s10401_s1 + $0x448] sm:$0xff] }
 0xb8c   : > { %v3966_v30 = vunpack.c.l.b16 %v3870_v15  ;;  %v3967_v61 = vunpack.c.l.b16 %v3871_v27  ;;  %v9539_v15 = vld [vmem:[%s10402_s2 + $0x4] ss:$0 sm:$0xff] }
 0xb8d   : > { %v4023_v39 = vpack.c.b16 %v4015_v36, %v4014_v52  ;;  %4963 = vmatpush.bf16.msra.mxu2 %v7154_v63  ;;  %v7150_v27 = vld [vmem:[%s10401_s1 + $0x400] sm:$0xff] }
 0xb8e   : > { %v3975_v5 = vpack.c.b16 %v3967_v61, %v3966_v30  ;;  %v7160_v30 = vld [vmem:[%s10401_s1 + $0x450] sm:$0xff] }
 0xb91   : > { %4964 = vmatpush.bf16.msra.mxu2 %v7153_v19 }
 0xb95   : > { %4317 = vmatmul.bf16.gmra.mxu0 %v3974_v45  ;;  %v3927_v45 = vpack.c.b16 %v3919_v62, %v3918_v31  ;;  %4965 = vmatpush.bf16.msra.mxu2 %v7152_v12  ;;  %v7158_v31 = vld [vmem:[%s10401_s1 + $0x440] sm:$0xff] }
 0xb99   : > { %4966 = vmatpush.bf16.msra.mxu2 %v7151_v11 }
 0xb9a   : > { %4366 = vmatmul.bf16.gmra.mxu1 %v4022_v13  ;;  %4268 = vmatmul.bf16.gmra.mxu2 %v3926_v28  ;;  %v7163_v13 = vld [vmem:[%s10401_s1 + $0x468] sm:$0xff] }
 0xb9b   : > { %5011 = vmatpush.bf16.msra.mxu0 %v7163_v13 }
 0xb9d   : > { %4967 = vmatpush.bf16.msra.mxu2 %v7150_v27 }
 0xb9f   : > { %5012 = vmatpush.bf16.msra.mxu0 %v7162_v38 }
 0xba3   : > { %5013 = vmatpush.bf16.msra.mxu0 %v7161_v51 }
 0xba5   : > { %4322 = vmatmul.bf16.gmra.mxu0 %v3975_v5 }
 0xba7   : > { %5014 = vmatpush.bf16.msra.mxu0 %v7160_v30 }
 0xbaa   : > { %4371 = vmatmul.bf16.gmra.mxu1 %v4023_v39  ;;  %4273 = vmatmul.bf16.gmra.mxu2 %v3927_v45 }
 0xbab   : > { %5015 = vmatpush.bf16.msra.mxu0 %v7159_v23 }
 0xbaf   : > { %5016 = vmatpush.bf16.msra.mxu0 %v7158_v31 }
 0xbb2   : > { %v4288_v57 = vpop.f32.mrf.mxu0 }
 0xbb7   : > { %v4337_v28 = vpop.f32.mrf.mxu1 }
 0xbba   : > { %v4290_v42 = vpop.f32.mrf.mxu0 }
 0xbbd   : > { %v4239_v46 = vpop.f32.mrf.mxu2 }
 0xbbe   : > { %v4240_v7 = vadd.f32 %v9539_v15, %v4239_v46 }
 0xbbf   : > { %v4339_v54 = vpop.f32.mrf.mxu1 }
 0xbc0   : > { %v4289_v61 = vadd.f32 %v4288_v57, %v4240_v7 }
 0xbc2   : > { %v4338_v18 = vadd.f32 %v4337_v28, %v4289_v61  ;;  %v4293_v60 = vpop.f32.mrf.mxu0 }
 0xbc4   : > { %v4393_v5 = vmul.f32 0.01, %v4338_v18  ;;  %vm4377_vm13 = vcmp.ge.f32.partialorder %v4338_v18, 0.0 }
 0xbc5   : > { %v4241_v48 = vpop.f32.mrf.mxu2 }
 0xbc6   : > { %v4242_v52 = vadd.f32 %v9539_v15, %v4241_v48  ;;  %v9558_v39 = vsel %vm4377_vm13, %v4338_v18, %v4393_v5 }
 0xbc7   : > { %v4342_v36 = vpop.f32.mrf.mxu1  ;;  %v4537_v63 = vpack.c.bf16 %v9558_v39, %v9558_v39  ;;  %v10481_v7 = vrot.slane %v9558_v39, 1 }
 0xbc8   : > { %v4291_v62 = vadd.f32 %v4290_v42, %v4242_v52 }
 0xbc9   : > { %v4633_v11 = vunpack.c.l.b16 %v4537_v63 }
 0xbca   : > { %v4340_v45 = vadd.f32 %v4339_v54, %v4291_v62  ;;  %v4295_v53 = vpop.f32.mrf.mxu0 }
 0xbcc   : > { %vm4378_vm11 = vcmp.ge.f32.partialorder %v4340_v45, 0.0  ;;  %v4394_v59 = vmul.f32 0.01, %v4340_v45 }
 0xbcd   : > { %v4244_v19 = vpop.f32.mrf.mxu2 }
 0xbce   : > { %v9562_v55 = vsel %vm4378_vm11, %v4340_v45, %v4394_v59  ;;  %v4245_v57 = vadd.f32 %v9539_v15, %v4244_v19  ;;  %vm10746_vm11 = vcmp.lt.s32.totalorder %v7323_v8, 7 }
 0xbcf   : > { %v4344_v12 = vpop.f32.mrf.mxu1  ;;  %v4538_v13 = vpack.c.bf16 %v9562_v55, %v9562_v55  ;;  %v4474_v42 = vrot.slane %v9562_v55, 1  ;;  %vm10747_vm14 = vmmov %vm10746_vm11 }
 0xbd0   : > { %v4294_v28 = vadd.f32 %v4293_v60, %v4245_v57 }
 0xbd1   : > { %v4634_v38 = vunpack.c.l.b16 %v4538_v13  ;;  %v4503_v60 = vsel %vm10746_vm11, %v10481_v7, %v4474_v42 }
 0xbd2   : > { %v4343_v27 = vadd.f32 %v4342_v36, %v4294_v28  ;;  %v4298_v51 = vpop.f32.mrf.mxu0  ;;  %v4553_v36 = vpack.c.bf16 %v4503_v60, %v4503_v60 }
 0xbd3   : > { %v4649_v46 = vpack.c.b16 %v4634_v38, %v4633_v11 }
 0xbd4   : > { %vm4379_vm13 = vcmp.ge.f32.partialorder %v4343_v27, 0.0  ;;  %v4395_v54 = vmul.f32 0.01, %v4343_v27  ;;  %v4681_v57 = vunpack.c.l.b16 %v4553_v36 }
 0xbd5   : > { %v4246_v30 = vpop.f32.mrf.mxu2  ;;  %4968 = vmatmul.bf16.vlgmr.msra.gmra.mxu2 %v4649_v46 }
 0xbd6   : > { %v9569_v61 = vsel %vm4379_vm13, %v4343_v27, %v4395_v54  ;;  %v4247_v18 = vadd.f32 %v9539_v15, %v4246_v30 }
 0xbd7   : > { %v4347_v23 = vpop.f32.mrf.mxu1  ;;  %v4475_v48 = vrot.slane %v9569_v61, 1  ;;  %v4539_v28 = vpack.c.bf16 %v9569_v61, %v9569_v61 }
 0xbd8   : > { %v4296_v5 = vadd.f32 %v4295_v53, %v4247_v18 }
 0xbd9   : > { %v4502_v52 = vsel %vm10747_vm14, %v4474_v42, %v4475_v48  ;;  %v4635_v46 = vunpack.c.l.b16 %v4539_v28 }
 0xbda   : > { %v4345_v31 = vadd.f32 %v4344_v12, %v4296_v5  ;;  %v4300_v62 = vpop.f32.mrf.mxu0  ;;  %v4506_v45 = vsel %vm10646_vm10, 0.0, %v4502_v52 }
 0xbdb   : > { %v4554_v59 = vpack.c.bf16 %v4506_v45, %v4506_v45 }
 0xbdc   : > { %vm4380_vm13 = vcmp.ge.f32.partialorder %v4345_v31, 0.0  ;;  %v4396_v63 = vmul.f32 0.01, %v4345_v31 }
 0xbdd   : > { %v4249_v19 = vpop.f32.mrf.mxu2  ;;  %v4682_v13 = vunpack.c.l.b16 %v4554_v59 }
 0xbde   : > { %v4250_v53 = vadd.f32 %v9539_v15, %v4249_v19  ;;  %v9584_v38 = vsel %vm4380_vm13, %v4345_v31, %v4396_v63  ;;  %v4426_v31 = vrot.slane %v9562_v55, 7  ;;  %v10482_v19 = vrot.slane %v9558_v39, 7  ;;  %vm10748_vm13 = vmmov %vm10746_vm11 }
 0xbdf   : > { %v4349_v11 = vpop.f32.mrf.mxu1  ;;  %v4697_v42 = vpack.c.b16 %v4682_v13, %v4681_v57  ;;  %v4540_v12 = vpack.c.bf16 %v9584_v38, %v9584_v38  ;;  %v4476_v60 = vrot.slane %v9584_v38, 1 }
 0xbe0   : > { %v4299_v27 = vadd.f32 %v4298_v51, %v4250_v53 }
 0xbe1   : > { %5017 = vmatmul.bf16.vlgmr.msra.gmra.mxu0 %v4697_v42  ;;  %v4636_v54 = vunpack.c.l.b16 %v4540_v12  ;;  %v4501_v51 = vsel %vm10746_vm11, %v4475_v48, %v4476_v60 }
 0xbe2   : > { %v4348_v30 = vadd.f32 %v4347_v23, %v4299_v27  ;;  %v4303_v18 = vpop.f32.mrf.mxu0  ;;  %v4555_v28 = vpack.c.bf16 %v4501_v51, %v4501_v51  ;;  %v4427_v51 = vrot.slane %v9569_v61, 7 }
 0xbe3   : > { %v4650_v5 = vpack.c.b16 %v4636_v54, %v4635_v46 }
 0xbe4   : > { %vm4381_vm14 = vcmp.ge.f32.partialorder %v4348_v30, 0.0  ;;  %v4397_v52 = vmul.f32 0.01, %v4348_v30 }
 0xbe5   : > { %v4251_v36 = vpop.f32.mrf.mxu2  ;;  %4973 = vmatmul.bf16.gmra.mxu2 %v4650_v5 }
 0xbe6   : > { %v9590_v45 = vsel %vm4381_vm14, %v4348_v30, %v4397_v52  ;;  %v4252_v59 = vadd.f32 %v9539_v15, %v4251_v36  ;;  %vm10749_vm14 = vcmp.lt.s32.totalorder %v7323_v8, 1 }
 0xbe7   : > { %v4352_v63 = vpop.f32.mrf.mxu1  ;;  %v4477_v23 = vrot.slane %v9590_v45, 1  ;;  %v9605_v12 = vsel %vm10749_vm14, %v10482_v19, %v4426_v31  ;;  %v4541_v30 = vpack.c.bf16 %v9590_v45, %v9590_v45 }
 0xbe8   : > { %v4301_v57 = vadd.f32 %v4300_v62, %v4252_v59  ;;  %v4683_v62 = vunpack.c.l.b16 %v4555_v28 }
 0xbe9   : > { %v4500_v13 = vsel %vm10748_vm13, %v4476_v60, %v4477_v23  ;;  %vm10750_vm13 = vmmov %vm10749_vm14 }
 0xbea   : > { %v4350_v53 = vadd.f32 %v4349_v11, %v4301_v57  ;;  %v4305_v42 = vpop.f32.mrf.mxu0  ;;  %v4508_v55 = vsel %vm7670_vm0, 0.0, %v4500_v13  ;;  %v4637_v57 = vunpack.c.l.b16 %v4541_v30 }
 0xbeb   : > { %v4556_v48 = vpack.c.bf16 %v4508_v55, %v4508_v55 }
 0xbec   : > { %vm4382_vm11 = vcmp.ge.f32.partialorder %v4350_v53, 0.0  ;;  %v4398_v27 = vmul.f32 0.01, %v4350_v53 }
 0xbed   : > { %v4254_v46 = vpop.f32.mrf.mxu2  ;;  %v4684_v54 = vunpack.c.l.b16 %v4556_v48 }
 0xbee   : > { %v4255_v11 = vadd.f32 %v9539_v15, %v4254_v46  ;;  %v9610_v5 = vsel %vm4382_vm11, %v4350_v53, %v4398_v27  ;;  %v4454_v46 = vsel %vm10750_vm13, %v4426_v31, %v4427_v51  ;;  %vm10751_vm11 = vcmp.lt.s32.totalorder %v7323_v8, 7 }
 0xbef   : > { %v4354_v60 = vpop.f32.mrf.mxu1  ;;  %v4698_v52 = vpack.c.b16 %v4684_v54, %v4683_v62  ;;  %v4542_v36 = vpack.c.bf16 %v9610_v5, %v9610_v5  ;;  %v4478_v48 = vrot.slane %v9610_v5, 1  ;;  %v4428_v62 = vrot.slane %v9584_v38, 7  ;;  %vm10752_vm13 = vmmov %vm10751_vm11 }
 0xbf0   : > { %v4304_v59 = vadd.f32 %v4303_v18, %v4255_v11  ;;  %v4459_v31 = vsel %vm7413_vm2, 0.0, %v4454_v46 }
 0xbf1   : > { %5022 = vmatmul.bf16.gmra.mxu0 %v4698_v52  ;;  %v4638_v13 = vunpack.c.l.b16 %v4542_v36 }
 0xbf2   : > { %v4353_v28 = vadd.f32 %v4352_v63, %v4304_v59  ;;  %v4308_v55 = vpop.f32.mrf.mxu0  ;;  %v4499_v63 = vsel %vm10751_vm11, %v4477_v23, %v4478_v48 }
 0xbf3   : > { %v4651_v7 = vpack.c.b16 %v4638_v13, %v4637_v57  ;;  %v4523_v57 = vpack.c.bf16 %v4459_v31, %v4459_v31 }
 0xbf4   : > { %vm4383_vm14 = vcmp.ge.f32.partialorder %v4353_v28, 0.0  ;;  %v4399_v53 = vmul.f32 0.01, %v4353_v28 }
 0xbf5   : > { %v4256_v27 = vpop.f32.mrf.mxu2  ;;  %4978 = vmatmul.bf16.gmra.mxu2 %v4651_v7  ;;  %v4557_v7 = vpack.c.bf16 %v4499_v63, %v4499_v63 }
 0xbf6   : > { %v9619_v18 = vsel %vm4383_vm14, %v4353_v28, %v4399_v53  ;;  %v4257_v61 = vadd.f32 %v9539_v15, %v4256_v27  ;;  %vm10753_vm14 = vcmp.lt.s32.totalorder %v7323_v8, 1 }
 0xbf7   : > { %v4357_v54 = vpop.f32.mrf.mxu1  ;;  %v4479_v30 = vrot.slane %v9619_v18, 1  ;;  %v4453_v59 = vsel %vm10753_vm14, %v4427_v51, %v4428_v62  ;;  %v4685_v46 = vunpack.c.l.b16 %v4557_v7  ;;  %v9640_v51 = vunpack.c.l.b16 %v4523_v57 }
 0xbf8   : > { %v4306_v11 = vadd.f32 %v4305_v42, %v4257_v61  ;;  %v4524_v28 = vpack.c.bf16 %v4453_v59, %v4453_v59  ;;  %v4429_v59 = vrot.slane %v9590_v45, 7 }
 0xbf9   : > { %v4498_v52 = vsel %vm10752_vm13, %v4478_v48, %v4479_v30  ;;  %v4543_v48 = vpack.c.bf16 %v9619_v18, %v9619_v18  ;;  %vm10754_vm13 = vmmov %vm10753_vm14 }
 0xbfa   : > { %v4355_v36 = vadd.f32 %v4354_v60, %v4306_v11  ;;  %v4510_v38 = vsel %vm7689_vm3, 0.0, %v4498_v52  ;;  %v4310_v13 = vpop.f32.mrf.mxu0  ;;  %v9635_v61 = vunpack.c.l.b16 %v4524_v28 }
 0xbfb   : > { %v4558_v23 = vpack.c.bf16 %v4510_v38, %v4510_v38 }
 0xbfc   : > { %vm4384_vm11 = vcmp.ge.f32.partialorder %v4355_v36, 0.0  ;;  %v4400_v53 = vmul.f32 0.01, %v4355_v36 }
 0xbfd   : > { %v4259_v27 = vpop.f32.mrf.mxu2  ;;  %v4686_v42 = vunpack.c.l.b16 %v4558_v23  ;;  %v4639_v23 = vunpack.c.l.b16 %v4543_v48 }
 0xbfe   : > { %v4260_v60 = vadd.f32 %v9539_v15, %v4259_v27  ;;  %v9638_v11 = vsel %vm4384_vm11, %v4355_v36, %v4400_v53  ;;  %v4452_v36 = vsel %vm10754_vm13, %v4428_v62, %v4429_v59  ;;  %vm10755_vm11 = vcmp.lt.s32.totalorder %v7323_v8, 7 }
 0xbff   : > { %v4359_v63 = vpop.f32.mrf.mxu1  ;;  %v4699_v31 = vpack.c.b16 %v4686_v42, %v4685_v46  ;;  %v4544_v52 = vpack.c.bf16 %v9638_v11, %v9638_v11  ;;  %v4480_v27 = vrot.slane %v9638_v11, 1  ;;  %v4461_v62 = vsel %vm7474_vm5, 0.0, %v4452_v36  ;;  %vm10756_vm13 = vmmov %vm10755_vm11 }
 0xc00   : > { %v4309_v38 = vadd.f32 %v4308_v55, %v4260_v60  ;;  %v4430_v55 = vrot.slane %v9610_v5, 7 }
 0xc01   : > { %5027 = vmatmul.bf16.gmra.mxu0 %v4699_v31  ;;  %v4640_v28 = vunpack.c.l.b16 %v4544_v52 }
 0xc02   : > { %v4358_v19 = vadd.f32 %v4357_v54, %v4309_v38  ;;  %v4313_v46 = vpop.f32.mrf.mxu0  ;;  %v4497_v54 = vsel %vm10755_vm11, %v4479_v30, %v4480_v27 }
 0xc03   : > { %v4652_v57 = vpack.c.b16 %v4640_v28, %v4639_v23  ;;  %v4559_v23 = vpack.c.bf16 %v4497_v54, %v4497_v54 }
 0xc04   : > { %vm4385_vm14 = vcmp.ge.f32.partialorder %v4358_v19, 0.0  ;;  %v4401_v53 = vmul.f32 0.01, %v4358_v19 }
 0xc05   : > { %v4261_v42 = vpop.f32.mrf.mxu2  ;;  %4983 = vmatmul.bf16.gmra.mxu2 %v4652_v57  ;;  %v4525_v57 = vpack.c.bf16 %v4461_v62, %v4461_v62 }
 0xc06   : > { %v9651_v60 = vsel %vm4385_vm14, %v4358_v19, %v4401_v53  ;;  %v4262_v45 = vadd.f32 %v9539_v15, %v4261_v42  ;;  %vm10757_vm14 = vcmp.lt.s32.totalorder %v7323_v8, 1 }
 0xc07   : > { %v4481_v48 = vrot.slane %v9651_v60, 1  ;;  %v4362_v31 = vpop.f32.mrf.mxu1  ;;  %v4451_v5 = vsel %vm10757_vm14, %v4429_v59, %v4430_v55  ;;  %v9675_v62 = vunpack.c.l.b16 %v4525_v57 }
 0xc08   : > { %v4311_v52 = vadd.f32 %v4310_v13, %v4262_v45  ;;  %v4526_v53 = vpack.c.bf16 %v4451_v5, %v4451_v5  ;;  %v7149_v13 = vld [vmem:[%s10401_s1 + $0x3f8] sm:$0xff]  ;;  %v4687_v45 = vunpack.c.l.b16 %v4559_v23 }
 0xc09   : > { %v4496_v38 = vsel %vm10756_vm13, %v4480_v27, %v4481_v48  ;;  %4911 = vmatpush.bf16.msrb.mxu3 %v7149_v13  ;;  %vm10758_vm13 = vmmov %vm10757_vm14 }
 0xc0a   : > { %v4360_v28 = vadd.f32 %v4359_v63, %v4311_v52  ;;  %v4512_v19 = vsel %vm7448_vm4, 0.0, %v4496_v38  ;;  %v4545_v63 = vpack.c.bf16 %v9651_v60, %v9651_v60  ;;  %v9670_v54 = vunpack.c.l.b16 %v4526_v53  ;;  %v4315_v38 = vpop.f32.mrf.mxu0 }
 0xc0b   : > { %v4560_v30 = vpack.c.bf16 %v4512_v19, %v4512_v19 }
 0xc0c   : > { %vm4386_vm11 = vcmp.ge.f32.partialorder %v4360_v28, 0.0  ;;  %v4402_v42 = vmul.f32 0.01, %v4360_v28  ;;  %v4641_v10 = vunpack.c.l.b16 %v4545_v63 }
 0xc0d   : > { %v4264_v36 = vpop.f32.mrf.mxu2  ;;  %v4688_v27 = vunpack.c.l.b16 %v4560_v30  ;;  %v4431_v30 = vrot.slane %v9619_v18, 7 }
 0xc0e   : > { %v4265_v52 = vadd.f32 %v9539_v15, %v4264_v36  ;;  %v9673_v59 = vsel %vm4386_vm11, %v4360_v28, %v4402_v42  ;;  %vm10759_vm11 = vcmp.lt.s32.totalorder %v7323_v8, 7 }
 0xc0f   : > { %v4700_v19 = vpack.c.b16 %v4688_v27, %v4687_v45  ;;  %v4546_v5 = vpack.c.bf16 %v9673_v59, %v9673_v59  ;;  %v4364_v53 = vpop.f32.mrf.mxu1  ;;  %v4482_v42 = vrot.slane %v9673_v59, 1  ;;  %v4450_v57 = vsel %vm10758_vm13, %v4430_v55, %v4431_v30  ;;  %v7148_v55 = vld [vmem:[%s10401_s1 + $0x3f0] sm:$0xff]  ;;  %vm10760_vm13 = vmmov %vm10759_vm11 }
 0xc10   : > { %v4314_v7 = vadd.f32 %v4313_v46, %v4265_v52  ;;  %v4432_v46 = vrot.slane %v9638_v11, 7  ;;  %4912 = vmatpush.bf16.msrb.mxu3 %v7148_v55 }
 0xc11   : > { %5032 = vmatmul.bf16.gmra.mxu0 %v4700_v19  ;;  %v4642_v36 = vunpack.c.l.b16 %v4546_v5  ;;  %v4495_v63 = vsel %vm10759_vm11, %v4481_v48, %v4482_v42  ;;  %v7147_v48 = vld [vmem:[%s10401_s1 + $0x3e8] sm:$0xff] }
 0xc12   : > { %v4363_v28 = vadd.f32 %v4362_v31, %v4314_v7  ;;  %v4318_v19 = vpop.f32.mrf.mxu0  ;;  %v4561_v5 = vpack.c.bf16 %v4495_v63, %v4495_v63 }
 0xc13   : > { %v4653_v13 = vpack.c.b16 %v4642_v36, %v4641_v10  ;;  %v4463_v10 = vsel %vm7510_vm7, 0.0, %v4450_v57 }
 0xc14   : > { %vm4387_vm14 = vcmp.ge.f32.partialorder %v4363_v28, 0.0  ;;  %v4403_v45 = vmul.f32 0.01, %v4363_v28  ;;  %v4689_v63 = vunpack.c.l.b16 %v4561_v5  ;;  %4913 = vmatpush.bf16.msrb.mxu3 %v7147_v48 }
 0xc15   : > { %v4266_v27 = vpop.f32.mrf.mxu2  ;;  %4988 = vmatmul.bf16.gmra.mxu2 %v4653_v13 }
 0xc16   : > { %v9686_v52 = vsel %vm4387_vm14, %v4363_v28, %v4403_v45  ;;  %v4267_v18 = vadd.f32 %v9539_v15, %v4266_v27  ;;  %vm10761_vm14 = vcmp.lt.s32.totalorder %v7323_v8, 1  ;;  %v4527_v45 = vpack.c.bf16 %v4463_v10, %v4463_v10 }
 0xc17   : > { %v4483_v7 = vrot.slane %v9686_v52, 1  ;;  %v4449_v13 = vsel %vm10761_vm14, %v4431_v30, %v4432_v46  ;;  %v4367_v57 = vpop.f32.mrf.mxu1  ;;  %v4547_v23 = vpack.c.bf16 %v9686_v52, %v9686_v52  ;;  %v4435_v43 = vrot.slane %v9686_v52, 7 }
 0xc18   : > { %v4316_v31 = vadd.f32 %v4315_v38, %v4267_v18  ;;  %v4528_v27 = vpack.c.bf16 %v4449_v13, %v4449_v13 }
 0xc19   : > { %v4494_v11 = vsel %vm10760_vm13, %v4482_v42, %v4483_v7  ;;  %v4643_v25 = vunpack.c.l.b16 %v4547_v23  ;;  %vm10762_vm13 = vmmov %vm10761_vm14  ;;  %v7144_v23 = vld [vmem:[%s10401_s1 + $0x3d0] sm:$0xff] }
 0xc1a   : > { %v4365_v36 = vadd.f32 %v4364_v53, %v4316_v31  ;;  %v4514_v28 = vsel %vm7501_vm6, 0.0, %v4494_v11  ;;  %v7146_v53 = vld [vmem:[%s10401_s1 + $0x3e0] sm:$0xff]  ;;  %v9711_v31 = vunpack.c.l.b16 %v4528_v27  ;;  %v9716_v11 = vunpack.c.l.b16 %v4527_v45 }
 0xc1b   : > { %v4562_v38 = vpack.c.bf16 %v4514_v28, %v4514_v28  ;;  %4914 = vmatpush.bf16.msrb.mxu3 %v7146_v53  ;;  %v4434_v53 = vrot.slane %v9673_v59, 7  ;;  %v7143_v59 = vld [vmem:[%s10401_s1 + $0x3c8] sm:$0xff] }
 0xc1c   : > { %vm4388_vm11 = vcmp.ge.f32.partialorder %v4365_v36, 0.0  ;;  %v4404_v18 = vmul.f32 0.01, %v4365_v36 }
 0xc1d   : > { %v4269_v42 = vpop.f32.mrf.mxu2  ;;  %v4690_v55 = vunpack.c.l.b16 %v4562_v38  ;;  %v4433_v38 = vrot.slane %v9651_v60, 7 }
 0xc1e   : > { %v4270_v30 = vadd.f32 %v9539_v15, %v4269_v42  ;;  %v9714_v10 = vsel %vm4388_vm11, %v4365_v36, %v4404_v18  ;;  %v7145_v36 = vld [vmem:[%s10401_s1 + $0x3d8] sm:$0xff]  ;;  %vm10763_vm11 = vcmp.lt.s32.totalorder %v7323_v8, 7 }
 0xc1f   : > { %v4701_v28 = vpack.c.b16 %v4690_v55, %v4689_v63  ;;  %v4548_v5 = vpack.c.bf16 %v9714_v10, %v9714_v10  ;;  %v4484_v18 = vrot.slane %v9714_v10, 1  ;;  %v4448_v42 = vsel %vm10762_vm13, %v4432_v46, %v4433_v38  ;;  %4915 = vmatpush.bf16.msrb.mxu3 %v7145_v36  ;;  %vm10764_vm13 = vmmov %vm10763_vm11 }
 0xc20   : > { %v4319_v13 = vadd.f32 %v4318_v19, %v4270_v30  ;;  %v4320_v19 = vpop.f32.mrf.mxu0  ;;  %v4369_v30 = vpop.f32.mrf.mxu1 }
 0xc21   : > { %5037 = vmatmul.bf16.gmra.mxu0 %v4701_v28  ;;  %v4644_v27 = vunpack.c.l.b16 %v4548_v5  ;;  %v4493_v46 = vsel %vm10763_vm11, %v4483_v7, %v4484_v18  ;;  %v4465_v5 = vsel %vm7546_vm9, 0.0, %v4448_v42 }
 0xc22   : > { %v4368_v45 = vadd.f32 %v4367_v57, %v4319_v13  ;;  %v4563_v36 = vpack.c.bf16 %v4493_v46, %v4493_v46 }
 0xc23   : > { %v4654_v63 = vpack.c.b16 %v4644_v27, %v4643_v25  ;;  %4916 = vmatpush.bf16.msrb.mxu3 %v7144_v23 }
 0xc24   : > { %vm4389_vm14 = vcmp.ge.f32.partialorder %v4368_v45, 0.0  ;;  %v4405_v55 = vmul.f32 0.01, %v4368_v45  ;;  %v4691_v46 = vunpack.c.l.b16 %v4563_v36 }
 0xc25   : > { %v4271_v60 = vpop.f32.mrf.mxu2  ;;  %4993 = vmatmul.bf16.gmra.mxu2 %v4654_v63 }
 0xc26   : > { %v9733_v57 = vsel %vm4389_vm14, %v4368_v45, %v4405_v55  ;;  %v4272_v28 = vadd.f32 %v9539_v15, %v4271_v60  ;;  %vm10765_vm14 = vcmp.lt.s32.totalorder %v7323_v8, 1  ;;  %v4529_v55 = vpack.c.bf16 %v4465_v5, %v4465_v5 }
 0xc27   : > { %v4485_v25 = vrot.slane %v9733_v57, 1  ;;  %v4447_v7 = vsel %vm10765_vm14, %v4433_v38, %v4434_v53  ;;  %v4549_v48 = vpack.c.bf16 %v9733_v57, %v9733_v57  ;;  %4917 = vmatpush.bf16.msrb.mxu3 %v7143_v59 }
 0xc28   : > { %v4321_v13 = vadd.f32 %v4320_v19, %v4272_v28  ;;  %v4530_v42 = vpack.c.bf16 %v4447_v7, %v4447_v7  ;;  %v4323_v28 = vpop.f32.mrf.mxu0 }
 0xc29   : > { %v4492_v27 = vsel %vm10764_vm13, %v4484_v18, %v4485_v25  ;;  %vm10766_vm13 = vmmov %vm10765_vm14 }
 0xc2a   : > { %v4370_v45 = vadd.f32 %v4369_v30, %v4321_v13  ;;  %v4516_v63 = vsel %vm10690_vm1, 0.0, %v4492_v27  ;;  %v7142_v30 = vld [vmem:[%s10401_s1 + $0x3c0] sm:$0xff]  ;;  %v9755_v13 = vunpack.c.l.b16 %v4530_v42  ;;  %v9760_v27 = vunpack.c.l.b16 %v4529_v55 }
 0xc2b   : > { %v4564_v60 = vpack.c.bf16 %v4516_v63, %v4516_v63  ;;  %v4372_v63 = vpop.f32.mrf.mxu1  ;;  %v4645_v42 = vunpack.c.l.b16 %v4549_v48  ;;  %4918 = vmatpush.bf16.msrb.mxu3 %v7142_v30  ;;  %v4446_v55 = vsel %vm10766_vm13, %v4434_v53, %v4435_v43 }
 0xc2c   : > { %vm4390_vm11 = vcmp.ge.f32.partialorder %v4370_v45, 0.0  ;;  %v4406_v19 = vmul.f32 0.01, %v4370_v45  ;;  %v4467_v53 = vsel %vm10729_vm12, 0.0, %v4446_v55 }
 0xc2d   : > { %v4274_v18 = vpop.f32.mrf.mxu2  ;;  %v4692_v23 = vunpack.c.l.b16 %v4564_v60 }
 0xc2e   : > { %v4275_v38 = vadd.f32 %v9539_v15, %v4274_v18  ;;  %v9758_v5 = vsel %vm4390_vm11, %v4370_v45, %v4406_v19  ;;  %vm10767_vm11 = vcmp.lt.s32.totalorder %v7323_v8, 7 }
 0xc2f   : > { %v4702_v7 = vpack.c.b16 %v4692_v23, %v4691_v46  ;;  %v4550_v36 = vpack.c.bf16 %v9758_v5, %v9758_v5  ;;  %v4486_v45 = vrot.slane %v9758_v5, 1  ;;  %vm10768_vm13 = vmmov %vm10767_vm11 }
 0xc30   : > { %v4324_v60 = vadd.f32 %v4323_v28, %v4275_v38  ;;  %v4436_v28 = vrot.slane %v9714_v10, 7  ;;  %v4325_v30 = vpop.f32.mrf.mxu0 }
 0xc31   : > { %5042 = vmatmul.bf16.gmra.mxu0 %v4702_v7  ;;  %v4646_v22 = vunpack.c.l.b16 %v4550_v36  ;;  %v4491_v48 = vsel %vm10767_vm11, %v4485_v25, %v4486_v45  ;;  %v4531_v25 = vpack.c.bf16 %v4467_v53, %v4467_v53 }
 0xc32   : > { %v4373_v18 = vadd.f32 %v4372_v63, %v4324_v60  ;;  %v4565_v60 = vpack.c.bf16 %v4491_v48, %v4491_v48 }
 0xc33   : > { %v4655_v19 = vpack.c.b16 %v4646_v22, %v4645_v42  ;;  %v4374_v7 = vpop.f32.mrf.mxu1  ;;  %v4595_v48 = vunpack.c.l.b16 %v4531_v25 }
 0xc34   : > { %vm4391_vm14 = vcmp.ge.f32.partialorder %v4373_v18, 0.0  ;;  %v4407_v46 = vmul.f32 0.01, %v4373_v18 }
 0xc35   : > { %v4276_v23 = vpop.f32.mrf.mxu2  ;;  %4998 = vmatmul.bf16.gmra.mxu2 %v4655_v19 }
 0xc36   : > { %v9771_v38 = vsel %vm4391_vm14, %v4373_v18, %v4407_v46  ;;  %v4277_v52 = vadd.f32 %v9539_v15, %v4276_v23  ;;  %vm10769_vm14 = vcmp.lt.s32.totalorder %v7323_v8, 1  ;;  %v4693_v23 = vunpack.c.l.b16 %v4565_v60 }
 0xc37   : > { %v4487_v63 = vrot.slane %v9771_v38, 1  ;;  %v4445_v15 = vsel %vm10769_vm14, %v4435_v43, %v4436_v28  ;;  %v4522_v43 = vpack.c.bf16 %v9605_v12, %v9605_v12  ;;  %v10770_v60 = vrot.slane %v9558_v39, 7 }
 0xc38   : > { %v4326_v22 = vadd.f32 %v4325_v30, %v4277_v52  ;;  %v4532_v19 = vpack.c.bf16 %v4445_v15, %v4445_v15  ;;  %v4551_v52 = vpack.c.bf16 %v9771_v38, %v9771_v38 }
 0xc39   : > { %v4490_v36 = vsel %vm10768_vm13, %v4486_v45, %v4487_v63  ;;  %vm10771_vm13 = vmmov %vm10769_vm14  ;;  %vm10773_vm14 = vcmp.lt.s32.totalorder %v7323_v8, 7 }
 0xc3a   : > { %v4375_v10 = vadd.f32 %v4374_v7, %v4326_v22  ;;  %v4518_v42 = vsel %vm10698_vm8, 0.0, %v4490_v36  ;;  %v4596_v30 = vunpack.c.l.b16 %v4532_v19  ;;  %vm10775_vm8 = vmmov %vm10771_vm13 }
 0xc3b   : > { %v4566_v18 = vpack.c.bf16 %v4518_v42, %v4518_v42  ;;  %v4437_v42 = vrot.slane %v9733_v57, 7  ;;  %vm10776_vm1 = vmmov %vm10773_vm14 }
 0xc3c   : > { %vm4392_vm11 = vcmp.ge.f32.partialorder %v4375_v10, 0.0  ;;  %v4408_v46 = vmul.f32 0.01, %v4375_v10  ;;  %v4606_v53 = vpack.c.b16 %v4596_v30, %v4595_v48 }
 0xc3d   : > { %v4694_v55 = vunpack.c.l.b16 %v4566_v18  ;;  %v4647_v18 = vunpack.c.l.b16 %v4551_v52  ;;  %v4444_v12 = vsel %vm10775_vm8, %v4436_v28, %v4437_v42 }
 0xc3e   : > { %v4424_v45 = vsel %vm4392_vm11, %v4375_v10, %v4408_v46  ;;  %v10772_v10 = vrot.slane %v9558_v39, 1  ;;  %vm10774_vm11 = vnez %v10643_v9  ;;  %v4586_v39 = vunpack.c.l.b16 %v4522_v43 }
 0xc3f   : > { %v4703_v22 = vpack.c.b16 %v4694_v55, %v4693_v23  ;;  %v4440_v7 = vrot.slane %v4424_v45, 7  ;;  %v4488_v59 = vrot.slane %v4424_v45, 1  ;;  %v4552_v36 = vpack.c.bf16 %v4424_v45, %v4424_v45 }
 0xc40   : > { %v4438_v45 = vrot.slane %v9758_v5, 7  ;;  %v4439_v5 = vrot.slane %v9771_v38, 7  ;;  %v10782_v38 = vpack.c.b16 %v9670_v54, %v9675_v62 }
 0xc41   : > { %5047 = vmatmul.bf16.gmra.mxu0 %v4703_v22  ;;  %v4456_v15 = vsel %vm10771_vm13, %v4440_v7, %v10770_v60  ;;  %v4648_v19 = vunpack.c.l.b16 %v4552_v36  ;;  %v4504_v25 = vsel %vm10773_vm14, %v4488_v59, %v10772_v10  ;;  %v4489_v55 = vsel %vm10776_vm1, %v4487_v63, %v4488_v59  ;;  %vm10778_vm1 = vmmov %vm10775_vm8 }
 0xc42   : > { %v4457_v46 = vsel %vm10774_vm11, 0.0, %v4456_v15  ;;  %v4520_v52 = vsel %vm10742_vm15, 0.0, %v4504_v25  ;;  %vm10777_vm13 = vnez %v10737_v17  ;;  %v4567_v36 = vpack.c.bf16 %v4489_v55, %v4489_v55 }
 0xc43   : > { %v4656_v57 = vpack.c.b16 %v4648_v19, %v4647_v18  ;;  %v4521_v23 = vpack.c.bf16 %v4457_v46, %v4457_v46  ;;  %v4469_v48 = vsel %vm10777_vm13, 0.0, %v4444_v12  ;;  %v4568_v60 = vpack.c.bf16 %v4520_v52, %v4520_v52 }
 0xc44   : > { %v4533_v28 = vpack.c.bf16 %v4469_v48, %v4469_v48  ;;  %v4443_v15 = vsel %vm10775_vm8, %v4437_v42, %v4438_v45  ;;  %v4695_v59 = vunpack.c.l.b16 %v4567_v36  ;;  %v4442_v46 = vsel %vm10778_vm1, %v4438_v45, %v4439_v5  ;;  %vm10781_vm8 = vmmov %vm10778_vm1 }
 0xc45   : > { %5003 = vmatmul.bf16.gmra.mxu2 %v4656_v57  ;;  %v4585_v30 = vunpack.c.l.b16 %v4521_v23  ;;  %v4696_v63 = vunpack.c.l.b16 %v4568_v60  ;;  %v4534_v18 = vpack.c.bf16 %v4443_v15, %v4443_v15  ;;  %vm10779_vm14 = vnez %v10744_v47 }
 0xc46   : > { %v4597_v19 = vunpack.c.l.b16 %v4533_v28  ;;  %v4471_v12 = vsel %vm10779_vm14, 0.0, %v4442_v46  ;;  %v10780_v57 = vpack.c.b16 %v9635_v61, %v9640_v51  ;;  %v4441_v23 = vsel %vm10781_vm8, %v4439_v5, %v4440_v7 }
 0xc47   : > { %v4601_v22 = vpack.c.b16 %v4586_v39, %v4585_v30  ;;  %v4598_v10 = vunpack.c.l.b16 %v4534_v18  ;;  %v4704_v25 = vpack.c.b16 %v4696_v63, %v4695_v59  ;;  %v4535_v42 = vpack.c.bf16 %v4471_v12, %v4471_v12 }
 0xc48   : > { %v4536_v55 = vpack.c.bf16 %v4441_v23, %v4441_v23  ;;  %v10783_v45 = vpack.c.b16 %v9711_v31, %v9716_v11  ;;  %v10784_v61 = vpack.c.b16 %v9755_v13, %v9760_v27  ;;  %vm10785_vm8 = vcmask 64512  }
 0xc49   : > { %4919 = vmatmul.bf16.vlgmr.msrb.gmra.mxu3 %v4601_v22  ;;  %v4607_v43 = vpack.c.b16 %v4598_v10, %v4597_v19  ;;  %v4599_v52 = vunpack.c.l.b16 %v4535_v42 }
 0xc4a   : > { %v4600_v30 = vunpack.c.l.b16 %v4536_v55 }
 0xc4c   : > { %v4608_v39 = vpack.c.b16 %v4600_v30, %v4599_v52 }
 0xc51   : > { %5052 = vmatmul.bf16.gmra.mxu0 %v4704_v25 }
 0xc58   : > { %v9830_v51 = vpop.f32.mrf.mxu2 }
 0xc59   : > { %4924 = vmatmul.bf16.gmra.mxu3 %v10780_v57 }
 0xc5e   : > { %v9832_v7 = vpop.f32.mrf.mxu0 }
 0xc60   : > { %v9834_v48 = vpop.f32.mrf.mxu2 }
 0xc66   : > { %v9836_v22 = vpop.f32.mrf.mxu0 }
 0xc68   : > { %v9838_v54 = vpop.f32.mrf.mxu2 }
 0xc69   : > { %4929 = vmatmul.bf16.gmra.mxu3 %v10782_v38 }
 0xc6e   : > { %v9840_v62 = vpop.f32.mrf.mxu0 }
 0xc70   : > { %v9844_v11 = vpop.f32.mrf.mxu2 }
 0xc76   : > { %v9846_v13 = vpop.f32.mrf.mxu0 }
 0xc79   : > { %4934 = vmatmul.bf16.gmra.mxu3 %v10783_v45 }
 0xc7e   : > { %v9852_v36 = vpop.f32.mrf.mxu0 }
 0xc86   : > { %v9858_v15 = vpop.f32.mrf.mxu0 }
 0xc89   : > { %4939 = vmatmul.bf16.gmra.mxu3 %v10784_v61 }
 0xc8e   : > { %v9866_v19 = vpop.f32.mrf.mxu0 }
 0xc99   : > { %4944 = vmatmul.bf16.gmra.mxu3 %v4606_v53  ;;  %v9850_v53 = vpop.f32.mrf.mxu2 }
 0xca1   : > { %v9856_v28 = vpop.f32.mrf.mxu2 }
 0xca9   : > { %4949 = vmatmul.bf16.gmra.mxu3 %v4607_v43  ;;  %v9862_v63 = vpop.f32.mrf.mxu2  ;;  %v9872_v43 = vpop.f32.mrf.mxu0 }
 0xcb1   : > { %v9870_v25 = vpop.f32.mrf.mxu2  ;;  %v5038_v12 = vpop.f32.mrf.mxu0 }
 0xcb9   : > { %4954 = vmatmul.bf16.gmra.mxu3 %v4608_v39  ;;  %v4989_v46 = vpop.f32.mrf.mxu2  ;;  %v9876_v23 = vpop.f32.mrf.mxu0 }
 0xcc1   : > { %v4991_v42 = vpop.f32.mrf.mxu2  ;;  %v5043_v39 = vpop.f32.mrf.mxu0 }
 0xcc9   : > { %v4994_v52 = vpop.f32.mrf.mxu2  ;;  %v5045_v61 = vpop.f32.mrf.mxu0 }
 0xccc   : > { %v9842_v31 = vpop.f32.mrf.mxu3 }
 0xcd1   : > { %v4996_v45 = vpop.f32.mrf.mxu2  ;;  %v5048_v1 = vpop.f32.mrf.mxu0 }
 0xcd4   : > { %v9848_v27 = vpop.f32.mrf.mxu3 }
 0xcd9   : > { %v4999_v58 = vpop.f32.mrf.mxu2  ;;  %v5050_v20 = vpop.f32.mrf.mxu0 }
 0xcdc   : > { %v9854_v60 = vpop.f32.mrf.mxu3 }
 0xce1   : > { %v5001_v29 = vpop.f32.mrf.mxu2  ;;  %v5053_v35 = vpop.f32.mrf.mxu0 }
 0xce4   : > { %v9860_v59 = vpop.f32.mrf.mxu3 }
 0xce9   : > { %v5004_v2 = vpop.f32.mrf.mxu2 }
 0xcec   : > { %v9864_v18 = vpop.f32.mrf.mxu3 }
 0xcf1   : > { %v5006_v37 = vpop.f32.mrf.mxu2 }
 0xcf4   : > { %v9868_v10 = vpop.f32.mrf.mxu3 }
 0xcfc   : > { %v9874_v5 = vpop.f32.mrf.mxu3 }
 0xd04   : > { %v4937_v57 = vpop.f32.mrf.mxu3 }
 0xd0c   : > { %v4940_v55 = vpop.f32.mrf.mxu3 }
 0xd0d   : > { %v4941_v17 = vadd.f32 %v9881_v6, %v4940_v55 }
 0xd0f   : > { %v4990_v47 = vadd.f32 %v4989_v46, %v4941_v17 }
 0xd11   : > { %v9884_v41 = vadd.f32 %v5038_v12, %v4990_v47  ;;  %v5055_v12 = vpop.f32.mrf.mxu0 }
 0xd14   : > { %v4942_v30 = vpop.f32.mrf.mxu3 }
 0xd1c   : > { %v4945_v38 = vpop.f32.mrf.mxu3 }
 0xd24   : > { %v4947_v3 = vpop.f32.mrf.mxu3 }
 0xd25   : > { %v4948_v49 = vadd.f32 %v9881_v6, %v4947_v3 }
 0xd2c   : > { %v4950_v56 = vpop.f32.mrf.mxu3 }
 0xd2d   : > { %v4951_v17 = vadd.f32 %v9881_v6, %v4950_v56  ;;  %v6865_v56 = vld [vmem:[%s10403_s3 + $0x1d8] sm:$0xff] }
 0xd2f   : > { %v5000_v0 = vadd.f32 %v4999_v58, %v4951_v17  ;;  %v6866_v58 = vld [vmem:[%s10403_s3 + $0x1e0] sm:$0xff] }
 0xd34   : > { %v4952_v14 = vpop.f32.mrf.mxu3 }
 0xd35   : > { %v4953_v24 = vadd.f32 %v9881_v6, %v4952_v14  ;;  %v6868_v14 = vld [vmem:[%s10403_s3 + $0x1f0] sm:$0xff] }
 0xd37   : > { %v5002_v4 = vadd.f32 %v5001_v29, %v4953_v24  ;;  %v6867_v24 = vld [vmem:[%s10403_s3 + $0x1e8] sm:$0xff]  ;;  %v4997_v29 = vadd.f32 %v4996_v45, %v4948_v49  ;;  %v4938_v49 = vadd.f32 %v9881_v6, %v4937_v57 }
 0xd38   : > { %v6863_v57 = vld [vmem:[%s10403_s3 + $0x1c8] sm:$0xff] }
 0xd3c   : > { %v4955_v50 = vpop.f32.mrf.mxu3 }
 0xd3d   : > { %v4956_v21 = vadd.f32 %v9881_v6, %v4955_v50  ;;  %v6869_v50 = vld [vmem:[%s10403_s3 + $0x1f8] sm:$0xff] }
 0xd3e   : > { %5095 = vmatpush.msra.mxu3 %v6869_v50 }
 0xd3f   : > { %v5005_v46 = vadd.f32 %v5004_v2, %v4956_v21  ;;  %v4943_v2 = vadd.f32 %v9881_v6, %v4942_v30 }
 0xd40   : > { %5096 = vmatpush.msra.mxu3 %v6868_v14 }
 0xd41   : > { %v9901_v21 = vadd.f32 %v5053_v35, %v5005_v46  ;;  %v9914_v35 = vadd.f32 %v5048_v1, %v5000_v0  ;;  %v4992_v30 = vadd.f32 %v4991_v42, %v4943_v2  ;;  %v4936_v0 = vadd.f32 %v9881_v6, %v9874_v5  ;;  %v6862_v5 = vld [vmem:[%s10403_s3 + $0x1c0] sm:$0xff]  ;;  %v7173_v2 = vld [vmem:[%s10401_s1 + $0x4b8] sm:$0xff] }
 0xd42   : > { %5097 = vmatpush.msra.mxu3 %v6867_v24  ;;  %v4933_v42 = vadd.f32 %v9881_v6, %v9868_v10  ;;  %v6861_v10 = vld [vmem:[%s10403_s3 + $0x1b8] sm:$0xff] }
 0xd43   : > { %v4985_v45 = vadd.f32 %v9862_v63, %v4936_v0  ;;  %v6860_v63 = vld [vmem:[%s10403_s3 + $0x1b0] sm:$0xff]  ;;  %v7181_v24 = vld [vmem:[%s10401_s1 + $0x4f8] sm:$0xff]  ;;  %v7178_v0 = vld [vmem:[%s10401_s1 + $0x4e0] sm:$0xff] }
 0xd44   : > { %v4957_v34 = vpop.f32.mrf.mxu3  ;;  %5098 = vmatpush.msra.mxu3 %v6866_v58  ;;  %v7180_v58 = vld [vmem:[%s10401_s1 + $0x4f0] sm:$0xff] }
 0xd45   : > { %v4958_v55 = vadd.f32 %v9881_v6, %v4957_v34  ;;  %v4946_v34 = vadd.f32 %v9881_v6, %v4945_v38  ;;  %v9939_v38 = vadd.f32 %v9876_v23, %v4992_v30  ;;  %v4982_v23 = vadd.f32 %v9856_v28, %v4933_v42  ;;  %v6859_v28 = vld [vmem:[%s10403_s3 + $0x1a8] sm:$0xff] }
 0xd46   : > { %5099 = vmatpush.msra.mxu3 %v6865_v56  ;;  %v7188_v56 = vld [vmem:[%s10401_s1 + $0x530] sm:$0xff]  ;;  %v7171_v30 = vld [vmem:[%s10401_s1 + $0x4a8] sm:$0xff] }
 0xd47   : > { %v5007_v47 = vadd.f32 %v5006_v37, %v4958_v55  ;;  %v9908_v37 = vadd.f32 %v5050_v20, %v5002_v4  ;;  %v4995_v3 = vadd.f32 %v4994_v52, %v4946_v34  ;;  %v9921_v4 = vadd.f32 %v5045_v61, %v4997_v29  ;;  %v6864_v20 = vld [vmem:[%s10403_s3 + $0x1d0] sm:$0xff]  ;;  %v7189_v29 = vld [vmem:[%s10401_s1 + $0x538] sm:$0xff] }
 0xd48   : > { %v4987_v52 = vadd.f32 %v9870_v25, %v4938_v49  ;;  %5100 = vmatpush.msra.mxu3 %v6864_v20  ;;  %v4928_v25 = vadd.f32 %v9881_v6, %v9860_v59  ;;  %v9966_v59 = vadd.f32 %v9866_v19, %v4985_v45  ;;  %v4921_v19 = vadd.f32 %v9881_v6, %v9842_v31  ;;  %v7179_v49 = vld [vmem:[%s10401_s1 + $0x4e8] sm:$0xff] }
 0xd49   : > { %v9891_v32 = vadd.f32 %v5055_v12, %v5007_v47  ;;  %v9929_v1 = vadd.f32 %v5043_v39, %v4995_v3  ;;  %v4931_v39 = vadd.f32 %v9881_v6, %v9864_v18  ;;  %v4926_v18 = vadd.f32 %v9881_v6, %v9854_v60  ;;  %v7233_v12 = vld [vmem:[%s10405_s5] sm:$0xff]  ;;  %v7172_v3 = vld [vmem:[%s10401_s1 + $0x4b0] sm:$0xff]  ;;  %5859 = vmatpush.bf16.msrb.mxu2 %v7189_v29  ;;  %v7187_v20 = vld [vmem:[%s10401_s1 + $0x528] sm:$0xff] }
 0xd4a   : > { %5101 = vmatpush.msra.mxu3 %v6863_v57  ;;  %v9956_v61 = vadd.f32 %v9872_v43, %v4987_v52  ;;  %v4923_v43 = vadd.f32 %v9881_v6, %v9848_v27  ;;  %v4977_v17 = vadd.f32 %v9844_v11, %v4928_v25  ;;  %v9976_v60 = vadd.f32 %v9858_v15, %v4982_v23  ;;  %v6857_v11 = vld [vmem:[%s10403_s3 + $0x198] sm:$0xff]  ;;  %v6856_v6 = vld [vmem:[%s10403_s3 + $0x190] sm:$0xff]  ;;  %v7170_v25 = vld [vmem:[%s10401_s1 + $0x4a0] sm:$0xff] }
 0xd4b   : > { %5058 = vmatpush.msrb.mxu1 %v9891_v32  ;;  %v4980_v55 = vadd.f32 %v9850_v53, %v4931_v39  ;;  %v6858_v53 = vld [vmem:[%s10403_s3 + $0x1a0] sm:$0xff]  ;;  %v4975_v46 = vadd.f32 %v9838_v54, %v4926_v18  ;;  %v4970_v54 = vadd.f32 %v9830_v51, %v4921_v19  ;;  %v7169_v18 = vld [vmem:[%s10401_s1 + $0x498] sm:$0xff]  ;;  %v7167_v19 = vld [vmem:[%s10401_s1 + $0x488] sm:$0xff] }
 0xd4c   : > { %5102 = vmatpush.msra.mxu3 %v6862_v5  ;;  %v4972_v15 = vadd.f32 %v9834_v48, %v4923_v43  ;;  %v9994_v47 = vadd.f32 %v9846_v13, %v4977_v17  ;;  %v6855_v48 = vld [vmem:[%s10403_s3 + $0x188] sm:$0xff]  ;;  %v7186_v23 = vld [vmem:[%s10401_s1 + $0x520] sm:$0xff]  ;;  %v7168_v43 = vld [vmem:[%s10401_s1 + $0x490] sm:$0xff] }
 0xd4d   : > { %5059 = vmatpush.msrb.mxu1 %v9901_v21  ;;  %v9986_v27 = vadd.f32 %v9852_v36, %v4980_v55  ;;  %v10002_v31 = vadd.f32 %v9840_v62, %v4975_v46  ;;  %v10013_v51 = vadd.f32 %v9832_v7, %v4970_v54  ;;  %v7232_v62 = vld [vmem:[%s10406_s6] sm:$0xff]  ;;  %v6870_v7 = vld [vmem:[%s10404_s4 + $0x18] sm:$0xff]  ;;  %5860 = vmatpush.bf16.msrb.mxu2 %v7188_v56  ;;  %v7184_v17 = vld [vmem:[%s10401_s1 + $0x510] sm:$0xff] }
 0xd4e   : > { %5103 = vmatpush.msra.mxu3 %v6861_v10  ;;  %v10009_v13 = vadd.f32 %v9836_v22, %v4972_v15  ;;  %v6854_v36 = vld [vmem:[%s10403_s3 + $0x180] sm:$0xff]  ;;  %v7177_v10 = vld [vmem:[%s10401_s1 + $0x4d8] sm:$0xff]  ;;  %v7183_v46 = vld [vmem:[%s10401_s1 + $0x508] sm:$0xff] }
 0xd4f   : > { %5060 = vmatpush.msrb.mxu1 %v9908_v37  ;;  %v7185_v55 = vld [vmem:[%s10401_s1 + $0x518] sm:$0xff]  ;;  %v7182_v15 = vld [vmem:[%s10401_s1 + $0x500] sm:$0xff] }
 0xd50   : > { %5104 = vmatpush.msra.mxu3 %v6860_v63  ;;  %v7176_v63 = vld [vmem:[%s10401_s1 + $0x4d0] sm:$0xff] }
 0xd51   : > { %5061 = vmatpush.msrb.mxu1 %v9914_v35  ;;  %5861 = vmatpush.bf16.msrb.mxu2 %v7187_v20 }
 0xd52   : > { %5105 = vmatpush.msra.mxu3 %v6859_v28  ;;  %v7175_v28 = vld [vmem:[%s10401_s1 + $0x4c8] sm:$0xff] }
 0xd53   : > { %5062 = vmatpush.msrb.mxu1 %v9921_v4 }
 0xd54   : > { %5106 = vmatpush.msra.mxu3 %v6858_v53  ;;  %v7174_v53 = vld [vmem:[%s10401_s1 + $0x4c0] sm:$0xff] }
 0xd55   : > { %5063 = vmatpush.msrb.mxu1 %v9929_v1  ;;  %5862 = vmatpush.bf16.msrb.mxu2 %v7186_v23 }
 0xd56   : > { %5107 = vmatpush.msra.mxu3 %v6857_v11  ;;  %v7166_v11 = vld [vmem:[%s10401_s1 + $0x480] sm:$0xff] }
 0xd57   : > { %5064 = vmatpush.msrb.mxu1 %v9939_v38 }
 0xd58   : > { %5108 = vmatpush.msra.mxu3 %v6856_v6 }
 0xd59   : > { %5065 = vmatpush.msrb.mxu1 %v9884_v41  ;;  %5863 = vmatpush.bf16.msrb.mxu2 %v7185_v55 }
 0xd5a   : > { %5109 = vmatpush.msra.mxu3 %v6855_v48 }
 0xd5b   : > { %5066 = vmatpush.msrb.mxu1 %v9956_v61 }
 0xd5c   : > { %5110 = vmatpush.msra.mxu3 %v6854_v36 }
 0xd5d   : > { %5067 = vmatpush.msrb.mxu1 %v9966_v59  ;;  %5864 = vmatpush.bf16.msrb.mxu2 %v7184_v17 }
 0xd5e   : > { %5761 = vmatpush.bf16.msrb.mxu3 %v7173_v2 }
 0xd5f   : > { %5068 = vmatpush.msrb.mxu1 %v9976_v60 }
 0xd61   : > { %5069 = vmatpush.msrb.mxu1 %v9986_v27  ;;  %5865 = vmatpush.bf16.msrb.mxu2 %v7183_v46 }
 0xd62   : > { %5762 = vmatpush.bf16.msrb.mxu3 %v7172_v3 }
 0xd63   : > { %5070 = vmatpush.msrb.mxu1 %v9994_v47 }
 0xd65   : > { %5071 = vmatpush.msrb.mxu1 %v10002_v31  ;;  %5866 = vmatpush.bf16.msrb.mxu2 %v7182_v15 }
 0xd66   : > { %5763 = vmatpush.bf16.msrb.mxu3 %v7171_v30 }
 0xd67   : > { %5072 = vmatpush.msrb.mxu1 %v10009_v13 }
 0xd69   : > { %5073 = vmatpush.msrb.mxu1 %v10013_v51 }
 0xd6a   : > { %5074 = vmatmul.f32.vlgmr.msrb.gmra.mxu1 %v7232_v62  ;;  %5764 = vmatpush.bf16.msrb.mxu3 %v7170_v25 }
 0xd6b   : > { %5138 = vmatpush.msra.mxu1 %v6870_v7 }
 0xd6d   : > { %5166 = vmatpush.msrb.mxu1 %v7233_v12 }
 0xd6e   : > { %5765 = vmatpush.bf16.msrb.mxu3 %v7169_v18 }
 0xd72   : > { %5766 = vmatpush.bf16.msrb.mxu3 %v7168_v43 }
 0xd76   : > { %5767 = vmatpush.bf16.msrb.mxu3 %v7167_v19 }
 0xd7a   : > { %5768 = vmatpush.bf16.msrb.mxu3 %v7166_v11 }
 0xde7   : > { %v5075_v22 = vpop.f32.mrf.mxu1 }
 0xde8   : > { %5111 = vmatmul.f32.vlgmr.msra.gmra.mxu3 %v5075_v22 }
 0xe6b   : > { %v5112_v50 = vpop.f32.mrf.mxu3 }
 0xe6c   : > { %vm5115_vm1 = vcmp.ge.f32.partialorder %v5112_v50, 0.0  ;;  %v5116_v14 = vmul.f32 0.01, %v5112_v50 }
 0xe6e   : > { %v5117_v34 = vsel %vm5115_vm1, %v5112_v50, %v5116_v14  ;;  %vm10786_vm1 = vmmov %vm10785_vm8 }
 0xe6f   : > { %6871 = vmatmul.msk.f32.vlgmr.msra.gmra.mxu1 %vm10785_vm8, %v5117_v34 }
 0xe70   : > { %5810 = vmatpush.bf16.msra.mxu1 %v7181_v24 }
 0xe74   : > { %5811 = vmatpush.bf16.msra.mxu1 %v7180_v58 }
 0xe78   : > { %5812 = vmatpush.bf16.msra.mxu1 %v7179_v49 }
 0xe7c   : > { %5813 = vmatpush.bf16.msra.mxu1 %v7178_v0 }
 0xe80   : > { %5814 = vmatpush.bf16.msra.mxu1 %v7177_v10 }
 0xe84   : > { %5815 = vmatpush.bf16.msra.mxu1 %v7176_v63 }
 0xe88   : > { %5816 = vmatpush.bf16.msra.mxu1 %v7175_v28 }
 0xe8c   : > { %5817 = vmatpush.bf16.msra.mxu1 %v7174_v53 }
 0xeec   : > { %v5140_v57 = vpop.f32.mrf.mxu1 }
 0xeed   : > { %v5143_v42 = vsub.f32 0.0, %v5140_v57 }
 0xeef   : > { %v5144_v52 = vmul.f32 1.442695, %v5143_v42 }
 0xef1   : > { %7225 = vpow2.f32 %v5144_v52 }
 0xef7   : > { %v7226_v5 = vpop.eup %7225 }
 0xef8   : > { %v5146_v39 = vadd.f32 1.0, %v7226_v5 }
 0xefa   : > { %7227 = vrcp.f32 %v5146_v39 }
 0xf00   : > { %v7228_v45 = vpop.eup %7227 }
 0xf01   : > { %6872 = vmatmul.msk.f32.vlgmr.msrb.gmra.mxu1 %vm10786_vm1, %v7228_v45 }
 0xf7e   : > { %v10102_v6 = vpop.f32.mrf.mxu1 }
 0xf7f   : > { %v5172_v54 = vrot.slane %v10102_v6, 1  ;;  %v5178_v48 = vrot.slane %v10102_v6, 7  ;;  %v5179_v62 = vperm.slane %v10102_v6, 0  ;;  %v5173_v22 = vrot.slane %v10102_v6, 2 }
 0xf80   : > { %v5174_v29 = vrot.slane %v10102_v6, 3 }
 0xf81   : > { %v5180_v36 = vperm.slane %v5172_v54, 0  ;;  %v10108_v7 = vperm.slane %v5178_v48, 0  ;;  %v5195_v12 = vmul.f32 %v5179_v62, %v10013_v51  ;;  %v5196_v50 = vmul.f32 %v5179_v62, %v10009_v13 }
 0xf82   : > { %v5181_v56 = vperm.slane %v5173_v22, 0  ;;  %v10792_v22 = vld [vmem:[#allocation2_spill] sm:$0xff] }
 0xf83   : > { %v5197_v14 = vmul.f32 %v5180_v36, %v10002_v31  ;;  %v5198_v34 = vmul.f32 %v5180_v36, %v9994_v47  ;;  %v5210_v24 = vmul.f32 %v10108_v7, %v9891_v32  ;;  %v5211_v2 = vadd.f32 %v5195_v12, %v9282_v33 }
 0xf84   : > { %v5212_v3 = vadd.f32 %v5196_v50, %v9285_v44  ;;  %v5199_v55 = vmul.f32 %v5181_v56, %v9986_v27  ;;  %v5182_v12 = vperm.slane %v5174_v29, 0 }
 0xf85   : > { %v5213_v58 = vadd.f32 %v5197_v14, %v9288_v40  ;;  %v5226_v51 = vadd.f32 %v5210_v24, %v9292_v16  ;;  %vm5227_vm8 = vcmp.ge.f32.partialorder %v5211_v2, 0.0  ;;  %v5243_v13 = vmul.f32 0.01, %v5211_v2 }
 0xf86   : > { %vm5228_vm1 = vcmp.ge.f32.partialorder %v5212_v3, 0.0  ;;  %v5244_v31 = vmul.f32 0.01, %v5212_v3  ;;  %v5214_v47 = vadd.f32 %v5198_v34, %v9305_v26  ;;  %v5215_v27 = vadd.f32 %v5199_v55, %v10792_v22 }
 0xf87   : > { %v5245_v49 = vmul.f32 0.01, %v5213_v58  ;;  %v10122_v30 = vsel %vm5227_vm8, %v5211_v2, %v5243_v13  ;;  %vm5242_vm13 = vcmp.ge.f32.partialorder %v5226_v51, 0.0  ;;  %v5258_v33 = vmul.f32 0.01, %v5226_v51 }
 0xf88   : > { %vm5229_vm12 = vcmp.ge.f32.partialorder %v5213_v58, 0.0  ;;  %v5260_v32 = vsel %vm5228_vm1, %v5212_v3, %v5244_v31  ;;  %v5275_v40 = vrot.slane %v10122_v30, 7  ;;  %v5323_v44 = vrot.slane %v10122_v30, 1 }
 0xf89   : > { %v5387_v16 = vpack.c.bf16 %v10122_v30, %v10122_v30  ;;  %v5276_v20 = vrot.slane %v5260_v32, 7  ;;  %v5324_v0 = vrot.slane %v5260_v32, 1  ;;  %v5388_v57 = vpack.c.bf16 %v5260_v32, %v5260_v32 }
 0xf8a   : > { %v10128_v42 = vsel %vm5242_vm13, %v5226_v51, %v5258_v33  ;;  %v5261_v5 = vsel %vm5229_vm12, %v5213_v58, %v5245_v49  ;;  %v5246_v39 = vmul.f32 0.01, %v5214_v47  ;;  %vm10787_vm8 = vcmp.lt.s32.totalorder %v7323_v8, 1 }
 0xf8b   : > { %v5483_v52 = vunpack.c.l.b16 %v5387_v16  ;;  %v5290_v26 = vrot.slane %v10128_v42, 7  ;;  %v5484_v45 = vunpack.c.l.b16 %v5388_v57  ;;  %v5305_v10 = vsel %vm10787_vm8, %v5275_v40, %v5276_v20  ;;  %vm10789_vm13 = vmmov %vm10787_vm8 }
 0xf8c   : > { %v5325_v25 = vrot.slane %v5261_v5, 1  ;;  %vm10788_vm1 = vcmp.lt.s32.totalorder %v7323_v8, 7  ;;  %v5372_v18 = vpack.c.bf16 %v5305_v10, %v5305_v10  ;;  %vm5230_vm6 = vcmp.ge.f32.partialorder %v5214_v47, 0.0 }
 0xf8d   : > { %v5353_v23 = vsel %vm10788_vm1, %v5323_v44, %v5324_v0  ;;  %v5306_v63 = vsel %vm10789_vm13, %v5290_v26, %v5275_v40  ;;  %v5499_v28 = vpack.c.b16 %v5484_v45, %v5483_v52  ;;  %vm10790_vm12 = vmmov %vm10788_vm1  ;;  %v5262_v54 = vsel %vm5230_vm6, %v5214_v47, %v5246_v39  ;;  %v10794_v47 = vld [vmem:[#allocation18_spill] sm:$0xff]  ;;  %v10798_v52 = vld [vmem:[#allocation19_spill] sm:$0xff] }
 0xf8e   : > { %v5307_v43 = vsel %vm10774_vm11, 0.0, %v5306_v63  ;;  %v5352_v17 = vsel %vm10790_vm12, %v5324_v0, %v5325_v25  ;;  %v5403_v53 = vpack.c.bf16 %v5353_v23, %v5353_v23  ;;  %v5436_v62 = vunpack.c.l.b16 %v5372_v18  ;;  %vm10795_vm6 = vmmov %vm10787_vm8 }
 0xf8f   : > { %v5371_v19 = vpack.c.bf16 %v5307_v43, %v5307_v43  ;;  %v5356_v11 = vsel %vm10646_vm10, 0.0, %v5352_v17  ;;  %5818 = vmatmul.bf16.vlgmr.msra.gmra.mxu1 %v5499_v28  ;;  %v5277_v36 = vrot.slane %v5261_v5, 7  ;;  %v5200_v34 = vmul.f32 %v5181_v56, %v9976_v60  ;;  %vm10793_vm10 = vmmov %vm10787_vm8 }
 0xf90   : > { %v5404_v15 = vpack.c.bf16 %v5356_v11, %v5356_v11  ;;  %v5531_v50 = vunpack.c.l.b16 %v5403_v53  ;;  %v5278_v2 = vrot.slane %v5262_v54, 7  ;;  %vm5231_vm11 = vcmp.ge.f32.partialorder %v5215_v27, 0.0  ;;  %vm10797_vm8 = vmmov %vm10788_vm1 }
 0xf91   : > { %v5435_v48 = vunpack.c.l.b16 %v5371_v19  ;;  %v5326_v58 = vrot.slane %v5262_v54, 1  ;;  %v5304_v3 = vsel %vm10793_vm10, %v5276_v20, %v5277_v36  ;;  %v5247_v51 = vmul.f32 0.01, %v5215_v27  ;;  %vm10802_vm12 = vmmov %vm10788_vm1 }
 0xf92   : > { %v5532_v9 = vunpack.c.l.b16 %v5404_v15  ;;  %v5389_v13 = vpack.c.bf16 %v5261_v5, %v5261_v5  ;;  %v5390_v31 = vpack.c.bf16 %v5262_v54, %v5262_v54  ;;  %v5201_v49 = vmul.f32 %v5182_v12, %v9966_v59  ;;  %vm10806_vm10 = vmmov %vm10788_vm1 }
 0xf93   : > { %v5451_v14 = vpack.c.b16 %v5436_v62, %v5435_v48  ;;  %v5263_v29 = vsel %vm5231_vm11, %v5215_v27, %v5247_v51  ;;  %v5216_v33 = vadd.f32 %v5200_v34, %v10794_v47  ;;  %v5303_v60 = vsel %vm10795_vm6, %v5277_v36, %v5278_v2  ;;  %v10801_v34 = vld [vmem:[#allocation20_spill] sm:$0xff] }
 0xf94   : > { %v5547_v24 = vpack.c.b16 %v5532_v9, %v5531_v50  ;;  %v5309_v32 = vsel %vm7413_vm2, 0.0, %v5304_v3  ;;  %v5327_v40 = vrot.slane %v5263_v29, 1  ;;  %v5175_v16 = vrot.slane %v10102_v6, 4 }
 0xf95   : > { %5769 = vmatmul.bf16.vlgmr.msrb.gmra.mxu3 %v5451_v14  ;;  %v5351_v20 = vsel %vm10797_vm8, %v5325_v25, %v5326_v58  ;;  %v5485_v0 = vunpack.c.l.b16 %v5389_v13  ;;  %v5486_v57 = vunpack.c.l.b16 %v5390_v31  ;;  %v5217_v5 = vadd.f32 %v5201_v49, %v10798_v52  ;;  %v10804_v13 = vld [vmem:[#allocation21_spill] sm:$0xff] }
 0xf96   : > { %5867 = vmatmul.bf16.vlgmr.msrb.gmra.mxu2 %v5547_v24  ;;  %v5350_v59 = vsel %vm10788_vm1, %v5326_v58, %v5327_v40  ;;  %v5373_v39 = vpack.c.bf16 %v5309_v32, %v5309_v32  ;;  %v5374_v45 = vpack.c.bf16 %v5303_v60, %v5303_v60  ;;  %v5248_v63 = vmul.f32 0.01, %v5216_v33 }
 0xf97   : > { %v5358_v23 = vsel %vm7670_vm0, 0.0, %v5350_v59  ;;  %v5405_v18 = vpack.c.bf16 %v5351_v20, %v5351_v20  ;;  %vm5232_vm2 = vcmp.ge.f32.partialorder %v5216_v33, 0.0  ;;  %vm5233_vm13 = vcmp.ge.f32.partialorder %v5217_v5, 0.0  ;;  %vm10800_vm0 = vmmov %vm10795_vm6 }
 0xf98   : > { %v5406_v55 = vpack.c.bf16 %v5358_v23, %v5358_v23  ;;  %v5249_v28 = vmul.f32 0.01, %v5217_v5  ;;  %v5183_v43 = vperm.slane %v5175_v16, 0  ;;  %v5500_v25 = vpack.c.b16 %v5486_v57, %v5485_v0  ;;  %vm10805_vm11 = vmmov %vm10800_vm0 }
 0xf99   : > { %v5437_v17 = vunpack.c.l.b16 %v5373_v39  ;;  %v5438_v53 = vunpack.c.l.b16 %v5374_v45  ;;  %v5264_v19 = vsel %vm5232_vm2, %v5216_v33, %v5248_v63  ;;  %v5533_v11 = vunpack.c.l.b16 %v5405_v18  ;;  %vm10810_vm8 = vmmov %vm10800_vm0 }
 0xf9a   : > { %v10166_v46 = vsel %vm5233_vm13, %v5217_v5, %v5249_v28  ;;  %v5534_v15 = vunpack.c.l.b16 %v5406_v55  ;;  %v5279_v54 = vrot.slane %v5263_v29, 7  ;;  %v5202_v48 = vmul.f32 %v5182_v12, %v9956_v61 }
 0xf9b   : > { %v5328_v62 = vrot.slane %v5264_v19, 1  ;;  %v5329_v36 = vrot.slane %v10166_v46, 1  ;;  %v5452_v22 = vpack.c.b16 %v5438_v53, %v5437_v17  ;;  %v5203_v27 = vmul.f32 %v5183_v43, %v9884_v41 }
 0xf9c   : > { %v5548_v50 = vpack.c.b16 %v5534_v15, %v5533_v11  ;;  %v5280_v9 = vrot.slane %v5264_v19, 7  ;;  %v5302_v14 = vsel %vm10800_vm0, %v5278_v2, %v5279_v54  ;;  %v5218_v24 = vadd.f32 %v5202_v48, %v10801_v34  ;;  %v10813_v34 = vld [vmem:[#allocation23_spill] sm:$0xff] }
 0xf9d   : > { %v5391_v58 = vpack.c.bf16 %v5263_v29, %v5263_v29  ;;  %v5392_v3 = vpack.c.bf16 %v5264_v19, %v5264_v19  ;;  %v5348_v61 = vsel %vm10802_vm12, %v5328_v62, %v5329_v36  ;;  %v5311_v51 = vsel %vm7474_vm5, 0.0, %v5302_v14  ;;  %vm10817_vm12 = vmmov %vm10788_vm1 }
 0xf9e   : > { %v5219_v31 = vadd.f32 %v5203_v27, %v10804_v13  ;;  %v5301_v41 = vsel %vm10805_vm11, %v5279_v54, %v5280_v9  ;;  %v5250_v49 = vmul.f32 0.01, %v5218_v24  ;;  %v5349_v2 = vsel %vm10806_vm10, %v5327_v40, %v5328_v62 }
 0xf9f   : > { %5823 = vmatmul.bf16.gmra.mxu1 %v5500_v25  ;;  %v5360_v33 = vsel %vm7689_vm3, 0.0, %v5348_v61  ;;  %vm5234_vm6 = vcmp.ge.f32.partialorder %v5218_v24, 0.0  ;;  %v5176_v29 = vrot.slane %v10102_v6, 5  ;;  %v5487_v60 = vunpack.c.l.b16 %v5391_v58  ;;  %vm10808_vm3 = vmmov %vm10800_vm0 }
 0xfa0   : > { %v5488_v56 = vunpack.c.l.b16 %v5392_v3  ;;  %v5375_v32 = vpack.c.bf16 %v5311_v51, %v5311_v51  ;;  %v5376_v16 = vpack.c.bf16 %v5301_v41, %v5301_v41  ;;  %v5281_v20 = vrot.slane %v10166_v46, 7  ;;  %vm10818_vm11 = vmmov %vm10808_vm3 }
 0xfa1   : > { %v5251_v0 = vmul.f32 0.01, %v5219_v31  ;;  %v5407_v57 = vpack.c.bf16 %v5349_v2, %v5349_v2  ;;  %v5408_v59 = vpack.c.bf16 %v5360_v33, %v5360_v33  ;;  %v10187_v52 = vsel %vm5234_vm6, %v5218_v24, %v5250_v49  ;;  %v10815_v49 = vld [vmem:[#allocation28_spill] sm:$0xff]  ;;  %vm10823_vm10 = vmmov %vm10808_vm3 }
 0xfa2   : > { %vm5235_vm5 = vcmp.ge.f32.partialorder %v5219_v31, 0.0  ;;  %v5184_v5 = vperm.slane %v5176_v29, 0  ;;  %v5501_v40 = vpack.c.b16 %v5488_v56, %v5487_v60  ;;  %v5439_v39 = vunpack.c.l.b16 %v5375_v32  ;;  %v10816_v32 = vld [vmem:[#allocation25_spill] sm:$0xff]  ;;  %vm10825_vm6 = vmmov %vm10788_vm1 }
 0xfa3   : > { %v5440_v45 = vunpack.c.l.b16 %v5376_v16  ;;  %v5282_v10 = vrot.slane %v10187_v52, 7  ;;  %v5300_v23 = vsel %vm10808_vm3, %v5280_v9, %v5281_v20  ;;  %v10192_v63 = vsel %vm5235_vm5, %v5219_v31, %v5251_v0  ;;  %vm10828_vm5 = vmmov %vm10788_vm1 }
 0xfa4   : > { %v5177_v18 = vrot.slane %v10102_v6, 6  ;;  %v5535_v55 = vunpack.c.l.b16 %v5407_v57  ;;  %v5536_v28 = vunpack.c.l.b16 %v5408_v59  ;;  %v5330_v25 = vrot.slane %v10187_v52, 1 }
 0xfa5   : > { %5774 = vmatmul.bf16.gmra.mxu3 %v5452_v22  ;;  %v5313_v53 = vsel %vm7510_vm7, 0.0, %v5300_v23  ;;  %v5331_v19 = vrot.slane %v10192_v63, 1  ;;  %v5204_v11 = vmul.f32 %v5183_v43, %v9939_v38  ;;  %v5453_v15 = vpack.c.b16 %v5440_v45, %v5439_v39  ;;  %vm10811_vm7 = vmmov %vm10788_vm1  ;;  %v10812_v43 = vld [vmem:[#allocation22_spill] sm:$0xff] }
 0xfa6   : > { %5872 = vmatmul.bf16.gmra.mxu2 %v5548_v50  ;;  %v5299_v54 = vsel %vm10810_vm8, %v5281_v20, %v5282_v10  ;;  %v5205_v48 = vmul.f32 %v5184_v5, %v9929_v1  ;;  %v5185_v62 = vperm.slane %v5177_v18, 0  ;;  %v5549_v6 = vpack.c.b16 %v5536_v28, %v5535_v55 }
 0xfa7   : > { %v5393_v22 = vpack.c.bf16 %v10166_v46, %v10166_v46  ;;  %v5394_v27 = vpack.c.bf16 %v10187_v52, %v10187_v52  ;;  %v5377_v50 = vpack.c.bf16 %v5313_v53, %v5313_v53  ;;  %v5378_v9 = vpack.c.bf16 %v5299_v54, %v5299_v54 }
 0xfa8   : > { %v5346_v38 = vsel %vm10811_vm7, %v5330_v25, %v5331_v19  ;;  %v5347_v1 = vsel %vm10788_vm1, %v5329_v36, %v5330_v25  ;;  %v5220_v14 = vadd.f32 %v5204_v11, %v10812_v43  ;;  %v5221_v24 = vadd.f32 %v5205_v48, %v10813_v34  ;;  %v10827_v34 = vld [vmem:[#allocation27_spill] sm:$0xff] }
 0xfa9   : > { %v5489_v46 = vunpack.c.l.b16 %v5393_v22  ;;  %v5208_v58 = vmul.f32 %v5185_v62, %v9908_v37  ;;  %v5490_v3 = vunpack.c.l.b16 %v5394_v27  ;;  %v5441_v61 = vunpack.c.l.b16 %v5377_v50  ;;  %v10821_v22 = vld [vmem:[#allocation24_spill] sm:$0xff] }
 0xfaa   : > { %v5362_v51 = vsel %vm7448_vm4, 0.0, %v5346_v38  ;;  %v5409_v13 = vpack.c.bf16 %v5347_v1, %v5347_v1  ;;  %v5442_v31 = vunpack.c.l.b16 %v5378_v9  ;;  %v5252_v41 = vmul.f32 0.01, %v5220_v14 }
 0xfab   : > { %v5224_v2 = vadd.f32 %v5208_v58, %v10815_v49  ;;  %v5209_v36 = vmul.f32 %v10108_v7, %v9901_v21  ;;  %vm5236_vm2 = vcmp.ge.f32.partialorder %v5220_v14, 0.0  ;;  %v5253_v47 = vmul.f32 0.01, %v5221_v24 }
 0xfac   : > { %v5410_v33 = vpack.c.bf16 %v5362_v51, %v5362_v51  ;;  %vm5237_vm13 = vcmp.ge.f32.partialorder %v5221_v24, 0.0  ;;  %v5502_v37 = vpack.c.b16 %v5490_v3, %v5489_v46  ;;  %v5537_v60 = vunpack.c.l.b16 %v5409_v13 }
 0xfad   : > { %vm5240_vm0 = vcmp.ge.f32.partialorder %v5224_v2, 0.0  ;;  %v5256_v29 = vmul.f32 0.01, %v5224_v2  ;;  %v5283_v56 = vrot.slane %v10192_v63, 7  ;;  %v5225_v16 = vadd.f32 %v5209_v36, %v10816_v32 }
 0xfae   : > { %v5454_v20 = vpack.c.b16 %v5442_v31, %v5441_v61  ;;  %v10223_v0 = vsel %vm5236_vm2, %v5220_v14, %v5252_v41  ;;  %v5338_v59 = vrot.slane %v10128_v42, 1  ;;  %v5395_v21 = vpack.c.bf16 %v10192_v63, %v10192_v63  ;;  %v10830_v41 = vld [vmem:[#allocation6_spill] sm:$0xff]  ;;  %vm10833_vm2 = vmmov %vm10828_vm5 }
 0xfaf   : > { %5828 = vmatmul.bf16.gmra.mxu1 %v5501_v40  ;;  %v10225_v57 = vsel %vm5240_vm0, %v5224_v2, %v5256_v29  ;;  %v10230_v7 = vsel %vm5237_vm13, %v5221_v24, %v5253_v47  ;;  %v5206_v52 = vmul.f32 %v5184_v5, %v9921_v4  ;;  %v5402_v40 = vpack.c.bf16 %v10128_v42, %v10128_v42 }
 0xfb0   : > { %v5538_v39 = vunpack.c.l.b16 %v5410_v33  ;;  %vm5241_vm4 = vcmp.ge.f32.partialorder %v5225_v16, 0.0  ;;  %v5257_v45 = vmul.f32 0.01, %v5225_v16  ;;  %v5354_v23 = vsel %vm10817_vm12, %v5338_v59, %v5323_v44 }
 0xfb1   : > { %v5284_v18 = vrot.slane %v10223_v0, 7  ;;  %v5332_v55 = vrot.slane %v10223_v0, 1  ;;  %v5298_v28 = vsel %vm10818_vm11, %v5282_v10, %v5283_v56  ;;  %v5288_v4 = vrot.slane %v10225_v57, 7 }
 0xfb2   : > { %v5333_v5 = vrot.slane %v10230_v7, 1  ;;  %v5207_v25 = vmul.f32 %v5185_v62, %v9914_v35  ;;  %v10246_v17 = vsel %vm5241_vm4, %v5225_v16, %v5257_v45  ;;  %v5370_v30 = vsel %vm10742_vm15, 0.0, %v5354_v23  ;;  %vm10822_vm15 = vmmov %vm10808_vm3 }
 0xfb3   : > { %v5337_v44 = vrot.slane %v10246_v17, 1  ;;  %v5401_v11 = vpack.c.bf16 %v10246_v17, %v10246_v17  ;;  %v5289_v10 = vrot.slane %v10246_v17, 7  ;;  %v5550_v54 = vpack.c.b16 %v5538_v39, %v5537_v60  ;;  %vm10837_vm4 = vmmov %vm10833_vm2 }
 0xfb4   : > { %v5396_v48 = vpack.c.bf16 %v10223_v0, %v10223_v0  ;;  %v5315_v35 = vsel %vm7546_vm9, 0.0, %v5298_v28  ;;  %v5418_v62 = vpack.c.bf16 %v5370_v30, %v5370_v30  ;;  %v5222_v27 = vadd.f32 %v5206_v52, %v10821_v22  ;;  %vm10824_vm9 = vmmov %vm10808_vm3 }
 0xfb5   : > { %5779 = vmatmul.bf16.gmra.mxu3 %v5453_v15  ;;  %v10253_v15 = vunpack.c.l.b16 %v5402_v40  ;;  %v10261_v50 = vunpack.c.l.b16 %v5401_v11  ;;  %v5291_v9 = vsel %vm10822_vm15, %v5289_v10, %v5290_v26  ;;  %v5292_v38 = vsel %vm10823_vm10, %v5288_v4, %v5289_v10  ;;  %vm10841_vm15 = vmmov %vm10833_vm2 }
 0xfb6   : > { %5877 = vmatmul.bf16.gmra.mxu2 %v5549_v6  ;;  %v5297_v1 = vsel %vm10824_vm9, %v5283_v56, %v5284_v18  ;;  %v5344_v43 = vsel %vm10825_vm6, %v5332_v55, %v5333_v5  ;;  %v5321_v14 = vsel %vm10779_vm14, 0.0, %v5292_v38  ;;  %v5386_v26 = vpack.c.bf16 %v5291_v9, %v5291_v9  ;;  %vm10829_vm14 = vmmov %vm10788_vm1  ;;  %v10835_v6 = vld [vmem:[#allocation11_spill] sm:$0xff] }
 0xfb7   : > { %v5223_v24 = vadd.f32 %v5207_v25, %v10827_v34  ;;  %v5506_v46 = vpack.c.b16 %v10253_v15, %v10261_v50  ;;  %v5385_v58 = vpack.c.bf16 %v5321_v14, %v5321_v14  ;;  %v5339_v3 = vsel %vm10828_vm5, %v5337_v44, %v5338_v59  ;;  %vm10832_vm1 = vmmov %vm10824_vm9 }
 0xfb8   : > { %v10288_v61 = vunpack.c.l.b16 %v5386_v26  ;;  %v5417_v12 = vpack.c.bf16 %v5339_v3, %v5339_v3  ;;  %v10290_v51 = vunpack.c.l.b16 %v5418_v62  ;;  %v5491_v13 = vunpack.c.l.b16 %v5395_v21  ;;  %vm10834_vm13 = vmmov %vm10832_vm1 }
 0xfb9   : > { %v5345_v31 = vsel %vm10829_vm14, %v5331_v19, %v5332_v55  ;;  %vm10831_vm3 = vnez %v10830_v41  ;;  %v10298_v2 = vunpack.c.l.b16 %v5385_v58  ;;  %v5492_v36 = vunpack.c.l.b16 %v5396_v48  ;;  %vm10840_vm11 = vmmov %vm10832_vm1 }
 0xfba   : > { %v5364_v49 = vsel %vm10831_vm3, 0.0, %v5344_v43  ;;  %v5379_v47 = vpack.c.bf16 %v5315_v35, %v5315_v35  ;;  %v5380_v33 = vpack.c.bf16 %v5297_v1, %v5297_v1  ;;  %v10300_v29 = vunpack.c.l.b16 %v5417_v12  ;;  %vm10842_vm10 = vmmov %vm10832_vm1 }
 0xfbb   : > { %vm5238_vm8 = vcmp.ge.f32.partialorder %v5222_v27, 0.0  ;;  %v5255_v60 = vmul.f32 0.01, %v5223_v24  ;;  %v5458_v56 = vpack.c.b16 %v10288_v61, %v10298_v2  ;;  %v5411_v63 = vpack.c.bf16 %v5345_v31, %v5345_v31  ;;  %vm10845_vm6 = vmmov %vm10833_vm2 }
 0xfbc   : > { %v5412_v32 = vpack.c.bf16 %v5364_v49, %v5364_v49  ;;  %vm5239_vm7 = vcmp.ge.f32.partialorder %v5223_v24, 0.0  ;;  %v5554_v19 = vpack.c.b16 %v10290_v51, %v10300_v29  ;;  %v5503_v16 = vpack.c.b16 %v5492_v36, %v5491_v13  ;;  %v10843_v36 = vld [vmem:[#allocation13_spill] sm:$0xff] }
 0xfbd   : > { %v5444_v59 = vunpack.c.l.b16 %v5380_v33  ;;  %v5271_v52 = vsel %vm5239_vm7, %v5223_v24, %v5255_v60  ;;  %v5539_v40 = vunpack.c.l.b16 %v5411_v63  ;;  %v5285_v45 = vrot.slane %v10230_v7, 7 }
 0xfbe   : > { %v5540_v39 = vunpack.c.l.b16 %v5412_v32  ;;  %v5335_v55 = vrot.slane %v5271_v52, 1  ;;  %v5397_v11 = vpack.c.bf16 %v10230_v7, %v10230_v7  ;;  %vm10836_vm0 = vnez %v10835_v6 }
 0xfbf   : > { %5833 = vmatmul.bf16.gmra.mxu1 %v5502_v37  ;;  %v5254_v37 = vmul.f32 0.01, %v5222_v27  ;;  %v5296_v30 = vsel %vm10832_vm1, %v5284_v18, %v5285_v45  ;;  %v10838_v18 = vld [vmem:[#allocation8_spill] sm:$0xff]  ;;  %v5287_v58 = vrot.slane %v5271_v52, 7  ;;  %v5336_v7 = vrot.slane %v10225_v57, 1 }
 0xfc0   : > { %v5551_v25 = vpack.c.b16 %v5540_v39, %v5539_v40  ;;  %v5317_v35 = vsel %vm10836_vm0, 0.0, %v5296_v30  ;;  %vm10839_vm12 = vnez %v10838_v18  ;;  %v5493_v22 = vunpack.c.l.b16 %v5397_v11 }
 0xfc1   : > { %v5270_v21 = vsel %vm5238_vm8, %v5222_v27, %v5254_v37  ;;  %v5381_v9 = vpack.c.bf16 %v5317_v35, %v5317_v35  ;;  %v5399_v13 = vpack.c.bf16 %v5271_v52, %v5271_v52  ;;  %v5400_v31 = vpack.c.bf16 %v10225_v57, %v10225_v57  ;;  %v10846_v37 = vld [vmem:[#allocation10_spill] sm:$0xff] }
 0xfc2   : > { %v5334_v23 = vrot.slane %v5270_v21, 1  ;;  %v5286_v53 = vrot.slane %v5270_v21, 7  ;;  %v5398_v10 = vpack.c.bf16 %v5270_v21, %v5270_v21  ;;  %v5340_v41 = vsel %vm10841_vm15, %v5336_v7, %v5337_v44 }
 0xfc3   : > { %v5445_v14 = vunpack.c.l.b16 %v5381_v9  ;;  %v5293_v49 = vsel %vm10842_vm10, %v5287_v58, %v5288_v4  ;;  %vm10844_vm9 = vnez %v10843_v36  ;;  %v5341_v33 = vsel %vm10845_vm6, %v5335_v55, %v5336_v7 }
 0xfc4   : > { %v5295_v48 = vsel %vm10834_vm13, %v5285_v45, %v5286_v53  ;;  %v5343_v0 = vsel %vm10837_vm4, %v5333_v5, %v5334_v23  ;;  %v5494_v27 = vunpack.c.l.b16 %v5398_v10  ;;  %v5294_v12 = vsel %vm10840_vm11, %v5286_v53, %v5287_v58 }
 0xfc5   : > { %5784 = vmatmul.bf16.gmra.mxu3 %v5454_v20  ;;  %v5443_v20 = vunpack.c.l.b16 %v5379_v47  ;;  %v5382_v38 = vpack.c.bf16 %v5295_v48, %v5295_v48  ;;  %v5413_v1 = vpack.c.bf16 %v5343_v0, %v5343_v0  ;;  %v5319_v47 = vsel %vm10844_vm9, 0.0, %v5294_v12 }
 0xfc6   : > { %5882 = vmatmul.bf16.gmra.mxu2 %v5550_v54  ;;  %v5342_v54 = vsel %vm10833_vm2, %v5334_v23, %v5335_v55  ;;  %v5504_v42 = vpack.c.b16 %v5494_v27, %v5493_v22  ;;  %vm10847_vm5 = vnez %v10846_v37  ;;  %v5495_v63 = vunpack.c.l.b16 %v5399_v13  ;;  %v10356_v23 = vld [vmem:[%s10402_s2 + $0x6] ss:$0 sm:$0xff] }
 0xfc7   : > { %v5455_v28 = vpack.c.b16 %v5444_v59, %v5443_v20  ;;  %v5366_v62 = vsel %vm10839_vm12, 0.0, %v5342_v54  ;;  %v5446_v26 = vunpack.c.l.b16 %v5382_v38  ;;  %v5541_v34 = vunpack.c.l.b16 %v5413_v1 }
 0xfc8   : > { %v5414_v43 = vpack.c.bf16 %v5366_v62, %v5366_v62  ;;  %v5368_v60 = vsel %vm10847_vm5, 0.0, %v5340_v41  ;;  %v5496_v32 = vunpack.c.l.b16 %v5400_v31  ;;  %v5383_v17 = vpack.c.bf16 %v5319_v47, %v5319_v47 }
 0xfc9   : > { %v5456_v3 = vpack.c.b16 %v5446_v26, %v5445_v14  ;;  %v5415_v20 = vpack.c.bf16 %v5341_v33, %v5341_v33  ;;  %v5416_v44 = vpack.c.bf16 %v5368_v60, %v5368_v60 }
 0xfca   : > { %v5542_v24 = vunpack.c.l.b16 %v5414_v43  ;;  %v5505_v59 = vpack.c.b16 %v5496_v32, %v5495_v63  ;;  %v5447_v57 = vunpack.c.l.b16 %v5383_v17 }
 0xfcb   : > { %v5543_v4 = vunpack.c.l.b16 %v5415_v20  ;;  %v5544_v52 = vunpack.c.l.b16 %v5416_v44 }
 0xfcc   : > { %v5552_v5 = vpack.c.b16 %v5542_v24, %v5541_v34 }
 0xfcd   : > { %v5553_v39 = vpack.c.b16 %v5544_v52, %v5543_v4 }
 0xfcf   : > { %5838 = vmatmul.bf16.gmra.mxu1 %v5503_v16  ;;  %v5384_v16 = vpack.c.bf16 %v5293_v49, %v5293_v49 }
 0xfd1   : > { %v5448_v21 = vunpack.c.l.b16 %v5384_v16 }
 0xfd3   : > { %v5457_v40 = vpack.c.b16 %v5448_v21, %v5447_v57 }
 0xfd5   : > { %5789 = vmatmul.bf16.gmra.mxu3 %v5455_v28 }
 0xfd6   : > { %5887 = vmatmul.bf16.gmra.mxu2 %v5551_v25 }
 0xfdf   : > { %5843 = vmatmul.bf16.gmra.mxu1 %v5504_v42 }
 0xfe5   : > { %5794 = vmatmul.bf16.gmra.mxu3 %v5456_v3 }
 0xfe6   : > { %5892 = vmatmul.bf16.gmra.mxu2 %v5552_v5 }
 0xfef   : > { %5848 = vmatmul.bf16.gmra.mxu1 %v5505_v59 }
 0xff5   : > { %5799 = vmatmul.bf16.gmra.mxu3 %v5457_v40 }
 0xff6   : > { %5897 = vmatmul.bf16.gmra.mxu2 %v5553_v39 }
 0xfff   : > { %5853 = vmatmul.bf16.gmra.mxu1 %v5506_v46 }
0x1005   : > { %5804 = vmatmul.bf16.gmra.mxu3 %v5458_v56 }
0x1006   : > { %5902 = vmatmul.bf16.gmra.mxu2 %v5554_v19 }
0x100c   : > { %v5819_v8 = vpop.f32.mrf.mxu1 }
0x1014   : > { %v5821_v45 = vpop.f32.mrf.mxu1 }
0x1018   : > { %v5770_v55 = vpop.f32.mrf.mxu3 }
0x1019   : > { %v5771_v28 = vadd.f32 %v10356_v23, %v5770_v55  ;;  %v5868_v15 = vpop.f32.mrf.mxu2 }
0x101b   : > { %v5820_v50 = vadd.f32 %v5819_v8, %v5771_v28 }
0x101c   : > { %v5824_v61 = vpop.f32.mrf.mxu1 }
0x101d   : > { %v5869_v46 = vadd.f32 %v5868_v15, %v5820_v50 }
0x101f   : > { %5908 = vst [vmem:[%s10364_s10] sm:$0xff] %v5869_v46 }
0x1020   : > { %v5772_v51 = vpop.f32.mrf.mxu3 }
0x1021   : > { %v5773_v2 = vadd.f32 %v10356_v23, %v5772_v51  ;;  %v5870_v29 = vpop.f32.mrf.mxu2 }
0x1023   : > { %v5822_v56 = vadd.f32 %v5821_v45, %v5773_v2 }
0x1024   : > { %v5826_v25 = vpop.f32.mrf.mxu1 }
0x1025   : > { %v5871_v19 = vadd.f32 %v5870_v29, %v5822_v56 }
0x1027   : > { %5909 = vst [vmem:[%s10364_s10 + $0x8] sm:$0xff] %v5871_v19 }
0x1028   : > { %v5775_v53 = vpop.f32.mrf.mxu3 }
0x1029   : > { %v5776_v30 = vadd.f32 %v10356_v23, %v5775_v53  ;;  %v5873_v11 = vpop.f32.mrf.mxu2 }
0x102b   : > { %v5825_v10 = vadd.f32 %v5824_v61, %v5776_v30 }
0x102c   : > { %v5829_v48 = vpop.f32.mrf.mxu1 }
0x102d   : > { %v5874_v54 = vadd.f32 %v5873_v11, %v5825_v10 }
0x102f   : > { %5910 = vst [vmem:[%s10364_s10 + $0x10] sm:$0xff] %v5874_v54 }
0x1030   : > { %v5777_v6 = vpop.f32.mrf.mxu3 }
0x1031   : > { %v5778_v35 = vadd.f32 %v10356_v23, %v5777_v6  ;;  %v5875_v0 = vpop.f32.mrf.mxu2 }
0x1033   : > { %v5827_v18 = vadd.f32 %v5826_v25, %v5778_v35 }
0x1034   : > { %v5831_v22 = vpop.f32.mrf.mxu1 }
0x1035   : > { %v5876_v62 = vadd.f32 %v5875_v0, %v5827_v18 }
0x1037   : > { %5911 = vst [vmem:[%s10364_s10 + $0x18] sm:$0xff] %v5876_v62 }
0x1038   : > { %v5780_v27 = vpop.f32.mrf.mxu3 }
0x1039   : > { %v5781_v9 = vadd.f32 %v10356_v23, %v5780_v27  ;;  %v5878_v38 = vpop.f32.mrf.mxu2 }
0x103b   : > { %v5830_v1 = vadd.f32 %v5829_v48, %v5781_v9 }
0x103c   : > { %v5834_v42 = vpop.f32.mrf.mxu1 }
0x103d   : > { %v5879_v43 = vadd.f32 %v5878_v38, %v5830_v1 }
0x103f   : > { %5912 = vst [vmem:[%s10364_s10 + $0x20] sm:$0xff] %v5879_v43 }
0x1040   : > { %v5782_v14 = vpop.f32.mrf.mxu3 }
0x1041   : > { %v5783_v26 = vadd.f32 %v10356_v23, %v5782_v14  ;;  %v5880_v34 = vpop.f32.mrf.mxu2 }
0x1043   : > { %v5832_v24 = vadd.f32 %v5831_v22, %v5783_v26 }
0x1044   : > { %v5836_v7 = vpop.f32.mrf.mxu1 }
0x1045   : > { %v5881_v58 = vadd.f32 %v5880_v34, %v5832_v24 }
0x1047   : > { %5913 = vst [vmem:[%s10364_s10 + $0x28] sm:$0xff] %v5881_v58 }
0x1048   : > { %v5785_v3 = vpop.f32.mrf.mxu3 }
0x1049   : > { %v5786_v5 = vadd.f32 %v10356_v23, %v5785_v3  ;;  %v5883_v12 = vpop.f32.mrf.mxu2 }
0x104b   : > { %v5835_v13 = vadd.f32 %v5834_v42, %v5786_v5 }
0x104c   : > { %v5839_v41 = vpop.f32.mrf.mxu1 }
0x104d   : > { %v5884_v31 = vadd.f32 %v5883_v12, %v5835_v13 }
0x104f   : > { %5914 = vst [vmem:[%s10364_s10 + $0x30] sm:$0xff] %v5884_v31 }
0x1050   : > { %v5787_v49 = vpop.f32.mrf.mxu3 }
0x1051   : > { %v5788_v36 = vadd.f32 %v10356_v23, %v5787_v49  ;;  %v5885_v47 = vpop.f32.mrf.mxu2 }
0x1053   : > { %v5837_v33 = vadd.f32 %v5836_v7, %v5788_v36 }
0x1054   : > { %v5841_v60 = vpop.f32.mrf.mxu1 }
0x1055   : > { %v5886_v37 = vadd.f32 %v5885_v47, %v5837_v33 }
0x1057   : > { %5915 = vst [vmem:[%s10364_s10 + $0x38] sm:$0xff] %v5886_v37 }
0x1058   : > { %v5790_v63 = vpop.f32.mrf.mxu3 }
0x1059   : > { %v5791_v32 = vadd.f32 %v10356_v23, %v5790_v63  ;;  %v5888_v17 = vpop.f32.mrf.mxu2 }
0x105b   : > { %v5840_v16 = vadd.f32 %v5839_v41, %v5791_v32 }
0x105c   : > { %v5844_v44 = vpop.f32.mrf.mxu1 }
0x105d   : > { %v5889_v20 = vadd.f32 %v5888_v17, %v5840_v16 }
0x105f   : > { %5916 = vst [vmem:[%s10364_s10 + $0x40] sm:$0xff] %v5889_v20 }
0x1060   : > { %v5792_v59 = vpop.f32.mrf.mxu3 }
0x1061   : > { %v5793_v57 = vadd.f32 %v10356_v23, %v5792_v59  ;;  %v5890_v21 = vpop.f32.mrf.mxu2 }
0x1063   : > { %v5842_v4 = vadd.f32 %v5841_v60, %v5793_v57 }
0x1064   : > { %v5846_v45 = vpop.f32.mrf.mxu1 }
0x1065   : > { %v5891_v52 = vadd.f32 %v5890_v21, %v5842_v4 }
0x1067   : > { %5917 = vst [vmem:[%s10364_s10 + $0x48] sm:$0xff] %v5891_v52 }
0x1068   : > { %v5795_v40 = vpop.f32.mrf.mxu3 }
0x1069   : > { %v5796_v39 = vadd.f32 %v10356_v23, %v5795_v40  ;;  %v5893_v8 = vpop.f32.mrf.mxu2 }
0x106b   : > { %v5845_v55 = vadd.f32 %v5844_v44, %v5796_v39 }
0x106c   : > { %v5849_v51 = vpop.f32.mrf.mxu1 }
0x106d   : > { %v5894_v28 = vadd.f32 %v5893_v8, %v5845_v55 }
0x106f   : > { %5918 = vst [vmem:[%s10364_s10 + $0x50] sm:$0xff] %v5894_v28 }
0x1070   : > { %v5797_v15 = vpop.f32.mrf.mxu3 }
0x1071   : > { %v5798_v50 = vadd.f32 %v10356_v23, %v5797_v15  ;;  %v5895_v46 = vpop.f32.mrf.mxu2 }
0x1073   : > { %v5847_v61 = vadd.f32 %v5846_v45, %v5798_v50 }
0x1074   : > { %v5851_v30 = vpop.f32.mrf.mxu1 }
0x1075   : > { %v5896_v2 = vadd.f32 %v5895_v46, %v5847_v61 }
0x1077   : > { %5919 = vst [vmem:[%s10364_s10 + $0x58] sm:$0xff] %v5896_v2 }
0x1078   : > { %v5800_v29 = vpop.f32.mrf.mxu3 }
0x1079   : > { %v5801_v56 = vadd.f32 %v10356_v23, %v5800_v29  ;;  %v5898_v19 = vpop.f32.mrf.mxu2 }
0x107b   : > { %v5850_v25 = vadd.f32 %v5849_v51, %v5801_v56 }
0x107c   : > { %v5854_v35 = vpop.f32.mrf.mxu1 }
0x107d   : > { %v5899_v53 = vadd.f32 %v5898_v19, %v5850_v25 }
0x107f   : > { %5920 = vst [vmem:[%s10364_s10 + $0x60] sm:$0xff] %v5899_v53 }
0x1080   : > { %v5802_v11 = vpop.f32.mrf.mxu3 }
0x1081   : > { %v5803_v10 = vadd.f32 %v10356_v23, %v5802_v11  ;;  %v5900_v54 = vpop.f32.mrf.mxu2 }
0x1083   : > { %v5852_v48 = vadd.f32 %v5851_v30, %v5803_v10 }
0x1084   : > { %v5856_v1 = vpop.f32.mrf.mxu1 }
0x1085   : > { %v5901_v6 = vadd.f32 %v5900_v54, %v5852_v48 }
0x1087   : > { %5921 = vst [vmem:[%s10364_s10 + $0x68] sm:$0xff] %v5901_v6 }
0x1088   : > { %v5805_v0 = vpop.f32.mrf.mxu3 }
0x1089   : > { %v5806_v18 = vadd.f32 %v10356_v23, %v5805_v0  ;;  %v5903_v62 = vpop.f32.mrf.mxu2 }
0x108b   : > { %v5855_v22 = vadd.f32 %v5854_v35, %v5806_v18 }
0x108d   : > { %v5904_v27 = vadd.f32 %v5903_v62, %v5855_v22 }
0x108f   : > { %5922 = vst [vmem:[%s10364_s10 + $0x70] sm:$0xff] %v5904_v27 }
0x1090   : > { %v5807_v9 = vpop.f32.mrf.mxu3 }
0x1091   : > { %v5808_v38 = vadd.f32 %v10356_v23, %v5807_v9  ;;  %v5905_v42 = vpop.f32.mrf.mxu2 }
0x1093   : > { %v5857_v43 = vadd.f32 %v5856_v1, %v5808_v38 }
0x1095   : > { %v5906_v14 = vadd.f32 %v5905_v42, %v5857_v43 }
0x1097   : > { %5923 = vst [vmem:[%s10364_s10 + $0x78] sm:$0xff] %v5906_v14 }
0x1098 PF: > { %s17_s24 = sadd.s32 1, %s7240_s24  }
0x1099   : > { %p14_p4 = scmp.ge.s32.totalorder %s17_s24, 4  }
0x109b   :  { %16 = sbr.rel (!%p14_p4) target bundleno = 1 (0x1), region = 96 }

</bundles_post_ra>
